<compile_context>
chip_gen: v5e
topology: v5e:2x2
jax: 0.10.0
libtpu: 0.0.40
codegen_flags: <defaults>
</compile_context>

<pallas_src>
import functools

import jax
import jax.numpy as jnp
from jax import lax
from jax.experimental import pallas as pl
from jax.experimental.pallas import tpu as pltpu

_EPS = 1e-5
_TK = 512  # K-tile for the im2col GEMM


def _round_up(x, m):
    return (x + m - 1) // m * m


# ----------------------------------------------------------------------------
# Fused conv(im2col GEMM) + BatchNorm(train) + optional residual + ReLU kernel
# ----------------------------------------------------------------------------
def _conv_bn_kernel(*refs, eps, relu, has_residual, n_valid):
    if has_residual:
        a_ref, b_ref, g_ref, be_ref, r_ref, o_ref, acc_ref = refs
    else:
        a_ref, b_ref, g_ref, be_ref, o_ref, acc_ref = refs
        r_ref = None

    k = pl.program_id(0)

    @pl.when(k == 0)
    def _():
        acc_ref[...] = jnp.zeros_like(acc_ref)

    acc_ref[...] += jnp.dot(a_ref[...], b_ref[...],
                            preferred_element_type=jnp.float32)

    @pl.when(k == pl.num_programs(0) - 1)
    def _():
        y = acc_ref[...]                      # (Mp, OC), rows = N*OH*OW (+ pad)
        mp = y.shape[0]
        inv_n = 1.0 / n_valid
        if mp == n_valid:                     # static: no row padding
            mean = jnp.sum(y, axis=0, keepdims=True) * inv_n
            d = y - mean
            var = jnp.sum(d * d, axis=0, keepdims=True) * inv_n
        else:                                 # mask zero-padded rows out of stats
            row = lax.broadcasted_iota(jnp.int32, (mp, 1), 0)
            mask = (row < n_valid).astype(jnp.float32)
            mean = jnp.sum(y * mask, axis=0, keepdims=True) * inv_n
            d = (y - mean) * mask
            var = jnp.sum(d * d, axis=0, keepdims=True) * inv_n
        z = (y - mean) * lax.rsqrt(var + eps) * g_ref[...] + be_ref[...]
        if has_residual:
            z = z + r_ref[...]
        if relu:
            z = jnp.maximum(z, 0.0)
        o_ref[...] = z


def _conv_bn_act_pallas(patches, w2, gamma, beta, *, relu, residual=None,
                        eps=_EPS):
    """patches: (R, K) f32, w2: (K, OC) f32, gamma/beta: (OC,). Returns (R, OC)."""
    R, K = patches.shape
    K2, OC = w2.shape
    assert K == K2
    Mp = _round_up(max(R, 8), 8)
    Kp = _round_up(K, _TK)

    a = jnp.pad(patches, ((0, Mp - R), (0, Kp - K)))
    b = jnp.pad(w2, ((0, Kp - K), (0, 0)))
    g = gamma.reshape(1, OC)
    be = beta.reshape(1, OC)

    inputs = [a, b, g, be]
    in_specs = [
        pl.BlockSpec((Mp, _TK), lambda k: (0, k)),
        pl.BlockSpec((_TK, OC), lambda k: (k, 0)),
        pl.BlockSpec((1, OC), lambda k: (0, 0)),
        pl.BlockSpec((1, OC), lambda k: (0, 0)),
    ]
    has_res = residual is not None
    if has_res:
        inputs.append(jnp.pad(residual, ((0, Mp - R), (0, 0))))
        in_specs.append(pl.BlockSpec((Mp, OC), lambda k: (0, 0)))

    kernel = functools.partial(_conv_bn_kernel, eps=eps, relu=relu,
                               has_residual=has_res, n_valid=R)

    out = pl.pallas_call(
        kernel,
        out_shape=jax.ShapeDtypeStruct((Mp, OC), jnp.float32),
        grid=(Kp // _TK,),
        in_specs=in_specs,
        out_specs=pl.BlockSpec((Mp, OC), lambda k: (0, 0)),
        scratch_shapes=[pltpu.VMEM((Mp, OC), jnp.float32)],
        compiler_params=pltpu.CompilerParams(
            dimension_semantics=("arbitrary",),
            vmem_limit_bytes=32 * 1024 * 1024),
    )(*inputs)
    return out[:R]


# ----------------------------------------------------------------------------
# Pooling kernels (leading-axis reductions -> plain VPU ops)
# ----------------------------------------------------------------------------
def _maxpool_kernel(x_ref, o_ref):
    o_ref[...] = jnp.max(x_ref[...], axis=0)          # reduce over window taps


def _avgpool_kernel(x_ref, o_ref, *, inv_s):
    o_ref[...] = jnp.sum(x_ref[...], axis=0) * inv_s  # reduce over spatial axis


# ----------------------------------------------------------------------------
# JAX-side layout plumbing (im2col, pooling windows, reshapes)
# ----------------------------------------------------------------------------
def _im2col(x, kh, kw, stride, padding):
    """x: (N, H, W, C) -> patches (N*OH*OW, kh*kw*C), OH, OW."""
    N, H, W, C = x.shape
    OH = (H + 2 * padding - kh) // stride + 1
    OW = (W + 2 * padding - kw) // stride + 1
    xp = jnp.pad(x, ((0, 0), (padding, padding), (padding, padding), (0, 0)))
    cols = []
    for i in range(kh):
        for j in range(kw):
            cols.append(xp[:, i:i + stride * OH:stride,
                           j:j + stride * OW:stride, :])
    patches = jnp.stack(cols, axis=3)                  # (N, OH, OW, kh*kw, C)
    return patches.reshape(N * OH * OW, kh * kw * C), OH, OW


def _conv_bn(x, w, gamma, beta, *, stride, padding, relu, residual=None):
    """x: (N, H, W, IC), w: (OC, IC, KH, KW) -> (N, OH, OW, OC)."""
    OC, IC, KH, KW = w.shape
    N = x.shape[0]
    patches, OH, OW = _im2col(x, KH, KW, stride, padding)
    w2 = jnp.transpose(w, (2, 3, 1, 0)).reshape(KH * KW * IC, OC)
    res_flat = None if residual is None else residual.reshape(N * OH * OW, OC)
    y = _conv_bn_act_pallas(patches, w2, gamma, beta, relu=relu,
                            residual=res_flat)
    return y.reshape(N, OH, OW, OC)


def _maxpool_3x3_s2_p1(x):
    N, H, W, C = x.shape
    OH = (H + 2 - 3) // 2 + 1
    OW = (W + 2 - 3) // 2 + 1
    xp = jnp.pad(x, ((0, 0), (1, 1), (1, 1), (0, 0)), constant_values=-1e30)
    cols = []
    for i in range(3):
        for j in range(3):
            cols.append(xp[:, i:i + 2 * OH:2, j:j + 2 * OW:2, :])
    stacked = jnp.stack(cols, axis=0).reshape(9, N * OH * OW, C)
    R = N * OH * OW
    out = pl.pallas_call(
        _maxpool_kernel,
        out_shape=jax.ShapeDtypeStruct((R, C), jnp.float32),
        grid=(1,),
        in_specs=[pl.BlockSpec((9, R, C), lambda i: (0, 0, 0))],
        out_specs=pl.BlockSpec((R, C), lambda i: (0, 0)),
        compiler_params=pltpu.CompilerParams(
            dimension_semantics=("arbitrary",)),
    )(stacked)
    return out.reshape(N, OH, OW, C)


def _global_avgpool(x):
    N, H, W, C = x.shape
    S = H * W
    xs = jnp.transpose(x.reshape(N, S, C), (1, 0, 2))   # (S, N, C)
    return pl.pallas_call(
        functools.partial(_avgpool_kernel, inv_s=1.0 / S),
        out_shape=jax.ShapeDtypeStruct((N, C), jnp.float32),
        grid=(1,),
        in_specs=[pl.BlockSpec((S, N, C), lambda i: (0, 0, 0))],
        out_specs=pl.BlockSpec((N, C), lambda i: (0, 0)),
        compiler_params=pltpu.CompilerParams(
            dimension_semantics=("arbitrary",)),
    )(xs)


# ----------------------------------------------------------------------------
# ResNet-18 trunk + EncoderCNN wrapper
# ----------------------------------------------------------------------------
def _basic_block(x, blk):
    stride = blk["stride"]
    identity = x
    out = _conv_bn(x, blk["conv1_w"], blk["bn1_g"], blk["bn1_b"],
                   stride=stride, padding=1, relu=True)
    if "ds_w" in blk:
        identity = _conv_bn(x, blk["ds_w"], blk["ds_bn_g"], blk["ds_bn_b"],
                            stride=stride, padding=0, relu=False)
    out = _conv_bn(out, blk["conv2_w"], blk["bn2_g"], blk["bn2_b"],
                   stride=1, padding=1, relu=True, residual=identity)
    return out


def encoder_cnn_forward(ACEs, params):
    """ACEs: (B, 3, M, H, W) -> (B, 512, M)."""
    ACEs = jnp.swapaxes(ACEs, 1, 2)                     # (B, M, 3, H, W)
    B, M = ACEs.shape[0], ACEs.shape[1]
    x = ACEs.reshape((B * M,) + ACEs.shape[2:])
    x = jnp.transpose(x, (0, 2, 3, 1))                  # NHWC, channels on lane
    x = _conv_bn(x, params["conv1_w"], params["bn1_g"], params["bn1_b"],
                 stride=2, padding=3, relu=True)
    x = _maxpool_3x3_s2_p1(x)
    for stage in params["layers"]:
        for blk in stage:
            x = _basic_block(x, blk)
    feat = _global_avgpool(x)                           # (N, 512)
    enc = feat.reshape(B, M, -1)
    return jnp.swapaxes(enc, 1, 2)                      # (B, 512, M)


def init_params(key):
    keys = iter(jax.random.split(key, 128))

    def conv(oc, ic, kh, kw):
        fan_in = ic * kh * kw
        return jax.random.normal(next(keys), (oc, ic, kh, kw),
                                 jnp.float32) * (2.0 / fan_in) ** 0.5

    def bn(c):
        g = 1.0 + 0.1 * jax.random.normal(next(keys), (c,), jnp.float32)
        b = 0.1 * jax.random.normal(next(keys), (c,), jnp.float32)
        return g, b

    p = {"conv1_w": conv(64, 3, 7, 7)}
    p["bn1_g"], p["bn1_b"] = bn(64)
    layers = []
    in_c = 64
    for out_c, stride in [(64, 1), (128, 2), (256, 2), (512, 2)]:
        blocks = []
        for b_i in range(2):
            s = stride if b_i == 0 else 1
            ic = in_c if b_i == 0 else out_c
            blk = {"stride": s,
                   "conv1_w": conv(out_c, ic, 3, 3),
                   "conv2_w": conv(out_c, out_c, 3, 3)}
            blk["bn1_g"], blk["bn1_b"] = bn(out_c)
            blk["bn2_g"], blk["bn2_b"] = bn(out_c)
            if s != 1 or ic != out_c:
                blk["ds_w"] = conv(out_c, ic, 1, 1)
                blk["ds_bn_g"], blk["ds_bn_b"] = bn(out_c)
            blocks.append(blk)
        layers.append(blocks)
        in_c = out_c
    p["layers"] = layers
    return p


# ----------------------------------------------------------------------------
# Pure-JAX reference (mirrors the PyTorch forward)
# ----------------------------------------------------------------------------
def _ref_conv_bn(x, w, g, b, *, stride, padding, relu, residual=None):
    y = lax.conv_general_dilated(
        x, jnp.transpose(w, (2, 3, 1, 0)), (stride, stride),
        [(padding, padding), (padding, padding)],
        dimension_numbers=("NHWC", "HWIO", "NHWC"),
        precision=lax.Precision.HIGHEST)
    mean = jnp.mean(y, axis=(0, 1, 2), keepdims=True)
    var = jnp.mean((y - mean) ** 2, axis=(0, 1, 2), keepdims=True)
    z = (y - mean) * lax.rsqrt(var + _EPS) * g.reshape(1, 1, 1, -1) \
        + b.reshape(1, 1, 1, -1)
    if residual is not None:
        z = z + residual
    if relu:
        z = jnp.maximum(z, 0.0)
    return z


def _ref_forward(ACEs, params):
    ACEs = jnp.swapaxes(ACEs, 1, 2)
    B, M = ACEs.shape[0], ACEs.shape[1]
    x = jnp.transpose(ACEs.reshape((B * M,) + ACEs.shape[2:]), (0, 2, 3, 1))
    x = _ref_conv_bn(x, params["conv1_w"], params["bn1_g"], params["bn1_b"],
                     stride=2, padding=3, relu=True)
    x = lax.reduce_window(x, -jnp.inf, lax.max, (1, 3, 3, 1), (1, 2, 2, 1),
                          [(0, 0), (1, 1), (1, 1), (0, 0)])
    for stage in params["layers"]:
        for blk in stage:
            s = blk["stride"]
            identity = x
            out = _ref_conv_bn(x, blk["conv1_w"], blk["bn1_g"], blk["bn1_b"],
                               stride=s, padding=1, relu=True)
            if "ds_w" in blk:
                identity = _ref_conv_bn(x, blk["ds_w"], blk["ds_bn_g"],
                                        blk["ds_bn_b"], stride=s, padding=0,
                                        relu=False)
            x = _ref_conv_bn(out, blk["conv2_w"], blk["bn2_g"], blk["bn2_b"],
                             stride=1, padding=1, relu=True, residual=identity)
    feat = jnp.mean(x, axis=(1, 2))
    return jnp.swapaxes(feat.reshape(B, M, -1), 1, 2)


if __name__ == "__main__":
    B, C_img, M, H, W = 2, 3, 2, 32, 32
    key = jax.random.PRNGKey(0)
    k_x, k_p = jax.random.split(key)

    ACEs = jax.random.normal(k_x, (B, C_img, M, H, W), jnp.float32)
    params = init_params(k_p)

    out = encoder_cnn_forward(ACEs, params)
    out = jax.block_until_ready(out)

    ref = _ref_forward(ACEs, params)
    assert out.shape == (B, 512, M), out.shape
    assert jnp.allclose(out, ref, atol=1e-2, rtol=1e-2), \
        float(jnp.max(jnp.abs(out - ref)))

    print("KERNEL_OK")
</pallas_src>

<mosaic_0001>
module attributes {stable_mosaic.version = 11 : i64} {
  func.func @_conv_bn_kernel(%arg0: i32, %arg1: memref<1024x512xf32, #tpu.memory_space<vmem>>, %arg2: memref<512x64xf32, #tpu.memory_space<vmem>>, %arg3: memref<1x64xf32, #tpu.memory_space<vmem>>, %arg4: memref<1x64xf32, #tpu.memory_space<vmem>>, %arg5: memref<1024x64xf32, #tpu.memory_space<vmem>>, %arg6: memref<1024x64xf32, #tpu.memory_space<vmem>>) attributes {dimension_semantics = [#tpu.dimension_semantics<arbitrary>], iteration_bounds = array<i64: 1>, scalar_prefetch = 0 : i64, scratch_operands = 1 : i64, tpu.core_type = #tpu.core_type<tc>, window_params = [{transform_indices = @transform_0, window_bounds = array<i64: 1024, 512>}, {transform_indices = @transform_1, window_bounds = array<i64: 512, 64>}, {pipeline_mode = #tpu.pipeline_mode<synchronous>, transform_indices = @transform_2, window_bounds = array<i64: 1, 64>}, {pipeline_mode = #tpu.pipeline_mode<synchronous>, transform_indices = @transform_3, window_bounds = array<i64: 1, 64>}, {pipeline_mode = #tpu.pipeline_mode<synchronous>, transform_indices = @transform_4, window_bounds = array<i64: 1024, 64>}]} {
    %c0_i32 = arith.constant 0 : i32
    %0 = arith.cmpi eq, %arg0, %c0_i32 : i32
    %1 = arith.extui %0 : i1 to i32
    %c0_i32_0 = arith.constant 0 : i32
    %2 = arith.cmpi ne, %1, %c0_i32_0 : i32
    scf.if %2 {
      %cst_10 = arith.constant 0.000000e+00 : f32
      %12 = vector.broadcast %cst_10 : f32 to vector<1024x64xf32>
      %c0_11 = arith.constant 0 : index
      %c0_12 = arith.constant 0 : index
      %13 = vector.load %arg6[%c0_11, %c0_12] : memref<1024x64xf32, #tpu.memory_space<vmem>>, vector<1024x64xf32>
      tpu.vector_store %arg6[%c0_11, %c0_12], %12 {strides = array<i32>} : memref<1024x64xf32, #tpu.memory_space<vmem>>, vector<1024x64xf32>,
    } else {
    }
    %c0 = arith.constant 0 : index
    %c0_1 = arith.constant 0 : index
    %3 = vector.load %arg6[%c0, %c0_1] : memref<1024x64xf32, #tpu.memory_space<vmem>>, vector<1024x64xf32>
    %c0_2 = arith.constant 0 : index
    %c0_3 = arith.constant 0 : index
    %4 = vector.load %arg1[%c0_2, %c0_3] : memref<1024x512xf32, #tpu.memory_space<vmem>>, vector<1024x512xf32>
    %c0_4 = arith.constant 0 : index
    %c0_5 = arith.constant 0 : index
    %5 = vector.load %arg2[%c0_4, %c0_5] : memref<512x64xf32, #tpu.memory_space<vmem>>, vector<512x64xf32>
    %cst = arith.constant dense<0.000000e+00> : vector<1024x64xf32>
    %6 = tpu.matmul %4, %5, %cst {dimension_numbers = #tpu.dot_dimension_numbers<[1], [0], [0], [1], [0, 0, 1, 1], [], []>} : vector<1024x512xf32>, vector<512x64xf32>, vector<1024x64xf32> -> vector<1024x64xf32>
    %7 = arith.addf %3, %6 : vector<1024x64xf32>
    %c0_6 = arith.constant 0 : index
    %c0_7 = arith.constant 0 : index
    %8 = vector.load %arg6[%c0_6, %c0_7] : memref<1024x64xf32, #tpu.memory_space<vmem>>, vector<1024x64xf32>
    tpu.vector_store %arg6[%c0_6, %c0_7], %7 {strides = array<i32>} : memref<1024x64xf32, #tpu.memory_space<vmem>>, vector<1024x64xf32>,
    %c0_i32_8 = arith.constant 0 : i32
    %9 = arith.cmpi eq, %arg0, %c0_i32_8 : i32
    %10 = arith.extui %9 : i1 to i32
    %c0_i32_9 = arith.constant 0 : i32
    %11 = arith.cmpi ne, %10, %c0_i32_9 : i32
    scf.if %11 {
      %c0_10 = arith.constant 0 : index
      %c0_11 = arith.constant 0 : index
      %12 = vector.load %arg6[%c0_10, %c0_11] : memref<1024x64xf32, #tpu.memory_space<vmem>>, vector<1024x64xf32>
      %cst_12 = arith.constant dense<0.000000e+00> : vector<64xf32>
      %13 = vector.multi_reduction <add>, %12, %cst_12 [0] : vector<1024x64xf32> to vector<64xf32>
      %14 = vector.shape_cast %13 : vector<64xf32> to vector<1x64xf32>
      %cst_13 = arith.constant 9.765625E-4 : f32
      %15 = vector.broadcast %cst_13 : f32 to vector<1x64xf32>
      %16 = arith.mulf %14, %15 : vector<1x64xf32>
      %17 = vector.broadcast %16 : vector<1x64xf32> to vector<1024x64xf32>
      %18 = arith.subf %12, %17 : vector<1024x64xf32>
      %19 = arith.mulf %18, %18 : vector<1024x64xf32>
      %cst_14 = arith.constant dense<0.000000e+00> : vector<64xf32>
      %20 = vector.multi_reduction <add>, %19, %cst_14 [0] : vector<1024x64xf32> to vector<64xf32>
      %21 = vector.shape_cast %20 : vector<64xf32> to vector<1x64xf32>
      %cst_15 = arith.constant 9.765625E-4 : f32
      %22 = vector.broadcast %cst_15 : f32 to vector<1x64xf32>
      %23 = arith.mulf %21, %22 : vector<1x64xf32>
      %24 = vector.broadcast %16 : vector<1x64xf32> to vector<1024x64xf32>
      %25 = arith.subf %12, %24 : vector<1024x64xf32>
      %cst_16 = arith.constant 9.99999974E-6 : f32
      %26 = vector.broadcast %cst_16 : f32 to vector<1x64xf32>
      %27 = arith.addf %23, %26 : vector<1x64xf32>
      %28 = math.rsqrt %27 : vector<1x64xf32>
      %29 = vector.broadcast %28 : vector<1x64xf32> to vector<1024x64xf32>
      %30 = arith.mulf %25, %29 : vector<1024x64xf32>
      %c0_17 = arith.constant 0 : index
      %c0_18 = arith.constant 0 : index
      %31 = vector.load %arg3[%c0_17, %c0_18] : memref<1x64xf32, #tpu.memory_space<vmem>>, vector<1x64xf32>
      %32 = vector.broadcast %31 : vector<1x64xf32> to vector<1024x64xf32>
      %33 = arith.mulf %30, %32 : vector<1024x64xf32>
      %c0_19 = arith.constant 0 : index
      %c0_20 = arith.constant 0 : index
      %34 = vector.load %arg4[%c0_19, %c0_20] : memref<1x64xf32, #tpu.memory_space<vmem>>, vector<1x64xf32>
      %35 = vector.broadcast %34 : vector<1x64xf32> to vector<1024x64xf32>
      %36 = arith.addf %33, %35 : vector<1024x64xf32>
      %cst_21 = arith.constant 0.000000e+00 : f32
      %37 = vector.broadcast %cst_21 : f32 to vector<1024x64xf32>
      %38 = arith.maximumf %36, %37 : vector<1024x64xf32>
      %c0_22 = arith.constant 0 : index
      %c0_23 = arith.constant 0 : index
      %39 = vector.load %arg5[%c0_22, %c0_23] : memref<1024x64xf32, #tpu.memory_space<vmem>>, vector<1024x64xf32>
      tpu.vector_store %arg5[%c0_22, %c0_23], %38 {strides = array<i32>} : memref<1024x64xf32, #tpu.memory_space<vmem>>, vector<1024x64xf32>,
    } else {
    }
    return
  }
  func.func @transform_0(%arg0: i32) -> (i32, i32) {
    %c0_i32 = arith.constant 0 : i32
    %c0_i32_0 = arith.constant 0 : i32
    return %c0_i32, %arg0 : i32, i32
  }
  func.func @transform_1(%arg0: i32) -> (i32, i32) {
    %c0_i32 = arith.constant 0 : i32
    %c0_i32_0 = arith.constant 0 : i32
    return %arg0, %c0_i32 : i32, i32
  }
  func.func @transform_2(%arg0: i32) -> (i32, i32) {
    %c0_i32 = arith.constant 0 : i32
    %c0_i32_0 = arith.constant 0 : i32
    %c0_i32_1 = arith.constant 0 : i32
    return %c0_i32, %c0_i32_0 : i32, i32
  }
  func.func @transform_3(%arg0: i32) -> (i32, i32) {
    %c0_i32 = arith.constant 0 : i32
    %c0_i32_0 = arith.constant 0 : i32
    %c0_i32_1 = arith.constant 0 : i32
    return %c0_i32, %c0_i32_0 : i32, i32
  }
  func.func @transform_4(%arg0: i32) -> (i32, i32) {
    %c0_i32 = arith.constant 0 : i32
    %c0_i32_0 = arith.constant 0 : i32
    %c0_i32_1 = arith.constant 0 : i32
    return %c0_i32, %c0_i32_0 : i32, i32
  }
}

</mosaic_0001>

<bundles_post_ra>
// kernel: tpu_custom_call.1
= control target key start
LH: loop header
LB: loop body
LE: loop exit
PB: predicated region body
PF: predicated region fallthrough
CT: control target
= control target key end

     0   :  { %9 = vsyncpa [#allocation4], 0  ;;  %s7761_s0 = inlined_call_operand.hbm [shape: f32[1024,512], index: 0, kind: input, shape index: {}]   ;;  %s7762_s1 = inlined_call_operand.vmem [shape: f32[512,64], index: 1, kind: input, shape index: {}]   ;;  %s7763_s2 = inlined_call_operand.hbm [shape: f32[1,64], index: 2, kind: input, shape index: {}]   ;;  %s7764_s3 = inlined_call_operand.hbm [shape: f32[1,64], index: 3, kind: input, shape index: {}]   ;;  %s7765_s4 = inlined_call_operand.vmem [shape: f32[1024,64], index: 4, kind: output, shape index: {}]  }
   0x1   :  { %10 = vsyncpa [#allocation6], 0  ;;  %s31_s17 = sshll.u32 %s7763_s2, 4  ;;  %s4532_s18 = smov [#allocation5]   ;;  %s32_s17 = int_to_ptr.hbm [resolvable:$true] %s31_s17 }
   0x2   :  { %s33_s19 = sshll.u32 %s4532_s18, 4  ;;  %s15_s22 = sshll.u32 %s7761_s0, 4  ;;  %s34_s19 = int_to_ptr.vmem [resolvable:$true] %s33_s19  ;;  %s16_s22 = int_to_ptr.hbm [resolvable:$true] %s15_s22 }
   0x3   :  { %36 = dma.hbm_to_vmem [thread:$0]  %s32_s17, 16, %s34_s19, [#allocation6]  }
   0x4   :  { %s4533_s23 = smov [#allocation3]   ;;  %s4534_s25 = smov 512  }
   0x5   :  { %s17_s24 = sshll.u32 %s4533_s23, 4  ;;  %s4535_s26 = smov 32   ;;  %s18_s24 = int_to_ptr.vmem [resolvable:$true] %s17_s24 }
   0x6   :  { %23 = dma.hbm_to_vmem [thread:$0]  %s16_s22, 65536, %s18_s24, [#allocation4], %s4534_s25, %s4534_s25, %s4535_s26  }
   0x7   :  { %s42_s2 = sshll.u32 %s7764_s3, 4  ;;  %s4536_s29 = smov [#allocation7]   ;;  %s43_s2 = int_to_ptr.hbm [resolvable:$true] %s42_s2 }
   0x8   :  { %s44_s30 = sshll.u32 %s4536_s29, 4  ;;  %s45_s30 = int_to_ptr.vmem [resolvable:$true] %s44_s30 }
   0x9   :  { %47 = dma.hbm_to_vmem [thread:$0]  %s43_s2, 16, %s45_s30, [#allocation6]  }
   0xa   :  { %4528 = dma.done.wait [#allocation4], 65536  }
   0xb   :  { %4529 = vsyncadd [#allocation4], 4294901760 }
   0xc   :  { %4530 = dma.done.wait [#allocation6], 32  }
   0xd   :  { %4531 = vsyncadd [#allocation6], 4294967264  ;;  %v880_v0 = vld [vmem:[%s7762_s1 + $0x178] sm:$0xff]  ;;  %v879_v1 = vld [vmem:[%s7762_s1 + $0x170] sm:$0xff]  ;;  %vm64_vm0 = vcmask 523264  }
   0xe   :  { %v896_v2 = vld [vmem:[%s7762_s1 + $0x1f8] sm:$0xff]  ;;  %1699 = vmatpush.msra.mxu2 %v880_v0  ;;  %v878_v5 = vld [vmem:[%s7762_s1 + $0x168] sm:$0xff]  ;;  %v895_v6 = vld [vmem:[%s7762_s1 + $0x1f0] sm:$0xff] }
   0xf   :  { %2100 = vmatpush.msra.mxu3 %v896_v2  ;;  %v848_v3 = vld [vmem:[%s7762_s1 + $0x78] sm:$0xff]  ;;  %v847_v7 = vld [vmem:[%s7762_s1 + $0x70] sm:$0xff]  ;;  %v894_v9 = vld [vmem:[%s7762_s1 + $0x1e8] sm:$0xff] }
  0x10   :  { %v864_v4 = vld [vmem:[%s7762_s1 + $0xf8] sm:$0xff]  ;;  %897 = vmatpush.msra.mxu0 %v848_v3  ;;  %v863_v8 = vld [vmem:[%s7762_s1 + $0xf0] sm:$0xff]  ;;  %1700 = vmatpush.msra.mxu2 %v879_v1  ;;  %v846_v10 = vld [vmem:[%s7762_s1 + $0x68] sm:$0xff] }
  0x11   :  { %1298 = vmatpush.msra.mxu1 %v864_v4  ;;  %2101 = vmatpush.msra.mxu3 %v895_v6  ;;  %v877_v11 = vld [vmem:[%s7762_s1 + $0x160] sm:$0xff]  ;;  %v862_v12 = vld [vmem:[%s7762_s1 + $0xe8] sm:$0xff]  ;;  %v876_v16 = vld [vmem:[%s7762_s1 + $0x158] sm:$0xff] }
  0x12   :  { %898 = vmatpush.msra.mxu0 %v847_v7  ;;  %v893_v13 = vld [vmem:[%s7762_s1 + $0x1e0] sm:$0xff]  ;;  %1701 = vmatpush.msra.mxu2 %v878_v5  ;;  %v892_v17 = vld [vmem:[%s7762_s1 + $0x1d8] sm:$0xff]  ;;  %v875_v20 = vld [vmem:[%s7762_s1 + $0x150] sm:$0xff] }
  0x13   :  { %1299 = vmatpush.msra.mxu1 %v863_v8  ;;  %2102 = vmatpush.msra.mxu3 %v894_v9  ;;  %v845_v14 = vld [vmem:[%s7762_s1 + $0x60] sm:$0xff]  ;;  %v844_v18 = vld [vmem:[%s7762_s1 + $0x58] sm:$0xff]  ;;  %v891_v21 = vld [vmem:[%s7762_s1 + $0x1d0] sm:$0xff] }
  0x14   :  { %v861_v15 = vld [vmem:[%s7762_s1 + $0xe0] sm:$0xff]  ;;  %899 = vmatpush.msra.mxu0 %v846_v10  ;;  %1702 = vmatpush.msra.mxu2 %v877_v11  ;;  %v860_v19 = vld [vmem:[%s7762_s1 + $0xd8] sm:$0xff]  ;;  %v843_v22 = vld [vmem:[%s7762_s1 + $0x50] sm:$0xff] }
  0x15   :  { %1300 = vmatpush.msra.mxu1 %v862_v12  ;;  %2103 = vmatpush.msra.mxu3 %v893_v13  ;;  %v859_v23 = vld [vmem:[%s7762_s1 + $0xd0] sm:$0xff]  ;;  %v874_v24 = vld [vmem:[%s7762_s1 + $0x148] sm:$0xff]  ;;  %v873_v28 = vld [vmem:[%s7762_s1 + $0x140] sm:$0xff] }
  0x16   :  { %900 = vmatpush.msra.mxu0 %v845_v14  ;;  %1703 = vmatpush.msra.mxu2 %v876_v16  ;;  %v890_v25 = vld [vmem:[%s7762_s1 + $0x1c8] sm:$0xff]  ;;  %v889_v29 = vld [vmem:[%s7762_s1 + $0x1c0] sm:$0xff]  ;;  %v872_v32 = vld [vmem:[%s7762_s1 + $0x138] sm:$0xff] }
  0x17   :  { %1301 = vmatpush.msra.mxu1 %v861_v15  ;;  %2104 = vmatpush.msra.mxu3 %v892_v17  ;;  %v842_v26 = vld [vmem:[%s7762_s1 + $0x48] sm:$0xff]  ;;  %v841_v30 = vld [vmem:[%s7762_s1 + $0x40] sm:$0xff]  ;;  %v888_v33 = vld [vmem:[%s7762_s1 + $0x1b8] sm:$0xff] }
  0x18   :  { %901 = vmatpush.msra.mxu0 %v844_v18  ;;  %1704 = vmatpush.msra.mxu2 %v875_v20  ;;  %v858_v27 = vld [vmem:[%s7762_s1 + $0xc8] sm:$0xff]  ;;  %v857_v31 = vld [vmem:[%s7762_s1 + $0xc0] sm:$0xff]  ;;  %v840_v34 = vld [vmem:[%s7762_s1 + $0x38] sm:$0xff] }
  0x19   :  { %1302 = vmatpush.msra.mxu1 %v860_v19  ;;  %2105 = vmatpush.msra.mxu3 %v891_v21  ;;  %v856_v35 = vld [vmem:[%s7762_s1 + $0xb8] sm:$0xff]  ;;  %v871_v36 = vld [vmem:[%s7762_s1 + $0x130] sm:$0xff]  ;;  %v870_v40 = vld [vmem:[%s7762_s1 + $0x128] sm:$0xff] }
  0x1a   :  { %902 = vmatpush.msra.mxu0 %v843_v22  ;;  %1705 = vmatpush.msra.mxu2 %v874_v24  ;;  %v887_v37 = vld [vmem:[%s7762_s1 + $0x1b0] sm:$0xff]  ;;  %v886_v41 = vld [vmem:[%s7762_s1 + $0x1a8] sm:$0xff]  ;;  %v869_v44 = vld [vmem:[%s7762_s1 + $0x120] sm:$0xff] }
  0x1b   :  { %1303 = vmatpush.msra.mxu1 %v859_v23  ;;  %2106 = vmatpush.msra.mxu3 %v890_v25  ;;  %v839_v38 = vld [vmem:[%s7762_s1 + $0x30] sm:$0xff]  ;;  %v838_v42 = vld [vmem:[%s7762_s1 + $0x28] sm:$0xff]  ;;  %v885_v45 = vld [vmem:[%s7762_s1 + $0x1a0] sm:$0xff] }
  0x1c   :  { %903 = vmatpush.msra.mxu0 %v842_v26  ;;  %1706 = vmatpush.msra.mxu2 %v873_v28  ;;  %v855_v39 = vld [vmem:[%s7762_s1 + $0xb0] sm:$0xff]  ;;  %v854_v43 = vld [vmem:[%s7762_s1 + $0xa8] sm:$0xff]  ;;  %v837_v46 = vld [vmem:[%s7762_s1 + $0x20] sm:$0xff] }
  0x1d   :  { %1304 = vmatpush.msra.mxu1 %v858_v27  ;;  %2107 = vmatpush.msra.mxu3 %v889_v29  ;;  %v853_v47 = vld [vmem:[%s7762_s1 + $0xa0] sm:$0xff]  ;;  %v868_v48 = vld [vmem:[%s7762_s1 + $0x118] sm:$0xff]  ;;  %v867_v52 = vld [vmem:[%s7762_s1 + $0x110] sm:$0xff] }
  0x1e   :  { %904 = vmatpush.msra.mxu0 %v841_v30  ;;  %1707 = vmatpush.msra.mxu2 %v872_v32  ;;  %v884_v49 = vld [vmem:[%s7762_s1 + $0x198] sm:$0xff]  ;;  %v883_v53 = vld [vmem:[%s7762_s1 + $0x190] sm:$0xff]  ;;  %v866_v56 = vld [vmem:[%s7762_s1 + $0x108] sm:$0xff] }
  0x1f   :  { %1305 = vmatpush.msra.mxu1 %v857_v31  ;;  %2108 = vmatpush.msra.mxu3 %v888_v33  ;;  %v836_v50 = vld [vmem:[%s7762_s1 + $0x18] sm:$0xff]  ;;  %v835_v54 = vld [vmem:[%s7762_s1 + $0x10] sm:$0xff]  ;;  %v882_v57 = vld [vmem:[%s7762_s1 + $0x188] sm:$0xff] }
  0x20   :  { %905 = vmatpush.msra.mxu0 %v840_v34  ;;  %1708 = vmatpush.msra.mxu2 %v871_v36  ;;  %v852_v51 = vld [vmem:[%s7762_s1 + $0x98] sm:$0xff]  ;;  %v851_v55 = vld [vmem:[%s7762_s1 + $0x90] sm:$0xff]  ;;  %v834_v58 = vld [vmem:[%s7762_s1 + $0x8] sm:$0xff] }
  0x21   :  { %1306 = vmatpush.msra.mxu1 %v856_v35  ;;  %2109 = vmatpush.msra.mxu3 %v887_v37  ;;  %v850_v59 = vld [vmem:[%s7762_s1 + $0x88] sm:$0xff]  ;;  %v865_v60 = vld [vmem:[%s7762_s1 + $0x100] sm:$0xff]  ;;  %v323_v62 = vld [vmem:[#allocation3 + $0x10] sm:$0xff] }
  0x22   :  { %906 = vmatpush.msra.mxu0 %v839_v38  ;;  %1709 = vmatpush.msra.mxu2 %v870_v40  ;;  %v881_v61 = vld [vmem:[%s7762_s1 + $0x180] sm:$0xff]  ;;  %v324_v63 = vld [vmem:[#allocation3 + $0x18] sm:$0xff]  ;;  %v322_v3 = vld [vmem:[#allocation3 + $0x8] sm:$0xff] }
  0x23   :  { %1307 = vmatpush.msra.mxu1 %v855_v39  ;;  %2110 = vmatpush.msra.mxu3 %v886_v41  ;;  %v833_v0 = vld [vmem:[%s7762_s1] sm:$0xff]  ;;  %v327_v4 = vld [vmem:[#allocation3 + $0x30] sm:$0xff]  ;;  %v328_v5 = vld [vmem:[#allocation3 + $0x38] sm:$0xff] }
  0x24   :  { %907 = vmatpush.msra.mxu0 %v838_v42  ;;  %1710 = vmatpush.msra.mxu2 %v869_v44  ;;  %v849_v1 = vld [vmem:[%s7762_s1 + $0x80] sm:$0xff]  ;;  %v326_v7 = vld [vmem:[#allocation3 + $0x28] sm:$0xff]  ;;  %v331_v8 = vld [vmem:[#allocation3 + $0x50] sm:$0xff] }
  0x25   :  { %1308 = vmatpush.msra.mxu1 %v854_v43  ;;  %2111 = vmatpush.msra.mxu3 %v885_v45  ;;  %v321_v2 = vld [vmem:[#allocation3] sm:$0xff]  ;;  %v332_v9 = vld [vmem:[#allocation3 + $0x58] sm:$0xff]  ;;  %v330_v11 = vld [vmem:[#allocation3 + $0x48] sm:$0xff] }
  0x26   :  { %908 = vmatpush.msra.mxu0 %v837_v46  ;;  %1711 = vmatpush.msra.mxu2 %v868_v48  ;;  %v325_v6 = vld [vmem:[#allocation3 + $0x20] sm:$0xff]  ;;  %v335_v12 = vld [vmem:[#allocation3 + $0x70] sm:$0xff]  ;;  %v336_v13 = vld [vmem:[#allocation3 + $0x78] sm:$0xff] }
  0x27   :  { %1309 = vmatpush.msra.mxu1 %v853_v47  ;;  %2112 = vmatpush.msra.mxu3 %v884_v49  ;;  %v329_v10 = vld [vmem:[#allocation3 + $0x40] sm:$0xff]  ;;  %v334_v15 = vld [vmem:[#allocation3 + $0x68] sm:$0xff]  ;;  %v339_v16 = vld [vmem:[#allocation3 + $0x90] sm:$0xff] }
  0x28   :  { %909 = vmatpush.msra.mxu0 %v836_v50  ;;  %1712 = vmatpush.msra.mxu2 %v867_v52  ;;  %v333_v14 = vld [vmem:[#allocation3 + $0x60] sm:$0xff]  ;;  %v340_v17 = vld [vmem:[#allocation3 + $0x98] sm:$0xff]  ;;  %v338_v19 = vld [vmem:[#allocation3 + $0x88] sm:$0xff]  ;;  %v4537_v52 = vmov 0.0  }
  0x29   :  { %1310 = vmatpush.msra.mxu1 %v852_v51  ;;  %2113 = vmatpush.msra.mxu3 %v883_v53  ;;  %v337_v18 = vld [vmem:[#allocation3 + $0x80] sm:$0xff]  ;;  %v343_v20 = vld [vmem:[#allocation3 + $0xb0] sm:$0xff]  ;;  %v344_v21 = vld [vmem:[#allocation3 + $0xb8] sm:$0xff]  ;;  %65 = vst.msk [vmem:[#allocation2] sm:$0xff] %vm64_vm0, %v4537_v52 }
  0x2a   :  { %910 = vmatpush.msra.mxu0 %v835_v54  ;;  %1713 = vmatpush.msra.mxu2 %v866_v56  ;;  %v341_v22 = vld [vmem:[#allocation3 + $0xa0] sm:$0xff]  ;;  %v342_v23 = vld [vmem:[#allocation3 + $0xa8] sm:$0xff]  ;;  %v347_v24 = vld [vmem:[#allocation3 + $0xd0] sm:$0xff]  ;;  %66 = vst.msk [vmem:[#allocation2 + $0x8] sm:$0xff] %vm64_vm0, %v4537_v52 }
  0x2b   :  { %1311 = vmatpush.msra.mxu1 %v851_v55  ;;  %2114 = vmatpush.msra.mxu3 %v882_v57  ;;  %v348_v25 = vld [vmem:[#allocation3 + $0xd8] sm:$0xff]  ;;  %v345_v26 = vld [vmem:[#allocation3 + $0xc0] sm:$0xff]  ;;  %v346_v27 = vld [vmem:[#allocation3 + $0xc8] sm:$0xff]  ;;  %67 = vst.msk [vmem:[#allocation2 + $0x10] sm:$0xff] %vm64_vm0, %v4537_v52 }
  0x2c   :  { %911 = vmatpush.msra.mxu0 %v834_v58  ;;  %1714 = vmatpush.msra.mxu2 %v865_v60  ;;  %v351_v28 = vld [vmem:[#allocation3 + $0xf0] sm:$0xff]  ;;  %v352_v29 = vld [vmem:[#allocation3 + $0xf8] sm:$0xff]  ;;  %v349_v30 = vld [vmem:[#allocation3 + $0xe0] sm:$0xff]  ;;  %68 = vst.msk [vmem:[#allocation2 + $0x18] sm:$0xff] %vm64_vm0, %v4537_v52 }
  0x2d   :  { %1312 = vmatpush.msra.mxu1 %v850_v59  ;;  %2115 = vmatpush.msra.mxu3 %v881_v61  ;;  %v350_v31 = vld [vmem:[#allocation3 + $0xe8] sm:$0xff]  ;;  %v355_v32 = vld [vmem:[#allocation3 + $0x110] sm:$0xff]  ;;  %v356_v33 = vld [vmem:[#allocation3 + $0x118] sm:$0xff]  ;;  %69 = vst.msk [vmem:[#allocation2 + $0x20] sm:$0xff] %vm64_vm0, %v4537_v52 }
  0x2e   :  { %1715 = vmatmul.f32.vlgmr.msra.gmra.mxu2 %v323_v62  ;;  %2116 = vmatmul.f32.vlgmr.msra.gmra.mxu3 %v324_v63  ;;  %v353_v34 = vld [vmem:[#allocation3 + $0x100] sm:$0xff]  ;;  %v354_v35 = vld [vmem:[#allocation3 + $0x108] sm:$0xff]  ;;  %v359_v36 = vld [vmem:[#allocation3 + $0x130] sm:$0xff]  ;;  %70 = vst.msk [vmem:[#allocation2 + $0x28] sm:$0xff] %vm64_vm0, %v4537_v52 }
  0x2f   :  { %912 = vmatpush.msra.mxu0 %v833_v0  ;;  %1313 = vmatpush.msra.mxu1 %v849_v1  ;;  %v360_v37 = vld [vmem:[#allocation3 + $0x138] sm:$0xff]  ;;  %v357_v38 = vld [vmem:[#allocation3 + $0x120] sm:$0xff]  ;;  %v358_v39 = vld [vmem:[#allocation3 + $0x128] sm:$0xff]  ;;  %71 = vst.msk [vmem:[#allocation2 + $0x30] sm:$0xff] %vm64_vm0, %v4537_v52 }
  0x30   :  { %913 = vmatmul.f32.vlgmr.msra.gmra.mxu0 %v321_v2  ;;  %1314 = vmatmul.f32.vlgmr.msra.gmra.mxu1 %v322_v3  ;;  %v363_v40 = vld [vmem:[#allocation3 + $0x150] sm:$0xff]  ;;  %v364_v41 = vld [vmem:[#allocation3 + $0x158] sm:$0xff]  ;;  %v361_v42 = vld [vmem:[#allocation3 + $0x140] sm:$0xff]  ;;  %72 = vst.msk [vmem:[#allocation2 + $0x38] sm:$0xff] %vm64_vm0, %v4537_v52 }
  0x31   :  { %v362_v43 = vld [vmem:[#allocation3 + $0x148] sm:$0xff]  ;;  %v367_v44 = vld [vmem:[#allocation3 + $0x170] sm:$0xff]  ;;  %v368_v45 = vld [vmem:[#allocation3 + $0x178] sm:$0xff]  ;;  %73 = vst.msk [vmem:[#allocation2 + $0x40] sm:$0xff] %vm64_vm0, %v4537_v52 }
  0x32   :  { %v365_v46 = vld [vmem:[#allocation3 + $0x160] sm:$0xff]  ;;  %v366_v47 = vld [vmem:[#allocation3 + $0x168] sm:$0xff]  ;;  %v371_v48 = vld [vmem:[#allocation3 + $0x190] sm:$0xff]  ;;  %74 = vst.msk [vmem:[#allocation2 + $0x48] sm:$0xff] %vm64_vm0, %v4537_v52 }
  0x33   :  { %v372_v49 = vld [vmem:[#allocation3 + $0x198] sm:$0xff]  ;;  %v369_v50 = vld [vmem:[#allocation3 + $0x180] sm:$0xff]  ;;  %v370_v51 = vld [vmem:[#allocation3 + $0x188] sm:$0xff]  ;;  %75 = vst.msk [vmem:[#allocation2 + $0x50] sm:$0xff] %vm64_vm0, %v4537_v52 }
  0x34   :  { %v375_v53 = vld [vmem:[#allocation3 + $0x1b0] sm:$0xff]  ;;  %v376_v54 = vld [vmem:[#allocation3 + $0x1b8] sm:$0xff]  ;;  %v373_v55 = vld [vmem:[#allocation3 + $0x1a0] sm:$0xff]  ;;  %76 = vst.msk [vmem:[#allocation2 + $0x58] sm:$0xff] %vm64_vm0, %v4537_v52 }
  0x35   :  { %v374_v56 = vld [vmem:[#allocation3 + $0x1a8] sm:$0xff]  ;;  %77 = vst.msk [vmem:[#allocation2 + $0x60] sm:$0xff] %vm64_vm0, %v4537_v52  ;;  %v379_v57 = vld [vmem:[#allocation3 + $0x1d0] sm:$0xff]  ;;  %v380_v58 = vld [vmem:[#allocation3 + $0x1d8] sm:$0xff] }
  0x36   :  { %1718 = vmatmul.f32.gmra.mxu2 %v327_v4  ;;  %2119 = vmatmul.f32.gmra.mxu3 %v328_v5  ;;  %78 = vst.msk [vmem:[#allocation2 + $0x68] sm:$0xff] %vm64_vm0, %v4537_v52  ;;  %v377_v59 = vld [vmem:[#allocation3 + $0x1c0] sm:$0xff]  ;;  %v378_v60 = vld [vmem:[#allocation3 + $0x1c8] sm:$0xff]  ;;  %v383_v61 = vld [vmem:[#allocation3 + $0x1f0] sm:$0xff] }
  0x37   :  { %79 = vst.msk [vmem:[#allocation2 + $0x70] sm:$0xff] %vm64_vm0, %v4537_v52  ;;  %v384_v62 = vld [vmem:[#allocation3 + $0x1f8] sm:$0xff]  ;;  %v381_v63 = vld [vmem:[#allocation3 + $0x1e0] sm:$0xff]  ;;  %v382_v0 = vld [vmem:[#allocation3 + $0x1e8] sm:$0xff] }
  0x38   :  { %916 = vmatmul.f32.gmra.mxu0 %v325_v6  ;;  %1317 = vmatmul.f32.gmra.mxu1 %v326_v7  ;;  %80 = vst.msk [vmem:[#allocation2 + $0x78] sm:$0xff] %vm64_vm0, %v4537_v52  ;;  %v387_v1 = vld [vmem:[#allocation3 + $0x210] sm:$0xff]  ;;  %v388_v2 = vld [vmem:[#allocation3 + $0x218] sm:$0xff]  ;;  %v385_v5 = vld [vmem:[#allocation3 + $0x200] sm:$0xff] }
  0x39   :  { %81 = vst.msk [vmem:[#allocation2 + $0x80] sm:$0xff] %vm64_vm0, %v4537_v52  ;;  %v386_v6 = vld [vmem:[#allocation3 + $0x208] sm:$0xff] }
  0x3a   :  { %82 = vst.msk [vmem:[#allocation2 + $0x88] sm:$0xff] %vm64_vm0, %v4537_v52 }
  0x3b   :  { %83 = vst.msk [vmem:[#allocation2 + $0x90] sm:$0xff] %vm64_vm0, %v4537_v52 }
  0x3c   :  { %84 = vst.msk [vmem:[#allocation2 + $0x98] sm:$0xff] %vm64_vm0, %v4537_v52 }
  0x3d   :  { %85 = vst.msk [vmem:[#allocation2 + $0xa0] sm:$0xff] %vm64_vm0, %v4537_v52 }
  0x3e   :  { %1721 = vmatmul.f32.gmra.mxu2 %v331_v8  ;;  %2122 = vmatmul.f32.gmra.mxu3 %v332_v9  ;;  %86 = vst.msk [vmem:[#allocation2 + $0xa8] sm:$0xff] %vm64_vm0, %v4537_v52 }
  0x3f   :  { %87 = vst.msk [vmem:[#allocation2 + $0xb0] sm:$0xff] %vm64_vm0, %v4537_v52 }
  0x40   :  { %919 = vmatmul.f32.gmra.mxu0 %v329_v10  ;;  %1320 = vmatmul.f32.gmra.mxu1 %v330_v11  ;;  %88 = vst.msk [vmem:[#allocation2 + $0xb8] sm:$0xff] %vm64_vm0, %v4537_v52  ;;  %v193_v11 = vld [vmem:[#allocation2] sm:$0xff] }
  0x41   :  { %89 = vst.msk [vmem:[#allocation2 + $0xc0] sm:$0xff] %vm64_vm0, %v4537_v52 }
  0x42   :  { %90 = vst.msk [vmem:[#allocation2 + $0xc8] sm:$0xff] %vm64_vm0, %v4537_v52 }
  0x43   :  { %91 = vst.msk [vmem:[#allocation2 + $0xd0] sm:$0xff] %vm64_vm0, %v4537_v52 }
  0x44   :  { %92 = vst.msk [vmem:[#allocation2 + $0xd8] sm:$0xff] %vm64_vm0, %v4537_v52 }
  0x45   :  { %93 = vst.msk [vmem:[#allocation2 + $0xe0] sm:$0xff] %vm64_vm0, %v4537_v52 }
  0x46   :  { %1724 = vmatmul.f32.gmra.mxu2 %v335_v12  ;;  %2125 = vmatmul.f32.gmra.mxu3 %v336_v13  ;;  %94 = vst.msk [vmem:[#allocation2 + $0xe8] sm:$0xff] %vm64_vm0, %v4537_v52  ;;  %v391_v12 = vld [vmem:[#allocation3 + $0x230] sm:$0xff]  ;;  %v392_v13 = vld [vmem:[#allocation3 + $0x238] sm:$0xff] }
  0x47   :  { %95 = vst.msk [vmem:[#allocation2 + $0xf0] sm:$0xff] %vm64_vm0, %v4537_v52 }
  0x48   :  { %922 = vmatmul.f32.gmra.mxu0 %v333_v14  ;;  %1323 = vmatmul.f32.gmra.mxu1 %v334_v15  ;;  %96 = vst.msk [vmem:[#allocation2 + $0xf8] sm:$0xff] %vm64_vm0, %v4537_v52  ;;  %v389_v15 = vld [vmem:[#allocation3 + $0x220] sm:$0xff] }
  0x49   :  { %97 = vst.msk [vmem:[#allocation2 + $0x100] sm:$0xff] %vm64_vm0, %v4537_v52 }
  0x4a   :  { %98 = vst.msk [vmem:[#allocation2 + $0x108] sm:$0xff] %vm64_vm0, %v4537_v52 }
  0x4b   :  { %99 = vst.msk [vmem:[#allocation2 + $0x110] sm:$0xff] %vm64_vm0, %v4537_v52 }
  0x4c   :  { %100 = vst.msk [vmem:[#allocation2 + $0x118] sm:$0xff] %vm64_vm0, %v4537_v52 }
  0x4d   :  { %101 = vst.msk [vmem:[#allocation2 + $0x120] sm:$0xff] %vm64_vm0, %v4537_v52 }
  0x4e   :  { %1727 = vmatmul.f32.gmra.mxu2 %v339_v16  ;;  %2128 = vmatmul.f32.gmra.mxu3 %v340_v17  ;;  %102 = vst.msk [vmem:[#allocation2 + $0x128] sm:$0xff] %vm64_vm0, %v4537_v52  ;;  %v390_v16 = vld [vmem:[#allocation3 + $0x228] sm:$0xff] }
  0x4f   :  { %103 = vst.msk [vmem:[#allocation2 + $0x130] sm:$0xff] %vm64_vm0, %v4537_v52 }
  0x50   :  { %925 = vmatmul.f32.gmra.mxu0 %v337_v18  ;;  %1326 = vmatmul.f32.gmra.mxu1 %v338_v19  ;;  %104 = vst.msk [vmem:[#allocation2 + $0x138] sm:$0xff] %vm64_vm0, %v4537_v52 }
  0x51   :  { %105 = vst.msk [vmem:[#allocation2 + $0x140] sm:$0xff] %vm64_vm0, %v4537_v52 }
  0x52   :  { %106 = vst.msk [vmem:[#allocation2 + $0x148] sm:$0xff] %vm64_vm0, %v4537_v52 }
  0x53   :  { %107 = vst.msk [vmem:[#allocation2 + $0x150] sm:$0xff] %vm64_vm0, %v4537_v52 }
  0x54   :  { %108 = vst.msk [vmem:[#allocation2 + $0x158] sm:$0xff] %vm64_vm0, %v4537_v52 }
  0x55   :  { %109 = vst.msk [vmem:[#allocation2 + $0x160] sm:$0xff] %vm64_vm0, %v4537_v52 }
  0x56   :  { %1730 = vmatmul.f32.gmra.mxu2 %v343_v20  ;;  %2131 = vmatmul.f32.gmra.mxu3 %v344_v21  ;;  %110 = vst.msk [vmem:[#allocation2 + $0x168] sm:$0xff] %vm64_vm0, %v4537_v52 }
  0x57   :  { %111 = vst.msk [vmem:[#allocation2 + $0x170] sm:$0xff] %vm64_vm0, %v4537_v52 }
  0x58   :  { %928 = vmatmul.f32.gmra.mxu0 %v341_v22  ;;  %1329 = vmatmul.f32.gmra.mxu1 %v342_v23  ;;  %112 = vst.msk [vmem:[#allocation2 + $0x178] sm:$0xff] %vm64_vm0, %v4537_v52  ;;  %v395_v22 = vld [vmem:[#allocation3 + $0x250] sm:$0xff] }
  0x59   :  { %113 = vst.msk [vmem:[#allocation2 + $0x180] sm:$0xff] %vm64_vm0, %v4537_v52 }
  0x5a   :  { %114 = vst.msk [vmem:[#allocation2 + $0x188] sm:$0xff] %vm64_vm0, %v4537_v52 }
  0x5b   :  { %115 = vst.msk [vmem:[#allocation2 + $0x190] sm:$0xff] %vm64_vm0, %v4537_v52 }
  0x5c   :  { %116 = vst.msk [vmem:[#allocation2 + $0x198] sm:$0xff] %vm64_vm0, %v4537_v52 }
  0x5d   :  { %117 = vst.msk [vmem:[#allocation2 + $0x1a0] sm:$0xff] %vm64_vm0, %v4537_v52 }
  0x5e   :  { %1733 = vmatmul.f32.gmra.mxu2 %v347_v24  ;;  %2134 = vmatmul.f32.gmra.mxu3 %v348_v25  ;;  %118 = vst.msk [vmem:[#allocation2 + $0x1a8] sm:$0xff] %vm64_vm0, %v4537_v52  ;;  %v396_v25 = vld [vmem:[#allocation3 + $0x258] sm:$0xff] }
  0x5f   :  { %119 = vst.msk [vmem:[#allocation2 + $0x1b0] sm:$0xff] %vm64_vm0, %v4537_v52 }
  0x60   :  { %931 = vmatmul.f32.gmra.mxu0 %v345_v26  ;;  %1332 = vmatmul.f32.gmra.mxu1 %v346_v27  ;;  %120 = vst.msk [vmem:[#allocation2 + $0x1b8] sm:$0xff] %vm64_vm0, %v4537_v52  ;;  %v393_v27 = vld [vmem:[#allocation3 + $0x240] sm:$0xff] }
  0x61   :  { %121 = vst.msk [vmem:[#allocation2 + $0x1c0] sm:$0xff] %vm64_vm0, %v4537_v52 }
  0x62   :  { %122 = vst.msk [vmem:[#allocation2 + $0x1c8] sm:$0xff] %vm64_vm0, %v4537_v52 }
  0x63   :  { %123 = vst.msk [vmem:[#allocation2 + $0x1d0] sm:$0xff] %vm64_vm0, %v4537_v52 }
  0x64   :  { %124 = vst.msk [vmem:[#allocation2 + $0x1d8] sm:$0xff] %vm64_vm0, %v4537_v52 }
  0x65   :  { %125 = vst.msk [vmem:[#allocation2 + $0x1e0] sm:$0xff] %vm64_vm0, %v4537_v52 }
  0x66   :  { %1736 = vmatmul.f32.gmra.mxu2 %v351_v28  ;;  %2137 = vmatmul.f32.gmra.mxu3 %v352_v29  ;;  %126 = vst.msk [vmem:[#allocation2 + $0x1e8] sm:$0xff] %vm64_vm0, %v4537_v52  ;;  %v394_v28 = vld [vmem:[#allocation3 + $0x248] sm:$0xff] }
  0x67   :  { %127 = vst.msk [vmem:[#allocation2 + $0x1f0] sm:$0xff] %vm64_vm0, %v4537_v52 }
  0x68   :  { %934 = vmatmul.f32.gmra.mxu0 %v349_v30  ;;  %1335 = vmatmul.f32.gmra.mxu1 %v350_v31  ;;  %128 = vst.msk [vmem:[#allocation2 + $0x1f8] sm:$0xff] %vm64_vm0, %v4537_v52  ;;  %v399_v30 = vld [vmem:[#allocation3 + $0x270] sm:$0xff] }
  0x69   :  { %129 = vst.msk [vmem:[#allocation2 + $0x200] sm:$0xff] %vm64_vm0, %v4537_v52 }
  0x6a   :  { %130 = vst.msk [vmem:[#allocation2 + $0x208] sm:$0xff] %vm64_vm0, %v4537_v52 }
  0x6b   :  { %131 = vst.msk [vmem:[#allocation2 + $0x210] sm:$0xff] %vm64_vm0, %v4537_v52 }
  0x6c   :  { %132 = vst.msk [vmem:[#allocation2 + $0x218] sm:$0xff] %vm64_vm0, %v4537_v52 }
  0x6d   :  { %133 = vst.msk [vmem:[#allocation2 + $0x220] sm:$0xff] %vm64_vm0, %v4537_v52 }
  0x6e   :  { %1739 = vmatmul.f32.gmra.mxu2 %v355_v32  ;;  %2140 = vmatmul.f32.gmra.mxu3 %v356_v33  ;;  %134 = vst.msk [vmem:[#allocation2 + $0x228] sm:$0xff] %vm64_vm0, %v4537_v52  ;;  %v400_v33 = vld [vmem:[#allocation3 + $0x278] sm:$0xff] }
  0x6f   :  { %135 = vst.msk [vmem:[#allocation2 + $0x230] sm:$0xff] %vm64_vm0, %v4537_v52 }
  0x70   :  { %937 = vmatmul.f32.gmra.mxu0 %v353_v34  ;;  %1338 = vmatmul.f32.gmra.mxu1 %v354_v35  ;;  %136 = vst.msk [vmem:[#allocation2 + $0x238] sm:$0xff] %vm64_vm0, %v4537_v52  ;;  %v397_v35 = vld [vmem:[#allocation3 + $0x260] sm:$0xff] }
  0x71   :  { %137 = vst.msk [vmem:[#allocation2 + $0x240] sm:$0xff] %vm64_vm0, %v4537_v52 }
  0x72   :  { %138 = vst.msk [vmem:[#allocation2 + $0x248] sm:$0xff] %vm64_vm0, %v4537_v52 }
  0x73   :  { %139 = vst.msk [vmem:[#allocation2 + $0x250] sm:$0xff] %vm64_vm0, %v4537_v52 }
  0x74   :  { %140 = vst.msk [vmem:[#allocation2 + $0x258] sm:$0xff] %vm64_vm0, %v4537_v52 }
  0x75   :  { %141 = vst.msk [vmem:[#allocation2 + $0x260] sm:$0xff] %vm64_vm0, %v4537_v52 }
  0x76   :  { %1742 = vmatmul.f32.gmra.mxu2 %v359_v36  ;;  %2143 = vmatmul.f32.gmra.mxu3 %v360_v37  ;;  %142 = vst.msk [vmem:[#allocation2 + $0x268] sm:$0xff] %vm64_vm0, %v4537_v52  ;;  %v398_v36 = vld [vmem:[#allocation3 + $0x268] sm:$0xff] }
  0x77   :  { %143 = vst.msk [vmem:[#allocation2 + $0x270] sm:$0xff] %vm64_vm0, %v4537_v52 }
  0x78   :  { %940 = vmatmul.f32.gmra.mxu0 %v357_v38  ;;  %1341 = vmatmul.f32.gmra.mxu1 %v358_v39  ;;  %144 = vst.msk [vmem:[#allocation2 + $0x278] sm:$0xff] %vm64_vm0, %v4537_v52  ;;  %v403_v38 = vld [vmem:[#allocation3 + $0x290] sm:$0xff]  ;;  %v404_v39 = vld [vmem:[#allocation3 + $0x298] sm:$0xff] }
  0x79   :  { %145 = vst.msk [vmem:[#allocation2 + $0x280] sm:$0xff] %vm64_vm0, %v4537_v52 }
  0x7a   :  { %146 = vst.msk [vmem:[#allocation2 + $0x288] sm:$0xff] %vm64_vm0, %v4537_v52 }
  0x7b   :  { %147 = vst.msk [vmem:[#allocation2 + $0x290] sm:$0xff] %vm64_vm0, %v4537_v52 }
  0x7c   :  { %148 = vst.msk [vmem:[#allocation2 + $0x298] sm:$0xff] %vm64_vm0, %v4537_v52 }
  0x7d   :  { %149 = vst.msk [vmem:[#allocation2 + $0x2a0] sm:$0xff] %vm64_vm0, %v4537_v52 }
  0x7e   :  { %1745 = vmatmul.f32.gmra.mxu2 %v363_v40  ;;  %2146 = vmatmul.f32.gmra.mxu3 %v364_v41  ;;  %150 = vst.msk [vmem:[#allocation2 + $0x2a8] sm:$0xff] %vm64_vm0, %v4537_v52 }
  0x7f   :  { %151 = vst.msk [vmem:[#allocation2 + $0x2b0] sm:$0xff] %vm64_vm0, %v4537_v52 }
  0x80   :  { %943 = vmatmul.f32.gmra.mxu0 %v361_v42  ;;  %1344 = vmatmul.f32.gmra.mxu1 %v362_v43  ;;  %152 = vst.msk [vmem:[#allocation2 + $0x2b8] sm:$0xff] %vm64_vm0, %v4537_v52  ;;  %v401_v42 = vld [vmem:[#allocation3 + $0x280] sm:$0xff]  ;;  %v402_v43 = vld [vmem:[#allocation3 + $0x288] sm:$0xff] }
  0x81   :  { %153 = vst.msk [vmem:[#allocation2 + $0x2c0] sm:$0xff] %vm64_vm0, %v4537_v52 }
  0x82   :  { %154 = vst.msk [vmem:[#allocation2 + $0x2c8] sm:$0xff] %vm64_vm0, %v4537_v52 }
  0x83   :  { %155 = vst.msk [vmem:[#allocation2 + $0x2d0] sm:$0xff] %vm64_vm0, %v4537_v52 }
  0x84   :  { %156 = vst.msk [vmem:[#allocation2 + $0x2d8] sm:$0xff] %vm64_vm0, %v4537_v52 }
  0x85   :  { %157 = vst.msk [vmem:[#allocation2 + $0x2e0] sm:$0xff] %vm64_vm0, %v4537_v52 }
  0x86   :  { %1748 = vmatmul.f32.gmra.mxu2 %v367_v44  ;;  %2149 = vmatmul.f32.gmra.mxu3 %v368_v45  ;;  %158 = vst.msk [vmem:[#allocation2 + $0x2e8] sm:$0xff] %vm64_vm0, %v4537_v52 }
  0x87   :  { %159 = vst.msk [vmem:[#allocation2 + $0x2f0] sm:$0xff] %vm64_vm0, %v4537_v52 }
  0x88   :  { %946 = vmatmul.f32.gmra.mxu0 %v365_v46  ;;  %1347 = vmatmul.f32.gmra.mxu1 %v366_v47  ;;  %160 = vst.msk [vmem:[#allocation2 + $0x2f8] sm:$0xff] %vm64_vm0, %v4537_v52 }
  0x89   :  { %161 = vst.msk [vmem:[#allocation2 + $0x300] sm:$0xff] %vm64_vm0, %v4537_v52 }
  0x8a   :  { %162 = vst.msk [vmem:[#allocation2 + $0x308] sm:$0xff] %vm64_vm0, %v4537_v52 }
  0x8b   :  { %163 = vst.msk [vmem:[#allocation2 + $0x310] sm:$0xff] %vm64_vm0, %v4537_v52 }
  0x8c   :  { %164 = vst.msk [vmem:[#allocation2 + $0x318] sm:$0xff] %vm64_vm0, %v4537_v52 }
  0x8d   :  { %165 = vst.msk [vmem:[#allocation2 + $0x320] sm:$0xff] %vm64_vm0, %v4537_v52 }
  0x8e   :  { %1751 = vmatmul.f32.gmra.mxu2 %v371_v48  ;;  %2152 = vmatmul.f32.gmra.mxu3 %v372_v49  ;;  %166 = vst.msk [vmem:[#allocation2 + $0x328] sm:$0xff] %vm64_vm0, %v4537_v52 }
  0x8f   :  { %167 = vst.msk [vmem:[#allocation2 + $0x330] sm:$0xff] %vm64_vm0, %v4537_v52 }
  0x90   :  { %949 = vmatmul.f32.gmra.mxu0 %v369_v50  ;;  %1350 = vmatmul.f32.gmra.mxu1 %v370_v51  ;;  %168 = vst.msk [vmem:[#allocation2 + $0x338] sm:$0xff] %vm64_vm0, %v4537_v52  ;;  %v407_v50 = vld [vmem:[#allocation3 + $0x2b0] sm:$0xff] }
  0x91   :  { %169 = vst.msk [vmem:[#allocation2 + $0x340] sm:$0xff] %vm64_vm0, %v4537_v52 }
  0x92   :  { %170 = vst.msk [vmem:[#allocation2 + $0x348] sm:$0xff] %vm64_vm0, %v4537_v52 }
  0x93   :  { %171 = vst.msk [vmem:[#allocation2 + $0x350] sm:$0xff] %vm64_vm0, %v4537_v52 }
  0x94   :  { %172 = vst.msk [vmem:[#allocation2 + $0x358] sm:$0xff] %vm64_vm0, %v4537_v52 }
  0x95   :  { %173 = vst.msk [vmem:[#allocation2 + $0x360] sm:$0xff] %vm64_vm0, %v4537_v52 }
  0x96   :  { %1754 = vmatmul.f32.gmra.mxu2 %v375_v53  ;;  %2155 = vmatmul.f32.gmra.mxu3 %v376_v54  ;;  %174 = vst.msk [vmem:[#allocation2 + $0x368] sm:$0xff] %vm64_vm0, %v4537_v52  ;;  %v408_v54 = vld [vmem:[#allocation3 + $0x2b8] sm:$0xff] }
  0x97   :  { %175 = vst.msk [vmem:[#allocation2 + $0x370] sm:$0xff] %vm64_vm0, %v4537_v52 }
  0x98   :  { %952 = vmatmul.f32.gmra.mxu0 %v373_v55  ;;  %1353 = vmatmul.f32.gmra.mxu1 %v374_v56  ;;  %176 = vst.msk [vmem:[#allocation2 + $0x378] sm:$0xff] %vm64_vm0, %v4537_v52 }
  0x99   :  { %177 = vst.msk [vmem:[#allocation2 + $0x380] sm:$0xff] %vm64_vm0, %v4537_v52 }
  0x9a   :  { %178 = vst.msk [vmem:[#allocation2 + $0x388] sm:$0xff] %vm64_vm0, %v4537_v52 }
  0x9b   :  { %179 = vst.msk [vmem:[#allocation2 + $0x390] sm:$0xff] %vm64_vm0, %v4537_v52 }
  0x9c   :  { %180 = vst.msk [vmem:[#allocation2 + $0x398] sm:$0xff] %vm64_vm0, %v4537_v52 }
  0x9d   :  { %181 = vst.msk [vmem:[#allocation2 + $0x3a0] sm:$0xff] %vm64_vm0, %v4537_v52 }
  0x9e   :  { %1757 = vmatmul.f32.gmra.mxu2 %v379_v57  ;;  %2158 = vmatmul.f32.gmra.mxu3 %v380_v58  ;;  %182 = vst.msk [vmem:[#allocation2 + $0x3a8] sm:$0xff] %vm64_vm0, %v4537_v52 }
  0x9f   :  { %183 = vst.msk [vmem:[#allocation2 + $0x3b0] sm:$0xff] %vm64_vm0, %v4537_v52 }
  0xa0   :  { %955 = vmatmul.f32.gmra.mxu0 %v377_v59  ;;  %1356 = vmatmul.f32.gmra.mxu1 %v378_v60  ;;  %184 = vst.msk [vmem:[#allocation2 + $0x3b8] sm:$0xff] %vm64_vm0, %v4537_v52  ;;  %v405_v59 = vld [vmem:[#allocation3 + $0x2a0] sm:$0xff]  ;;  %v406_v60 = vld [vmem:[#allocation3 + $0x2a8] sm:$0xff] }
  0xa1   :  { %185 = vst.msk [vmem:[#allocation2 + $0x3c0] sm:$0xff] %vm64_vm0, %v4537_v52 }
  0xa2   :  { %186 = vst.msk [vmem:[#allocation2 + $0x3c8] sm:$0xff] %vm64_vm0, %v4537_v52 }
  0xa3   :  { %187 = vst.msk [vmem:[#allocation2 + $0x3d0] sm:$0xff] %vm64_vm0, %v4537_v52 }
  0xa4   :  { %188 = vst.msk [vmem:[#allocation2 + $0x3d8] sm:$0xff] %vm64_vm0, %v4537_v52 }
  0xa5   :  { %189 = vst.msk [vmem:[#allocation2 + $0x3e0] sm:$0xff] %vm64_vm0, %v4537_v52 }
  0xa6   :  { %1760 = vmatmul.f32.gmra.mxu2 %v383_v61  ;;  %2161 = vmatmul.f32.gmra.mxu3 %v384_v62  ;;  %190 = vst.msk [vmem:[#allocation2 + $0x3e8] sm:$0xff] %vm64_vm0, %v4537_v52 }
  0xa7   :  { %191 = vst.msk [vmem:[#allocation2 + $0x3f0] sm:$0xff] %vm64_vm0, %v4537_v52 }
  0xa8   :  { %958 = vmatmul.f32.gmra.mxu0 %v381_v63  ;;  %1359 = vmatmul.f32.gmra.mxu1 %v382_v0  ;;  %v194_v63 = vld [vmem:[#allocation2 + $0x8] sm:$0xff]  ;;  %192 = vst.msk [vmem:[#allocation2 + $0x3f8] sm:$0xff] %vm64_vm0, %v4537_v52  ;;  %v199_v52 = vld [vmem:[#allocation2 + $0x30] sm:$0xff] }
  0xad   :  { %v914_v3 = vpop.f32.mrf.mxu0  ;;  %v1315_v4 = vpop.f32.mrf.mxu1 }
  0xae   :  { %1763 = vmatmul.f32.gmra.mxu2 %v387_v1  ;;  %v1316_v7 = vadd.f32 %v1315_v4, %v914_v3  ;;  %2164 = vmatmul.f32.gmra.mxu3 %v388_v2  ;;  %v195_v2 = vld [vmem:[#allocation2 + $0x10] sm:$0xff] }
  0xb0   :  { %961 = vmatmul.f32.gmra.mxu0 %v385_v5  ;;  %1362 = vmatmul.f32.gmra.mxu1 %v386_v6  ;;  %v196_v5 = vld [vmem:[#allocation2 + $0x18] sm:$0xff] }
  0xb1   :  { %v1716_v8 = vpop.f32.mrf.mxu2  ;;  %v2117_v9 = vpop.f32.mrf.mxu3 }
  0xb2   :  { %v1717_v10 = vadd.f32 %v1716_v8, %v1316_v7  ;;  %v411_v8 = vld [vmem:[#allocation3 + $0x2d0] sm:$0xff] }
  0xb4   :  { %v2118_v14 = vadd.f32 %v2117_v9, %v1717_v10  ;;  %v197_v10 = vld [vmem:[#allocation2 + $0x20] sm:$0xff] }
  0xb5   :  { %v917_v18 = vpop.f32.mrf.mxu0  ;;  %v1318_v19 = vpop.f32.mrf.mxu1 }
  0xb6   :  { %v2501_v17 = vadd.f32 %v2118_v14, %v193_v11  ;;  %1766 = vmatmul.f32.gmra.mxu2 %v391_v12  ;;  %2167 = vmatmul.f32.gmra.mxu3 %v392_v13  ;;  %v1319_v44 = vadd.f32 %v1318_v19, %v917_v18  ;;  %v198_v13 = vld [vmem:[#allocation2 + $0x28] sm:$0xff]  ;;  %v412_v14 = vld [vmem:[#allocation3 + $0x2d8] sm:$0xff]  ;;  %v409_v19 = vld [vmem:[#allocation3 + $0x2c0] sm:$0xff] }
  0xb8   :  { %2630 = vst.msk [vmem:[#allocation2] sm:$0xff] %vm64_vm0, %v2501_v17  ;;  %964 = vmatmul.f32.gmra.mxu0 %v389_v15  ;;  %1365 = vmatmul.f32.gmra.mxu1 %v390_v16 }
  0xb9   :  { %v4941_v20 = vpop.f32.mrf.mxu2  ;;  %v4947_v21 = vpop.f32.mrf.mxu3 }
  0xba   :  { %v1720_v51 = vadd.f32 %v4941_v20, %v1319_v44  ;;  %v410_v20 = vld [vmem:[#allocation3 + $0x2c8] sm:$0xff] }
  0xbc   :  { %v2121_v61 = vadd.f32 %v4947_v21, %v1720_v51 }
  0xbd   :  { %v920_v23 = vpop.f32.mrf.mxu0  ;;  %v1321_v24 = vpop.f32.mrf.mxu1 }
  0xbe   :  { %1769 = vmatmul.f32.gmra.mxu2 %v395_v22  ;;  %2170 = vmatmul.f32.gmra.mxu3 %v396_v25  ;;  %v1322_v45 = vadd.f32 %v1321_v24, %v920_v23  ;;  %v2502_v9 = vadd.f32 %v2121_v61, %v194_v63 }
  0xc0   :  { %967 = vmatmul.f32.gmra.mxu0 %v393_v27  ;;  %1368 = vmatmul.f32.gmra.mxu1 %v394_v28  ;;  %2631 = vst.msk [vmem:[#allocation2 + $0x8] sm:$0xff] %vm64_vm0, %v2502_v9  ;;  %v416_v28 = vld [vmem:[#allocation3 + $0x2f8] sm:$0xff]  ;;  %v426_v9 = vld [vmem:[#allocation3 + $0x348] sm:$0xff] }
  0xc1   :  { %v1722_v26 = vpop.f32.mrf.mxu2  ;;  %v4969_v29 = vpop.f32.mrf.mxu3 }
  0xc2   :  { %v1723_v53 = vadd.f32 %v1722_v26, %v1322_v45  ;;  %v415_v26 = vld [vmem:[#allocation3 + $0x2f0] sm:$0xff]  ;;  %v417_v45 = vld [vmem:[#allocation3 + $0x300] sm:$0xff] }
  0xc4   :  { %v2124_v0 = vadd.f32 %v4969_v29, %v1723_v53  ;;  %v423_v53 = vld [vmem:[#allocation3 + $0x330] sm:$0xff] }
  0xc5   :  { %v923_v31 = vpop.f32.mrf.mxu0  ;;  %v1324_v32 = vpop.f32.mrf.mxu1 }
  0xc6   :  { %1772 = vmatmul.f32.gmra.mxu2 %v399_v30  ;;  %2173 = vmatmul.f32.gmra.mxu3 %v400_v33  ;;  %v1325_v47 = vadd.f32 %v1324_v32, %v923_v31  ;;  %v2503_v12 = vadd.f32 %v2124_v0, %v195_v2  ;;  %v413_v32 = vld [vmem:[#allocation3 + $0x2e0] sm:$0xff]  ;;  %v414_v33 = vld [vmem:[#allocation3 + $0x2e8] sm:$0xff]  ;;  %v427_v2 = vld [vmem:[#allocation3 + $0x350] sm:$0xff] }
  0xc7   :  { %v202_v0 = vld [vmem:[#allocation2 + $0x48] sm:$0xff] }
  0xc8   :  { %970 = vmatmul.f32.gmra.mxu0 %v397_v35  ;;  %1371 = vmatmul.f32.gmra.mxu1 %v398_v36  ;;  %2632 = vst.msk [vmem:[#allocation2 + $0x10] sm:$0xff] %vm64_vm0, %v2503_v12 }
  0xc9   :  { %v1725_v34 = vpop.f32.mrf.mxu2  ;;  %v2126_v37 = vpop.f32.mrf.mxu3 }
  0xca   :  { %v1726_v55 = vadd.f32 %v1725_v34, %v1325_v47 }
  0xcc   :  { %v2127_v3 = vadd.f32 %v2126_v37, %v1726_v55  ;;  %v200_v37 = vld [vmem:[#allocation2 + $0x38] sm:$0xff] }
  0xcd   :  { %v926_v40 = vpop.f32.mrf.mxu0  ;;  %v1327_v41 = vpop.f32.mrf.mxu1  ;;  %v424_v55 = vld [vmem:[#allocation3 + $0x338] sm:$0xff] }
  0xce   :  { %1775 = vmatmul.f32.gmra.mxu2 %v403_v38  ;;  %2176 = vmatmul.f32.gmra.mxu3 %v404_v39  ;;  %v1328_v48 = vadd.f32 %v1327_v41, %v926_v40  ;;  %v2504_v15 = vadd.f32 %v2127_v3, %v196_v5  ;;  %v419_v39 = vld [vmem:[#allocation3 + $0x310] sm:$0xff]  ;;  %v420_v41 = vld [vmem:[#allocation3 + $0x318] sm:$0xff] }
  0xd0   :  { %973 = vmatmul.f32.gmra.mxu0 %v401_v42  ;;  %1374 = vmatmul.f32.gmra.mxu1 %v402_v43  ;;  %2633 = vst.msk [vmem:[#allocation2 + $0x18] sm:$0xff] %vm64_vm0, %v2504_v15  ;;  %v431_v15 = vld [vmem:[#allocation3 + $0x370] sm:$0xff] }
  0xd1   :  { %v1728_v46 = vpop.f32.mrf.mxu2  ;;  %v2129_v49 = vpop.f32.mrf.mxu3 }
  0xd2   :  { %v1729_v56 = vadd.f32 %v1728_v46, %v1328_v48  ;;  %v418_v46 = vld [vmem:[#allocation3 + $0x308] sm:$0xff] }
  0xd4   :  { %v2130_v6 = vadd.f32 %v2129_v49, %v1729_v56 }
  0xd5   :  { %v929_v57 = vpop.f32.mrf.mxu0  ;;  %v1330_v58 = vpop.f32.mrf.mxu1 }
  0xd6   :  { %1778 = vmatmul.f32.gmra.mxu2 %v407_v50  ;;  %v1331_v62 = vadd.f32 %v1330_v58, %v929_v57  ;;  %2179 = vmatmul.f32.gmra.mxu3 %v408_v54  ;;  %v2505_v16 = vadd.f32 %v2130_v6, %v197_v10  ;;  %v201_v50 = vld [vmem:[#allocation2 + $0x40] sm:$0xff] }
  0xd8   :  { %976 = vmatmul.f32.gmra.mxu0 %v405_v59  ;;  %1377 = vmatmul.f32.gmra.mxu1 %v406_v60  ;;  %2634 = vst.msk [vmem:[#allocation2 + $0x20] sm:$0xff] %vm64_vm0, %v2505_v16  ;;  %v421_v59 = vld [vmem:[#allocation3 + $0x320] sm:$0xff]  ;;  %v422_v60 = vld [vmem:[#allocation3 + $0x328] sm:$0xff] }
  0xd9   :  { %v1731_v1 = vpop.f32.mrf.mxu2  ;;  %v2132_v7 = vpop.f32.mrf.mxu3 }
  0xda   :  { %v1732_v4 = vadd.f32 %v1731_v1, %v1331_v62 }
  0xdc   :  { %v2133_v11 = vadd.f32 %v2132_v7, %v1732_v4  ;;  %v428_v4 = vld [vmem:[#allocation3 + $0x358] sm:$0xff] }
  0xdd   :  { %v932_v17 = vpop.f32.mrf.mxu0  ;;  %v1333_v18 = vpop.f32.mrf.mxu1 }
  0xde   :  { %1781 = vmatmul.f32.gmra.mxu2 %v411_v8  ;;  %v2506_v21 = vadd.f32 %v2133_v11, %v198_v13  ;;  %v1334_v22 = vadd.f32 %v1333_v18, %v932_v17  ;;  %2182 = vmatmul.f32.gmra.mxu3 %v412_v14  ;;  %v425_v8 = vld [vmem:[#allocation3 + $0x340] sm:$0xff]  ;;  %v203_v13 = vld [vmem:[#allocation2 + $0x50] sm:$0xff]  ;;  %v432_v17 = vld [vmem:[#allocation3 + $0x378] sm:$0xff] }
  0xe0   :  { %979 = vmatmul.f32.gmra.mxu0 %v409_v19  ;;  %1380 = vmatmul.f32.gmra.mxu1 %v410_v20  ;;  %2635 = vst.msk [vmem:[#allocation2 + $0x28] sm:$0xff] %vm64_vm0, %v2506_v21  ;;  %v429_v21 = vld [vmem:[#allocation3 + $0x360] sm:$0xff] }
  0xe1   :  { %v1734_v23 = vpop.f32.mrf.mxu2  ;;  %v2135_v25 = vpop.f32.mrf.mxu3 }
  0xe2   :  { %v1735_v24 = vadd.f32 %v1734_v23, %v1334_v22  ;;  %v430_v22 = vld [vmem:[#allocation3 + $0x368] sm:$0xff] }
  0xe4   :  { %v2136_v27 = vadd.f32 %v2135_v25, %v1735_v24  ;;  %v204_v25 = vld [vmem:[#allocation2 + $0x58] sm:$0xff] }
  0xe5   :  { %v935_v30 = vpop.f32.mrf.mxu0  ;;  %v1336_v31 = vpop.f32.mrf.mxu1 }
  0xe6   :  { %v2507_v29 = vadd.f32 %v2136_v27, %v199_v52  ;;  %1784 = vmatmul.f32.gmra.mxu2 %v415_v26  ;;  %v1337_v34 = vadd.f32 %v1336_v31, %v935_v30  ;;  %2185 = vmatmul.f32.gmra.mxu3 %v416_v28  ;;  %v435_v27 = vld [vmem:[#allocation3 + $0x390] sm:$0xff] }
  0xe8   :  { %2636 = vst.msk [vmem:[#allocation2 + $0x30] sm:$0xff] %vm64_vm0, %v2507_v29  ;;  %982 = vmatmul.f32.gmra.mxu0 %v413_v32  ;;  %1383 = vmatmul.f32.gmra.mxu1 %v414_v33  ;;  %v436_v29 = vld [vmem:[#allocation3 + $0x398] sm:$0xff]  ;;  %v433_v33 = vld [vmem:[#allocation3 + $0x380] sm:$0xff] }
  0xe9   :  { %v1737_v35 = vpop.f32.mrf.mxu2  ;;  %v2138_v38 = vpop.f32.mrf.mxu3 }
  0xea   :  { %v1738_v36 = vadd.f32 %v1737_v35, %v1337_v34  ;;  %v434_v34 = vld [vmem:[#allocation3 + $0x388] sm:$0xff] }
  0xec   :  { %v2139_v40 = vadd.f32 %v2138_v38, %v1738_v36  ;;  %v205_v38 = vld [vmem:[#allocation2 + $0x60] sm:$0xff] }
  0xed   :  { %v938_v43 = vpop.f32.mrf.mxu0  ;;  %v1339_v44 = vpop.f32.mrf.mxu1 }
  0xee   :  { %v2508_v42 = vadd.f32 %v2139_v40, %v200_v37  ;;  %1787 = vmatmul.f32.gmra.mxu2 %v419_v39  ;;  %v1340_v47 = vadd.f32 %v1339_v44, %v938_v43  ;;  %2188 = vmatmul.f32.gmra.mxu3 %v420_v41  ;;  %v439_v40 = vld [vmem:[#allocation3 + $0x3b0] sm:$0xff] }
  0xf0   :  { %2637 = vst.msk [vmem:[#allocation2 + $0x38] sm:$0xff] %vm64_vm0, %v2508_v42  ;;  %985 = vmatmul.f32.gmra.mxu0 %v417_v45  ;;  %1386 = vmatmul.f32.gmra.mxu1 %v418_v46  ;;  %v440_v42 = vld [vmem:[#allocation3 + $0x3b8] sm:$0xff]  ;;  %v437_v46 = vld [vmem:[#allocation3 + $0x3a0] sm:$0xff] }
  0xf1   :  { %v1740_v48 = vpop.f32.mrf.mxu2  ;;  %v2141_v51 = vpop.f32.mrf.mxu3 }
  0xf2   :  { %v1741_v49 = vadd.f32 %v1740_v48, %v1340_v47  ;;  %v438_v47 = vld [vmem:[#allocation3 + $0x3a8] sm:$0xff] }
  0xf4   :  { %v2142_v54 = vadd.f32 %v2141_v51, %v1741_v49  ;;  %v206_v51 = vld [vmem:[#allocation2 + $0x68] sm:$0xff] }
  0xf5   :  { %v941_v57 = vpop.f32.mrf.mxu0  ;;  %v1342_v58 = vpop.f32.mrf.mxu1 }
  0xf6   :  { %v2509_v56 = vadd.f32 %v2142_v54, %v201_v50  ;;  %1790 = vmatmul.f32.gmra.mxu2 %v423_v53  ;;  %v1343_v61 = vadd.f32 %v1342_v58, %v941_v57  ;;  %2191 = vmatmul.f32.gmra.mxu3 %v424_v55  ;;  %v443_v54 = vld [vmem:[#allocation3 + $0x3d0] sm:$0xff] }
  0xf8   :  { %2638 = vst.msk [vmem:[#allocation2 + $0x40] sm:$0xff] %vm64_vm0, %v2509_v56  ;;  %988 = vmatmul.f32.gmra.mxu0 %v421_v59  ;;  %1389 = vmatmul.f32.gmra.mxu1 %v422_v60  ;;  %v444_v56 = vld [vmem:[#allocation3 + $0x3d8] sm:$0xff]  ;;  %v441_v60 = vld [vmem:[#allocation3 + $0x3c0] sm:$0xff] }
  0xf9   :  { %v1743_v62 = vpop.f32.mrf.mxu2  ;;  %v2144_v1 = vpop.f32.mrf.mxu3 }
  0xfa   :  { %v1744_v63 = vadd.f32 %v1743_v62, %v1343_v61  ;;  %v442_v61 = vld [vmem:[#allocation3 + $0x3c8] sm:$0xff] }
  0xfc   :  { %v2145_v3 = vadd.f32 %v2144_v1, %v1744_v63  ;;  %v207_v1 = vld [vmem:[#allocation2 + $0x70] sm:$0xff] }
  0xfd   :  { %v944_v6 = vpop.f32.mrf.mxu0  ;;  %v1345_v7 = vpop.f32.mrf.mxu1 }
  0xfe   :  { %v2510_v5 = vadd.f32 %v2145_v3, %v202_v0  ;;  %1793 = vmatmul.f32.gmra.mxu2 %v427_v2  ;;  %v1346_v10 = vadd.f32 %v1345_v7, %v944_v6  ;;  %2194 = vmatmul.f32.gmra.mxu3 %v428_v4  ;;  %v447_v3 = vld [vmem:[#allocation3 + $0x3f0] sm:$0xff] }
 0x100   :  { %2639 = vst.msk [vmem:[#allocation2 + $0x48] sm:$0xff] %vm64_vm0, %v2510_v5  ;;  %991 = vmatmul.f32.gmra.mxu0 %v425_v8  ;;  %1392 = vmatmul.f32.gmra.mxu1 %v426_v9  ;;  %v448_v5 = vld [vmem:[#allocation3 + $0x3f8] sm:$0xff]  ;;  %v445_v9 = vld [vmem:[#allocation3 + $0x3e0] sm:$0xff] }
 0x101   :  { %v1746_v11 = vpop.f32.mrf.mxu2  ;;  %v2147_v14 = vpop.f32.mrf.mxu3 }
 0x102   :  { %v1747_v12 = vadd.f32 %v1746_v11, %v1346_v10  ;;  %v446_v10 = vld [vmem:[#allocation3 + $0x3e8] sm:$0xff] }
 0x104   :  { %v2148_v16 = vadd.f32 %v2147_v14, %v1747_v12  ;;  %v208_v14 = vld [vmem:[#allocation2 + $0x78] sm:$0xff] }
 0x105   :  { %v947_v19 = vpop.f32.mrf.mxu0  ;;  %v1348_v20 = vpop.f32.mrf.mxu1 }
 0x106   :  { %v2511_v18 = vadd.f32 %v2148_v16, %v203_v13  ;;  %1796 = vmatmul.f32.gmra.mxu2 %v431_v15  ;;  %v1349_v23 = vadd.f32 %v1348_v20, %v947_v19  ;;  %2197 = vmatmul.f32.gmra.mxu3 %v432_v17  ;;  %v451_v16 = vld [vmem:[#allocation3 + $0x410] sm:$0xff] }
 0x108   :  { %2640 = vst.msk [vmem:[#allocation2 + $0x50] sm:$0xff] %vm64_vm0, %v2511_v18  ;;  %994 = vmatmul.f32.gmra.mxu0 %v429_v21  ;;  %1395 = vmatmul.f32.gmra.mxu1 %v430_v22  ;;  %v452_v18 = vld [vmem:[#allocation3 + $0x418] sm:$0xff]  ;;  %v449_v22 = vld [vmem:[#allocation3 + $0x400] sm:$0xff] }
 0x109   :  { %v1749_v24 = vpop.f32.mrf.mxu2  ;;  %v2150_v26 = vpop.f32.mrf.mxu3 }
 0x10a   :  { %v1750_v52 = vadd.f32 %v1749_v24, %v1349_v23  ;;  %v450_v23 = vld [vmem:[#allocation3 + $0x408] sm:$0xff] }
 0x10c   :  { %v2151_v28 = vadd.f32 %v2150_v26, %v1750_v52  ;;  %v209_v26 = vld [vmem:[#allocation2 + $0x80] sm:$0xff] }
 0x10d   :  { %v950_v31 = vpop.f32.mrf.mxu0  ;;  %v1351_v32 = vpop.f32.mrf.mxu1 }
 0x10e   :  { %v2512_v30 = vadd.f32 %v2151_v28, %v204_v25  ;;  %1799 = vmatmul.f32.gmra.mxu2 %v435_v27  ;;  %v1352_v35 = vadd.f32 %v1351_v32, %v950_v31  ;;  %2200 = vmatmul.f32.gmra.mxu3 %v436_v29  ;;  %v455_v28 = vld [vmem:[#allocation3 + $0x430] sm:$0xff] }
 0x110   :  { %2641 = vst.msk [vmem:[#allocation2 + $0x58] sm:$0xff] %vm64_vm0, %v2512_v30  ;;  %997 = vmatmul.f32.gmra.mxu0 %v433_v33  ;;  %1398 = vmatmul.f32.gmra.mxu1 %v434_v34  ;;  %v456_v30 = vld [vmem:[#allocation3 + $0x438] sm:$0xff]  ;;  %v453_v34 = vld [vmem:[#allocation3 + $0x420] sm:$0xff] }
 0x111   :  { %v1752_v36 = vpop.f32.mrf.mxu2  ;;  %v2153_v39 = vpop.f32.mrf.mxu3 }
 0x112   :  { %v1753_v37 = vadd.f32 %v1752_v36, %v1352_v35  ;;  %v454_v35 = vld [vmem:[#allocation3 + $0x428] sm:$0xff] }
 0x114   :  { %v2154_v41 = vadd.f32 %v2153_v39, %v1753_v37  ;;  %v210_v39 = vld [vmem:[#allocation2 + $0x88] sm:$0xff] }
 0x115   :  { %v953_v44 = vpop.f32.mrf.mxu0  ;;  %v1354_v45 = vpop.f32.mrf.mxu1 }
 0x116   :  { %v2513_v43 = vadd.f32 %v2154_v41, %v205_v38  ;;  %1802 = vmatmul.f32.gmra.mxu2 %v439_v40  ;;  %v1355_v48 = vadd.f32 %v1354_v45, %v953_v44  ;;  %2203 = vmatmul.f32.gmra.mxu3 %v440_v42  ;;  %v459_v41 = vld [vmem:[#allocation3 + $0x450] sm:$0xff] }
 0x118   :  { %2642 = vst.msk [vmem:[#allocation2 + $0x60] sm:$0xff] %vm64_vm0, %v2513_v43  ;;  %1000 = vmatmul.f32.gmra.mxu0 %v437_v46  ;;  %1401 = vmatmul.f32.gmra.mxu1 %v438_v47  ;;  %v460_v43 = vld [vmem:[#allocation3 + $0x458] sm:$0xff]  ;;  %v457_v47 = vld [vmem:[#allocation3 + $0x440] sm:$0xff] }
 0x119   :  { %v1755_v49 = vpop.f32.mrf.mxu2  ;;  %v2156_v53 = vpop.f32.mrf.mxu3 }
 0x11a   :  { %v1756_v50 = vadd.f32 %v1755_v49, %v1355_v48  ;;  %v458_v48 = vld [vmem:[#allocation3 + $0x448] sm:$0xff] }
 0x11c   :  { %v2157_v55 = vadd.f32 %v2156_v53, %v1756_v50  ;;  %v211_v53 = vld [vmem:[#allocation2 + $0x90] sm:$0xff] }
 0x11d   :  { %v956_v58 = vpop.f32.mrf.mxu0  ;;  %v1357_v59 = vpop.f32.mrf.mxu1 }
 0x11e   :  { %v2514_v57 = vadd.f32 %v2157_v55, %v206_v51  ;;  %1805 = vmatmul.f32.gmra.mxu2 %v443_v54  ;;  %v1358_v62 = vadd.f32 %v1357_v59, %v956_v58  ;;  %2206 = vmatmul.f32.gmra.mxu3 %v444_v56  ;;  %v463_v55 = vld [vmem:[#allocation3 + $0x470] sm:$0xff] }
 0x120   :  { %2643 = vst.msk [vmem:[#allocation2 + $0x68] sm:$0xff] %vm64_vm0, %v2514_v57  ;;  %1003 = vmatmul.f32.gmra.mxu0 %v441_v60  ;;  %1404 = vmatmul.f32.gmra.mxu1 %v442_v61  ;;  %v464_v57 = vld [vmem:[#allocation3 + $0x478] sm:$0xff]  ;;  %v461_v61 = vld [vmem:[#allocation3 + $0x460] sm:$0xff] }
 0x121   :  { %v1758_v63 = vpop.f32.mrf.mxu2  ;;  %v2159_v2 = vpop.f32.mrf.mxu3 }
 0x122   :  { %v1759_v0 = vadd.f32 %v1758_v63, %v1358_v62  ;;  %v462_v62 = vld [vmem:[#allocation3 + $0x468] sm:$0xff] }
 0x124   :  { %v2160_v4 = vadd.f32 %v2159_v2, %v1759_v0  ;;  %v212_v2 = vld [vmem:[#allocation2 + $0x98] sm:$0xff] }
 0x125   :  { %v959_v7 = vpop.f32.mrf.mxu0  ;;  %v1360_v8 = vpop.f32.mrf.mxu1 }
 0x126   :  { %v2515_v6 = vadd.f32 %v2160_v4, %v207_v1  ;;  %1808 = vmatmul.f32.gmra.mxu2 %v447_v3  ;;  %v1361_v11 = vadd.f32 %v1360_v8, %v959_v7  ;;  %2209 = vmatmul.f32.gmra.mxu3 %v448_v5  ;;  %v467_v4 = vld [vmem:[#allocation3 + $0x490] sm:$0xff] }
 0x128   :  { %2644 = vst.msk [vmem:[#allocation2 + $0x70] sm:$0xff] %vm64_vm0, %v2515_v6  ;;  %1006 = vmatmul.f32.gmra.mxu0 %v445_v9  ;;  %1407 = vmatmul.f32.gmra.mxu1 %v446_v10  ;;  %v468_v6 = vld [vmem:[#allocation3 + $0x498] sm:$0xff]  ;;  %v465_v10 = vld [vmem:[#allocation3 + $0x480] sm:$0xff] }
 0x129   :  { %v1761_v12 = vpop.f32.mrf.mxu2  ;;  %v2162_v15 = vpop.f32.mrf.mxu3 }
 0x12a   :  { %v1762_v13 = vadd.f32 %v1761_v12, %v1361_v11  ;;  %v466_v11 = vld [vmem:[#allocation3 + $0x488] sm:$0xff] }
 0x12c   :  { %v2163_v17 = vadd.f32 %v2162_v15, %v1762_v13  ;;  %v213_v15 = vld [vmem:[#allocation2 + $0xa0] sm:$0xff] }
 0x12d   :  { %v962_v20 = vpop.f32.mrf.mxu0  ;;  %v1363_v21 = vpop.f32.mrf.mxu1 }
 0x12e   :  { %v2516_v19 = vadd.f32 %v2163_v17, %v208_v14  ;;  %1811 = vmatmul.f32.gmra.mxu2 %v451_v16  ;;  %v1364_v24 = vadd.f32 %v1363_v21, %v962_v20  ;;  %2212 = vmatmul.f32.gmra.mxu3 %v452_v18  ;;  %v471_v17 = vld [vmem:[#allocation3 + $0x4b0] sm:$0xff] }
 0x130   :  { %2645 = vst.msk [vmem:[#allocation2 + $0x78] sm:$0xff] %vm64_vm0, %v2516_v19  ;;  %1009 = vmatmul.f32.gmra.mxu0 %v449_v22  ;;  %1410 = vmatmul.f32.gmra.mxu1 %v450_v23  ;;  %v472_v19 = vld [vmem:[#allocation3 + $0x4b8] sm:$0xff]  ;;  %v469_v23 = vld [vmem:[#allocation3 + $0x4a0] sm:$0xff] }
 0x131   :  { %v1764_v52 = vpop.f32.mrf.mxu2  ;;  %v2165_v27 = vpop.f32.mrf.mxu3 }
 0x132   :  { %v1765_v25 = vadd.f32 %v1764_v52, %v1364_v24  ;;  %v470_v24 = vld [vmem:[#allocation3 + $0x4a8] sm:$0xff] }
 0x134   :  { %v2166_v29 = vadd.f32 %v2165_v27, %v1765_v25  ;;  %v214_v27 = vld [vmem:[#allocation2 + $0xa8] sm:$0xff] }
 0x135   :  { %v965_v32 = vpop.f32.mrf.mxu0  ;;  %v1366_v33 = vpop.f32.mrf.mxu1 }
 0x136   :  { %v2517_v31 = vadd.f32 %v2166_v29, %v209_v26  ;;  %1814 = vmatmul.f32.gmra.mxu2 %v455_v28  ;;  %v1367_v36 = vadd.f32 %v1366_v33, %v965_v32  ;;  %2215 = vmatmul.f32.gmra.mxu3 %v456_v30  ;;  %v475_v29 = vld [vmem:[#allocation3 + $0x4d0] sm:$0xff] }
 0x138   :  { %2646 = vst.msk [vmem:[#allocation2 + $0x80] sm:$0xff] %vm64_vm0, %v2517_v31  ;;  %1012 = vmatmul.f32.gmra.mxu0 %v453_v34  ;;  %1413 = vmatmul.f32.gmra.mxu1 %v454_v35  ;;  %v476_v31 = vld [vmem:[#allocation3 + $0x4d8] sm:$0xff]  ;;  %v473_v35 = vld [vmem:[#allocation3 + $0x4c0] sm:$0xff] }
 0x139   :  { %v1767_v37 = vpop.f32.mrf.mxu2  ;;  %v2168_v40 = vpop.f32.mrf.mxu3 }
 0x13a   :  { %v1768_v38 = vadd.f32 %v1767_v37, %v1367_v36  ;;  %v474_v36 = vld [vmem:[#allocation3 + $0x4c8] sm:$0xff] }
 0x13c   :  { %v2169_v42 = vadd.f32 %v2168_v40, %v1768_v38  ;;  %v215_v40 = vld [vmem:[#allocation2 + $0xb0] sm:$0xff] }
 0x13d   :  { %v968_v45 = vpop.f32.mrf.mxu0  ;;  %v1369_v46 = vpop.f32.mrf.mxu1 }
 0x13e   :  { %v2518_v44 = vadd.f32 %v2169_v42, %v210_v39  ;;  %1817 = vmatmul.f32.gmra.mxu2 %v459_v41  ;;  %v1370_v49 = vadd.f32 %v1369_v46, %v968_v45  ;;  %2218 = vmatmul.f32.gmra.mxu3 %v460_v43  ;;  %v479_v42 = vld [vmem:[#allocation3 + $0x4f0] sm:$0xff] }
 0x140   :  { %2647 = vst.msk [vmem:[#allocation2 + $0x88] sm:$0xff] %vm64_vm0, %v2518_v44  ;;  %1015 = vmatmul.f32.gmra.mxu0 %v457_v47  ;;  %1416 = vmatmul.f32.gmra.mxu1 %v458_v48  ;;  %v480_v44 = vld [vmem:[#allocation3 + $0x4f8] sm:$0xff]  ;;  %v477_v48 = vld [vmem:[#allocation3 + $0x4e0] sm:$0xff] }
 0x141   :  { %v1770_v50 = vpop.f32.mrf.mxu2  ;;  %v2171_v54 = vpop.f32.mrf.mxu3 }
 0x142   :  { %v1771_v51 = vadd.f32 %v1770_v50, %v1370_v49  ;;  %v478_v49 = vld [vmem:[#allocation3 + $0x4e8] sm:$0xff] }
 0x144   :  { %v2172_v56 = vadd.f32 %v2171_v54, %v1771_v51  ;;  %v216_v54 = vld [vmem:[#allocation2 + $0xb8] sm:$0xff] }
 0x145   :  { %v971_v59 = vpop.f32.mrf.mxu0  ;;  %v1372_v60 = vpop.f32.mrf.mxu1 }
 0x146   :  { %v2519_v58 = vadd.f32 %v2172_v56, %v211_v53  ;;  %1820 = vmatmul.f32.gmra.mxu2 %v463_v55  ;;  %v1373_v63 = vadd.f32 %v1372_v60, %v971_v59  ;;  %2221 = vmatmul.f32.gmra.mxu3 %v464_v57  ;;  %v483_v56 = vld [vmem:[#allocation3 + $0x510] sm:$0xff] }
 0x148   :  { %2648 = vst.msk [vmem:[#allocation2 + $0x90] sm:$0xff] %vm64_vm0, %v2519_v58  ;;  %1018 = vmatmul.f32.gmra.mxu0 %v461_v61  ;;  %1419 = vmatmul.f32.gmra.mxu1 %v462_v62  ;;  %v484_v58 = vld [vmem:[#allocation3 + $0x518] sm:$0xff]  ;;  %v481_v62 = vld [vmem:[#allocation3 + $0x500] sm:$0xff] }
 0x149   :  { %v1773_v0 = vpop.f32.mrf.mxu2  ;;  %v2174_v3 = vpop.f32.mrf.mxu3 }
 0x14a   :  { %v1774_v1 = vadd.f32 %v1773_v0, %v1373_v63  ;;  %v482_v63 = vld [vmem:[#allocation3 + $0x508] sm:$0xff] }
 0x14c   :  { %v2175_v5 = vadd.f32 %v2174_v3, %v1774_v1  ;;  %v217_v3 = vld [vmem:[#allocation2 + $0xc0] sm:$0xff] }
 0x14d   :  { %v974_v8 = vpop.f32.mrf.mxu0  ;;  %v1375_v9 = vpop.f32.mrf.mxu1 }
 0x14e   :  { %v2520_v7 = vadd.f32 %v2175_v5, %v212_v2  ;;  %1823 = vmatmul.f32.gmra.mxu2 %v467_v4  ;;  %v1376_v12 = vadd.f32 %v1375_v9, %v974_v8  ;;  %2224 = vmatmul.f32.gmra.mxu3 %v468_v6  ;;  %v487_v5 = vld [vmem:[#allocation3 + $0x530] sm:$0xff] }
 0x150   :  { %2649 = vst.msk [vmem:[#allocation2 + $0x98] sm:$0xff] %vm64_vm0, %v2520_v7  ;;  %1021 = vmatmul.f32.gmra.mxu0 %v465_v10  ;;  %1422 = vmatmul.f32.gmra.mxu1 %v466_v11  ;;  %v488_v7 = vld [vmem:[#allocation3 + $0x538] sm:$0xff]  ;;  %v485_v11 = vld [vmem:[#allocation3 + $0x520] sm:$0xff] }
 0x151   :  { %v1776_v13 = vpop.f32.mrf.mxu2  ;;  %v2177_v16 = vpop.f32.mrf.mxu3 }
 0x152   :  { %v1777_v14 = vadd.f32 %v1776_v13, %v1376_v12  ;;  %v486_v12 = vld [vmem:[#allocation3 + $0x528] sm:$0xff] }
 0x154   :  { %v2178_v18 = vadd.f32 %v2177_v16, %v1777_v14  ;;  %v218_v16 = vld [vmem:[#allocation2 + $0xc8] sm:$0xff] }
 0x155   :  { %v977_v21 = vpop.f32.mrf.mxu0  ;;  %v1378_v22 = vpop.f32.mrf.mxu1 }
 0x156   :  { %v2521_v20 = vadd.f32 %v2178_v18, %v213_v15  ;;  %1826 = vmatmul.f32.gmra.mxu2 %v471_v17  ;;  %v1379_v52 = vadd.f32 %v1378_v22, %v977_v21  ;;  %2227 = vmatmul.f32.gmra.mxu3 %v472_v19  ;;  %v491_v18 = vld [vmem:[#allocation3 + $0x550] sm:$0xff] }
 0x158   :  { %2650 = vst.msk [vmem:[#allocation2 + $0xa0] sm:$0xff] %vm64_vm0, %v2521_v20  ;;  %1024 = vmatmul.f32.gmra.mxu0 %v469_v23  ;;  %1425 = vmatmul.f32.gmra.mxu1 %v470_v24  ;;  %v492_v20 = vld [vmem:[#allocation3 + $0x558] sm:$0xff]  ;;  %v489_v24 = vld [vmem:[#allocation3 + $0x540] sm:$0xff] }
 0x159   :  { %v1779_v25 = vpop.f32.mrf.mxu2  ;;  %v2180_v28 = vpop.f32.mrf.mxu3 }
 0x15a   :  { %v1780_v26 = vadd.f32 %v1779_v25, %v1379_v52  ;;  %v490_v52 = vld [vmem:[#allocation3 + $0x548] sm:$0xff] }
 0x15c   :  { %v2181_v30 = vadd.f32 %v2180_v28, %v1780_v26  ;;  %v219_v28 = vld [vmem:[#allocation2 + $0xd0] sm:$0xff] }
 0x15d   :  { %v980_v33 = vpop.f32.mrf.mxu0  ;;  %v1381_v34 = vpop.f32.mrf.mxu1 }
 0x15e   :  { %v2522_v32 = vadd.f32 %v2181_v30, %v214_v27  ;;  %1829 = vmatmul.f32.gmra.mxu2 %v475_v29  ;;  %v1382_v37 = vadd.f32 %v1381_v34, %v980_v33  ;;  %2230 = vmatmul.f32.gmra.mxu3 %v476_v31  ;;  %v495_v30 = vld [vmem:[#allocation3 + $0x570] sm:$0xff] }
 0x160   :  { %2651 = vst.msk [vmem:[#allocation2 + $0xa8] sm:$0xff] %vm64_vm0, %v2522_v32  ;;  %1027 = vmatmul.f32.gmra.mxu0 %v473_v35  ;;  %1428 = vmatmul.f32.gmra.mxu1 %v474_v36  ;;  %v496_v32 = vld [vmem:[#allocation3 + $0x578] sm:$0xff]  ;;  %v493_v36 = vld [vmem:[#allocation3 + $0x560] sm:$0xff] }
 0x161   :  { %v1782_v38 = vpop.f32.mrf.mxu2  ;;  %v2183_v41 = vpop.f32.mrf.mxu3 }
 0x162   :  { %v1783_v39 = vadd.f32 %v1782_v38, %v1382_v37  ;;  %v494_v37 = vld [vmem:[#allocation3 + $0x568] sm:$0xff] }
 0x164   :  { %v2184_v43 = vadd.f32 %v2183_v41, %v1783_v39  ;;  %v220_v41 = vld [vmem:[#allocation2 + $0xd8] sm:$0xff] }
 0x165   :  { %v983_v46 = vpop.f32.mrf.mxu0  ;;  %v1384_v47 = vpop.f32.mrf.mxu1 }
 0x166   :  { %v2523_v45 = vadd.f32 %v2184_v43, %v215_v40  ;;  %1832 = vmatmul.f32.gmra.mxu2 %v479_v42  ;;  %v1385_v50 = vadd.f32 %v1384_v47, %v983_v46  ;;  %2233 = vmatmul.f32.gmra.mxu3 %v480_v44  ;;  %v499_v43 = vld [vmem:[#allocation3 + $0x590] sm:$0xff] }
 0x168   :  { %2652 = vst.msk [vmem:[#allocation2 + $0xb0] sm:$0xff] %vm64_vm0, %v2523_v45  ;;  %1030 = vmatmul.f32.gmra.mxu0 %v477_v48  ;;  %1431 = vmatmul.f32.gmra.mxu1 %v478_v49  ;;  %v500_v45 = vld [vmem:[#allocation3 + $0x598] sm:$0xff]  ;;  %v497_v49 = vld [vmem:[#allocation3 + $0x580] sm:$0xff] }
 0x169   :  { %v1785_v51 = vpop.f32.mrf.mxu2  ;;  %v2186_v55 = vpop.f32.mrf.mxu3 }
 0x16a   :  { %v1786_v53 = vadd.f32 %v1785_v51, %v1385_v50  ;;  %v498_v50 = vld [vmem:[#allocation3 + $0x588] sm:$0xff] }
 0x16c   :  { %v2187_v57 = vadd.f32 %v2186_v55, %v1786_v53  ;;  %v221_v55 = vld [vmem:[#allocation2 + $0xe0] sm:$0xff] }
 0x16d   :  { %v986_v60 = vpop.f32.mrf.mxu0  ;;  %v1387_v61 = vpop.f32.mrf.mxu1 }
 0x16e   :  { %v2524_v59 = vadd.f32 %v2187_v57, %v216_v54  ;;  %1835 = vmatmul.f32.gmra.mxu2 %v483_v56  ;;  %v1388_v0 = vadd.f32 %v1387_v61, %v986_v60  ;;  %2236 = vmatmul.f32.gmra.mxu3 %v484_v58  ;;  %v503_v57 = vld [vmem:[#allocation3 + $0x5b0] sm:$0xff] }
 0x170   :  { %2653 = vst.msk [vmem:[#allocation2 + $0xb8] sm:$0xff] %vm64_vm0, %v2524_v59  ;;  %1033 = vmatmul.f32.gmra.mxu0 %v481_v62  ;;  %1434 = vmatmul.f32.gmra.mxu1 %v482_v63  ;;  %v504_v59 = vld [vmem:[#allocation3 + $0x5b8] sm:$0xff]  ;;  %v501_v63 = vld [vmem:[#allocation3 + $0x5a0] sm:$0xff] }
 0x171   :  { %v1788_v1 = vpop.f32.mrf.mxu2  ;;  %v2189_v4 = vpop.f32.mrf.mxu3 }
 0x172   :  { %v1789_v2 = vadd.f32 %v1788_v1, %v1388_v0  ;;  %v502_v0 = vld [vmem:[#allocation3 + $0x5a8] sm:$0xff] }
 0x174   :  { %v2190_v6 = vadd.f32 %v2189_v4, %v1789_v2  ;;  %v222_v4 = vld [vmem:[#allocation2 + $0xe8] sm:$0xff] }
 0x175   :  { %v989_v9 = vpop.f32.mrf.mxu0  ;;  %v1390_v10 = vpop.f32.mrf.mxu1 }
 0x176   :  { %v2525_v8 = vadd.f32 %v2190_v6, %v217_v3  ;;  %1838 = vmatmul.f32.gmra.mxu2 %v487_v5  ;;  %v1391_v13 = vadd.f32 %v1390_v10, %v989_v9  ;;  %2239 = vmatmul.f32.gmra.mxu3 %v488_v7  ;;  %v507_v6 = vld [vmem:[#allocation3 + $0x5d0] sm:$0xff] }
 0x178   :  { %2654 = vst.msk [vmem:[#allocation2 + $0xc0] sm:$0xff] %vm64_vm0, %v2525_v8  ;;  %1036 = vmatmul.f32.gmra.mxu0 %v485_v11  ;;  %1437 = vmatmul.f32.gmra.mxu1 %v486_v12  ;;  %v508_v8 = vld [vmem:[#allocation3 + $0x5d8] sm:$0xff]  ;;  %v505_v12 = vld [vmem:[#allocation3 + $0x5c0] sm:$0xff] }
 0x179   :  { %v1791_v14 = vpop.f32.mrf.mxu2  ;;  %v2192_v17 = vpop.f32.mrf.mxu3 }
 0x17a   :  { %v1792_v15 = vadd.f32 %v1791_v14, %v1391_v13  ;;  %v506_v13 = vld [vmem:[#allocation3 + $0x5c8] sm:$0xff] }
 0x17c   :  { %v2193_v19 = vadd.f32 %v2192_v17, %v1792_v15  ;;  %v223_v17 = vld [vmem:[#allocation2 + $0xf0] sm:$0xff] }
 0x17d   :  { %v992_v22 = vpop.f32.mrf.mxu0  ;;  %v1393_v23 = vpop.f32.mrf.mxu1 }
 0x17e   :  { %v2526_v21 = vadd.f32 %v2193_v19, %v218_v16  ;;  %1841 = vmatmul.f32.gmra.mxu2 %v491_v18  ;;  %v1394_v25 = vadd.f32 %v1393_v23, %v992_v22  ;;  %2242 = vmatmul.f32.gmra.mxu3 %v492_v20  ;;  %v511_v19 = vld [vmem:[#allocation3 + $0x5f0] sm:$0xff] }
 0x180   :  { %2655 = vst.msk [vmem:[#allocation2 + $0xc8] sm:$0xff] %vm64_vm0, %v2526_v21  ;;  %1039 = vmatmul.f32.gmra.mxu0 %v489_v24  ;;  %1440 = vmatmul.f32.gmra.mxu1 %v490_v52  ;;  %v512_v21 = vld [vmem:[#allocation3 + $0x5f8] sm:$0xff]  ;;  %v509_v52 = vld [vmem:[#allocation3 + $0x5e0] sm:$0xff] }
 0x181   :  { %v1794_v26 = vpop.f32.mrf.mxu2  ;;  %v2195_v29 = vpop.f32.mrf.mxu3 }
 0x182   :  { %v1795_v27 = vadd.f32 %v1794_v26, %v1394_v25  ;;  %v510_v25 = vld [vmem:[#allocation3 + $0x5e8] sm:$0xff] }
 0x184   :  { %v2196_v31 = vadd.f32 %v2195_v29, %v1795_v27  ;;  %v224_v29 = vld [vmem:[#allocation2 + $0xf8] sm:$0xff] }
 0x185   :  { %v995_v34 = vpop.f32.mrf.mxu0  ;;  %v1396_v35 = vpop.f32.mrf.mxu1 }
 0x186   :  { %v2527_v33 = vadd.f32 %v2196_v31, %v219_v28  ;;  %1844 = vmatmul.f32.gmra.mxu2 %v495_v30  ;;  %v1397_v38 = vadd.f32 %v1396_v35, %v995_v34  ;;  %2245 = vmatmul.f32.gmra.mxu3 %v496_v32  ;;  %v515_v31 = vld [vmem:[#allocation3 + $0x610] sm:$0xff] }
 0x188   :  { %2656 = vst.msk [vmem:[#allocation2 + $0xd0] sm:$0xff] %vm64_vm0, %v2527_v33  ;;  %1042 = vmatmul.f32.gmra.mxu0 %v493_v36  ;;  %1443 = vmatmul.f32.gmra.mxu1 %v494_v37  ;;  %v516_v33 = vld [vmem:[#allocation3 + $0x618] sm:$0xff]  ;;  %v513_v37 = vld [vmem:[#allocation3 + $0x600] sm:$0xff] }
 0x189   :  { %v1797_v39 = vpop.f32.mrf.mxu2  ;;  %v2198_v42 = vpop.f32.mrf.mxu3 }
 0x18a   :  { %v1798_v40 = vadd.f32 %v1797_v39, %v1397_v38  ;;  %v514_v38 = vld [vmem:[#allocation3 + $0x608] sm:$0xff] }
 0x18c   :  { %v2199_v44 = vadd.f32 %v2198_v42, %v1798_v40  ;;  %v225_v42 = vld [vmem:[#allocation2 + $0x100] sm:$0xff] }
 0x18d   :  { %v998_v47 = vpop.f32.mrf.mxu0  ;;  %v1399_v48 = vpop.f32.mrf.mxu1 }
 0x18e   :  { %v2528_v46 = vadd.f32 %v2199_v44, %v220_v41  ;;  %1847 = vmatmul.f32.gmra.mxu2 %v499_v43  ;;  %v1400_v51 = vadd.f32 %v1399_v48, %v998_v47  ;;  %2248 = vmatmul.f32.gmra.mxu3 %v500_v45  ;;  %v519_v44 = vld [vmem:[#allocation3 + $0x630] sm:$0xff] }
 0x190   :  { %2657 = vst.msk [vmem:[#allocation2 + $0xd8] sm:$0xff] %vm64_vm0, %v2528_v46  ;;  %1045 = vmatmul.f32.gmra.mxu0 %v497_v49  ;;  %1446 = vmatmul.f32.gmra.mxu1 %v498_v50  ;;  %v520_v46 = vld [vmem:[#allocation3 + $0x638] sm:$0xff]  ;;  %v517_v50 = vld [vmem:[#allocation3 + $0x620] sm:$0xff] }
 0x191   :  { %v1800_v53 = vpop.f32.mrf.mxu2  ;;  %v2201_v56 = vpop.f32.mrf.mxu3 }
 0x192   :  { %v1801_v54 = vadd.f32 %v1800_v53, %v1400_v51  ;;  %v518_v51 = vld [vmem:[#allocation3 + $0x628] sm:$0xff] }
 0x194   :  { %v2202_v58 = vadd.f32 %v2201_v56, %v1801_v54  ;;  %v226_v56 = vld [vmem:[#allocation2 + $0x108] sm:$0xff] }
 0x195   :  { %v1001_v61 = vpop.f32.mrf.mxu0  ;;  %v1402_v62 = vpop.f32.mrf.mxu1 }
 0x196   :  { %v2529_v60 = vadd.f32 %v2202_v58, %v221_v55  ;;  %1850 = vmatmul.f32.gmra.mxu2 %v503_v57  ;;  %v1403_v1 = vadd.f32 %v1402_v62, %v1001_v61  ;;  %2251 = vmatmul.f32.gmra.mxu3 %v504_v59  ;;  %v523_v58 = vld [vmem:[#allocation3 + $0x650] sm:$0xff] }
 0x198   :  { %2658 = vst.msk [vmem:[#allocation2 + $0xe0] sm:$0xff] %vm64_vm0, %v2529_v60  ;;  %1048 = vmatmul.f32.gmra.mxu0 %v501_v63  ;;  %1449 = vmatmul.f32.gmra.mxu1 %v502_v0  ;;  %v524_v60 = vld [vmem:[#allocation3 + $0x658] sm:$0xff]  ;;  %v521_v0 = vld [vmem:[#allocation3 + $0x640] sm:$0xff] }
 0x199   :  { %v1803_v2 = vpop.f32.mrf.mxu2  ;;  %v2204_v5 = vpop.f32.mrf.mxu3 }
 0x19a   :  { %v1804_v3 = vadd.f32 %v1803_v2, %v1403_v1  ;;  %v522_v1 = vld [vmem:[#allocation3 + $0x648] sm:$0xff] }
 0x19c   :  { %v2205_v7 = vadd.f32 %v2204_v5, %v1804_v3  ;;  %v227_v5 = vld [vmem:[#allocation2 + $0x110] sm:$0xff] }
 0x19d   :  { %v1004_v10 = vpop.f32.mrf.mxu0  ;;  %v1405_v11 = vpop.f32.mrf.mxu1 }
 0x19e   :  { %v2530_v9 = vadd.f32 %v2205_v7, %v222_v4  ;;  %1853 = vmatmul.f32.gmra.mxu2 %v507_v6  ;;  %v1406_v14 = vadd.f32 %v1405_v11, %v1004_v10  ;;  %2254 = vmatmul.f32.gmra.mxu3 %v508_v8  ;;  %v527_v7 = vld [vmem:[#allocation3 + $0x670] sm:$0xff] }
 0x1a0   :  { %2659 = vst.msk [vmem:[#allocation2 + $0xe8] sm:$0xff] %vm64_vm0, %v2530_v9  ;;  %1051 = vmatmul.f32.gmra.mxu0 %v505_v12  ;;  %1452 = vmatmul.f32.gmra.mxu1 %v506_v13  ;;  %v528_v9 = vld [vmem:[#allocation3 + $0x678] sm:$0xff]  ;;  %v525_v13 = vld [vmem:[#allocation3 + $0x660] sm:$0xff] }
 0x1a1   :  { %v1806_v15 = vpop.f32.mrf.mxu2  ;;  %v2207_v18 = vpop.f32.mrf.mxu3 }
 0x1a2   :  { %v1807_v16 = vadd.f32 %v1806_v15, %v1406_v14  ;;  %v526_v14 = vld [vmem:[#allocation3 + $0x668] sm:$0xff] }
 0x1a4   :  { %v2208_v20 = vadd.f32 %v2207_v18, %v1807_v16  ;;  %v228_v18 = vld [vmem:[#allocation2 + $0x118] sm:$0xff] }
 0x1a5   :  { %v1007_v23 = vpop.f32.mrf.mxu0  ;;  %v1408_v24 = vpop.f32.mrf.mxu1 }
 0x1a6   :  { %v2531_v22 = vadd.f32 %v2208_v20, %v223_v17  ;;  %1856 = vmatmul.f32.gmra.mxu2 %v511_v19  ;;  %v1409_v26 = vadd.f32 %v1408_v24, %v1007_v23  ;;  %2257 = vmatmul.f32.gmra.mxu3 %v512_v21  ;;  %v531_v20 = vld [vmem:[#allocation3 + $0x690] sm:$0xff] }
 0x1a8   :  { %2660 = vst.msk [vmem:[#allocation2 + $0xf0] sm:$0xff] %vm64_vm0, %v2531_v22  ;;  %1054 = vmatmul.f32.gmra.mxu0 %v509_v52  ;;  %1455 = vmatmul.f32.gmra.mxu1 %v510_v25  ;;  %v532_v22 = vld [vmem:[#allocation3 + $0x698] sm:$0xff]  ;;  %v529_v25 = vld [vmem:[#allocation3 + $0x680] sm:$0xff] }
 0x1a9   :  { %v1809_v27 = vpop.f32.mrf.mxu2  ;;  %v2210_v30 = vpop.f32.mrf.mxu3 }
 0x1aa   :  { %v1810_v28 = vadd.f32 %v1809_v27, %v1409_v26  ;;  %v530_v26 = vld [vmem:[#allocation3 + $0x688] sm:$0xff] }
 0x1ac   :  { %v2211_v32 = vadd.f32 %v2210_v30, %v1810_v28  ;;  %v229_v30 = vld [vmem:[#allocation2 + $0x120] sm:$0xff] }
 0x1ad   :  { %v1010_v35 = vpop.f32.mrf.mxu0  ;;  %v1411_v36 = vpop.f32.mrf.mxu1 }
 0x1ae   :  { %v2532_v34 = vadd.f32 %v2211_v32, %v224_v29  ;;  %1859 = vmatmul.f32.gmra.mxu2 %v515_v31  ;;  %v1412_v39 = vadd.f32 %v1411_v36, %v1010_v35  ;;  %2260 = vmatmul.f32.gmra.mxu3 %v516_v33  ;;  %v535_v32 = vld [vmem:[#allocation3 + $0x6b0] sm:$0xff] }
 0x1b0   :  { %2661 = vst.msk [vmem:[#allocation2 + $0xf8] sm:$0xff] %vm64_vm0, %v2532_v34  ;;  %1057 = vmatmul.f32.gmra.mxu0 %v513_v37  ;;  %1458 = vmatmul.f32.gmra.mxu1 %v514_v38  ;;  %v536_v34 = vld [vmem:[#allocation3 + $0x6b8] sm:$0xff]  ;;  %v533_v38 = vld [vmem:[#allocation3 + $0x6a0] sm:$0xff] }
 0x1b1   :  { %v1812_v40 = vpop.f32.mrf.mxu2  ;;  %v2213_v43 = vpop.f32.mrf.mxu3 }
 0x1b2   :  { %v1813_v41 = vadd.f32 %v1812_v40, %v1412_v39  ;;  %v534_v39 = vld [vmem:[#allocation3 + $0x6a8] sm:$0xff] }
 0x1b4   :  { %v2214_v45 = vadd.f32 %v2213_v43, %v1813_v41  ;;  %v230_v43 = vld [vmem:[#allocation2 + $0x128] sm:$0xff] }
 0x1b5   :  { %v1013_v48 = vpop.f32.mrf.mxu0  ;;  %v1414_v49 = vpop.f32.mrf.mxu1 }
 0x1b6   :  { %v2533_v47 = vadd.f32 %v2214_v45, %v225_v42  ;;  %1862 = vmatmul.f32.gmra.mxu2 %v519_v44  ;;  %v1415_v53 = vadd.f32 %v1414_v49, %v1013_v48  ;;  %2263 = vmatmul.f32.gmra.mxu3 %v520_v46  ;;  %v539_v45 = vld [vmem:[#allocation3 + $0x6d0] sm:$0xff] }
 0x1b8   :  { %2662 = vst.msk [vmem:[#allocation2 + $0x100] sm:$0xff] %vm64_vm0, %v2533_v47  ;;  %1060 = vmatmul.f32.gmra.mxu0 %v517_v50  ;;  %1461 = vmatmul.f32.gmra.mxu1 %v518_v51  ;;  %v540_v47 = vld [vmem:[#allocation3 + $0x6d8] sm:$0xff]  ;;  %v537_v51 = vld [vmem:[#allocation3 + $0x6c0] sm:$0xff] }
 0x1b9   :  { %v1815_v54 = vpop.f32.mrf.mxu2  ;;  %v2216_v57 = vpop.f32.mrf.mxu3 }
 0x1ba   :  { %v1816_v55 = vadd.f32 %v1815_v54, %v1415_v53  ;;  %v538_v53 = vld [vmem:[#allocation3 + $0x6c8] sm:$0xff] }
 0x1bc   :  { %v2217_v59 = vadd.f32 %v2216_v57, %v1816_v55  ;;  %v231_v57 = vld [vmem:[#allocation2 + $0x130] sm:$0xff] }
 0x1bd   :  { %v1016_v62 = vpop.f32.mrf.mxu0  ;;  %v1417_v63 = vpop.f32.mrf.mxu1 }
 0x1be   :  { %v2534_v61 = vadd.f32 %v2217_v59, %v226_v56  ;;  %1865 = vmatmul.f32.gmra.mxu2 %v523_v58  ;;  %v1418_v2 = vadd.f32 %v1417_v63, %v1016_v62  ;;  %2266 = vmatmul.f32.gmra.mxu3 %v524_v60  ;;  %v543_v59 = vld [vmem:[#allocation3 + $0x6f0] sm:$0xff] }
 0x1c0   :  { %2663 = vst.msk [vmem:[#allocation2 + $0x108] sm:$0xff] %vm64_vm0, %v2534_v61  ;;  %1063 = vmatmul.f32.gmra.mxu0 %v521_v0  ;;  %1464 = vmatmul.f32.gmra.mxu1 %v522_v1  ;;  %v544_v61 = vld [vmem:[#allocation3 + $0x6f8] sm:$0xff]  ;;  %v541_v1 = vld [vmem:[#allocation3 + $0x6e0] sm:$0xff] }
 0x1c1   :  { %v1818_v3 = vpop.f32.mrf.mxu2  ;;  %v2219_v6 = vpop.f32.mrf.mxu3 }
 0x1c2   :  { %v1819_v4 = vadd.f32 %v1818_v3, %v1418_v2  ;;  %v542_v2 = vld [vmem:[#allocation3 + $0x6e8] sm:$0xff] }
 0x1c4   :  { %v2220_v8 = vadd.f32 %v2219_v6, %v1819_v4  ;;  %v232_v6 = vld [vmem:[#allocation2 + $0x138] sm:$0xff] }
 0x1c5   :  { %v1019_v11 = vpop.f32.mrf.mxu0  ;;  %v1420_v12 = vpop.f32.mrf.mxu1 }
 0x1c6   :  { %v2535_v10 = vadd.f32 %v2220_v8, %v227_v5  ;;  %1868 = vmatmul.f32.gmra.mxu2 %v527_v7  ;;  %v1421_v15 = vadd.f32 %v1420_v12, %v1019_v11  ;;  %2269 = vmatmul.f32.gmra.mxu3 %v528_v9  ;;  %v547_v8 = vld [vmem:[#allocation3 + $0x710] sm:$0xff] }
 0x1c8   :  { %2664 = vst.msk [vmem:[#allocation2 + $0x110] sm:$0xff] %vm64_vm0, %v2535_v10  ;;  %1066 = vmatmul.f32.gmra.mxu0 %v525_v13  ;;  %1467 = vmatmul.f32.gmra.mxu1 %v526_v14  ;;  %v548_v10 = vld [vmem:[#allocation3 + $0x718] sm:$0xff]  ;;  %v545_v14 = vld [vmem:[#allocation3 + $0x700] sm:$0xff] }
 0x1c9   :  { %v1821_v16 = vpop.f32.mrf.mxu2  ;;  %v2222_v19 = vpop.f32.mrf.mxu3 }
 0x1ca   :  { %v1822_v17 = vadd.f32 %v1821_v16, %v1421_v15  ;;  %v546_v15 = vld [vmem:[#allocation3 + $0x708] sm:$0xff] }
 0x1cc   :  { %v2223_v21 = vadd.f32 %v2222_v19, %v1822_v17  ;;  %v233_v19 = vld [vmem:[#allocation2 + $0x140] sm:$0xff] }
 0x1cd   :  { %v1022_v24 = vpop.f32.mrf.mxu0  ;;  %v1423_v52 = vpop.f32.mrf.mxu1 }
 0x1ce   :  { %v2536_v23 = vadd.f32 %v2223_v21, %v228_v18  ;;  %1871 = vmatmul.f32.gmra.mxu2 %v531_v20  ;;  %v1424_v27 = vadd.f32 %v1423_v52, %v1022_v24  ;;  %2272 = vmatmul.f32.gmra.mxu3 %v532_v22  ;;  %v551_v21 = vld [vmem:[#allocation3 + $0x730] sm:$0xff] }
 0x1d0   :  { %2665 = vst.msk [vmem:[#allocation2 + $0x118] sm:$0xff] %vm64_vm0, %v2536_v23  ;;  %1069 = vmatmul.f32.gmra.mxu0 %v529_v25  ;;  %1470 = vmatmul.f32.gmra.mxu1 %v530_v26  ;;  %v552_v23 = vld [vmem:[#allocation3 + $0x738] sm:$0xff]  ;;  %v549_v26 = vld [vmem:[#allocation3 + $0x720] sm:$0xff] }
 0x1d1   :  { %v1824_v28 = vpop.f32.mrf.mxu2  ;;  %v2225_v31 = vpop.f32.mrf.mxu3 }
 0x1d2   :  { %v1825_v29 = vadd.f32 %v1824_v28, %v1424_v27  ;;  %v550_v27 = vld [vmem:[#allocation3 + $0x728] sm:$0xff] }
 0x1d4   :  { %v2226_v33 = vadd.f32 %v2225_v31, %v1825_v29  ;;  %v234_v31 = vld [vmem:[#allocation2 + $0x148] sm:$0xff] }
 0x1d5   :  { %v1025_v36 = vpop.f32.mrf.mxu0  ;;  %v1426_v37 = vpop.f32.mrf.mxu1 }
 0x1d6   :  { %v2537_v35 = vadd.f32 %v2226_v33, %v229_v30  ;;  %1874 = vmatmul.f32.gmra.mxu2 %v535_v32  ;;  %v1427_v40 = vadd.f32 %v1426_v37, %v1025_v36  ;;  %2275 = vmatmul.f32.gmra.mxu3 %v536_v34  ;;  %v555_v33 = vld [vmem:[#allocation3 + $0x750] sm:$0xff] }
 0x1d8   :  { %2666 = vst.msk [vmem:[#allocation2 + $0x120] sm:$0xff] %vm64_vm0, %v2537_v35  ;;  %1072 = vmatmul.f32.gmra.mxu0 %v533_v38  ;;  %1473 = vmatmul.f32.gmra.mxu1 %v534_v39  ;;  %v556_v35 = vld [vmem:[#allocation3 + $0x758] sm:$0xff]  ;;  %v553_v39 = vld [vmem:[#allocation3 + $0x740] sm:$0xff] }
 0x1d9   :  { %v1827_v41 = vpop.f32.mrf.mxu2  ;;  %v2228_v44 = vpop.f32.mrf.mxu3 }
 0x1da   :  { %v1828_v42 = vadd.f32 %v1827_v41, %v1427_v40  ;;  %v554_v40 = vld [vmem:[#allocation3 + $0x748] sm:$0xff] }
 0x1dc   :  { %v2229_v46 = vadd.f32 %v2228_v44, %v1828_v42  ;;  %v235_v44 = vld [vmem:[#allocation2 + $0x150] sm:$0xff] }
 0x1dd   :  { %v1028_v49 = vpop.f32.mrf.mxu0  ;;  %v1429_v50 = vpop.f32.mrf.mxu1 }
 0x1de   :  { %v2538_v48 = vadd.f32 %v2229_v46, %v230_v43  ;;  %1877 = vmatmul.f32.gmra.mxu2 %v539_v45  ;;  %v1430_v54 = vadd.f32 %v1429_v50, %v1028_v49  ;;  %2278 = vmatmul.f32.gmra.mxu3 %v540_v47  ;;  %v559_v46 = vld [vmem:[#allocation3 + $0x770] sm:$0xff] }
 0x1e0   :  { %2667 = vst.msk [vmem:[#allocation2 + $0x128] sm:$0xff] %vm64_vm0, %v2538_v48  ;;  %1075 = vmatmul.f32.gmra.mxu0 %v537_v51  ;;  %1476 = vmatmul.f32.gmra.mxu1 %v538_v53  ;;  %v560_v48 = vld [vmem:[#allocation3 + $0x778] sm:$0xff]  ;;  %v557_v53 = vld [vmem:[#allocation3 + $0x760] sm:$0xff] }
 0x1e1   :  { %v1830_v55 = vpop.f32.mrf.mxu2  ;;  %v2231_v58 = vpop.f32.mrf.mxu3 }
 0x1e2   :  { %v1831_v56 = vadd.f32 %v1830_v55, %v1430_v54  ;;  %v558_v54 = vld [vmem:[#allocation3 + $0x768] sm:$0xff] }
 0x1e4   :  { %v2232_v60 = vadd.f32 %v2231_v58, %v1831_v56  ;;  %v236_v58 = vld [vmem:[#allocation2 + $0x158] sm:$0xff] }
 0x1e5   :  { %v1031_v63 = vpop.f32.mrf.mxu0  ;;  %v1432_v0 = vpop.f32.mrf.mxu1 }
 0x1e6   :  { %v2539_v62 = vadd.f32 %v2232_v60, %v231_v57  ;;  %1880 = vmatmul.f32.gmra.mxu2 %v543_v59  ;;  %v1433_v3 = vadd.f32 %v1432_v0, %v1031_v63  ;;  %2281 = vmatmul.f32.gmra.mxu3 %v544_v61  ;;  %v563_v60 = vld [vmem:[#allocation3 + $0x790] sm:$0xff] }
 0x1e8   :  { %2668 = vst.msk [vmem:[#allocation2 + $0x130] sm:$0xff] %vm64_vm0, %v2539_v62  ;;  %1078 = vmatmul.f32.gmra.mxu0 %v541_v1  ;;  %1479 = vmatmul.f32.gmra.mxu1 %v542_v2  ;;  %v564_v62 = vld [vmem:[#allocation3 + $0x798] sm:$0xff]  ;;  %v561_v2 = vld [vmem:[#allocation3 + $0x780] sm:$0xff] }
 0x1e9   :  { %v1833_v4 = vpop.f32.mrf.mxu2  ;;  %v2234_v7 = vpop.f32.mrf.mxu3 }
 0x1ea   :  { %v1834_v5 = vadd.f32 %v1833_v4, %v1433_v3  ;;  %v562_v3 = vld [vmem:[#allocation3 + $0x788] sm:$0xff] }
 0x1ec   :  { %v2235_v9 = vadd.f32 %v2234_v7, %v1834_v5  ;;  %v237_v7 = vld [vmem:[#allocation2 + $0x160] sm:$0xff] }
 0x1ed   :  { %v1034_v12 = vpop.f32.mrf.mxu0  ;;  %v1435_v13 = vpop.f32.mrf.mxu1 }
 0x1ee   :  { %v2540_v11 = vadd.f32 %v2235_v9, %v232_v6  ;;  %1883 = vmatmul.f32.gmra.mxu2 %v547_v8  ;;  %v1436_v16 = vadd.f32 %v1435_v13, %v1034_v12  ;;  %2284 = vmatmul.f32.gmra.mxu3 %v548_v10  ;;  %v567_v9 = vld [vmem:[#allocation3 + $0x7b0] sm:$0xff] }
 0x1f0   :  { %2669 = vst.msk [vmem:[#allocation2 + $0x138] sm:$0xff] %vm64_vm0, %v2540_v11  ;;  %1081 = vmatmul.f32.gmra.mxu0 %v545_v14  ;;  %1482 = vmatmul.f32.gmra.mxu1 %v546_v15  ;;  %v568_v11 = vld [vmem:[#allocation3 + $0x7b8] sm:$0xff]  ;;  %v565_v15 = vld [vmem:[#allocation3 + $0x7a0] sm:$0xff] }
 0x1f1   :  { %v1836_v17 = vpop.f32.mrf.mxu2  ;;  %v2237_v20 = vpop.f32.mrf.mxu3 }
 0x1f2   :  { %v1837_v18 = vadd.f32 %v1836_v17, %v1436_v16  ;;  %v566_v16 = vld [vmem:[#allocation3 + $0x7a8] sm:$0xff] }
 0x1f4   :  { %v2238_v22 = vadd.f32 %v2237_v20, %v1837_v18  ;;  %v238_v20 = vld [vmem:[#allocation2 + $0x168] sm:$0xff] }
 0x1f5   :  { %v1037_v52 = vpop.f32.mrf.mxu0  ;;  %v1438_v25 = vpop.f32.mrf.mxu1 }
 0x1f6   :  { %v2541_v24 = vadd.f32 %v2238_v22, %v233_v19  ;;  %1886 = vmatmul.f32.gmra.mxu2 %v551_v21  ;;  %v1439_v28 = vadd.f32 %v1438_v25, %v1037_v52  ;;  %2287 = vmatmul.f32.gmra.mxu3 %v552_v23  ;;  %v571_v22 = vld [vmem:[#allocation3 + $0x7d0] sm:$0xff] }
 0x1f8   :  { %2670 = vst.msk [vmem:[#allocation2 + $0x140] sm:$0xff] %vm64_vm0, %v2541_v24  ;;  %1084 = vmatmul.f32.gmra.mxu0 %v549_v26  ;;  %1485 = vmatmul.f32.gmra.mxu1 %v550_v27  ;;  %v572_v24 = vld [vmem:[#allocation3 + $0x7d8] sm:$0xff]  ;;  %v569_v27 = vld [vmem:[#allocation3 + $0x7c0] sm:$0xff] }
 0x1f9   :  { %v1839_v29 = vpop.f32.mrf.mxu2  ;;  %v2240_v32 = vpop.f32.mrf.mxu3 }
 0x1fa   :  { %v1840_v30 = vadd.f32 %v1839_v29, %v1439_v28  ;;  %v570_v28 = vld [vmem:[#allocation3 + $0x7c8] sm:$0xff] }
 0x1fc   :  { %v2241_v34 = vadd.f32 %v2240_v32, %v1840_v30  ;;  %v239_v32 = vld [vmem:[#allocation2 + $0x170] sm:$0xff] }
 0x1fd   :  { %v1040_v37 = vpop.f32.mrf.mxu0  ;;  %v1441_v38 = vpop.f32.mrf.mxu1 }
 0x1fe   :  { %v2542_v36 = vadd.f32 %v2241_v34, %v234_v31  ;;  %1889 = vmatmul.f32.gmra.mxu2 %v555_v33  ;;  %v1442_v41 = vadd.f32 %v1441_v38, %v1040_v37  ;;  %2290 = vmatmul.f32.gmra.mxu3 %v556_v35  ;;  %v575_v34 = vld [vmem:[#allocation3 + $0x7f0] sm:$0xff] }
 0x200   :  { %2671 = vst.msk [vmem:[#allocation2 + $0x148] sm:$0xff] %vm64_vm0, %v2542_v36  ;;  %1087 = vmatmul.f32.gmra.mxu0 %v553_v39  ;;  %1488 = vmatmul.f32.gmra.mxu1 %v554_v40  ;;  %v576_v36 = vld [vmem:[#allocation3 + $0x7f8] sm:$0xff]  ;;  %v573_v40 = vld [vmem:[#allocation3 + $0x7e0] sm:$0xff] }
 0x201   :  { %v1842_v42 = vpop.f32.mrf.mxu2  ;;  %v2243_v45 = vpop.f32.mrf.mxu3 }
 0x202   :  { %v1843_v43 = vadd.f32 %v1842_v42, %v1442_v41  ;;  %v574_v41 = vld [vmem:[#allocation3 + $0x7e8] sm:$0xff] }
 0x204   :  { %v2244_v47 = vadd.f32 %v2243_v45, %v1843_v43  ;;  %v240_v45 = vld [vmem:[#allocation2 + $0x178] sm:$0xff] }
 0x205   :  { %v1043_v50 = vpop.f32.mrf.mxu0  ;;  %v1444_v51 = vpop.f32.mrf.mxu1 }
 0x206   :  { %v2543_v49 = vadd.f32 %v2244_v47, %v235_v44  ;;  %1892 = vmatmul.f32.gmra.mxu2 %v559_v46  ;;  %v1445_v55 = vadd.f32 %v1444_v51, %v1043_v50  ;;  %2293 = vmatmul.f32.gmra.mxu3 %v560_v48  ;;  %v579_v47 = vld [vmem:[#allocation3 + $0x810] sm:$0xff] }
 0x208   :  { %2672 = vst.msk [vmem:[#allocation2 + $0x150] sm:$0xff] %vm64_vm0, %v2543_v49  ;;  %1090 = vmatmul.f32.gmra.mxu0 %v557_v53  ;;  %1491 = vmatmul.f32.gmra.mxu1 %v558_v54  ;;  %v580_v49 = vld [vmem:[#allocation3 + $0x818] sm:$0xff]  ;;  %v577_v54 = vld [vmem:[#allocation3 + $0x800] sm:$0xff] }
 0x209   :  { %v1845_v56 = vpop.f32.mrf.mxu2  ;;  %v2246_v59 = vpop.f32.mrf.mxu3 }
 0x20a   :  { %v1846_v57 = vadd.f32 %v1845_v56, %v1445_v55  ;;  %v578_v55 = vld [vmem:[#allocation3 + $0x808] sm:$0xff] }
 0x20c   :  { %v2247_v61 = vadd.f32 %v2246_v59, %v1846_v57  ;;  %v241_v59 = vld [vmem:[#allocation2 + $0x180] sm:$0xff] }
 0x20d   :  { %v1046_v0 = vpop.f32.mrf.mxu0  ;;  %v1447_v1 = vpop.f32.mrf.mxu1 }
 0x20e   :  { %v2544_v63 = vadd.f32 %v2247_v61, %v236_v58  ;;  %1895 = vmatmul.f32.gmra.mxu2 %v563_v60  ;;  %v1448_v4 = vadd.f32 %v1447_v1, %v1046_v0  ;;  %2296 = vmatmul.f32.gmra.mxu3 %v564_v62  ;;  %v583_v61 = vld [vmem:[#allocation3 + $0x830] sm:$0xff] }
 0x210   :  { %2673 = vst.msk [vmem:[#allocation2 + $0x158] sm:$0xff] %vm64_vm0, %v2544_v63  ;;  %1093 = vmatmul.f32.gmra.mxu0 %v561_v2  ;;  %1494 = vmatmul.f32.gmra.mxu1 %v562_v3  ;;  %v584_v63 = vld [vmem:[#allocation3 + $0x838] sm:$0xff]  ;;  %v581_v3 = vld [vmem:[#allocation3 + $0x820] sm:$0xff] }
 0x211   :  { %v1848_v5 = vpop.f32.mrf.mxu2  ;;  %v2249_v8 = vpop.f32.mrf.mxu3 }
 0x212   :  { %v1849_v6 = vadd.f32 %v1848_v5, %v1448_v4  ;;  %v582_v4 = vld [vmem:[#allocation3 + $0x828] sm:$0xff] }
 0x214   :  { %v2250_v10 = vadd.f32 %v2249_v8, %v1849_v6  ;;  %v242_v8 = vld [vmem:[#allocation2 + $0x188] sm:$0xff] }
 0x215   :  { %v1049_v13 = vpop.f32.mrf.mxu0  ;;  %v1450_v14 = vpop.f32.mrf.mxu1 }
 0x216   :  { %v2545_v12 = vadd.f32 %v2250_v10, %v237_v7  ;;  %1898 = vmatmul.f32.gmra.mxu2 %v567_v9  ;;  %v1451_v17 = vadd.f32 %v1450_v14, %v1049_v13  ;;  %2299 = vmatmul.f32.gmra.mxu3 %v568_v11  ;;  %v587_v10 = vld [vmem:[#allocation3 + $0x850] sm:$0xff] }
 0x218   :  { %2674 = vst.msk [vmem:[#allocation2 + $0x160] sm:$0xff] %vm64_vm0, %v2545_v12  ;;  %1096 = vmatmul.f32.gmra.mxu0 %v565_v15  ;;  %1497 = vmatmul.f32.gmra.mxu1 %v566_v16  ;;  %v588_v12 = vld [vmem:[#allocation3 + $0x858] sm:$0xff]  ;;  %v585_v16 = vld [vmem:[#allocation3 + $0x840] sm:$0xff] }
 0x219   :  { %v1851_v18 = vpop.f32.mrf.mxu2  ;;  %v2252_v21 = vpop.f32.mrf.mxu3 }
 0x21a   :  { %v1852_v19 = vadd.f32 %v1851_v18, %v1451_v17  ;;  %v586_v17 = vld [vmem:[#allocation3 + $0x848] sm:$0xff] }
 0x21c   :  { %v2253_v23 = vadd.f32 %v2252_v21, %v1852_v19  ;;  %v243_v21 = vld [vmem:[#allocation2 + $0x190] sm:$0xff] }
 0x21d   :  { %v1052_v25 = vpop.f32.mrf.mxu0  ;;  %v1453_v26 = vpop.f32.mrf.mxu1 }
 0x21e   :  { %v2546_v52 = vadd.f32 %v2253_v23, %v238_v20  ;;  %1901 = vmatmul.f32.gmra.mxu2 %v571_v22  ;;  %v1454_v29 = vadd.f32 %v1453_v26, %v1052_v25  ;;  %2302 = vmatmul.f32.gmra.mxu3 %v572_v24  ;;  %v591_v23 = vld [vmem:[#allocation3 + $0x870] sm:$0xff] }
 0x220   :  { %2675 = vst.msk [vmem:[#allocation2 + $0x168] sm:$0xff] %vm64_vm0, %v2546_v52  ;;  %1099 = vmatmul.f32.gmra.mxu0 %v569_v27  ;;  %1500 = vmatmul.f32.gmra.mxu1 %v570_v28  ;;  %v592_v52 = vld [vmem:[#allocation3 + $0x878] sm:$0xff]  ;;  %v589_v28 = vld [vmem:[#allocation3 + $0x860] sm:$0xff] }
 0x221   :  { %v1854_v30 = vpop.f32.mrf.mxu2  ;;  %v2255_v33 = vpop.f32.mrf.mxu3 }
 0x222   :  { %v1855_v31 = vadd.f32 %v1854_v30, %v1454_v29  ;;  %v590_v29 = vld [vmem:[#allocation3 + $0x868] sm:$0xff] }
 0x224   :  { %v2256_v35 = vadd.f32 %v2255_v33, %v1855_v31  ;;  %v244_v33 = vld [vmem:[#allocation2 + $0x198] sm:$0xff] }
 0x225   :  { %v1055_v38 = vpop.f32.mrf.mxu0  ;;  %v1456_v39 = vpop.f32.mrf.mxu1 }
 0x226   :  { %v2547_v37 = vadd.f32 %v2256_v35, %v239_v32  ;;  %1904 = vmatmul.f32.gmra.mxu2 %v575_v34  ;;  %v1457_v42 = vadd.f32 %v1456_v39, %v1055_v38  ;;  %2305 = vmatmul.f32.gmra.mxu3 %v576_v36  ;;  %v595_v35 = vld [vmem:[#allocation3 + $0x890] sm:$0xff] }
 0x228   :  { %2676 = vst.msk [vmem:[#allocation2 + $0x170] sm:$0xff] %vm64_vm0, %v2547_v37  ;;  %1102 = vmatmul.f32.gmra.mxu0 %v573_v40  ;;  %1503 = vmatmul.f32.gmra.mxu1 %v574_v41  ;;  %v596_v37 = vld [vmem:[#allocation3 + $0x898] sm:$0xff]  ;;  %v593_v41 = vld [vmem:[#allocation3 + $0x880] sm:$0xff] }
 0x229   :  { %v1857_v43 = vpop.f32.mrf.mxu2  ;;  %v2258_v46 = vpop.f32.mrf.mxu3 }
 0x22a   :  { %v1858_v44 = vadd.f32 %v1857_v43, %v1457_v42  ;;  %v594_v42 = vld [vmem:[#allocation3 + $0x888] sm:$0xff] }
 0x22c   :  { %v2259_v48 = vadd.f32 %v2258_v46, %v1858_v44  ;;  %v245_v46 = vld [vmem:[#allocation2 + $0x1a0] sm:$0xff] }
 0x22d   :  { %v1058_v51 = vpop.f32.mrf.mxu0  ;;  %v1459_v53 = vpop.f32.mrf.mxu1 }
 0x22e   :  { %v2548_v50 = vadd.f32 %v2259_v48, %v240_v45  ;;  %1907 = vmatmul.f32.gmra.mxu2 %v579_v47  ;;  %v1460_v56 = vadd.f32 %v1459_v53, %v1058_v51  ;;  %2308 = vmatmul.f32.gmra.mxu3 %v580_v49  ;;  %v599_v48 = vld [vmem:[#allocation3 + $0x8b0] sm:$0xff] }
 0x230   :  { %2677 = vst.msk [vmem:[#allocation2 + $0x178] sm:$0xff] %vm64_vm0, %v2548_v50  ;;  %1105 = vmatmul.f32.gmra.mxu0 %v577_v54  ;;  %1506 = vmatmul.f32.gmra.mxu1 %v578_v55  ;;  %v600_v50 = vld [vmem:[#allocation3 + $0x8b8] sm:$0xff]  ;;  %v597_v55 = vld [vmem:[#allocation3 + $0x8a0] sm:$0xff] }
 0x231   :  { %v1860_v57 = vpop.f32.mrf.mxu2  ;;  %v2261_v60 = vpop.f32.mrf.mxu3 }
 0x232   :  { %v1861_v58 = vadd.f32 %v1860_v57, %v1460_v56  ;;  %v598_v56 = vld [vmem:[#allocation3 + $0x8a8] sm:$0xff] }
 0x234   :  { %v2262_v62 = vadd.f32 %v2261_v60, %v1861_v58  ;;  %v246_v60 = vld [vmem:[#allocation2 + $0x1a8] sm:$0xff] }
 0x235   :  { %v1061_v1 = vpop.f32.mrf.mxu0  ;;  %v1462_v2 = vpop.f32.mrf.mxu1 }
 0x236   :  { %v2549_v0 = vadd.f32 %v2262_v62, %v241_v59  ;;  %1910 = vmatmul.f32.gmra.mxu2 %v583_v61  ;;  %v1463_v5 = vadd.f32 %v1462_v2, %v1061_v1  ;;  %2311 = vmatmul.f32.gmra.mxu3 %v584_v63  ;;  %v603_v62 = vld [vmem:[#allocation3 + $0x8d0] sm:$0xff] }
 0x238   :  { %2678 = vst.msk [vmem:[#allocation2 + $0x180] sm:$0xff] %vm64_vm0, %v2549_v0  ;;  %1108 = vmatmul.f32.gmra.mxu0 %v581_v3  ;;  %1509 = vmatmul.f32.gmra.mxu1 %v582_v4  ;;  %v604_v0 = vld [vmem:[#allocation3 + $0x8d8] sm:$0xff]  ;;  %v601_v4 = vld [vmem:[#allocation3 + $0x8c0] sm:$0xff] }
 0x239   :  { %v1863_v6 = vpop.f32.mrf.mxu2  ;;  %v2264_v9 = vpop.f32.mrf.mxu3 }
 0x23a   :  { %v1864_v7 = vadd.f32 %v1863_v6, %v1463_v5  ;;  %v602_v5 = vld [vmem:[#allocation3 + $0x8c8] sm:$0xff] }
 0x23c   :  { %v2265_v11 = vadd.f32 %v2264_v9, %v1864_v7  ;;  %v247_v9 = vld [vmem:[#allocation2 + $0x1b0] sm:$0xff] }
 0x23d   :  { %v1064_v14 = vpop.f32.mrf.mxu0  ;;  %v1465_v15 = vpop.f32.mrf.mxu1 }
 0x23e   :  { %v2550_v13 = vadd.f32 %v2265_v11, %v242_v8  ;;  %1913 = vmatmul.f32.gmra.mxu2 %v587_v10  ;;  %v1466_v18 = vadd.f32 %v1465_v15, %v1064_v14  ;;  %2314 = vmatmul.f32.gmra.mxu3 %v588_v12  ;;  %v607_v11 = vld [vmem:[#allocation3 + $0x8f0] sm:$0xff] }
 0x240   :  { %2679 = vst.msk [vmem:[#allocation2 + $0x188] sm:$0xff] %vm64_vm0, %v2550_v13  ;;  %1111 = vmatmul.f32.gmra.mxu0 %v585_v16  ;;  %1512 = vmatmul.f32.gmra.mxu1 %v586_v17  ;;  %v608_v13 = vld [vmem:[#allocation3 + $0x8f8] sm:$0xff]  ;;  %v605_v17 = vld [vmem:[#allocation3 + $0x8e0] sm:$0xff] }
 0x241   :  { %v1866_v19 = vpop.f32.mrf.mxu2  ;;  %v2267_v22 = vpop.f32.mrf.mxu3 }
 0x242   :  { %v1867_v20 = vadd.f32 %v1866_v19, %v1466_v18  ;;  %v606_v18 = vld [vmem:[#allocation3 + $0x8e8] sm:$0xff] }
 0x244   :  { %v2268_v24 = vadd.f32 %v2267_v22, %v1867_v20  ;;  %v248_v22 = vld [vmem:[#allocation2 + $0x1b8] sm:$0xff] }
 0x245   :  { %v1067_v26 = vpop.f32.mrf.mxu0  ;;  %v1468_v27 = vpop.f32.mrf.mxu1 }
 0x246   :  { %v2551_v25 = vadd.f32 %v2268_v24, %v243_v21  ;;  %1916 = vmatmul.f32.gmra.mxu2 %v591_v23  ;;  %v1469_v30 = vadd.f32 %v1468_v27, %v1067_v26  ;;  %2317 = vmatmul.f32.gmra.mxu3 %v592_v52  ;;  %v611_v24 = vld [vmem:[#allocation3 + $0x910] sm:$0xff] }
 0x248   :  { %2680 = vst.msk [vmem:[#allocation2 + $0x190] sm:$0xff] %vm64_vm0, %v2551_v25  ;;  %1114 = vmatmul.f32.gmra.mxu0 %v589_v28  ;;  %1515 = vmatmul.f32.gmra.mxu1 %v590_v29  ;;  %v612_v25 = vld [vmem:[#allocation3 + $0x918] sm:$0xff]  ;;  %v609_v29 = vld [vmem:[#allocation3 + $0x900] sm:$0xff] }
 0x249   :  { %v1869_v31 = vpop.f32.mrf.mxu2  ;;  %v2270_v34 = vpop.f32.mrf.mxu3 }
 0x24a   :  { %v1870_v32 = vadd.f32 %v1869_v31, %v1469_v30  ;;  %v610_v30 = vld [vmem:[#allocation3 + $0x908] sm:$0xff] }
 0x24c   :  { %v2271_v36 = vadd.f32 %v2270_v34, %v1870_v32  ;;  %v249_v34 = vld [vmem:[#allocation2 + $0x1c0] sm:$0xff] }
 0x24d   :  { %v1070_v39 = vpop.f32.mrf.mxu0  ;;  %v1471_v40 = vpop.f32.mrf.mxu1 }
 0x24e   :  { %v2552_v38 = vadd.f32 %v2271_v36, %v244_v33  ;;  %1919 = vmatmul.f32.gmra.mxu2 %v595_v35  ;;  %v1472_v43 = vadd.f32 %v1471_v40, %v1070_v39  ;;  %2320 = vmatmul.f32.gmra.mxu3 %v596_v37  ;;  %v615_v36 = vld [vmem:[#allocation3 + $0x930] sm:$0xff] }
 0x250   :  { %2681 = vst.msk [vmem:[#allocation2 + $0x198] sm:$0xff] %vm64_vm0, %v2552_v38  ;;  %1117 = vmatmul.f32.gmra.mxu0 %v593_v41  ;;  %1518 = vmatmul.f32.gmra.mxu1 %v594_v42  ;;  %v616_v38 = vld [vmem:[#allocation3 + $0x938] sm:$0xff]  ;;  %v613_v42 = vld [vmem:[#allocation3 + $0x920] sm:$0xff] }
 0x251   :  { %v1872_v44 = vpop.f32.mrf.mxu2  ;;  %v2273_v47 = vpop.f32.mrf.mxu3 }
 0x252   :  { %v1873_v45 = vadd.f32 %v1872_v44, %v1472_v43  ;;  %v614_v43 = vld [vmem:[#allocation3 + $0x928] sm:$0xff] }
 0x254   :  { %v2274_v49 = vadd.f32 %v2273_v47, %v1873_v45  ;;  %v250_v47 = vld [vmem:[#allocation2 + $0x1c8] sm:$0xff] }
 0x255   :  { %v1073_v53 = vpop.f32.mrf.mxu0  ;;  %v1474_v54 = vpop.f32.mrf.mxu1 }
 0x256   :  { %v2553_v51 = vadd.f32 %v2274_v49, %v245_v46  ;;  %1922 = vmatmul.f32.gmra.mxu2 %v599_v48  ;;  %v1475_v57 = vadd.f32 %v1474_v54, %v1073_v53  ;;  %2323 = vmatmul.f32.gmra.mxu3 %v600_v50  ;;  %v619_v49 = vld [vmem:[#allocation3 + $0x950] sm:$0xff] }
 0x258   :  { %2682 = vst.msk [vmem:[#allocation2 + $0x1a0] sm:$0xff] %vm64_vm0, %v2553_v51  ;;  %1120 = vmatmul.f32.gmra.mxu0 %v597_v55  ;;  %1521 = vmatmul.f32.gmra.mxu1 %v598_v56  ;;  %v620_v51 = vld [vmem:[#allocation3 + $0x958] sm:$0xff]  ;;  %v617_v56 = vld [vmem:[#allocation3 + $0x940] sm:$0xff] }
 0x259   :  { %v1875_v58 = vpop.f32.mrf.mxu2  ;;  %v2276_v61 = vpop.f32.mrf.mxu3 }
 0x25a   :  { %v1876_v59 = vadd.f32 %v1875_v58, %v1475_v57  ;;  %v618_v57 = vld [vmem:[#allocation3 + $0x948] sm:$0xff] }
 0x25c   :  { %v2277_v63 = vadd.f32 %v2276_v61, %v1876_v59  ;;  %v251_v61 = vld [vmem:[#allocation2 + $0x1d0] sm:$0xff] }
 0x25d   :  { %v1076_v2 = vpop.f32.mrf.mxu0  ;;  %v1477_v3 = vpop.f32.mrf.mxu1 }
 0x25e   :  { %v2554_v1 = vadd.f32 %v2277_v63, %v246_v60  ;;  %1925 = vmatmul.f32.gmra.mxu2 %v603_v62  ;;  %v1478_v6 = vadd.f32 %v1477_v3, %v1076_v2  ;;  %2326 = vmatmul.f32.gmra.mxu3 %v604_v0  ;;  %v623_v63 = vld [vmem:[#allocation3 + $0x970] sm:$0xff] }
 0x260   :  { %2683 = vst.msk [vmem:[#allocation2 + $0x1a8] sm:$0xff] %vm64_vm0, %v2554_v1  ;;  %1123 = vmatmul.f32.gmra.mxu0 %v601_v4  ;;  %1524 = vmatmul.f32.gmra.mxu1 %v602_v5  ;;  %v624_v1 = vld [vmem:[#allocation3 + $0x978] sm:$0xff]  ;;  %v621_v5 = vld [vmem:[#allocation3 + $0x960] sm:$0xff] }
 0x261   :  { %v1878_v7 = vpop.f32.mrf.mxu2  ;;  %v2279_v10 = vpop.f32.mrf.mxu3 }
 0x262   :  { %v1879_v8 = vadd.f32 %v1878_v7, %v1478_v6  ;;  %v622_v6 = vld [vmem:[#allocation3 + $0x968] sm:$0xff] }
 0x264   :  { %v2280_v12 = vadd.f32 %v2279_v10, %v1879_v8  ;;  %v252_v10 = vld [vmem:[#allocation2 + $0x1d8] sm:$0xff] }
 0x265   :  { %v1079_v15 = vpop.f32.mrf.mxu0  ;;  %v1480_v16 = vpop.f32.mrf.mxu1 }
 0x266   :  { %v2555_v14 = vadd.f32 %v2280_v12, %v247_v9  ;;  %1928 = vmatmul.f32.gmra.mxu2 %v607_v11  ;;  %v1481_v19 = vadd.f32 %v1480_v16, %v1079_v15  ;;  %2329 = vmatmul.f32.gmra.mxu3 %v608_v13  ;;  %v627_v12 = vld [vmem:[#allocation3 + $0x990] sm:$0xff] }
 0x268   :  { %2684 = vst.msk [vmem:[#allocation2 + $0x1b0] sm:$0xff] %vm64_vm0, %v2555_v14  ;;  %1126 = vmatmul.f32.gmra.mxu0 %v605_v17  ;;  %1527 = vmatmul.f32.gmra.mxu1 %v606_v18  ;;  %v628_v14 = vld [vmem:[#allocation3 + $0x998] sm:$0xff]  ;;  %v625_v18 = vld [vmem:[#allocation3 + $0x980] sm:$0xff] }
 0x269   :  { %v1881_v20 = vpop.f32.mrf.mxu2  ;;  %v2282_v23 = vpop.f32.mrf.mxu3 }
 0x26a   :  { %v1882_v21 = vadd.f32 %v1881_v20, %v1481_v19  ;;  %v626_v19 = vld [vmem:[#allocation3 + $0x988] sm:$0xff] }
 0x26c   :  { %v2283_v52 = vadd.f32 %v2282_v23, %v1882_v21  ;;  %v253_v23 = vld [vmem:[#allocation2 + $0x1e0] sm:$0xff] }
 0x26d   :  { %v1082_v27 = vpop.f32.mrf.mxu0  ;;  %v1483_v28 = vpop.f32.mrf.mxu1 }
 0x26e   :  { %v2556_v26 = vadd.f32 %v2283_v52, %v248_v22  ;;  %1931 = vmatmul.f32.gmra.mxu2 %v611_v24  ;;  %v1484_v31 = vadd.f32 %v1483_v28, %v1082_v27  ;;  %2332 = vmatmul.f32.gmra.mxu3 %v612_v25  ;;  %v631_v52 = vld [vmem:[#allocation3 + $0x9b0] sm:$0xff] }
 0x270   :  { %2685 = vst.msk [vmem:[#allocation2 + $0x1b8] sm:$0xff] %vm64_vm0, %v2556_v26  ;;  %1129 = vmatmul.f32.gmra.mxu0 %v609_v29  ;;  %1530 = vmatmul.f32.gmra.mxu1 %v610_v30  ;;  %v632_v26 = vld [vmem:[#allocation3 + $0x9b8] sm:$0xff]  ;;  %v629_v30 = vld [vmem:[#allocation3 + $0x9a0] sm:$0xff] }
 0x271   :  { %v1884_v32 = vpop.f32.mrf.mxu2  ;;  %v2285_v35 = vpop.f32.mrf.mxu3 }
 0x272   :  { %v1885_v33 = vadd.f32 %v1884_v32, %v1484_v31  ;;  %v630_v31 = vld [vmem:[#allocation3 + $0x9a8] sm:$0xff] }
 0x274   :  { %v2286_v37 = vadd.f32 %v2285_v35, %v1885_v33  ;;  %v254_v35 = vld [vmem:[#allocation2 + $0x1e8] sm:$0xff] }
 0x275   :  { %v1085_v40 = vpop.f32.mrf.mxu0  ;;  %v1486_v41 = vpop.f32.mrf.mxu1 }
 0x276   :  { %v2557_v39 = vadd.f32 %v2286_v37, %v249_v34  ;;  %1934 = vmatmul.f32.gmra.mxu2 %v615_v36  ;;  %v1487_v44 = vadd.f32 %v1486_v41, %v1085_v40  ;;  %2335 = vmatmul.f32.gmra.mxu3 %v616_v38  ;;  %v635_v37 = vld [vmem:[#allocation3 + $0x9d0] sm:$0xff] }
 0x278   :  { %2686 = vst.msk [vmem:[#allocation2 + $0x1c0] sm:$0xff] %vm64_vm0, %v2557_v39  ;;  %1132 = vmatmul.f32.gmra.mxu0 %v613_v42  ;;  %1533 = vmatmul.f32.gmra.mxu1 %v614_v43  ;;  %v636_v39 = vld [vmem:[#allocation3 + $0x9d8] sm:$0xff]  ;;  %v633_v43 = vld [vmem:[#allocation3 + $0x9c0] sm:$0xff] }
 0x279   :  { %v1887_v45 = vpop.f32.mrf.mxu2  ;;  %v2288_v48 = vpop.f32.mrf.mxu3 }
 0x27a   :  { %v1888_v46 = vadd.f32 %v1887_v45, %v1487_v44  ;;  %v634_v44 = vld [vmem:[#allocation3 + $0x9c8] sm:$0xff] }
 0x27c   :  { %v2289_v50 = vadd.f32 %v2288_v48, %v1888_v46  ;;  %v255_v48 = vld [vmem:[#allocation2 + $0x1f0] sm:$0xff] }
 0x27d   :  { %v1088_v54 = vpop.f32.mrf.mxu0  ;;  %v1489_v55 = vpop.f32.mrf.mxu1 }
 0x27e   :  { %v2558_v53 = vadd.f32 %v2289_v50, %v250_v47  ;;  %1937 = vmatmul.f32.gmra.mxu2 %v619_v49  ;;  %v1490_v58 = vadd.f32 %v1489_v55, %v1088_v54  ;;  %2338 = vmatmul.f32.gmra.mxu3 %v620_v51  ;;  %v639_v50 = vld [vmem:[#allocation3 + $0x9f0] sm:$0xff] }
 0x280   :  { %2687 = vst.msk [vmem:[#allocation2 + $0x1c8] sm:$0xff] %vm64_vm0, %v2558_v53  ;;  %1135 = vmatmul.f32.gmra.mxu0 %v617_v56  ;;  %1536 = vmatmul.f32.gmra.mxu1 %v618_v57  ;;  %v640_v53 = vld [vmem:[#allocation3 + $0x9f8] sm:$0xff]  ;;  %v637_v57 = vld [vmem:[#allocation3 + $0x9e0] sm:$0xff] }
 0x281   :  { %v1890_v59 = vpop.f32.mrf.mxu2  ;;  %v2291_v62 = vpop.f32.mrf.mxu3 }
 0x282   :  { %v1891_v60 = vadd.f32 %v1890_v59, %v1490_v58  ;;  %v638_v58 = vld [vmem:[#allocation3 + $0x9e8] sm:$0xff] }
 0x284   :  { %v2292_v0 = vadd.f32 %v2291_v62, %v1891_v60  ;;  %v256_v62 = vld [vmem:[#allocation2 + $0x1f8] sm:$0xff] }
 0x285   :  { %v1091_v3 = vpop.f32.mrf.mxu0  ;;  %v1492_v4 = vpop.f32.mrf.mxu1 }
 0x286   :  { %v2559_v2 = vadd.f32 %v2292_v0, %v251_v61  ;;  %1940 = vmatmul.f32.gmra.mxu2 %v623_v63  ;;  %v1493_v7 = vadd.f32 %v1492_v4, %v1091_v3  ;;  %2341 = vmatmul.f32.gmra.mxu3 %v624_v1  ;;  %v643_v0 = vld [vmem:[#allocation3 + $0xa10] sm:$0xff] }
 0x288   :  { %2688 = vst.msk [vmem:[#allocation2 + $0x1d0] sm:$0xff] %vm64_vm0, %v2559_v2  ;;  %1138 = vmatmul.f32.gmra.mxu0 %v621_v5  ;;  %1539 = vmatmul.f32.gmra.mxu1 %v622_v6  ;;  %v644_v2 = vld [vmem:[#allocation3 + $0xa18] sm:$0xff]  ;;  %v641_v6 = vld [vmem:[#allocation3 + $0xa00] sm:$0xff] }
 0x289   :  { %v1893_v8 = vpop.f32.mrf.mxu2  ;;  %v2294_v11 = vpop.f32.mrf.mxu3 }
 0x28a   :  { %v1894_v9 = vadd.f32 %v1893_v8, %v1493_v7  ;;  %v642_v7 = vld [vmem:[#allocation3 + $0xa08] sm:$0xff] }
 0x28c   :  { %v2295_v13 = vadd.f32 %v2294_v11, %v1894_v9  ;;  %v257_v11 = vld [vmem:[#allocation2 + $0x200] sm:$0xff] }
 0x28d   :  { %v1094_v16 = vpop.f32.mrf.mxu0  ;;  %v1495_v17 = vpop.f32.mrf.mxu1 }
 0x28e   :  { %v2560_v15 = vadd.f32 %v2295_v13, %v252_v10  ;;  %1943 = vmatmul.f32.gmra.mxu2 %v627_v12  ;;  %v1496_v20 = vadd.f32 %v1495_v17, %v1094_v16  ;;  %2344 = vmatmul.f32.gmra.mxu3 %v628_v14  ;;  %v647_v13 = vld [vmem:[#allocation3 + $0xa30] sm:$0xff] }
 0x290   :  { %2689 = vst.msk [vmem:[#allocation2 + $0x1d8] sm:$0xff] %vm64_vm0, %v2560_v15  ;;  %1141 = vmatmul.f32.gmra.mxu0 %v625_v18  ;;  %1542 = vmatmul.f32.gmra.mxu1 %v626_v19  ;;  %v648_v15 = vld [vmem:[#allocation3 + $0xa38] sm:$0xff]  ;;  %v645_v19 = vld [vmem:[#allocation3 + $0xa20] sm:$0xff] }
 0x291   :  { %v1896_v21 = vpop.f32.mrf.mxu2  ;;  %v2297_v24 = vpop.f32.mrf.mxu3 }
 0x292   :  { %v1897_v22 = vadd.f32 %v1896_v21, %v1496_v20  ;;  %v646_v20 = vld [vmem:[#allocation3 + $0xa28] sm:$0xff] }
 0x294   :  { %v2298_v25 = vadd.f32 %v2297_v24, %v1897_v22  ;;  %v258_v24 = vld [vmem:[#allocation2 + $0x208] sm:$0xff] }
 0x295   :  { %v1097_v28 = vpop.f32.mrf.mxu0  ;;  %v1498_v29 = vpop.f32.mrf.mxu1 }
 0x296   :  { %v2561_v27 = vadd.f32 %v2298_v25, %v253_v23  ;;  %1946 = vmatmul.f32.gmra.mxu2 %v631_v52  ;;  %v1499_v32 = vadd.f32 %v1498_v29, %v1097_v28  ;;  %2347 = vmatmul.f32.gmra.mxu3 %v632_v26  ;;  %v651_v25 = vld [vmem:[#allocation3 + $0xa50] sm:$0xff] }
 0x298   :  { %2690 = vst.msk [vmem:[#allocation2 + $0x1e0] sm:$0xff] %vm64_vm0, %v2561_v27  ;;  %1144 = vmatmul.f32.gmra.mxu0 %v629_v30  ;;  %1545 = vmatmul.f32.gmra.mxu1 %v630_v31  ;;  %v652_v27 = vld [vmem:[#allocation3 + $0xa58] sm:$0xff]  ;;  %v649_v31 = vld [vmem:[#allocation3 + $0xa40] sm:$0xff] }
 0x299   :  { %v1899_v33 = vpop.f32.mrf.mxu2  ;;  %v2300_v36 = vpop.f32.mrf.mxu3 }
 0x29a   :  { %v1900_v34 = vadd.f32 %v1899_v33, %v1499_v32  ;;  %v650_v32 = vld [vmem:[#allocation3 + $0xa48] sm:$0xff] }
 0x29c   :  { %v2301_v38 = vadd.f32 %v2300_v36, %v1900_v34  ;;  %v259_v36 = vld [vmem:[#allocation2 + $0x210] sm:$0xff] }
 0x29d   :  { %v1100_v41 = vpop.f32.mrf.mxu0  ;;  %v1501_v42 = vpop.f32.mrf.mxu1 }
 0x29e   :  { %v2562_v40 = vadd.f32 %v2301_v38, %v254_v35  ;;  %1949 = vmatmul.f32.gmra.mxu2 %v635_v37  ;;  %v1502_v45 = vadd.f32 %v1501_v42, %v1100_v41  ;;  %2350 = vmatmul.f32.gmra.mxu3 %v636_v39  ;;  %v655_v38 = vld [vmem:[#allocation3 + $0xa70] sm:$0xff] }
 0x2a0   :  { %2691 = vst.msk [vmem:[#allocation2 + $0x1e8] sm:$0xff] %vm64_vm0, %v2562_v40  ;;  %1147 = vmatmul.f32.gmra.mxu0 %v633_v43  ;;  %1548 = vmatmul.f32.gmra.mxu1 %v634_v44  ;;  %v656_v40 = vld [vmem:[#allocation3 + $0xa78] sm:$0xff]  ;;  %v653_v44 = vld [vmem:[#allocation3 + $0xa60] sm:$0xff] }
 0x2a1   :  { %v1902_v46 = vpop.f32.mrf.mxu2  ;;  %v2303_v49 = vpop.f32.mrf.mxu3 }
 0x2a2   :  { %v1903_v47 = vadd.f32 %v1902_v46, %v1502_v45  ;;  %v654_v45 = vld [vmem:[#allocation3 + $0xa68] sm:$0xff] }
 0x2a4   :  { %v2304_v51 = vadd.f32 %v2303_v49, %v1903_v47  ;;  %v260_v49 = vld [vmem:[#allocation2 + $0x218] sm:$0xff] }
 0x2a5   :  { %v1103_v55 = vpop.f32.mrf.mxu0  ;;  %v1504_v56 = vpop.f32.mrf.mxu1 }
 0x2a6   :  { %v2563_v54 = vadd.f32 %v2304_v51, %v255_v48  ;;  %1952 = vmatmul.f32.gmra.mxu2 %v639_v50  ;;  %v1505_v59 = vadd.f32 %v1504_v56, %v1103_v55  ;;  %2353 = vmatmul.f32.gmra.mxu3 %v640_v53  ;;  %v659_v51 = vld [vmem:[#allocation3 + $0xa90] sm:$0xff] }
 0x2a8   :  { %2692 = vst.msk [vmem:[#allocation2 + $0x1f0] sm:$0xff] %vm64_vm0, %v2563_v54  ;;  %1150 = vmatmul.f32.gmra.mxu0 %v637_v57  ;;  %1551 = vmatmul.f32.gmra.mxu1 %v638_v58  ;;  %v660_v54 = vld [vmem:[#allocation3 + $0xa98] sm:$0xff]  ;;  %v657_v58 = vld [vmem:[#allocation3 + $0xa80] sm:$0xff] }
 0x2a9   :  { %v1905_v60 = vpop.f32.mrf.mxu2  ;;  %v2306_v63 = vpop.f32.mrf.mxu3 }
 0x2aa   :  { %v1906_v61 = vadd.f32 %v1905_v60, %v1505_v59  ;;  %v658_v59 = vld [vmem:[#allocation3 + $0xa88] sm:$0xff] }
 0x2ac   :  { %v2307_v1 = vadd.f32 %v2306_v63, %v1906_v61  ;;  %v261_v63 = vld [vmem:[#allocation2 + $0x220] sm:$0xff] }
 0x2ad   :  { %v1106_v4 = vpop.f32.mrf.mxu0  ;;  %v1507_v5 = vpop.f32.mrf.mxu1 }
 0x2ae   :  { %v2564_v3 = vadd.f32 %v2307_v1, %v256_v62  ;;  %1955 = vmatmul.f32.gmra.mxu2 %v643_v0  ;;  %v1508_v8 = vadd.f32 %v1507_v5, %v1106_v4  ;;  %2356 = vmatmul.f32.gmra.mxu3 %v644_v2  ;;  %v663_v1 = vld [vmem:[#allocation3 + $0xab0] sm:$0xff] }
 0x2b0   :  { %2693 = vst.msk [vmem:[#allocation2 + $0x1f8] sm:$0xff] %vm64_vm0, %v2564_v3  ;;  %1153 = vmatmul.f32.gmra.mxu0 %v641_v6  ;;  %1554 = vmatmul.f32.gmra.mxu1 %v642_v7  ;;  %v664_v3 = vld [vmem:[#allocation3 + $0xab8] sm:$0xff]  ;;  %v661_v7 = vld [vmem:[#allocation3 + $0xaa0] sm:$0xff] }
 0x2b1   :  { %v1908_v9 = vpop.f32.mrf.mxu2  ;;  %v2309_v12 = vpop.f32.mrf.mxu3 }
 0x2b2   :  { %v1909_v10 = vadd.f32 %v1908_v9, %v1508_v8  ;;  %v662_v8 = vld [vmem:[#allocation3 + $0xaa8] sm:$0xff] }
 0x2b4   :  { %v2310_v14 = vadd.f32 %v2309_v12, %v1909_v10  ;;  %v262_v12 = vld [vmem:[#allocation2 + $0x228] sm:$0xff] }
 0x2b5   :  { %v1109_v17 = vpop.f32.mrf.mxu0  ;;  %v1510_v18 = vpop.f32.mrf.mxu1 }
 0x2b6   :  { %v2565_v16 = vadd.f32 %v2310_v14, %v257_v11  ;;  %1958 = vmatmul.f32.gmra.mxu2 %v647_v13  ;;  %v1511_v21 = vadd.f32 %v1510_v18, %v1109_v17  ;;  %2359 = vmatmul.f32.gmra.mxu3 %v648_v15  ;;  %v667_v14 = vld [vmem:[#allocation3 + $0xad0] sm:$0xff] }
 0x2b8   :  { %2694 = vst.msk [vmem:[#allocation2 + $0x200] sm:$0xff] %vm64_vm0, %v2565_v16  ;;  %1156 = vmatmul.f32.gmra.mxu0 %v645_v19  ;;  %1557 = vmatmul.f32.gmra.mxu1 %v646_v20  ;;  %v668_v16 = vld [vmem:[#allocation3 + $0xad8] sm:$0xff]  ;;  %v665_v20 = vld [vmem:[#allocation3 + $0xac0] sm:$0xff] }
 0x2b9   :  { %v1911_v22 = vpop.f32.mrf.mxu2  ;;  %v2312_v52 = vpop.f32.mrf.mxu3 }
 0x2ba   :  { %v1912_v23 = vadd.f32 %v1911_v22, %v1511_v21  ;;  %v666_v21 = vld [vmem:[#allocation3 + $0xac8] sm:$0xff] }
 0x2bc   :  { %v2313_v26 = vadd.f32 %v2312_v52, %v1912_v23  ;;  %v263_v52 = vld [vmem:[#allocation2 + $0x230] sm:$0xff] }
 0x2bd   :  { %v1112_v29 = vpop.f32.mrf.mxu0  ;;  %v1513_v30 = vpop.f32.mrf.mxu1 }
 0x2be   :  { %v2566_v28 = vadd.f32 %v2313_v26, %v258_v24  ;;  %1961 = vmatmul.f32.gmra.mxu2 %v651_v25  ;;  %v1514_v33 = vadd.f32 %v1513_v30, %v1112_v29  ;;  %2362 = vmatmul.f32.gmra.mxu3 %v652_v27  ;;  %v671_v26 = vld [vmem:[#allocation3 + $0xaf0] sm:$0xff] }
 0x2c0   :  { %2695 = vst.msk [vmem:[#allocation2 + $0x208] sm:$0xff] %vm64_vm0, %v2566_v28  ;;  %1159 = vmatmul.f32.gmra.mxu0 %v649_v31  ;;  %1560 = vmatmul.f32.gmra.mxu1 %v650_v32  ;;  %v672_v28 = vld [vmem:[#allocation3 + $0xaf8] sm:$0xff]  ;;  %v669_v32 = vld [vmem:[#allocation3 + $0xae0] sm:$0xff] }
 0x2c1   :  { %v1914_v34 = vpop.f32.mrf.mxu2  ;;  %v2315_v37 = vpop.f32.mrf.mxu3 }
 0x2c2   :  { %v1915_v35 = vadd.f32 %v1914_v34, %v1514_v33  ;;  %v670_v33 = vld [vmem:[#allocation3 + $0xae8] sm:$0xff] }
 0x2c4   :  { %v2316_v39 = vadd.f32 %v2315_v37, %v1915_v35  ;;  %v264_v37 = vld [vmem:[#allocation2 + $0x238] sm:$0xff] }
 0x2c5   :  { %v1115_v42 = vpop.f32.mrf.mxu0  ;;  %v1516_v43 = vpop.f32.mrf.mxu1 }
 0x2c6   :  { %v2567_v41 = vadd.f32 %v2316_v39, %v259_v36  ;;  %1964 = vmatmul.f32.gmra.mxu2 %v655_v38  ;;  %v1517_v46 = vadd.f32 %v1516_v43, %v1115_v42  ;;  %2365 = vmatmul.f32.gmra.mxu3 %v656_v40  ;;  %v675_v39 = vld [vmem:[#allocation3 + $0xb10] sm:$0xff] }
 0x2c8   :  { %2696 = vst.msk [vmem:[#allocation2 + $0x210] sm:$0xff] %vm64_vm0, %v2567_v41  ;;  %1162 = vmatmul.f32.gmra.mxu0 %v653_v44  ;;  %1563 = vmatmul.f32.gmra.mxu1 %v654_v45  ;;  %v676_v41 = vld [vmem:[#allocation3 + $0xb18] sm:$0xff]  ;;  %v673_v45 = vld [vmem:[#allocation3 + $0xb00] sm:$0xff] }
 0x2c9   :  { %v1917_v47 = vpop.f32.mrf.mxu2  ;;  %v2318_v50 = vpop.f32.mrf.mxu3 }
 0x2ca   :  { %v1918_v48 = vadd.f32 %v1917_v47, %v1517_v46  ;;  %v674_v46 = vld [vmem:[#allocation3 + $0xb08] sm:$0xff] }
 0x2cc   :  { %v2319_v53 = vadd.f32 %v2318_v50, %v1918_v48  ;;  %v265_v50 = vld [vmem:[#allocation2 + $0x240] sm:$0xff] }
 0x2cd   :  { %v1118_v56 = vpop.f32.mrf.mxu0  ;;  %v1519_v57 = vpop.f32.mrf.mxu1 }
 0x2ce   :  { %v2568_v55 = vadd.f32 %v2319_v53, %v260_v49  ;;  %1967 = vmatmul.f32.gmra.mxu2 %v659_v51  ;;  %v1520_v60 = vadd.f32 %v1519_v57, %v1118_v56  ;;  %2368 = vmatmul.f32.gmra.mxu3 %v660_v54  ;;  %v679_v53 = vld [vmem:[#allocation3 + $0xb30] sm:$0xff] }
 0x2d0   :  { %2697 = vst.msk [vmem:[#allocation2 + $0x218] sm:$0xff] %vm64_vm0, %v2568_v55  ;;  %1165 = vmatmul.f32.gmra.mxu0 %v657_v58  ;;  %1566 = vmatmul.f32.gmra.mxu1 %v658_v59  ;;  %v680_v55 = vld [vmem:[#allocation3 + $0xb38] sm:$0xff]  ;;  %v677_v59 = vld [vmem:[#allocation3 + $0xb20] sm:$0xff] }
 0x2d1   :  { %v1920_v61 = vpop.f32.mrf.mxu2  ;;  %v2321_v0 = vpop.f32.mrf.mxu3 }
 0x2d2   :  { %v1921_v62 = vadd.f32 %v1920_v61, %v1520_v60  ;;  %v678_v60 = vld [vmem:[#allocation3 + $0xb28] sm:$0xff] }
 0x2d4   :  { %v2322_v2 = vadd.f32 %v2321_v0, %v1921_v62  ;;  %v266_v0 = vld [vmem:[#allocation2 + $0x248] sm:$0xff] }
 0x2d5   :  { %v1121_v5 = vpop.f32.mrf.mxu0  ;;  %v1522_v6 = vpop.f32.mrf.mxu1 }
 0x2d6   :  { %v2569_v4 = vadd.f32 %v2322_v2, %v261_v63  ;;  %1970 = vmatmul.f32.gmra.mxu2 %v663_v1  ;;  %v1523_v9 = vadd.f32 %v1522_v6, %v1121_v5  ;;  %2371 = vmatmul.f32.gmra.mxu3 %v664_v3  ;;  %v683_v2 = vld [vmem:[#allocation3 + $0xb50] sm:$0xff] }
 0x2d8   :  { %2698 = vst.msk [vmem:[#allocation2 + $0x220] sm:$0xff] %vm64_vm0, %v2569_v4  ;;  %1168 = vmatmul.f32.gmra.mxu0 %v661_v7  ;;  %1569 = vmatmul.f32.gmra.mxu1 %v662_v8  ;;  %v684_v4 = vld [vmem:[#allocation3 + $0xb58] sm:$0xff]  ;;  %v681_v8 = vld [vmem:[#allocation3 + $0xb40] sm:$0xff] }
 0x2d9   :  { %v1923_v10 = vpop.f32.mrf.mxu2  ;;  %v2324_v13 = vpop.f32.mrf.mxu3 }
 0x2da   :  { %v1924_v11 = vadd.f32 %v1923_v10, %v1523_v9  ;;  %v682_v9 = vld [vmem:[#allocation3 + $0xb48] sm:$0xff] }
 0x2dc   :  { %v2325_v15 = vadd.f32 %v2324_v13, %v1924_v11  ;;  %v267_v13 = vld [vmem:[#allocation2 + $0x250] sm:$0xff] }
 0x2dd   :  { %v1124_v18 = vpop.f32.mrf.mxu0  ;;  %v1525_v19 = vpop.f32.mrf.mxu1 }
 0x2de   :  { %v2570_v17 = vadd.f32 %v2325_v15, %v262_v12  ;;  %1973 = vmatmul.f32.gmra.mxu2 %v667_v14  ;;  %v1526_v22 = vadd.f32 %v1525_v19, %v1124_v18  ;;  %2374 = vmatmul.f32.gmra.mxu3 %v668_v16  ;;  %v687_v15 = vld [vmem:[#allocation3 + $0xb70] sm:$0xff] }
 0x2e0   :  { %2699 = vst.msk [vmem:[#allocation2 + $0x228] sm:$0xff] %vm64_vm0, %v2570_v17  ;;  %1171 = vmatmul.f32.gmra.mxu0 %v665_v20  ;;  %1572 = vmatmul.f32.gmra.mxu1 %v666_v21  ;;  %v688_v17 = vld [vmem:[#allocation3 + $0xb78] sm:$0xff]  ;;  %v685_v21 = vld [vmem:[#allocation3 + $0xb60] sm:$0xff] }
 0x2e1   :  { %v1926_v23 = vpop.f32.mrf.mxu2  ;;  %v2327_v25 = vpop.f32.mrf.mxu3 }
 0x2e2   :  { %v1927_v24 = vadd.f32 %v1926_v23, %v1526_v22  ;;  %v686_v22 = vld [vmem:[#allocation3 + $0xb68] sm:$0xff] }
 0x2e4   :  { %v2328_v27 = vadd.f32 %v2327_v25, %v1927_v24  ;;  %v268_v25 = vld [vmem:[#allocation2 + $0x258] sm:$0xff] }
 0x2e5   :  { %v1127_v30 = vpop.f32.mrf.mxu0  ;;  %v1528_v31 = vpop.f32.mrf.mxu1 }
 0x2e6   :  { %v2571_v29 = vadd.f32 %v2328_v27, %v263_v52  ;;  %1976 = vmatmul.f32.gmra.mxu2 %v671_v26  ;;  %v1529_v34 = vadd.f32 %v1528_v31, %v1127_v30  ;;  %2377 = vmatmul.f32.gmra.mxu3 %v672_v28  ;;  %v691_v27 = vld [vmem:[#allocation3 + $0xb90] sm:$0xff] }
 0x2e8   :  { %2700 = vst.msk [vmem:[#allocation2 + $0x230] sm:$0xff] %vm64_vm0, %v2571_v29  ;;  %1174 = vmatmul.f32.gmra.mxu0 %v669_v32  ;;  %1575 = vmatmul.f32.gmra.mxu1 %v670_v33  ;;  %v692_v29 = vld [vmem:[#allocation3 + $0xb98] sm:$0xff]  ;;  %v689_v33 = vld [vmem:[#allocation3 + $0xb80] sm:$0xff] }
 0x2e9   :  { %v1929_v35 = vpop.f32.mrf.mxu2  ;;  %v2330_v38 = vpop.f32.mrf.mxu3 }
 0x2ea   :  { %v1930_v36 = vadd.f32 %v1929_v35, %v1529_v34  ;;  %v690_v34 = vld [vmem:[#allocation3 + $0xb88] sm:$0xff] }
 0x2ec   :  { %v2331_v40 = vadd.f32 %v2330_v38, %v1930_v36  ;;  %v269_v38 = vld [vmem:[#allocation2 + $0x260] sm:$0xff] }
 0x2ed   :  { %v1130_v43 = vpop.f32.mrf.mxu0  ;;  %v1531_v44 = vpop.f32.mrf.mxu1 }
 0x2ee   :  { %v2572_v42 = vadd.f32 %v2331_v40, %v264_v37  ;;  %1979 = vmatmul.f32.gmra.mxu2 %v675_v39  ;;  %v1532_v47 = vadd.f32 %v1531_v44, %v1130_v43  ;;  %2380 = vmatmul.f32.gmra.mxu3 %v676_v41  ;;  %v695_v40 = vld [vmem:[#allocation3 + $0xbb0] sm:$0xff] }
 0x2f0   :  { %2701 = vst.msk [vmem:[#allocation2 + $0x238] sm:$0xff] %vm64_vm0, %v2572_v42  ;;  %1177 = vmatmul.f32.gmra.mxu0 %v673_v45  ;;  %1578 = vmatmul.f32.gmra.mxu1 %v674_v46  ;;  %v696_v42 = vld [vmem:[#allocation3 + $0xbb8] sm:$0xff]  ;;  %v693_v46 = vld [vmem:[#allocation3 + $0xba0] sm:$0xff] }
 0x2f1   :  { %v1932_v48 = vpop.f32.mrf.mxu2  ;;  %v2333_v51 = vpop.f32.mrf.mxu3 }
 0x2f2   :  { %v1933_v49 = vadd.f32 %v1932_v48, %v1532_v47  ;;  %v694_v47 = vld [vmem:[#allocation3 + $0xba8] sm:$0xff] }
 0x2f4   :  { %v2334_v54 = vadd.f32 %v2333_v51, %v1933_v49  ;;  %v270_v51 = vld [vmem:[#allocation2 + $0x268] sm:$0xff] }
 0x2f5   :  { %v1133_v57 = vpop.f32.mrf.mxu0  ;;  %v1534_v58 = vpop.f32.mrf.mxu1 }
 0x2f6   :  { %v2573_v56 = vadd.f32 %v2334_v54, %v265_v50  ;;  %1982 = vmatmul.f32.gmra.mxu2 %v679_v53  ;;  %v1535_v61 = vadd.f32 %v1534_v58, %v1133_v57  ;;  %2383 = vmatmul.f32.gmra.mxu3 %v680_v55  ;;  %v699_v54 = vld [vmem:[#allocation3 + $0xbd0] sm:$0xff] }
 0x2f8   :  { %2702 = vst.msk [vmem:[#allocation2 + $0x240] sm:$0xff] %vm64_vm0, %v2573_v56  ;;  %1180 = vmatmul.f32.gmra.mxu0 %v677_v59  ;;  %1581 = vmatmul.f32.gmra.mxu1 %v678_v60  ;;  %v700_v56 = vld [vmem:[#allocation3 + $0xbd8] sm:$0xff]  ;;  %v697_v60 = vld [vmem:[#allocation3 + $0xbc0] sm:$0xff] }
 0x2f9   :  { %v1935_v62 = vpop.f32.mrf.mxu2  ;;  %v2336_v1 = vpop.f32.mrf.mxu3 }
 0x2fa   :  { %v1936_v63 = vadd.f32 %v1935_v62, %v1535_v61  ;;  %v698_v61 = vld [vmem:[#allocation3 + $0xbc8] sm:$0xff] }
 0x2fc   :  { %v2337_v3 = vadd.f32 %v2336_v1, %v1936_v63  ;;  %v271_v1 = vld [vmem:[#allocation2 + $0x270] sm:$0xff] }
 0x2fd   :  { %v1136_v6 = vpop.f32.mrf.mxu0  ;;  %v1537_v7 = vpop.f32.mrf.mxu1 }
 0x2fe   :  { %v2574_v5 = vadd.f32 %v2337_v3, %v266_v0  ;;  %1985 = vmatmul.f32.gmra.mxu2 %v683_v2  ;;  %v1538_v10 = vadd.f32 %v1537_v7, %v1136_v6  ;;  %2386 = vmatmul.f32.gmra.mxu3 %v684_v4  ;;  %v703_v3 = vld [vmem:[#allocation3 + $0xbf0] sm:$0xff] }
 0x300   :  { %2703 = vst.msk [vmem:[#allocation2 + $0x248] sm:$0xff] %vm64_vm0, %v2574_v5  ;;  %1183 = vmatmul.f32.gmra.mxu0 %v681_v8  ;;  %1584 = vmatmul.f32.gmra.mxu1 %v682_v9  ;;  %v704_v5 = vld [vmem:[#allocation3 + $0xbf8] sm:$0xff]  ;;  %v701_v9 = vld [vmem:[#allocation3 + $0xbe0] sm:$0xff] }
 0x301   :  { %v1938_v11 = vpop.f32.mrf.mxu2  ;;  %v2339_v14 = vpop.f32.mrf.mxu3 }
 0x302   :  { %v1939_v12 = vadd.f32 %v1938_v11, %v1538_v10  ;;  %v702_v10 = vld [vmem:[#allocation3 + $0xbe8] sm:$0xff] }
 0x304   :  { %v2340_v16 = vadd.f32 %v2339_v14, %v1939_v12  ;;  %v272_v14 = vld [vmem:[#allocation2 + $0x278] sm:$0xff] }
 0x305   :  { %v1139_v19 = vpop.f32.mrf.mxu0  ;;  %v1540_v20 = vpop.f32.mrf.mxu1 }
 0x306   :  { %v2575_v18 = vadd.f32 %v2340_v16, %v267_v13  ;;  %1988 = vmatmul.f32.gmra.mxu2 %v687_v15  ;;  %v1541_v23 = vadd.f32 %v1540_v20, %v1139_v19  ;;  %2389 = vmatmul.f32.gmra.mxu3 %v688_v17  ;;  %v707_v16 = vld [vmem:[#allocation3 + $0xc10] sm:$0xff] }
 0x308   :  { %2704 = vst.msk [vmem:[#allocation2 + $0x250] sm:$0xff] %vm64_vm0, %v2575_v18  ;;  %1186 = vmatmul.f32.gmra.mxu0 %v685_v21  ;;  %1587 = vmatmul.f32.gmra.mxu1 %v686_v22  ;;  %v708_v18 = vld [vmem:[#allocation3 + $0xc18] sm:$0xff]  ;;  %v705_v22 = vld [vmem:[#allocation3 + $0xc00] sm:$0xff] }
 0x309   :  { %v1941_v24 = vpop.f32.mrf.mxu2  ;;  %v2342_v26 = vpop.f32.mrf.mxu3 }
 0x30a   :  { %v1942_v52 = vadd.f32 %v1941_v24, %v1541_v23  ;;  %v706_v23 = vld [vmem:[#allocation3 + $0xc08] sm:$0xff] }
 0x30c   :  { %v2343_v28 = vadd.f32 %v2342_v26, %v1942_v52  ;;  %v273_v26 = vld [vmem:[#allocation2 + $0x280] sm:$0xff] }
 0x30d   :  { %v1142_v31 = vpop.f32.mrf.mxu0  ;;  %v1543_v32 = vpop.f32.mrf.mxu1 }
 0x30e   :  { %v2576_v30 = vadd.f32 %v2343_v28, %v268_v25  ;;  %1991 = vmatmul.f32.gmra.mxu2 %v691_v27  ;;  %v1544_v35 = vadd.f32 %v1543_v32, %v1142_v31  ;;  %2392 = vmatmul.f32.gmra.mxu3 %v692_v29  ;;  %v711_v28 = vld [vmem:[#allocation3 + $0xc30] sm:$0xff] }
 0x310   :  { %2705 = vst.msk [vmem:[#allocation2 + $0x258] sm:$0xff] %vm64_vm0, %v2576_v30  ;;  %1189 = vmatmul.f32.gmra.mxu0 %v689_v33  ;;  %1590 = vmatmul.f32.gmra.mxu1 %v690_v34  ;;  %v712_v30 = vld [vmem:[#allocation3 + $0xc38] sm:$0xff]  ;;  %v709_v34 = vld [vmem:[#allocation3 + $0xc20] sm:$0xff] }
 0x311   :  { %v1944_v36 = vpop.f32.mrf.mxu2  ;;  %v2345_v39 = vpop.f32.mrf.mxu3 }
 0x312   :  { %v1945_v37 = vadd.f32 %v1944_v36, %v1544_v35  ;;  %v710_v35 = vld [vmem:[#allocation3 + $0xc28] sm:$0xff] }
 0x314   :  { %v2346_v41 = vadd.f32 %v2345_v39, %v1945_v37  ;;  %v274_v39 = vld [vmem:[#allocation2 + $0x288] sm:$0xff] }
 0x315   :  { %v1145_v44 = vpop.f32.mrf.mxu0  ;;  %v1546_v45 = vpop.f32.mrf.mxu1 }
 0x316   :  { %v2577_v43 = vadd.f32 %v2346_v41, %v269_v38  ;;  %1994 = vmatmul.f32.gmra.mxu2 %v695_v40  ;;  %v1547_v48 = vadd.f32 %v1546_v45, %v1145_v44  ;;  %2395 = vmatmul.f32.gmra.mxu3 %v696_v42  ;;  %v715_v41 = vld [vmem:[#allocation3 + $0xc50] sm:$0xff] }
 0x318   :  { %2706 = vst.msk [vmem:[#allocation2 + $0x260] sm:$0xff] %vm64_vm0, %v2577_v43  ;;  %1192 = vmatmul.f32.gmra.mxu0 %v693_v46  ;;  %1593 = vmatmul.f32.gmra.mxu1 %v694_v47  ;;  %v716_v43 = vld [vmem:[#allocation3 + $0xc58] sm:$0xff]  ;;  %v713_v47 = vld [vmem:[#allocation3 + $0xc40] sm:$0xff] }
 0x319   :  { %v1947_v49 = vpop.f32.mrf.mxu2  ;;  %v2348_v53 = vpop.f32.mrf.mxu3 }
 0x31a   :  { %v1948_v50 = vadd.f32 %v1947_v49, %v1547_v48  ;;  %v714_v48 = vld [vmem:[#allocation3 + $0xc48] sm:$0xff] }
 0x31c   :  { %v2349_v55 = vadd.f32 %v2348_v53, %v1948_v50  ;;  %v275_v53 = vld [vmem:[#allocation2 + $0x290] sm:$0xff] }
 0x31d   :  { %v1148_v58 = vpop.f32.mrf.mxu0  ;;  %v1549_v59 = vpop.f32.mrf.mxu1 }
 0x31e   :  { %v2578_v57 = vadd.f32 %v2349_v55, %v270_v51  ;;  %1997 = vmatmul.f32.gmra.mxu2 %v699_v54  ;;  %v1550_v62 = vadd.f32 %v1549_v59, %v1148_v58  ;;  %2398 = vmatmul.f32.gmra.mxu3 %v700_v56  ;;  %v719_v55 = vld [vmem:[#allocation3 + $0xc70] sm:$0xff] }
 0x320   :  { %2707 = vst.msk [vmem:[#allocation2 + $0x268] sm:$0xff] %vm64_vm0, %v2578_v57  ;;  %1195 = vmatmul.f32.gmra.mxu0 %v697_v60  ;;  %1596 = vmatmul.f32.gmra.mxu1 %v698_v61  ;;  %v720_v57 = vld [vmem:[#allocation3 + $0xc78] sm:$0xff]  ;;  %v717_v61 = vld [vmem:[#allocation3 + $0xc60] sm:$0xff] }
 0x321   :  { %v1950_v63 = vpop.f32.mrf.mxu2  ;;  %v2351_v2 = vpop.f32.mrf.mxu3 }
 0x322   :  { %v1951_v0 = vadd.f32 %v1950_v63, %v1550_v62  ;;  %v718_v62 = vld [vmem:[#allocation3 + $0xc68] sm:$0xff] }
 0x324   :  { %v2352_v4 = vadd.f32 %v2351_v2, %v1951_v0  ;;  %v276_v2 = vld [vmem:[#allocation2 + $0x298] sm:$0xff] }
 0x325   :  { %v1151_v7 = vpop.f32.mrf.mxu0  ;;  %v1552_v8 = vpop.f32.mrf.mxu1 }
 0x326   :  { %v2579_v6 = vadd.f32 %v2352_v4, %v271_v1  ;;  %2000 = vmatmul.f32.gmra.mxu2 %v703_v3  ;;  %v1553_v11 = vadd.f32 %v1552_v8, %v1151_v7  ;;  %2401 = vmatmul.f32.gmra.mxu3 %v704_v5  ;;  %v723_v4 = vld [vmem:[#allocation3 + $0xc90] sm:$0xff] }
 0x328   :  { %2708 = vst.msk [vmem:[#allocation2 + $0x270] sm:$0xff] %vm64_vm0, %v2579_v6  ;;  %1198 = vmatmul.f32.gmra.mxu0 %v701_v9  ;;  %1599 = vmatmul.f32.gmra.mxu1 %v702_v10  ;;  %v724_v6 = vld [vmem:[#allocation3 + $0xc98] sm:$0xff]  ;;  %v721_v10 = vld [vmem:[#allocation3 + $0xc80] sm:$0xff] }
 0x329   :  { %v1953_v12 = vpop.f32.mrf.mxu2  ;;  %v2354_v15 = vpop.f32.mrf.mxu3 }
 0x32a   :  { %v1954_v13 = vadd.f32 %v1953_v12, %v1553_v11  ;;  %v722_v11 = vld [vmem:[#allocation3 + $0xc88] sm:$0xff] }
 0x32c   :  { %v2355_v17 = vadd.f32 %v2354_v15, %v1954_v13  ;;  %v277_v15 = vld [vmem:[#allocation2 + $0x2a0] sm:$0xff] }
 0x32d   :  { %v1154_v20 = vpop.f32.mrf.mxu0  ;;  %v1555_v21 = vpop.f32.mrf.mxu1 }
 0x32e   :  { %v2580_v19 = vadd.f32 %v2355_v17, %v272_v14  ;;  %2003 = vmatmul.f32.gmra.mxu2 %v707_v16  ;;  %v1556_v24 = vadd.f32 %v1555_v21, %v1154_v20  ;;  %2404 = vmatmul.f32.gmra.mxu3 %v708_v18  ;;  %v727_v17 = vld [vmem:[#allocation3 + $0xcb0] sm:$0xff] }
 0x330   :  { %2709 = vst.msk [vmem:[#allocation2 + $0x278] sm:$0xff] %vm64_vm0, %v2580_v19  ;;  %1201 = vmatmul.f32.gmra.mxu0 %v705_v22  ;;  %1602 = vmatmul.f32.gmra.mxu1 %v706_v23  ;;  %v728_v19 = vld [vmem:[#allocation3 + $0xcb8] sm:$0xff]  ;;  %v725_v23 = vld [vmem:[#allocation3 + $0xca0] sm:$0xff] }
 0x331   :  { %v1956_v52 = vpop.f32.mrf.mxu2  ;;  %v2357_v27 = vpop.f32.mrf.mxu3 }
 0x332   :  { %v1957_v25 = vadd.f32 %v1956_v52, %v1556_v24  ;;  %v726_v24 = vld [vmem:[#allocation3 + $0xca8] sm:$0xff] }
 0x334   :  { %v2358_v29 = vadd.f32 %v2357_v27, %v1957_v25  ;;  %v278_v27 = vld [vmem:[#allocation2 + $0x2a8] sm:$0xff] }
 0x335   :  { %v1157_v32 = vpop.f32.mrf.mxu0  ;;  %v1558_v33 = vpop.f32.mrf.mxu1 }
 0x336   :  { %v2581_v31 = vadd.f32 %v2358_v29, %v273_v26  ;;  %2006 = vmatmul.f32.gmra.mxu2 %v711_v28  ;;  %v1559_v36 = vadd.f32 %v1558_v33, %v1157_v32  ;;  %2407 = vmatmul.f32.gmra.mxu3 %v712_v30  ;;  %v731_v29 = vld [vmem:[#allocation3 + $0xcd0] sm:$0xff] }
 0x338   :  { %2710 = vst.msk [vmem:[#allocation2 + $0x280] sm:$0xff] %vm64_vm0, %v2581_v31  ;;  %1204 = vmatmul.f32.gmra.mxu0 %v709_v34  ;;  %1605 = vmatmul.f32.gmra.mxu1 %v710_v35  ;;  %v732_v31 = vld [vmem:[#allocation3 + $0xcd8] sm:$0xff]  ;;  %v729_v35 = vld [vmem:[#allocation3 + $0xcc0] sm:$0xff] }
 0x339   :  { %v1959_v37 = vpop.f32.mrf.mxu2  ;;  %v2360_v40 = vpop.f32.mrf.mxu3 }
 0x33a   :  { %v1960_v38 = vadd.f32 %v1959_v37, %v1559_v36  ;;  %v730_v36 = vld [vmem:[#allocation3 + $0xcc8] sm:$0xff] }
 0x33c   :  { %v2361_v42 = vadd.f32 %v2360_v40, %v1960_v38  ;;  %v279_v40 = vld [vmem:[#allocation2 + $0x2b0] sm:$0xff] }
 0x33d   :  { %v1160_v45 = vpop.f32.mrf.mxu0  ;;  %v1561_v46 = vpop.f32.mrf.mxu1 }
 0x33e   :  { %v2582_v44 = vadd.f32 %v2361_v42, %v274_v39  ;;  %2009 = vmatmul.f32.gmra.mxu2 %v715_v41  ;;  %v1562_v49 = vadd.f32 %v1561_v46, %v1160_v45  ;;  %2410 = vmatmul.f32.gmra.mxu3 %v716_v43  ;;  %v735_v42 = vld [vmem:[#allocation3 + $0xcf0] sm:$0xff] }
 0x340   :  { %2711 = vst.msk [vmem:[#allocation2 + $0x288] sm:$0xff] %vm64_vm0, %v2582_v44  ;;  %1207 = vmatmul.f32.gmra.mxu0 %v713_v47  ;;  %1608 = vmatmul.f32.gmra.mxu1 %v714_v48  ;;  %v736_v44 = vld [vmem:[#allocation3 + $0xcf8] sm:$0xff]  ;;  %v733_v48 = vld [vmem:[#allocation3 + $0xce0] sm:$0xff] }
 0x341   :  { %v1962_v50 = vpop.f32.mrf.mxu2  ;;  %v2363_v54 = vpop.f32.mrf.mxu3 }
 0x342   :  { %v1963_v51 = vadd.f32 %v1962_v50, %v1562_v49  ;;  %v734_v49 = vld [vmem:[#allocation3 + $0xce8] sm:$0xff] }
 0x344   :  { %v2364_v56 = vadd.f32 %v2363_v54, %v1963_v51  ;;  %v280_v54 = vld [vmem:[#allocation2 + $0x2b8] sm:$0xff] }
 0x345   :  { %v1163_v59 = vpop.f32.mrf.mxu0  ;;  %v1564_v60 = vpop.f32.mrf.mxu1 }
 0x346   :  { %v2583_v58 = vadd.f32 %v2364_v56, %v275_v53  ;;  %2012 = vmatmul.f32.gmra.mxu2 %v719_v55  ;;  %v1565_v63 = vadd.f32 %v1564_v60, %v1163_v59  ;;  %2413 = vmatmul.f32.gmra.mxu3 %v720_v57  ;;  %v739_v56 = vld [vmem:[#allocation3 + $0xd10] sm:$0xff] }
 0x348   :  { %2712 = vst.msk [vmem:[#allocation2 + $0x290] sm:$0xff] %vm64_vm0, %v2583_v58  ;;  %1210 = vmatmul.f32.gmra.mxu0 %v717_v61  ;;  %1611 = vmatmul.f32.gmra.mxu1 %v718_v62  ;;  %v740_v58 = vld [vmem:[#allocation3 + $0xd18] sm:$0xff]  ;;  %v737_v62 = vld [vmem:[#allocation3 + $0xd00] sm:$0xff] }
 0x349   :  { %v1965_v0 = vpop.f32.mrf.mxu2  ;;  %v2366_v3 = vpop.f32.mrf.mxu3 }
 0x34a   :  { %v1966_v1 = vadd.f32 %v1965_v0, %v1565_v63  ;;  %v738_v63 = vld [vmem:[#allocation3 + $0xd08] sm:$0xff] }
 0x34c   :  { %v2367_v5 = vadd.f32 %v2366_v3, %v1966_v1  ;;  %v281_v3 = vld [vmem:[#allocation2 + $0x2c0] sm:$0xff] }
 0x34d   :  { %v1166_v8 = vpop.f32.mrf.mxu0  ;;  %v1567_v9 = vpop.f32.mrf.mxu1 }
 0x34e   :  { %v2584_v7 = vadd.f32 %v2367_v5, %v276_v2  ;;  %2015 = vmatmul.f32.gmra.mxu2 %v723_v4  ;;  %v1568_v12 = vadd.f32 %v1567_v9, %v1166_v8  ;;  %2416 = vmatmul.f32.gmra.mxu3 %v724_v6  ;;  %v743_v5 = vld [vmem:[#allocation3 + $0xd30] sm:$0xff] }
 0x350   :  { %2713 = vst.msk [vmem:[#allocation2 + $0x298] sm:$0xff] %vm64_vm0, %v2584_v7  ;;  %1213 = vmatmul.f32.gmra.mxu0 %v721_v10  ;;  %1614 = vmatmul.f32.gmra.mxu1 %v722_v11  ;;  %v744_v7 = vld [vmem:[#allocation3 + $0xd38] sm:$0xff]  ;;  %v741_v11 = vld [vmem:[#allocation3 + $0xd20] sm:$0xff] }
 0x351   :  { %v1968_v13 = vpop.f32.mrf.mxu2  ;;  %v2369_v16 = vpop.f32.mrf.mxu3 }
 0x352   :  { %v1969_v14 = vadd.f32 %v1968_v13, %v1568_v12  ;;  %v742_v12 = vld [vmem:[#allocation3 + $0xd28] sm:$0xff] }
 0x354   :  { %v2370_v18 = vadd.f32 %v2369_v16, %v1969_v14  ;;  %v282_v16 = vld [vmem:[#allocation2 + $0x2c8] sm:$0xff] }
 0x355   :  { %v1169_v21 = vpop.f32.mrf.mxu0  ;;  %v1570_v22 = vpop.f32.mrf.mxu1 }
 0x356   :  { %v2585_v20 = vadd.f32 %v2370_v18, %v277_v15  ;;  %2018 = vmatmul.f32.gmra.mxu2 %v727_v17  ;;  %v1571_v52 = vadd.f32 %v1570_v22, %v1169_v21  ;;  %2419 = vmatmul.f32.gmra.mxu3 %v728_v19  ;;  %v747_v18 = vld [vmem:[#allocation3 + $0xd50] sm:$0xff] }
 0x358   :  { %2714 = vst.msk [vmem:[#allocation2 + $0x2a0] sm:$0xff] %vm64_vm0, %v2585_v20  ;;  %1216 = vmatmul.f32.gmra.mxu0 %v725_v23  ;;  %1617 = vmatmul.f32.gmra.mxu1 %v726_v24  ;;  %v748_v20 = vld [vmem:[#allocation3 + $0xd58] sm:$0xff]  ;;  %v745_v24 = vld [vmem:[#allocation3 + $0xd40] sm:$0xff] }
 0x359   :  { %v1971_v25 = vpop.f32.mrf.mxu2  ;;  %v2372_v28 = vpop.f32.mrf.mxu3 }
 0x35a   :  { %v1972_v26 = vadd.f32 %v1971_v25, %v1571_v52  ;;  %v746_v52 = vld [vmem:[#allocation3 + $0xd48] sm:$0xff] }
 0x35c   :  { %v2373_v30 = vadd.f32 %v2372_v28, %v1972_v26  ;;  %v283_v28 = vld [vmem:[#allocation2 + $0x2d0] sm:$0xff] }
 0x35d   :  { %v1172_v33 = vpop.f32.mrf.mxu0  ;;  %v1573_v34 = vpop.f32.mrf.mxu1 }
 0x35e   :  { %v2586_v32 = vadd.f32 %v2373_v30, %v278_v27  ;;  %2021 = vmatmul.f32.gmra.mxu2 %v731_v29  ;;  %v1574_v37 = vadd.f32 %v1573_v34, %v1172_v33  ;;  %2422 = vmatmul.f32.gmra.mxu3 %v732_v31  ;;  %v751_v30 = vld [vmem:[#allocation3 + $0xd70] sm:$0xff] }
 0x360   :  { %2715 = vst.msk [vmem:[#allocation2 + $0x2a8] sm:$0xff] %vm64_vm0, %v2586_v32  ;;  %1219 = vmatmul.f32.gmra.mxu0 %v729_v35  ;;  %1620 = vmatmul.f32.gmra.mxu1 %v730_v36  ;;  %v752_v32 = vld [vmem:[#allocation3 + $0xd78] sm:$0xff]  ;;  %v749_v36 = vld [vmem:[#allocation3 + $0xd60] sm:$0xff] }
 0x361   :  { %v1974_v38 = vpop.f32.mrf.mxu2  ;;  %v2375_v41 = vpop.f32.mrf.mxu3 }
 0x362   :  { %v1975_v39 = vadd.f32 %v1974_v38, %v1574_v37  ;;  %v750_v37 = vld [vmem:[#allocation3 + $0xd68] sm:$0xff] }
 0x364   :  { %v2376_v43 = vadd.f32 %v2375_v41, %v1975_v39  ;;  %v284_v41 = vld [vmem:[#allocation2 + $0x2d8] sm:$0xff] }
 0x365   :  { %v1175_v46 = vpop.f32.mrf.mxu0  ;;  %v1576_v47 = vpop.f32.mrf.mxu1 }
 0x366   :  { %v2587_v45 = vadd.f32 %v2376_v43, %v279_v40  ;;  %2024 = vmatmul.f32.gmra.mxu2 %v735_v42  ;;  %v1577_v50 = vadd.f32 %v1576_v47, %v1175_v46  ;;  %2425 = vmatmul.f32.gmra.mxu3 %v736_v44  ;;  %v755_v43 = vld [vmem:[#allocation3 + $0xd90] sm:$0xff] }
 0x368   :  { %2716 = vst.msk [vmem:[#allocation2 + $0x2b0] sm:$0xff] %vm64_vm0, %v2587_v45  ;;  %1222 = vmatmul.f32.gmra.mxu0 %v733_v48  ;;  %1623 = vmatmul.f32.gmra.mxu1 %v734_v49  ;;  %v756_v45 = vld [vmem:[#allocation3 + $0xd98] sm:$0xff]  ;;  %v753_v49 = vld [vmem:[#allocation3 + $0xd80] sm:$0xff] }
 0x369   :  { %v1977_v51 = vpop.f32.mrf.mxu2  ;;  %v2378_v55 = vpop.f32.mrf.mxu3 }
 0x36a   :  { %v1978_v53 = vadd.f32 %v1977_v51, %v1577_v50  ;;  %v754_v50 = vld [vmem:[#allocation3 + $0xd88] sm:$0xff] }
 0x36c   :  { %v2379_v57 = vadd.f32 %v2378_v55, %v1978_v53  ;;  %v285_v55 = vld [vmem:[#allocation2 + $0x2e0] sm:$0xff] }
 0x36d   :  { %v1178_v60 = vpop.f32.mrf.mxu0  ;;  %v1579_v61 = vpop.f32.mrf.mxu1 }
 0x36e   :  { %v2588_v59 = vadd.f32 %v2379_v57, %v280_v54  ;;  %2027 = vmatmul.f32.gmra.mxu2 %v739_v56  ;;  %v1580_v0 = vadd.f32 %v1579_v61, %v1178_v60  ;;  %2428 = vmatmul.f32.gmra.mxu3 %v740_v58  ;;  %v759_v57 = vld [vmem:[#allocation3 + $0xdb0] sm:$0xff] }
 0x370   :  { %2717 = vst.msk [vmem:[#allocation2 + $0x2b8] sm:$0xff] %vm64_vm0, %v2588_v59  ;;  %1225 = vmatmul.f32.gmra.mxu0 %v737_v62  ;;  %1626 = vmatmul.f32.gmra.mxu1 %v738_v63  ;;  %v760_v59 = vld [vmem:[#allocation3 + $0xdb8] sm:$0xff]  ;;  %v757_v63 = vld [vmem:[#allocation3 + $0xda0] sm:$0xff] }
 0x371   :  { %v1980_v1 = vpop.f32.mrf.mxu2  ;;  %v2381_v4 = vpop.f32.mrf.mxu3 }
 0x372   :  { %v1981_v2 = vadd.f32 %v1980_v1, %v1580_v0  ;;  %v758_v0 = vld [vmem:[#allocation3 + $0xda8] sm:$0xff] }
 0x374   :  { %v2382_v6 = vadd.f32 %v2381_v4, %v1981_v2  ;;  %v286_v4 = vld [vmem:[#allocation2 + $0x2e8] sm:$0xff] }
 0x375   :  { %v1181_v9 = vpop.f32.mrf.mxu0  ;;  %v1582_v10 = vpop.f32.mrf.mxu1 }
 0x376   :  { %v2589_v8 = vadd.f32 %v2382_v6, %v281_v3  ;;  %2030 = vmatmul.f32.gmra.mxu2 %v743_v5  ;;  %v1583_v13 = vadd.f32 %v1582_v10, %v1181_v9  ;;  %2431 = vmatmul.f32.gmra.mxu3 %v744_v7  ;;  %v763_v6 = vld [vmem:[#allocation3 + $0xdd0] sm:$0xff] }
 0x378   :  { %2718 = vst.msk [vmem:[#allocation2 + $0x2c0] sm:$0xff] %vm64_vm0, %v2589_v8  ;;  %1228 = vmatmul.f32.gmra.mxu0 %v741_v11  ;;  %1629 = vmatmul.f32.gmra.mxu1 %v742_v12  ;;  %v764_v8 = vld [vmem:[#allocation3 + $0xdd8] sm:$0xff]  ;;  %v761_v12 = vld [vmem:[#allocation3 + $0xdc0] sm:$0xff] }
 0x379   :  { %v1983_v14 = vpop.f32.mrf.mxu2  ;;  %v2384_v17 = vpop.f32.mrf.mxu3 }
 0x37a   :  { %v1984_v15 = vadd.f32 %v1983_v14, %v1583_v13  ;;  %v762_v13 = vld [vmem:[#allocation3 + $0xdc8] sm:$0xff] }
 0x37c   :  { %v2385_v19 = vadd.f32 %v2384_v17, %v1984_v15  ;;  %v287_v17 = vld [vmem:[#allocation2 + $0x2f0] sm:$0xff] }
 0x37d   :  { %v1184_v22 = vpop.f32.mrf.mxu0  ;;  %v1585_v23 = vpop.f32.mrf.mxu1 }
 0x37e   :  { %v2590_v21 = vadd.f32 %v2385_v19, %v282_v16  ;;  %2033 = vmatmul.f32.gmra.mxu2 %v747_v18  ;;  %v1586_v25 = vadd.f32 %v1585_v23, %v1184_v22  ;;  %2434 = vmatmul.f32.gmra.mxu3 %v748_v20  ;;  %v767_v19 = vld [vmem:[#allocation3 + $0xdf0] sm:$0xff] }
 0x380   :  { %2719 = vst.msk [vmem:[#allocation2 + $0x2c8] sm:$0xff] %vm64_vm0, %v2590_v21  ;;  %1231 = vmatmul.f32.gmra.mxu0 %v745_v24  ;;  %1632 = vmatmul.f32.gmra.mxu1 %v746_v52  ;;  %v768_v21 = vld [vmem:[#allocation3 + $0xdf8] sm:$0xff]  ;;  %v765_v52 = vld [vmem:[#allocation3 + $0xde0] sm:$0xff] }
 0x381   :  { %v1986_v26 = vpop.f32.mrf.mxu2  ;;  %v2387_v29 = vpop.f32.mrf.mxu3 }
 0x382   :  { %v1987_v27 = vadd.f32 %v1986_v26, %v1586_v25  ;;  %v766_v25 = vld [vmem:[#allocation3 + $0xde8] sm:$0xff] }
 0x384   :  { %v2388_v31 = vadd.f32 %v2387_v29, %v1987_v27  ;;  %v288_v29 = vld [vmem:[#allocation2 + $0x2f8] sm:$0xff] }
 0x385   :  { %v1187_v34 = vpop.f32.mrf.mxu0  ;;  %v1588_v35 = vpop.f32.mrf.mxu1 }
 0x386   :  { %v2591_v33 = vadd.f32 %v2388_v31, %v283_v28  ;;  %2036 = vmatmul.f32.gmra.mxu2 %v751_v30  ;;  %v1589_v38 = vadd.f32 %v1588_v35, %v1187_v34  ;;  %2437 = vmatmul.f32.gmra.mxu3 %v752_v32  ;;  %v771_v31 = vld [vmem:[#allocation3 + $0xe10] sm:$0xff] }
 0x388   :  { %2720 = vst.msk [vmem:[#allocation2 + $0x2d0] sm:$0xff] %vm64_vm0, %v2591_v33  ;;  %1234 = vmatmul.f32.gmra.mxu0 %v749_v36  ;;  %1635 = vmatmul.f32.gmra.mxu1 %v750_v37  ;;  %v772_v33 = vld [vmem:[#allocation3 + $0xe18] sm:$0xff]  ;;  %v769_v37 = vld [vmem:[#allocation3 + $0xe00] sm:$0xff] }
 0x389   :  { %v1989_v39 = vpop.f32.mrf.mxu2  ;;  %v2390_v42 = vpop.f32.mrf.mxu3 }
 0x38a   :  { %v1990_v40 = vadd.f32 %v1989_v39, %v1589_v38  ;;  %v770_v38 = vld [vmem:[#allocation3 + $0xe08] sm:$0xff] }
 0x38c   :  { %v2391_v44 = vadd.f32 %v2390_v42, %v1990_v40  ;;  %v289_v42 = vld [vmem:[#allocation2 + $0x300] sm:$0xff] }
 0x38d   :  { %v1190_v47 = vpop.f32.mrf.mxu0  ;;  %v1591_v48 = vpop.f32.mrf.mxu1 }
 0x38e   :  { %v2592_v46 = vadd.f32 %v2391_v44, %v284_v41  ;;  %2039 = vmatmul.f32.gmra.mxu2 %v755_v43  ;;  %v1592_v51 = vadd.f32 %v1591_v48, %v1190_v47  ;;  %2440 = vmatmul.f32.gmra.mxu3 %v756_v45  ;;  %v775_v44 = vld [vmem:[#allocation3 + $0xe30] sm:$0xff] }
 0x390   :  { %2721 = vst.msk [vmem:[#allocation2 + $0x2d8] sm:$0xff] %vm64_vm0, %v2592_v46  ;;  %1237 = vmatmul.f32.gmra.mxu0 %v753_v49  ;;  %1638 = vmatmul.f32.gmra.mxu1 %v754_v50  ;;  %v776_v46 = vld [vmem:[#allocation3 + $0xe38] sm:$0xff]  ;;  %v773_v50 = vld [vmem:[#allocation3 + $0xe20] sm:$0xff] }
 0x391   :  { %v1992_v53 = vpop.f32.mrf.mxu2  ;;  %v2393_v56 = vpop.f32.mrf.mxu3 }
 0x392   :  { %v1993_v54 = vadd.f32 %v1992_v53, %v1592_v51  ;;  %v774_v51 = vld [vmem:[#allocation3 + $0xe28] sm:$0xff] }
 0x394   :  { %v2394_v58 = vadd.f32 %v2393_v56, %v1993_v54  ;;  %v290_v56 = vld [vmem:[#allocation2 + $0x308] sm:$0xff] }
 0x395   :  { %v1193_v61 = vpop.f32.mrf.mxu0  ;;  %v1594_v62 = vpop.f32.mrf.mxu1 }
 0x396   :  { %v2593_v60 = vadd.f32 %v2394_v58, %v285_v55  ;;  %2042 = vmatmul.f32.gmra.mxu2 %v759_v57  ;;  %v1595_v1 = vadd.f32 %v1594_v62, %v1193_v61  ;;  %2443 = vmatmul.f32.gmra.mxu3 %v760_v59  ;;  %v779_v58 = vld [vmem:[#allocation3 + $0xe50] sm:$0xff] }
 0x398   :  { %2722 = vst.msk [vmem:[#allocation2 + $0x2e0] sm:$0xff] %vm64_vm0, %v2593_v60  ;;  %1240 = vmatmul.f32.gmra.mxu0 %v757_v63  ;;  %1641 = vmatmul.f32.gmra.mxu1 %v758_v0  ;;  %v780_v60 = vld [vmem:[#allocation3 + $0xe58] sm:$0xff]  ;;  %v777_v0 = vld [vmem:[#allocation3 + $0xe40] sm:$0xff] }
 0x399   :  { %v1995_v2 = vpop.f32.mrf.mxu2  ;;  %v2396_v5 = vpop.f32.mrf.mxu3 }
 0x39a   :  { %v1996_v3 = vadd.f32 %v1995_v2, %v1595_v1  ;;  %v778_v1 = vld [vmem:[#allocation3 + $0xe48] sm:$0xff] }
 0x39c   :  { %v2397_v7 = vadd.f32 %v2396_v5, %v1996_v3  ;;  %v291_v5 = vld [vmem:[#allocation2 + $0x310] sm:$0xff] }
 0x39d   :  { %v1196_v10 = vpop.f32.mrf.mxu0  ;;  %v1597_v11 = vpop.f32.mrf.mxu1 }
 0x39e   :  { %v2594_v9 = vadd.f32 %v2397_v7, %v286_v4  ;;  %2045 = vmatmul.f32.gmra.mxu2 %v763_v6  ;;  %v1598_v14 = vadd.f32 %v1597_v11, %v1196_v10  ;;  %2446 = vmatmul.f32.gmra.mxu3 %v764_v8  ;;  %v783_v7 = vld [vmem:[#allocation3 + $0xe70] sm:$0xff]  ;;  %v2762_v10 = vld [vmem:[#allocation2 + $0x8] sm:$0xff] }
 0x3a0   :  { %2723 = vst.msk [vmem:[#allocation2 + $0x2e8] sm:$0xff] %vm64_vm0, %v2594_v9  ;;  %1243 = vmatmul.f32.gmra.mxu0 %v761_v12  ;;  %1644 = vmatmul.f32.gmra.mxu1 %v762_v13  ;;  %v784_v9 = vld [vmem:[#allocation3 + $0xe78] sm:$0xff] }
 0x3a1   :  { %v1998_v15 = vpop.f32.mrf.mxu2  ;;  %v2399_v18 = vpop.f32.mrf.mxu3 }
 0x3a2   :  { %v1999_v16 = vadd.f32 %v1998_v15, %v1598_v14  ;;  %v781_v14 = vld [vmem:[#allocation3 + $0xe60] sm:$0xff]  ;;  %v782_v15 = vld [vmem:[#allocation3 + $0xe68] sm:$0xff] }
 0x3a4   :  { %v2400_v20 = vadd.f32 %v2399_v18, %v1999_v16  ;;  %v2761_v16 = vld [vmem:[#allocation2] sm:$0xff] }
 0x3a5   :  { %v1199_v23 = vpop.f32.mrf.mxu0  ;;  %v1600_v24 = vpop.f32.mrf.mxu1 }
 0x3a6   :  { %v2595_v22 = vadd.f32 %v2400_v20, %v287_v17  ;;  %2048 = vmatmul.f32.gmra.mxu2 %v767_v19  ;;  %v1601_v26 = vadd.f32 %v1600_v24, %v1199_v23  ;;  %2449 = vmatmul.f32.gmra.mxu3 %v768_v21  ;;  %v2763_v17 = vld [vmem:[#allocation2 + $0x10] sm:$0xff]  ;;  %v2890_v19 = vsel %vm64_vm0, %v2762_v10, 0.0  ;;  %v2764_v21 = vld [vmem:[#allocation2 + $0x18] sm:$0xff]  ;;  %v2889_v23 = vsel %vm64_vm0, %v2761_v16, 0.0 }
 0x3a7   :  { %v2892_v24 = vsel %vm64_vm0, %v2763_v17, 0.0 }
 0x3a8   :  { %2724 = vst.msk [vmem:[#allocation2 + $0x2f0] sm:$0xff] %vm64_vm0, %v2595_v22  ;;  %1246 = vmatmul.f32.gmra.mxu0 %v765_v52  ;;  %1647 = vmatmul.f32.gmra.mxu1 %v766_v25  ;;  %v292_v52 = vld [vmem:[#allocation2 + $0x318] sm:$0xff] }
 0x3a9   :  { %v2001_v27 = vpop.f32.mrf.mxu2  ;;  %v2402_v30 = vpop.f32.mrf.mxu3 }
 0x3aa   :  { %v2002_v28 = vadd.f32 %v2001_v27, %v1601_v26  ;;  %v787_v26 = vld [vmem:[#allocation3 + $0xe90] sm:$0xff]  ;;  %v2891_v27 = vadd.f32 %v2890_v19, %v2889_v23 }
 0x3ac   :  { %v2403_v32 = vadd.f32 %v2402_v30, %v2002_v28  ;;  %v2765_v28 = vld [vmem:[#allocation2 + $0x20] sm:$0xff]  ;;  %v2894_v30 = vsel %vm64_vm0, %v2764_v21, 0.0 }
 0x3ad   :  { %v1202_v35 = vpop.f32.mrf.mxu0  ;;  %v1603_v36 = vpop.f32.mrf.mxu1 }
 0x3ae   :  { %v2596_v34 = vadd.f32 %v2403_v32, %v288_v29  ;;  %2051 = vmatmul.f32.gmra.mxu2 %v771_v31  ;;  %v1604_v39 = vadd.f32 %v1603_v36, %v1202_v35  ;;  %2452 = vmatmul.f32.gmra.mxu3 %v772_v33  ;;  %v788_v31 = vld [vmem:[#allocation3 + $0xe98] sm:$0xff]  ;;  %v2893_v32 = vadd.f32 %v2892_v24, %v2891_v27  ;;  %v2766_v33 = vld [vmem:[#allocation2 + $0x28] sm:$0xff]  ;;  %v2896_v35 = vsel %vm64_vm0, %v2765_v28, 0.0  ;;  %v2775_v27 = vld [vmem:[#allocation2 + $0x70] sm:$0xff] }
 0x3b0   :  { %2725 = vst.msk [vmem:[#allocation2 + $0x2f8] sm:$0xff] %vm64_vm0, %v2596_v34  ;;  %1249 = vmatmul.f32.gmra.mxu0 %v769_v37  ;;  %1650 = vmatmul.f32.gmra.mxu1 %v770_v38  ;;  %v785_v38 = vld [vmem:[#allocation3 + $0xe80] sm:$0xff] }
 0x3b1   :  { %v2004_v40 = vpop.f32.mrf.mxu2  ;;  %v2405_v43 = vpop.f32.mrf.mxu3 }
 0x3b2   :  { %v2005_v41 = vadd.f32 %v2004_v40, %v1604_v39  ;;  %v786_v39 = vld [vmem:[#allocation3 + $0xe88] sm:$0xff]  ;;  %v2895_v40 = vadd.f32 %v2894_v30, %v2893_v32  ;;  %v2776_v32 = vld [vmem:[#allocation2 + $0x78] sm:$0xff] }
 0x3b4   :  { %v2406_v45 = vadd.f32 %v2405_v43, %v2005_v41  ;;  %v2767_v41 = vld [vmem:[#allocation2 + $0x30] sm:$0xff]  ;;  %v2898_v43 = vsel %vm64_vm0, %v2766_v33, 0.0 }
 0x3b5   :  { %v1205_v48 = vpop.f32.mrf.mxu0  ;;  %v1606_v49 = vpop.f32.mrf.mxu1 }
 0x3b6   :  { %v2597_v47 = vadd.f32 %v2406_v45, %v289_v42  ;;  %2054 = vmatmul.f32.gmra.mxu2 %v775_v44  ;;  %v1607_v53 = vadd.f32 %v1606_v49, %v1205_v48  ;;  %2455 = vmatmul.f32.gmra.mxu3 %v776_v46  ;;  %v2897_v45 = vadd.f32 %v2896_v35, %v2895_v40  ;;  %v2768_v46 = vld [vmem:[#allocation2 + $0x38] sm:$0xff]  ;;  %v2900_v48 = vsel %vm64_vm0, %v2767_v41, 0.0  ;;  %v293_v49 = vld [vmem:[#allocation2 + $0x320] sm:$0xff]  ;;  %v295_v35 = vld [vmem:[#allocation2 + $0x330] sm:$0xff] }
 0x3b7   :  { %v2918_v41 = vsel %vm64_vm0, %v2776_v32, 0.0 }
 0x3b8   :  { %2726 = vst.msk [vmem:[#allocation2 + $0x300] sm:$0xff] %vm64_vm0, %v2597_v47  ;;  %1252 = vmatmul.f32.gmra.mxu0 %v773_v50  ;;  %1653 = vmatmul.f32.gmra.mxu1 %v774_v51  ;;  %v791_v51 = vld [vmem:[#allocation3 + $0xeb0] sm:$0xff] }
 0x3b9   :  { %v2007_v54 = vpop.f32.mrf.mxu2  ;;  %v2408_v57 = vpop.f32.mrf.mxu3 }
 0x3ba   :  { %v2008_v55 = vadd.f32 %v2007_v54, %v1607_v53  ;;  %v2899_v53 = vadd.f32 %v2898_v43, %v2897_v45  ;;  %v2769_v54 = vld [vmem:[#allocation2 + $0x40] sm:$0xff] }
 0x3bc   :  { %v2409_v59 = vadd.f32 %v2408_v57, %v2008_v55  ;;  %v792_v57 = vld [vmem:[#allocation3 + $0xeb8] sm:$0xff] }
 0x3bd   :  { %v1208_v62 = vpop.f32.mrf.mxu0  ;;  %v1609_v63 = vpop.f32.mrf.mxu1 }
 0x3be   :  { %v2598_v61 = vadd.f32 %v2409_v59, %v290_v56  ;;  %2057 = vmatmul.f32.gmra.mxu2 %v779_v58  ;;  %v1610_v2 = vadd.f32 %v1609_v63, %v1208_v62  ;;  %2458 = vmatmul.f32.gmra.mxu3 %v780_v60  ;;  %v2902_v56 = vsel %vm64_vm0, %v2768_v46, 0.0  ;;  %v2901_v58 = vadd.f32 %v2900_v48, %v2899_v53  ;;  %v2770_v59 = vld [vmem:[#allocation2 + $0x48] sm:$0xff]  ;;  %v2779_v53 = vld [vmem:[#allocation2 + $0x90] sm:$0xff] }
 0x3c0   :  { %2727 = vst.msk [vmem:[#allocation2 + $0x308] sm:$0xff] %vm64_vm0, %v2598_v61  ;;  %1255 = vmatmul.f32.gmra.mxu0 %v777_v0  ;;  %1656 = vmatmul.f32.gmra.mxu1 %v778_v1  ;;  %v2904_v61 = vsel %vm64_vm0, %v2769_v54, 0.0  ;;  %v789_v0 = vld [vmem:[#allocation3 + $0xea0] sm:$0xff]  ;;  %v790_v1 = vld [vmem:[#allocation3 + $0xea8] sm:$0xff] }
 0x3c1   :  { %v2010_v3 = vpop.f32.mrf.mxu2  ;;  %v2411_v6 = vpop.f32.mrf.mxu3 }
 0x3c2   :  { %v2011_v4 = vadd.f32 %v2010_v3, %v1610_v2  ;;  %v2903_v2 = vadd.f32 %v2902_v56, %v2901_v58  ;;  %v2771_v3 = vld [vmem:[#allocation2 + $0x50] sm:$0xff]  ;;  %v2780_v58 = vld [vmem:[#allocation2 + $0x98] sm:$0xff] }
 0x3c3   :  { %v2908_v10 = vsel %vm64_vm0, %v2771_v3, 0.0  ;;  %v2926_v3 = vsel %vm64_vm0, %v2780_v58, 0.0 }
 0x3c4   :  { %v2412_v8 = vadd.f32 %v2411_v6, %v2011_v4 }
 0x3c5   :  { %v1211_v12 = vpop.f32.mrf.mxu0  ;;  %v1612_v13 = vpop.f32.mrf.mxu1 }
 0x3c6   :  { %v2599_v11 = vadd.f32 %v2412_v8, %v291_v5  ;;  %2060 = vmatmul.f32.gmra.mxu2 %v783_v7  ;;  %v1613_v18 = vadd.f32 %v1612_v13, %v1211_v12  ;;  %2461 = vmatmul.f32.gmra.mxu3 %v784_v9  ;;  %v2906_v5 = vsel %vm64_vm0, %v2770_v59, 0.0  ;;  %v2905_v7 = vadd.f32 %v2904_v61, %v2903_v2  ;;  %v2772_v8 = vld [vmem:[#allocation2 + $0x58] sm:$0xff]  ;;  %v795_v13 = vld [vmem:[#allocation3 + $0xed0] sm:$0xff] }
 0x3c7   :  { %v2910_v17 = vsel %vm64_vm0, %v2772_v8, 0.0  ;;  %v296_v61 = vld [vmem:[#allocation2 + $0x338] sm:$0xff] }
 0x3c8   :  { %2728 = vst.msk [vmem:[#allocation2 + $0x310] sm:$0xff] %vm64_vm0, %v2599_v11  ;;  %1258 = vmatmul.f32.gmra.mxu0 %v781_v14  ;;  %1659 = vmatmul.f32.gmra.mxu1 %v782_v15  ;;  %v294_v11 = vld [vmem:[#allocation2 + $0x328] sm:$0xff]  ;;  %v2907_v14 = vadd.f32 %v2906_v5, %v2905_v7  ;;  %v2773_v15 = vld [vmem:[#allocation2 + $0x60] sm:$0xff] }
 0x3c9   :  { %v2013_v20 = vpop.f32.mrf.mxu2  ;;  %v2414_v25 = vpop.f32.mrf.mxu3 }
 0x3ca   :  { %v2014_v22 = vadd.f32 %v2013_v20, %v1613_v18  ;;  %v796_v18 = vld [vmem:[#allocation3 + $0xed8] sm:$0xff]  ;;  %v2909_v19 = vadd.f32 %v2908_v10, %v2907_v14  ;;  %v2774_v20 = vld [vmem:[#allocation2 + $0x68] sm:$0xff]  ;;  %v2783_v14 = vld [vmem:[#allocation2 + $0xb0] sm:$0xff] }
 0x3cc   :  { %v2415_v29 = vadd.f32 %v2414_v25, %v2014_v22  ;;  %v2912_v22 = vsel %vm64_vm0, %v2773_v15, 0.0  ;;  %v794_v25 = vld [vmem:[#allocation3 + $0xec8] sm:$0xff] }
 0x3cd   :  { %v1214_v36 = vpop.f32.mrf.mxu0  ;;  %v1615_v37 = vpop.f32.mrf.mxu1 }
 0x3ce   :  { %v2600_v34 = vadd.f32 %v2415_v29, %v292_v52  ;;  %2063 = vmatmul.f32.gmra.mxu2 %v787_v26  ;;  %v1616_v42 = vadd.f32 %v1615_v37, %v1214_v36  ;;  %2464 = vmatmul.f32.gmra.mxu3 %v788_v31  ;;  %v793_v52 = vld [vmem:[#allocation3 + $0xec0] sm:$0xff]  ;;  %v2911_v26 = vadd.f32 %v2910_v17, %v2909_v19  ;;  %v2914_v29 = vsel %vm64_vm0, %v2774_v20, 0.0  ;;  %v799_v37 = vld [vmem:[#allocation3 + $0xef0] sm:$0xff]  ;;  %v2784_v19 = vld [vmem:[#allocation2 + $0xb8] sm:$0xff] }
 0x3d0   :  { %2729 = vst.msk [vmem:[#allocation2 + $0x318] sm:$0xff] %vm64_vm0, %v2600_v34  ;;  %1261 = vmatmul.f32.gmra.mxu0 %v785_v38  ;;  %1662 = vmatmul.f32.gmra.mxu1 %v786_v39  ;;  %v2913_v31 = vadd.f32 %v2912_v22, %v2911_v26  ;;  %v2916_v34 = vsel %vm64_vm0, %v2775_v27, 0.0  ;;  %v2777_v39 = vld [vmem:[#allocation2 + $0x80] sm:$0xff]  ;;  %v2934_v27 = vsel %vm64_vm0, %v2784_v19, 0.0 }
 0x3d1   :  { %v2016_v44 = vpop.f32.mrf.mxu2  ;;  %v2417_v50 = vpop.f32.mrf.mxu3  ;;  %v2920_v46 = vsel %vm64_vm0, %v2777_v39, 0.0  ;;  %v297_v22 = vld [vmem:[#allocation2 + $0x340] sm:$0xff] }
 0x3d2   :  { %v2017_v47 = vadd.f32 %v2016_v44, %v1616_v42  ;;  %v2915_v38 = vadd.f32 %v2914_v29, %v2913_v31  ;;  %v800_v42 = vld [vmem:[#allocation3 + $0xef8] sm:$0xff]  ;;  %v2778_v44 = vld [vmem:[#allocation2 + $0x88] sm:$0xff] }
 0x3d4   :  { %v2418_v55 = vadd.f32 %v2417_v50, %v2017_v47  ;;  %v2917_v43 = vadd.f32 %v2916_v34, %v2915_v38  ;;  %v798_v50 = vld [vmem:[#allocation3 + $0xee8] sm:$0xff]  ;;  %v2787_v38 = vld [vmem:[#allocation2 + $0xd0] sm:$0xff] }
 0x3d5   :  { %v1217_v62 = vpop.f32.mrf.mxu0  ;;  %v1618_v63 = vpop.f32.mrf.mxu1 }
 0x3d6   :  { %v2601_v60 = vadd.f32 %v2418_v55, %v293_v49  ;;  %2066 = vmatmul.f32.gmra.mxu2 %v791_v51  ;;  %v1619_v4 = vadd.f32 %v1618_v63, %v1217_v62  ;;  %2467 = vmatmul.f32.gmra.mxu3 %v792_v57  ;;  %v797_v49 = vld [vmem:[#allocation3 + $0xee0] sm:$0xff]  ;;  %v2919_v51 = vadd.f32 %v2918_v41, %v2917_v43  ;;  %v2922_v55 = vsel %vm64_vm0, %v2778_v44, 0.0  ;;  %v803_v63 = vld [vmem:[#allocation3 + $0xf10] sm:$0xff]  ;;  %v2788_v43 = vld [vmem:[#allocation2 + $0xd8] sm:$0xff] }
 0x3d8   :  { %2730 = vst.msk [vmem:[#allocation2 + $0x320] sm:$0xff] %vm64_vm0, %v2601_v60  ;;  %1264 = vmatmul.f32.gmra.mxu0 %v789_v0  ;;  %1665 = vmatmul.f32.gmra.mxu1 %v790_v1  ;;  %v2921_v57 = vadd.f32 %v2920_v46, %v2919_v51  ;;  %v2924_v60 = vsel %vm64_vm0, %v2779_v53, 0.0  ;;  %v2781_v1 = vld [vmem:[#allocation2 + $0xa0] sm:$0xff]  ;;  %v298_v46 = vld [vmem:[#allocation2 + $0x348] sm:$0xff]  ;;  %v2942_v53 = vsel %vm64_vm0, %v2788_v43, 0.0 }
 0x3d9   :  { %v2019_v6 = vpop.f32.mrf.mxu2  ;;  %v2420_v12 = vpop.f32.mrf.mxu3  ;;  %v2928_v8 = vsel %vm64_vm0, %v2781_v1, 0.0 }
 0x3da   :  { %v2020_v9 = vadd.f32 %v2019_v6, %v1619_v4  ;;  %v2923_v0 = vadd.f32 %v2922_v55, %v2921_v57  ;;  %v804_v4 = vld [vmem:[#allocation3 + $0xf18] sm:$0xff]  ;;  %v2782_v6 = vld [vmem:[#allocation2 + $0xa8] sm:$0xff] }
 0x3dc   :  { %v2421_v16 = vadd.f32 %v2420_v12, %v2020_v9  ;;  %v2925_v5 = vadd.f32 %v2924_v60, %v2923_v0  ;;  %v802_v12 = vld [vmem:[#allocation3 + $0xf08] sm:$0xff]  ;;  %v2791_v0 = vld [vmem:[#allocation2 + $0xf0] sm:$0xff] }
 0x3dd   :  { %v1220_v23 = vpop.f32.mrf.mxu0  ;;  %v1621_v24 = vpop.f32.mrf.mxu1 }
 0x3de   :  { %v2602_v21 = vadd.f32 %v2421_v16, %v294_v11  ;;  %2069 = vmatmul.f32.gmra.mxu2 %v795_v13  ;;  %v1622_v28 = vadd.f32 %v1621_v24, %v1220_v23  ;;  %2470 = vmatmul.f32.gmra.mxu3 %v796_v18  ;;  %v801_v11 = vld [vmem:[#allocation3 + $0xf00] sm:$0xff]  ;;  %v2927_v13 = vadd.f32 %v2926_v3, %v2925_v5  ;;  %v2930_v16 = vsel %vm64_vm0, %v2782_v6, 0.0  ;;  %v807_v24 = vld [vmem:[#allocation3 + $0xf30] sm:$0xff]  ;;  %v2792_v5 = vld [vmem:[#allocation2 + $0xf8] sm:$0xff] }
 0x3e0   :  { %2731 = vst.msk [vmem:[#allocation2 + $0x328] sm:$0xff] %vm64_vm0, %v2602_v21  ;;  %1267 = vmatmul.f32.gmra.mxu0 %v793_v52  ;;  %1668 = vmatmul.f32.gmra.mxu1 %v794_v25  ;;  %v2929_v18 = vadd.f32 %v2928_v8, %v2927_v13  ;;  %v2932_v21 = vsel %vm64_vm0, %v2783_v14, 0.0  ;;  %v2785_v25 = vld [vmem:[#allocation2 + $0xc0] sm:$0xff]  ;;  %v299_v8 = vld [vmem:[#allocation2 + $0x350] sm:$0xff]  ;;  %v2950_v14 = vsel %vm64_vm0, %v2792_v5, 0.0 }
 0x3e1   :  { %v2022_v30 = vpop.f32.mrf.mxu2  ;;  %v2423_v36 = vpop.f32.mrf.mxu3  ;;  %v2936_v32 = vsel %vm64_vm0, %v2785_v25, 0.0 }
 0x3e2   :  { %v2023_v33 = vadd.f32 %v2022_v30, %v1622_v28  ;;  %v2931_v52 = vadd.f32 %v2930_v16, %v2929_v18  ;;  %v808_v28 = vld [vmem:[#allocation3 + $0xf38] sm:$0xff]  ;;  %v2786_v30 = vld [vmem:[#allocation2 + $0xc8] sm:$0xff] }
 0x3e4   :  { %v2424_v40 = vadd.f32 %v2423_v36, %v2023_v33  ;;  %v2933_v29 = vadd.f32 %v2932_v21, %v2931_v52  ;;  %v806_v36 = vld [vmem:[#allocation3 + $0xf28] sm:$0xff]  ;;  %v2795_v52 = vld [vmem:[#allocation2 + $0x110] sm:$0xff] }
 0x3e5   :  { %v1223_v47 = vpop.f32.mrf.mxu0  ;;  %v1624_v48 = vpop.f32.mrf.mxu1 }
 0x3e6   :  { %v2603_v45 = vadd.f32 %v2424_v40, %v295_v35  ;;  %2072 = vmatmul.f32.gmra.mxu2 %v799_v37  ;;  %v1625_v54 = vadd.f32 %v1624_v48, %v1223_v47  ;;  %2473 = vmatmul.f32.gmra.mxu3 %v800_v42  ;;  %v805_v35 = vld [vmem:[#allocation3 + $0xf20] sm:$0xff]  ;;  %v2935_v37 = vadd.f32 %v2934_v27, %v2933_v29  ;;  %v2938_v40 = vsel %vm64_vm0, %v2786_v30, 0.0  ;;  %v811_v48 = vld [vmem:[#allocation3 + $0xf50] sm:$0xff]  ;;  %v2796_v29 = vld [vmem:[#allocation2 + $0x118] sm:$0xff] }
 0x3e8   :  { %2732 = vst.msk [vmem:[#allocation2 + $0x330] sm:$0xff] %vm64_vm0, %v2603_v45  ;;  %1270 = vmatmul.f32.gmra.mxu0 %v797_v49  ;;  %1671 = vmatmul.f32.gmra.mxu1 %v798_v50  ;;  %v2937_v42 = vadd.f32 %v2936_v32, %v2935_v37  ;;  %v2940_v45 = vsel %vm64_vm0, %v2787_v38, 0.0  ;;  %v2789_v50 = vld [vmem:[#allocation2 + $0xe0] sm:$0xff]  ;;  %v300_v32 = vld [vmem:[#allocation2 + $0x358] sm:$0xff]  ;;  %v2958_v38 = vsel %vm64_vm0, %v2796_v29, 0.0 }
 0x3e9   :  { %v2025_v56 = vpop.f32.mrf.mxu2  ;;  %v2426_v62 = vpop.f32.mrf.mxu3  ;;  %v2944_v58 = vsel %vm64_vm0, %v2789_v50, 0.0 }
 0x3ea   :  { %v2026_v59 = vadd.f32 %v2025_v56, %v1625_v54  ;;  %v2939_v49 = vadd.f32 %v2938_v40, %v2937_v42  ;;  %v812_v54 = vld [vmem:[#allocation3 + $0xf58] sm:$0xff]  ;;  %v2790_v56 = vld [vmem:[#allocation2 + $0xe8] sm:$0xff] }
 0x3ec   :  { %v2427_v2 = vadd.f32 %v2426_v62, %v2026_v59  ;;  %v2941_v55 = vadd.f32 %v2940_v45, %v2939_v49  ;;  %v810_v62 = vld [vmem:[#allocation3 + $0xf48] sm:$0xff]  ;;  %v2799_v49 = vld [vmem:[#allocation2 + $0x130] sm:$0xff] }
 0x3ed   :  { %v1226_v9 = vpop.f32.mrf.mxu0  ;;  %v1627_v10 = vpop.f32.mrf.mxu1 }
 0x3ee   :  { %v2604_v7 = vadd.f32 %v2427_v2, %v296_v61  ;;  %2075 = vmatmul.f32.gmra.mxu2 %v803_v63  ;;  %v1628_v15 = vadd.f32 %v1627_v10, %v1226_v9  ;;  %2476 = vmatmul.f32.gmra.mxu3 %v804_v4  ;;  %v809_v61 = vld [vmem:[#allocation3 + $0xf40] sm:$0xff]  ;;  %v2943_v63 = vadd.f32 %v2942_v53, %v2941_v55  ;;  %v2946_v2 = vsel %vm64_vm0, %v2790_v56, 0.0  ;;  %v815_v10 = vld [vmem:[#allocation3 + $0xf70] sm:$0xff]  ;;  %v2800_v55 = vld [vmem:[#allocation2 + $0x138] sm:$0xff] }
 0x3f0   :  { %2733 = vst.msk [vmem:[#allocation2 + $0x338] sm:$0xff] %vm64_vm0, %v2604_v7  ;;  %1273 = vmatmul.f32.gmra.mxu0 %v801_v11  ;;  %1674 = vmatmul.f32.gmra.mxu1 %v802_v12  ;;  %v2945_v4 = vadd.f32 %v2944_v58, %v2943_v63  ;;  %v2948_v7 = vsel %vm64_vm0, %v2791_v0, 0.0  ;;  %v2793_v12 = vld [vmem:[#allocation2 + $0x100] sm:$0xff]  ;;  %v2966_v0 = vsel %vm64_vm0, %v2800_v55, 0.0 }
 0x3f1   :  { %v2028_v17 = vpop.f32.mrf.mxu2  ;;  %v2429_v23 = vpop.f32.mrf.mxu3  ;;  %v2952_v19 = vsel %vm64_vm0, %v2793_v12, 0.0  ;;  %v301_v58 = vld [vmem:[#allocation2 + $0x360] sm:$0xff] }
 0x3f2   :  { %v2029_v20 = vadd.f32 %v2028_v17, %v1628_v15  ;;  %v2947_v11 = vadd.f32 %v2946_v2, %v2945_v4  ;;  %v816_v15 = vld [vmem:[#allocation3 + $0xf78] sm:$0xff]  ;;  %v2794_v17 = vld [vmem:[#allocation2 + $0x108] sm:$0xff] }
 0x3f4   :  { %v2430_v26 = vadd.f32 %v2429_v23, %v2029_v20  ;;  %v2949_v16 = vadd.f32 %v2948_v7, %v2947_v11  ;;  %v814_v23 = vld [vmem:[#allocation3 + $0xf68] sm:$0xff]  ;;  %v2803_v11 = vld [vmem:[#allocation2 + $0x150] sm:$0xff] }
 0x3f5   :  { %v1229_v33 = vpop.f32.mrf.mxu0  ;;  %v1630_v34 = vpop.f32.mrf.mxu1 }
 0x3f6   :  { %v2605_v31 = vadd.f32 %v2430_v26, %v297_v22  ;;  %2078 = vmatmul.f32.gmra.mxu2 %v807_v24  ;;  %v1631_v39 = vadd.f32 %v1630_v34, %v1229_v33  ;;  %2479 = vmatmul.f32.gmra.mxu3 %v808_v28  ;;  %v813_v22 = vld [vmem:[#allocation3 + $0xf60] sm:$0xff]  ;;  %v2951_v24 = vadd.f32 %v2950_v14, %v2949_v16  ;;  %v2954_v26 = vsel %vm64_vm0, %v2794_v17, 0.0  ;;  %v819_v34 = vld [vmem:[#allocation3 + $0xf90] sm:$0xff]  ;;  %v2804_v16 = vld [vmem:[#allocation2 + $0x158] sm:$0xff] }
 0x3f8   :  { %2734 = vst.msk [vmem:[#allocation2 + $0x340] sm:$0xff] %vm64_vm0, %v2605_v31  ;;  %1276 = vmatmul.f32.gmra.mxu0 %v805_v35  ;;  %1677 = vmatmul.f32.gmra.mxu1 %v806_v36  ;;  %v2953_v28 = vadd.f32 %v2952_v19, %v2951_v24  ;;  %v2956_v31 = vsel %vm64_vm0, %v2795_v52, 0.0  ;;  %v2797_v36 = vld [vmem:[#allocation2 + $0x120] sm:$0xff]  ;;  %v302_v19 = vld [vmem:[#allocation2 + $0x368] sm:$0xff]  ;;  %v2974_v52 = vsel %vm64_vm0, %v2804_v16, 0.0 }
 0x3f9   :  { %v2031_v41 = vpop.f32.mrf.mxu2  ;;  %v2432_v47 = vpop.f32.mrf.mxu3  ;;  %v2960_v43 = vsel %vm64_vm0, %v2797_v36, 0.0 }
 0x3fa   :  { %v2032_v44 = vadd.f32 %v2031_v41, %v1631_v39  ;;  %v2955_v35 = vadd.f32 %v2954_v26, %v2953_v28  ;;  %v820_v39 = vld [vmem:[#allocation3 + $0xf98] sm:$0xff]  ;;  %v2798_v41 = vld [vmem:[#allocation2 + $0x128] sm:$0xff] }
 0x3fc   :  { %v2433_v51 = vadd.f32 %v2432_v47, %v2032_v44  ;;  %v2957_v40 = vadd.f32 %v2956_v31, %v2955_v35  ;;  %v818_v47 = vld [vmem:[#allocation3 + $0xf88] sm:$0xff]  ;;  %v2807_v35 = vld [vmem:[#allocation2 + $0x170] sm:$0xff] }
 0x3fd   :  { %v1232_v59 = vpop.f32.mrf.mxu0  ;;  %v1633_v60 = vpop.f32.mrf.mxu1 }
 0x3fe   :  { %v2606_v57 = vadd.f32 %v2433_v51, %v298_v46  ;;  %2081 = vmatmul.f32.gmra.mxu2 %v811_v48  ;;  %v1634_v1 = vadd.f32 %v1633_v60, %v1232_v59  ;;  %2482 = vmatmul.f32.gmra.mxu3 %v812_v54  ;;  %v817_v46 = vld [vmem:[#allocation3 + $0xf80] sm:$0xff]  ;;  %v2959_v48 = vadd.f32 %v2958_v38, %v2957_v40  ;;  %v2962_v51 = vsel %vm64_vm0, %v2798_v41, 0.0  ;;  %v823_v60 = vld [vmem:[#allocation3 + $0xfb0] sm:$0xff]  ;;  %v2808_v40 = vld [vmem:[#allocation2 + $0x178] sm:$0xff] }
 0x400   :  { %2735 = vst.msk [vmem:[#allocation2 + $0x348] sm:$0xff] %vm64_vm0, %v2606_v57  ;;  %1279 = vmatmul.f32.gmra.mxu0 %v809_v61  ;;  %1680 = vmatmul.f32.gmra.mxu1 %v810_v62  ;;  %v2961_v54 = vadd.f32 %v2960_v43, %v2959_v48  ;;  %v2964_v57 = vsel %vm64_vm0, %v2799_v49, 0.0  ;;  %v2801_v62 = vld [vmem:[#allocation2 + $0x140] sm:$0xff]  ;;  %v303_v43 = vld [vmem:[#allocation2 + $0x370] sm:$0xff]  ;;  %v2982_v49 = vsel %vm64_vm0, %v2808_v40, 0.0 }
 0x401   :  { %v2034_v3 = vpop.f32.mrf.mxu2  ;;  %v2435_v9 = vpop.f32.mrf.mxu3  ;;  %v2968_v5 = vsel %vm64_vm0, %v2801_v62, 0.0 }
 0x402   :  { %v2035_v6 = vadd.f32 %v2034_v3, %v1634_v1  ;;  %v2963_v61 = vadd.f32 %v2962_v51, %v2961_v54  ;;  %v824_v1 = vld [vmem:[#allocation3 + $0xfb8] sm:$0xff]  ;;  %v2802_v3 = vld [vmem:[#allocation2 + $0x148] sm:$0xff] }
 0x404   :  { %v2436_v13 = vadd.f32 %v2435_v9, %v2035_v6  ;;  %v2965_v2 = vadd.f32 %v2964_v57, %v2963_v61  ;;  %v822_v9 = vld [vmem:[#allocation3 + $0xfa8] sm:$0xff]  ;;  %v2811_v61 = vld [vmem:[#allocation2 + $0x190] sm:$0xff] }
 0x405   :  { %v1235_v20 = vpop.f32.mrf.mxu0  ;;  %v1636_v21 = vpop.f32.mrf.mxu1 }
 0x406   :  { %v2607_v18 = vadd.f32 %v2436_v13, %v299_v8  ;;  %2084 = vmatmul.f32.gmra.mxu2 %v815_v10  ;;  %v1637_v25 = vadd.f32 %v1636_v21, %v1235_v20  ;;  %2485 = vmatmul.f32.gmra.mxu3 %v816_v15  ;;  %v821_v8 = vld [vmem:[#allocation3 + $0xfa0] sm:$0xff]  ;;  %v2967_v10 = vadd.f32 %v2966_v0, %v2965_v2  ;;  %v2970_v13 = vsel %vm64_vm0, %v2802_v3, 0.0  ;;  %v827_v21 = vld [vmem:[#allocation3 + $0xfd0] sm:$0xff]  ;;  %v2812_v2 = vld [vmem:[#allocation2 + $0x198] sm:$0xff] }
 0x408   :  { %2736 = vst.msk [vmem:[#allocation2 + $0x350] sm:$0xff] %vm64_vm0, %v2607_v18  ;;  %1282 = vmatmul.f32.gmra.mxu0 %v813_v22  ;;  %1683 = vmatmul.f32.gmra.mxu1 %v814_v23  ;;  %v2969_v15 = vadd.f32 %v2968_v5, %v2967_v10  ;;  %v2972_v18 = vsel %vm64_vm0, %v2803_v11, 0.0  ;;  %v2805_v23 = vld [vmem:[#allocation2 + $0x160] sm:$0xff]  ;;  %v304_v5 = vld [vmem:[#allocation2 + $0x378] sm:$0xff]  ;;  %v2990_v10 = vsel %vm64_vm0, %v2812_v2, 0.0 }
 0x409   :  { %v2037_v27 = vpop.f32.mrf.mxu2  ;;  %v2438_v33 = vpop.f32.mrf.mxu3  ;;  %v2976_v29 = vsel %vm64_vm0, %v2805_v23, 0.0  ;;  %v2816_v23 = vld [vmem:[#allocation2 + $0x1b8] sm:$0xff] }
 0x40a   :  { %v2038_v30 = vadd.f32 %v2037_v27, %v1637_v25  ;;  %v2971_v22 = vadd.f32 %v2970_v13, %v2969_v15  ;;  %v828_v25 = vld [vmem:[#allocation3 + $0xfd8] sm:$0xff]  ;;  %v2806_v27 = vld [vmem:[#allocation2 + $0x168] sm:$0xff] }
 0x40c   :  { %v2439_v37 = vadd.f32 %v2438_v33, %v2038_v30  ;;  %v2973_v26 = vadd.f32 %v2972_v18, %v2971_v22  ;;  %v826_v33 = vld [vmem:[#allocation3 + $0xfc8] sm:$0xff]  ;;  %v2815_v18 = vld [vmem:[#allocation2 + $0x1b0] sm:$0xff] }
 0x40d   :  { %v1238_v44 = vpop.f32.mrf.mxu0  ;;  %v1639_v45 = vpop.f32.mrf.mxu1 }
 0x40e   :  { %v2608_v42 = vadd.f32 %v2439_v37, %v300_v32  ;;  %2087 = vmatmul.f32.gmra.mxu2 %v819_v34  ;;  %v1640_v50 = vadd.f32 %v1639_v45, %v1238_v44  ;;  %2488 = vmatmul.f32.gmra.mxu3 %v820_v39  ;;  %v825_v32 = vld [vmem:[#allocation3 + $0xfc0] sm:$0xff]  ;;  %v2975_v34 = vadd.f32 %v2974_v52, %v2973_v26  ;;  %v2978_v37 = vsel %vm64_vm0, %v2806_v27, 0.0  ;;  %v831_v45 = vld [vmem:[#allocation3 + $0xff0] sm:$0xff] }
 0x40f   :  { %v2996_v52 = vsel %vm64_vm0, %v2815_v18, 0.0 }
 0x410   :  { %2737 = vst.msk [vmem:[#allocation2 + $0x358] sm:$0xff] %vm64_vm0, %v2608_v42  ;;  %1285 = vmatmul.f32.gmra.mxu0 %v817_v46  ;;  %1686 = vmatmul.f32.gmra.mxu1 %v818_v47  ;;  %v2977_v39 = vadd.f32 %v2976_v29, %v2975_v34  ;;  %v2980_v42 = vsel %vm64_vm0, %v2807_v35, 0.0  ;;  %v2809_v47 = vld [vmem:[#allocation2 + $0x180] sm:$0xff] }
 0x411   :  { %v2040_v53 = vpop.f32.mrf.mxu2  ;;  %v2441_v59 = vpop.f32.mrf.mxu3  ;;  %v2984_v55 = vsel %vm64_vm0, %v2809_v47, 0.0 }
 0x412   :  { %v2041_v56 = vadd.f32 %v2040_v53, %v1640_v50  ;;  %v2979_v46 = vadd.f32 %v2978_v37, %v2977_v39  ;;  %v832_v50 = vld [vmem:[#allocation3 + $0xff8] sm:$0xff]  ;;  %v2810_v53 = vld [vmem:[#allocation2 + $0x188] sm:$0xff] }
 0x414   :  { %v2442_v63 = vadd.f32 %v2441_v59, %v2041_v56  ;;  %v2981_v51 = vadd.f32 %v2980_v42, %v2979_v46  ;;  %v830_v59 = vld [vmem:[#allocation3 + $0xfe8] sm:$0xff] }
 0x415   :  { %v1241_v6 = vpop.f32.mrf.mxu0  ;;  %v1642_v7 = vpop.f32.mrf.mxu1  ;;  %v306_v46 = vld [vmem:[#allocation2 + $0x388] sm:$0xff] }
 0x416   :  { %v2609_v4 = vadd.f32 %v2442_v63, %v301_v58  ;;  %2090 = vmatmul.f32.gmra.mxu2 %v823_v60  ;;  %v1643_v12 = vadd.f32 %v1642_v7, %v1241_v6  ;;  %2491 = vmatmul.f32.gmra.mxu3 %v824_v1  ;;  %v829_v58 = vld [vmem:[#allocation3 + $0xfe0] sm:$0xff]  ;;  %v2983_v60 = vadd.f32 %v2982_v49, %v2981_v51  ;;  %v2986_v63 = vsel %vm64_vm0, %v2810_v53, 0.0 }
 0x417   :  { %v2821_v49 = vld [vmem:[#allocation2 + $0x1e0] sm:$0xff] }
 0x418   :  { %2738 = vst.msk [vmem:[#allocation2 + $0x360] sm:$0xff] %vm64_vm0, %v2609_v4  ;;  %1288 = vmatmul.f32.gmra.mxu0 %v821_v8  ;;  %1689 = vmatmul.f32.gmra.mxu1 %v822_v9  ;;  %v2985_v1 = vadd.f32 %v2984_v55, %v2983_v60  ;;  %v2988_v4 = vsel %vm64_vm0, %v2811_v61, 0.0  ;;  %v2813_v8 = vld [vmem:[#allocation2 + $0x1a0] sm:$0xff]  ;;  %v2823_v60 = vld [vmem:[#allocation2 + $0x1f0] sm:$0xff] }
 0x419   :  { %v2043_v14 = vpop.f32.mrf.mxu2  ;;  %v2444_v20 = vpop.f32.mrf.mxu3 }
 0x41a   :  { %v2044_v17 = vadd.f32 %v2043_v14, %v1643_v12  ;;  %v2987_v7 = vadd.f32 %v2986_v63, %v2985_v1  ;;  %v2814_v12 = vld [vmem:[#allocation2 + $0x1a8] sm:$0xff]  ;;  %v2992_v14 = vsel %vm64_vm0, %v2813_v8, 0.0  ;;  %v2824_v1 = vld [vmem:[#allocation2 + $0x1f8] sm:$0xff] }
 0x41c   :  { %v2445_v24 = vadd.f32 %v2444_v20, %v2044_v17  ;;  %v2989_v11 = vadd.f32 %v2988_v4, %v2987_v7  ;;  %v2994_v20 = vsel %vm64_vm0, %v2814_v12, 0.0  ;;  %v307_v4 = vld [vmem:[#allocation2 + $0x390] sm:$0xff]  ;;  %v2825_v7 = vld [vmem:[#allocation2 + $0x200] sm:$0xff] }
 0x41d   :  { %v1244_v30 = vpop.f32.mrf.mxu0  ;;  %v1645_v31 = vpop.f32.mrf.mxu1 }
 0x41e   :  { %v2610_v28 = vadd.f32 %v2445_v24, %v302_v19  ;;  %2093 = vmatmul.f32.gmra.mxu2 %v827_v21  ;;  %v1646_v36 = vadd.f32 %v1645_v31, %v1244_v30  ;;  %2494 = vmatmul.f32.gmra.mxu3 %v828_v25  ;;  %v2991_v17 = vadd.f32 %v2990_v10, %v2989_v11  ;;  %v305_v25 = vld [vmem:[#allocation2 + $0x380] sm:$0xff]  ;;  %v2998_v30 = vsel %vm64_vm0, %v2816_v23, 0.0  ;;  %v2826_v11 = vld [vmem:[#allocation2 + $0x208] sm:$0xff] }
 0x420   :  { %2739 = vst.msk [vmem:[#allocation2 + $0x368] sm:$0xff] %vm64_vm0, %v2610_v28  ;;  %1291 = vmatmul.f32.gmra.mxu0 %v825_v32  ;;  %1692 = vmatmul.f32.gmra.mxu1 %v826_v33  ;;  %v2993_v22 = vadd.f32 %v2992_v14, %v2991_v17  ;;  %v2817_v28 = vld [vmem:[#allocation2 + $0x1c0] sm:$0xff]  ;;  %v2818_v32 = vld [vmem:[#allocation2 + $0x1c8] sm:$0xff]  ;;  %v2827_v17 = vld [vmem:[#allocation2 + $0x210] sm:$0xff] }
 0x421   :  { %v2046_v38 = vpop.f32.mrf.mxu2  ;;  %v2447_v44 = vpop.f32.mrf.mxu3  ;;  %v3000_v34 = vsel %vm64_vm0, %v2817_v28, 0.0  ;;  %v3002_v40 = vsel %vm64_vm0, %v2818_v32, 0.0 }
 0x422   :  { %v2047_v41 = vadd.f32 %v2046_v38, %v1646_v36  ;;  %v2995_v27 = vadd.f32 %v2994_v20, %v2993_v22  ;;  %v2819_v38 = vld [vmem:[#allocation2 + $0x1d0] sm:$0xff]  ;;  %v2828_v22 = vld [vmem:[#allocation2 + $0x218] sm:$0xff] }
 0x424   :  { %v2448_v48 = vadd.f32 %v2447_v44, %v2047_v41  ;;  %v2997_v31 = vadd.f32 %v2996_v52, %v2995_v27  ;;  %v308_v52 = vld [vmem:[#allocation2 + $0x398] sm:$0xff]  ;;  %v2829_v27 = vld [vmem:[#allocation2 + $0x220] sm:$0xff] }
 0x425   :  { %v1247_v56 = vpop.f32.mrf.mxu0  ;;  %v1648_v57 = vpop.f32.mrf.mxu1 }
 0x426   :  { %v2611_v54 = vadd.f32 %v2448_v48, %v303_v43  ;;  %2096 = vmatmul.f32.gmra.mxu2 %v831_v45  ;;  %v1649_v62 = vadd.f32 %v1648_v57, %v1247_v56  ;;  %2497 = vmatmul.f32.gmra.mxu3 %v832_v50  ;;  %v2999_v37 = vadd.f32 %v2998_v30, %v2997_v31  ;;  %v2820_v43 = vld [vmem:[#allocation2 + $0x1d8] sm:$0xff]  ;;  %v3004_v45 = vsel %vm64_vm0, %v2819_v38, 0.0  ;;  %v2830_v31 = vld [vmem:[#allocation2 + $0x228] sm:$0xff] }
 0x427   :  { %v3006_v51 = vsel %vm64_vm0, %v2820_v43, 0.0  ;;  %v3008_v56 = vsel %vm64_vm0, %v2821_v49, 0.0 }
 0x428   :  { %2740 = vst.msk [vmem:[#allocation2 + $0x370] sm:$0xff] %vm64_vm0, %v2611_v54  ;;  %1294 = vmatmul.f32.gmra.mxu0 %v829_v58  ;;  %1695 = vmatmul.f32.gmra.mxu1 %v830_v59  ;;  %v3001_v42 = vadd.f32 %v3000_v34, %v2999_v37  ;;  %v2822_v54 = vld [vmem:[#allocation2 + $0x1e8] sm:$0xff]  ;;  %v2831_v37 = vld [vmem:[#allocation2 + $0x230] sm:$0xff] }
 0x429   :  { %v2049_v0 = vpop.f32.mrf.mxu2  ;;  %v2450_v6 = vpop.f32.mrf.mxu3 }
 0x42a   :  { %v2050_v3 = vadd.f32 %v2049_v0, %v1649_v62  ;;  %v3003_v48 = vadd.f32 %v3002_v40, %v3001_v42  ;;  %v3010_v62 = vsel %vm64_vm0, %v2822_v54, 0.0  ;;  %v2832_v42 = vld [vmem:[#allocation2 + $0x238] sm:$0xff] }
 0x42c   :  { %v2451_v9 = vadd.f32 %v2450_v6, %v2050_v3  ;;  %v3005_v53 = vadd.f32 %v3004_v45, %v3003_v48  ;;  %v3012_v3 = vsel %vm64_vm0, %v2823_v60, 0.0  ;;  %v309_v45 = vld [vmem:[#allocation2 + $0x3a0] sm:$0xff] }
 0x42d   :  { %v1250_v15 = vpop.f32.mrf.mxu0  ;;  %v1651_v16 = vpop.f32.mrf.mxu1  ;;  %v2833_v48 = vld [vmem:[#allocation2 + $0x240] sm:$0xff] }
 0x42e   :  { %v2612_v13 = vadd.f32 %v2451_v9, %v304_v5  ;;  %v1652_v19 = vadd.f32 %v1651_v16, %v1250_v15  ;;  %v3007_v59 = vadd.f32 %v3006_v51, %v3005_v53  ;;  %v3014_v9 = vsel %vm64_vm0, %v2824_v1, 0.0  ;;  %v2834_v53 = vld [vmem:[#allocation2 + $0x248] sm:$0xff] }
 0x430   :  { %2741 = vst.msk [vmem:[#allocation2 + $0x378] sm:$0xff] %vm64_vm0, %v2612_v13  ;;  %v3009_v0 = vadd.f32 %v3008_v56, %v3007_v59  ;;  %v3016_v13 = vsel %vm64_vm0, %v2825_v7, 0.0  ;;  %v2835_v59 = vld [vmem:[#allocation2 + $0x250] sm:$0xff] }
 0x431   :  { %v2052_v21 = vpop.f32.mrf.mxu2  ;;  %v2453_v26 = vpop.f32.mrf.mxu3 }
 0x432   :  { %v2053_v24 = vadd.f32 %v2052_v21, %v1652_v19  ;;  %v3011_v6 = vadd.f32 %v3010_v62, %v3009_v0  ;;  %v3018_v19 = vsel %vm64_vm0, %v2826_v11, 0.0  ;;  %v2836_v0 = vld [vmem:[#allocation2 + $0x258] sm:$0xff] }
 0x434   :  { %v2454_v29 = vadd.f32 %v2453_v26, %v2053_v24  ;;  %v3013_v10 = vadd.f32 %v3012_v3, %v3011_v6  ;;  %v3020_v24 = vsel %vm64_vm0, %v2827_v17, 0.0  ;;  %v310_v3 = vld [vmem:[#allocation2 + $0x3a8] sm:$0xff]  ;;  %v2837_v6 = vld [vmem:[#allocation2 + $0x260] sm:$0xff] }
 0x435   :  { %v1253_v35 = vpop.f32.mrf.mxu0  ;;  %v1654_v36 = vpop.f32.mrf.mxu1 }
 0x436   :  { %v2613_v33 = vadd.f32 %v2454_v29, %v305_v25  ;;  %v1655_v39 = vadd.f32 %v1654_v36, %v1253_v35  ;;  %v3015_v16 = vadd.f32 %v3014_v9, %v3013_v10  ;;  %v3022_v29 = vsel %vm64_vm0, %v2828_v22, 0.0  ;;  %v2838_v10 = vld [vmem:[#allocation2 + $0x268] sm:$0xff] }
 0x438   :  { %2742 = vst.msk [vmem:[#allocation2 + $0x380] sm:$0xff] %vm64_vm0, %v2613_v33  ;;  %v3017_v21 = vadd.f32 %v3016_v13, %v3015_v16  ;;  %v3024_v33 = vsel %vm64_vm0, %v2829_v27, 0.0  ;;  %v2839_v16 = vld [vmem:[#allocation2 + $0x270] sm:$0xff] }
 0x439   :  { %v2055_v41 = vpop.f32.mrf.mxu2  ;;  %v2456_v47 = vpop.f32.mrf.mxu3 }
 0x43a   :  { %v2056_v44 = vadd.f32 %v2055_v41, %v1655_v39  ;;  %v3019_v26 = vadd.f32 %v3018_v19, %v3017_v21  ;;  %v3026_v39 = vsel %vm64_vm0, %v2830_v31, 0.0  ;;  %v2840_v21 = vld [vmem:[#allocation2 + $0x278] sm:$0xff] }
 0x43c   :  { %v2457_v50 = vadd.f32 %v2456_v47, %v2056_v44  ;;  %v3021_v30 = vadd.f32 %v3020_v24, %v3019_v26  ;;  %v3028_v44 = vsel %vm64_vm0, %v2831_v37, 0.0  ;;  %v311_v24 = vld [vmem:[#allocation2 + $0x3b0] sm:$0xff]  ;;  %v2841_v26 = vld [vmem:[#allocation2 + $0x280] sm:$0xff] }
 0x43d   :  { %v1256_v57 = vpop.f32.mrf.mxu0  ;;  %v1657_v58 = vpop.f32.mrf.mxu1 }
 0x43e   :  { %v2614_v55 = vadd.f32 %v2457_v50, %v306_v46  ;;  %v1658_v61 = vadd.f32 %v1657_v58, %v1256_v57  ;;  %v3023_v36 = vadd.f32 %v3022_v29, %v3021_v30  ;;  %v3030_v50 = vsel %vm64_vm0, %v2832_v42, 0.0  ;;  %v2842_v30 = vld [vmem:[#allocation2 + $0x288] sm:$0xff] }
 0x440   :  { %2743 = vst.msk [vmem:[#allocation2 + $0x388] sm:$0xff] %vm64_vm0, %v2614_v55  ;;  %v3025_v41 = vadd.f32 %v3024_v33, %v3023_v36  ;;  %v3032_v55 = vsel %vm64_vm0, %v2833_v48, 0.0  ;;  %v2843_v36 = vld [vmem:[#allocation2 + $0x290] sm:$0xff] }
 0x441   :  { %v2058_v63 = vpop.f32.mrf.mxu2  ;;  %v2459_v5 = vpop.f32.mrf.mxu3 }
 0x442   :  { %v2059_v2 = vadd.f32 %v2058_v63, %v1658_v61  ;;  %v3027_v47 = vadd.f32 %v3026_v39, %v3025_v41  ;;  %v3034_v61 = vsel %vm64_vm0, %v2834_v53, 0.0  ;;  %v2844_v41 = vld [vmem:[#allocation2 + $0x298] sm:$0xff] }
 0x444   :  { %v2460_v8 = vadd.f32 %v2459_v5, %v2059_v2  ;;  %v3029_v51 = vadd.f32 %v3028_v44, %v3027_v47  ;;  %v3036_v2 = vsel %vm64_vm0, %v2835_v59, 0.0  ;;  %v312_v44 = vld [vmem:[#allocation2 + $0x3b8] sm:$0xff]  ;;  %v2845_v47 = vld [vmem:[#allocation2 + $0x2a0] sm:$0xff] }
 0x445   :  { %v1259_v14 = vpop.f32.mrf.mxu0  ;;  %v1660_v15 = vpop.f32.mrf.mxu1 }
 0x446   :  { %v2615_v12 = vadd.f32 %v2460_v8, %v307_v4  ;;  %v1661_v18 = vadd.f32 %v1660_v15, %v1259_v14  ;;  %v3031_v58 = vadd.f32 %v3030_v50, %v3029_v51  ;;  %v3038_v8 = vsel %vm64_vm0, %v2836_v0, 0.0  ;;  %v2846_v51 = vld [vmem:[#allocation2 + $0x2a8] sm:$0xff] }
 0x448   :  { %2744 = vst.msk [vmem:[#allocation2 + $0x390] sm:$0xff] %vm64_vm0, %v2615_v12  ;;  %v3033_v63 = vadd.f32 %v3032_v55, %v3031_v58  ;;  %v3040_v12 = vsel %vm64_vm0, %v2837_v6, 0.0  ;;  %v2847_v58 = vld [vmem:[#allocation2 + $0x2b0] sm:$0xff] }
 0x449   :  { %v2061_v20 = vpop.f32.mrf.mxu2  ;;  %v2462_v25 = vpop.f32.mrf.mxu3 }
 0x44a   :  { %v2062_v23 = vadd.f32 %v2061_v20, %v1661_v18  ;;  %v3035_v5 = vadd.f32 %v3034_v61, %v3033_v63  ;;  %v3042_v18 = vsel %vm64_vm0, %v2838_v10, 0.0  ;;  %v2848_v63 = vld [vmem:[#allocation2 + $0x2b8] sm:$0xff] }
 0x44c   :  { %v2463_v28 = vadd.f32 %v2462_v25, %v2062_v23  ;;  %v3037_v9 = vadd.f32 %v3036_v2, %v3035_v5  ;;  %v3044_v23 = vsel %vm64_vm0, %v2839_v16, 0.0  ;;  %v313_v2 = vld [vmem:[#allocation2 + $0x3c0] sm:$0xff] }
 0x44d   :  { %v1262_v34 = vpop.f32.mrf.mxu0  ;;  %v1663_v35 = vpop.f32.mrf.mxu1  ;;  %v2849_v5 = vld [vmem:[#allocation2 + $0x2c0] sm:$0xff] }
 0x44e   :  { %v2616_v32 = vadd.f32 %v2463_v28, %v308_v52  ;;  %v1664_v38 = vadd.f32 %v1663_v35, %v1262_v34  ;;  %v3039_v15 = vadd.f32 %v3038_v8, %v3037_v9  ;;  %v3046_v28 = vsel %vm64_vm0, %v2840_v21, 0.0  ;;  %v2850_v9 = vld [vmem:[#allocation2 + $0x2c8] sm:$0xff] }
 0x450   :  { %2745 = vst.msk [vmem:[#allocation2 + $0x398] sm:$0xff] %vm64_vm0, %v2616_v32  ;;  %v3041_v20 = vadd.f32 %v3040_v12, %v3039_v15  ;;  %v3048_v32 = vsel %vm64_vm0, %v2841_v26, 0.0  ;;  %v2851_v15 = vld [vmem:[#allocation2 + $0x2d0] sm:$0xff] }
 0x451   :  { %v2064_v40 = vpop.f32.mrf.mxu2  ;;  %v2465_v46 = vpop.f32.mrf.mxu3 }
 0x452   :  { %v2065_v43 = vadd.f32 %v2064_v40, %v1664_v38  ;;  %v3043_v25 = vadd.f32 %v3042_v18, %v3041_v20  ;;  %v3050_v38 = vsel %vm64_vm0, %v2842_v30, 0.0  ;;  %v2852_v20 = vld [vmem:[#allocation2 + $0x2d8] sm:$0xff] }
 0x454   :  { %v2466_v49 = vadd.f32 %v2465_v46, %v2065_v43  ;;  %v3045_v29 = vadd.f32 %v3044_v23, %v3043_v25  ;;  %v3052_v43 = vsel %vm64_vm0, %v2843_v36, 0.0  ;;  %v314_v23 = vld [vmem:[#allocation2 + $0x3c8] sm:$0xff]  ;;  %v2853_v25 = vld [vmem:[#allocation2 + $0x2e0] sm:$0xff] }
 0x455   :  { %v1265_v56 = vpop.f32.mrf.mxu0  ;;  %v1666_v57 = vpop.f32.mrf.mxu1 }
 0x456   :  { %v2617_v54 = vadd.f32 %v2466_v49, %v309_v45  ;;  %v1667_v60 = vadd.f32 %v1666_v57, %v1265_v56  ;;  %v3047_v35 = vadd.f32 %v3046_v28, %v3045_v29  ;;  %v3054_v49 = vsel %vm64_vm0, %v2844_v41, 0.0  ;;  %v2854_v29 = vld [vmem:[#allocation2 + $0x2e8] sm:$0xff] }
 0x458   :  { %2746 = vst.msk [vmem:[#allocation2 + $0x3a0] sm:$0xff] %vm64_vm0, %v2617_v54  ;;  %v3049_v40 = vadd.f32 %v3048_v32, %v3047_v35  ;;  %v3056_v54 = vsel %vm64_vm0, %v2845_v47, 0.0  ;;  %v2855_v35 = vld [vmem:[#allocation2 + $0x2f0] sm:$0xff] }
 0x459   :  { %v2067_v62 = vpop.f32.mrf.mxu2  ;;  %v2468_v4 = vpop.f32.mrf.mxu3 }
 0x45a   :  { %v2068_v1 = vadd.f32 %v2067_v62, %v1667_v60  ;;  %v3051_v46 = vadd.f32 %v3050_v38, %v3049_v40  ;;  %v3058_v60 = vsel %vm64_vm0, %v2846_v51, 0.0  ;;  %v2856_v40 = vld [vmem:[#allocation2 + $0x2f8] sm:$0xff] }
 0x45c   :  { %v2469_v7 = vadd.f32 %v2468_v4, %v2068_v1  ;;  %v3053_v50 = vadd.f32 %v3052_v43, %v3051_v46  ;;  %v3060_v1 = vsel %vm64_vm0, %v2847_v58, 0.0  ;;  %v315_v43 = vld [vmem:[#allocation2 + $0x3d0] sm:$0xff]  ;;  %v2857_v46 = vld [vmem:[#allocation2 + $0x300] sm:$0xff] }
 0x45d   :  { %v1268_v13 = vpop.f32.mrf.mxu0  ;;  %v1669_v14 = vpop.f32.mrf.mxu1 }
 0x45e   :  { %v2618_v11 = vadd.f32 %v2469_v7, %v310_v3  ;;  %v1670_v17 = vadd.f32 %v1669_v14, %v1268_v13  ;;  %v3055_v57 = vadd.f32 %v3054_v49, %v3053_v50  ;;  %v3062_v7 = vsel %vm64_vm0, %v2848_v63, 0.0  ;;  %v2858_v50 = vld [vmem:[#allocation2 + $0x308] sm:$0xff] }
 0x460   :  { %2747 = vst.msk [vmem:[#allocation2 + $0x3a8] sm:$0xff] %vm64_vm0, %v2618_v11  ;;  %v3057_v62 = vadd.f32 %v3056_v54, %v3055_v57  ;;  %v3064_v11 = vsel %vm64_vm0, %v2849_v5, 0.0  ;;  %v2859_v57 = vld [vmem:[#allocation2 + $0x310] sm:$0xff] }
 0x461   :  { %v2070_v19 = vpop.f32.mrf.mxu2  ;;  %v2471_v52 = vpop.f32.mrf.mxu3 }
 0x462   :  { %v2071_v22 = vadd.f32 %v2070_v19, %v1670_v17  ;;  %v3059_v4 = vadd.f32 %v3058_v60, %v3057_v62  ;;  %v3066_v17 = vsel %vm64_vm0, %v2850_v9, 0.0  ;;  %v2860_v62 = vld [vmem:[#allocation2 + $0x318] sm:$0xff] }
 0x464   :  { %v2472_v27 = vadd.f32 %v2471_v52, %v2071_v22  ;;  %v3061_v8 = vadd.f32 %v3060_v1, %v3059_v4  ;;  %v3068_v22 = vsel %vm64_vm0, %v2851_v15, 0.0  ;;  %v316_v1 = vld [vmem:[#allocation2 + $0x3d8] sm:$0xff]  ;;  %v2861_v4 = vld [vmem:[#allocation2 + $0x320] sm:$0xff] }
 0x465   :  { %v1271_v33 = vpop.f32.mrf.mxu0  ;;  %v1672_v34 = vpop.f32.mrf.mxu1 }
 0x466   :  { %v2619_v31 = vadd.f32 %v2472_v27, %v311_v24  ;;  %v1673_v37 = vadd.f32 %v1672_v34, %v1271_v33  ;;  %v3063_v14 = vadd.f32 %v3062_v7, %v3061_v8  ;;  %v3070_v27 = vsel %vm64_vm0, %v2852_v20, 0.0  ;;  %v2862_v8 = vld [vmem:[#allocation2 + $0x328] sm:$0xff] }
 0x468   :  { %2748 = vst.msk [vmem:[#allocation2 + $0x3b0] sm:$0xff] %vm64_vm0, %v2619_v31  ;;  %v3065_v19 = vadd.f32 %v3064_v11, %v3063_v14  ;;  %v3072_v31 = vsel %vm64_vm0, %v2853_v25, 0.0  ;;  %v2863_v14 = vld [vmem:[#allocation2 + $0x330] sm:$0xff] }
 0x469   :  { %v2073_v39 = vpop.f32.mrf.mxu2  ;;  %v2474_v45 = vpop.f32.mrf.mxu3 }
 0x46a   :  { %v2074_v42 = vadd.f32 %v2073_v39, %v1673_v37  ;;  %v3067_v52 = vadd.f32 %v3066_v17, %v3065_v19  ;;  %v3074_v37 = vsel %vm64_vm0, %v2854_v29, 0.0  ;;  %v2864_v19 = vld [vmem:[#allocation2 + $0x338] sm:$0xff] }
 0x46c   :  { %v2475_v48 = vadd.f32 %v2474_v45, %v2074_v42  ;;  %v3069_v28 = vadd.f32 %v3068_v22, %v3067_v52  ;;  %v3076_v42 = vsel %vm64_vm0, %v2855_v35, 0.0  ;;  %v317_v22 = vld [vmem:[#allocation2 + $0x3e0] sm:$0xff] }
 0x46d   :  { %v1274_v55 = vpop.f32.mrf.mxu0  ;;  %v1675_v56 = vpop.f32.mrf.mxu1  ;;  %v2865_v52 = vld [vmem:[#allocation2 + $0x340] sm:$0xff] }
 0x46e   :  { %v2620_v53 = vadd.f32 %v2475_v48, %v312_v44  ;;  %v1676_v59 = vadd.f32 %v1675_v56, %v1274_v55  ;;  %v3071_v34 = vadd.f32 %v3070_v27, %v3069_v28  ;;  %v3078_v48 = vsel %vm64_vm0, %v2856_v40, 0.0  ;;  %v2866_v28 = vld [vmem:[#allocation2 + $0x348] sm:$0xff] }
 0x470   :  { %2749 = vst.msk [vmem:[#allocation2 + $0x3b8] sm:$0xff] %vm64_vm0, %v2620_v53  ;;  %v3073_v39 = vadd.f32 %v3072_v31, %v3071_v34  ;;  %v3080_v53 = vsel %vm64_vm0, %v2857_v46, 0.0  ;;  %v2867_v34 = vld [vmem:[#allocation2 + $0x350] sm:$0xff] }
 0x471   :  { %v2076_v61 = vpop.f32.mrf.mxu2  ;;  %v2477_v3 = vpop.f32.mrf.mxu3 }
 0x472   :  { %v2077_v0 = vadd.f32 %v2076_v61, %v1676_v59  ;;  %v3075_v45 = vadd.f32 %v3074_v37, %v3073_v39  ;;  %v3082_v59 = vsel %vm64_vm0, %v2858_v50, 0.0  ;;  %v2868_v39 = vld [vmem:[#allocation2 + $0x358] sm:$0xff] }
 0x474   :  { %v2478_v6 = vadd.f32 %v2477_v3, %v2077_v0  ;;  %v3077_v49 = vadd.f32 %v3076_v42, %v3075_v45  ;;  %v3084_v0 = vsel %vm64_vm0, %v2859_v57, 0.0  ;;  %v318_v42 = vld [vmem:[#allocation2 + $0x3e8] sm:$0xff]  ;;  %v2869_v45 = vld [vmem:[#allocation2 + $0x360] sm:$0xff] }
 0x475   :  { %v1277_v12 = vpop.f32.mrf.mxu0  ;;  %v1678_v13 = vpop.f32.mrf.mxu1 }
 0x476   :  { %v2621_v10 = vadd.f32 %v2478_v6, %v313_v2  ;;  %v1679_v16 = vadd.f32 %v1678_v13, %v1277_v12  ;;  %v3079_v56 = vadd.f32 %v3078_v48, %v3077_v49  ;;  %v3086_v6 = vsel %vm64_vm0, %v2860_v62, 0.0  ;;  %v2870_v49 = vld [vmem:[#allocation2 + $0x368] sm:$0xff] }
 0x478   :  { %2750 = vst.msk [vmem:[#allocation2 + $0x3c0] sm:$0xff] %vm64_vm0, %v2621_v10  ;;  %v3081_v61 = vadd.f32 %v3080_v53, %v3079_v56  ;;  %v3088_v10 = vsel %vm64_vm0, %v2861_v4, 0.0  ;;  %v2871_v56 = vld [vmem:[#allocation2 + $0x370] sm:$0xff] }
 0x479   :  { %v2079_v18 = vpop.f32.mrf.mxu2  ;;  %v2480_v24 = vpop.f32.mrf.mxu3 }
 0x47a   :  { %v2080_v21 = vadd.f32 %v2079_v18, %v1679_v16  ;;  %v3083_v3 = vadd.f32 %v3082_v59, %v3081_v61  ;;  %v3090_v16 = vsel %vm64_vm0, %v2862_v8, 0.0  ;;  %v2872_v61 = vld [vmem:[#allocation2 + $0x378] sm:$0xff] }
 0x47c   :  { %v2481_v26 = vadd.f32 %v2480_v24, %v2080_v21  ;;  %v3085_v7 = vadd.f32 %v3084_v0, %v3083_v3  ;;  %v3092_v21 = vsel %vm64_vm0, %v2863_v14, 0.0  ;;  %v319_v0 = vld [vmem:[#allocation2 + $0x3f0] sm:$0xff]  ;;  %v5266_v3 = vld [vmem:[#allocation2 + $0x380] sm:$0xff] }
 0x47d   :  { %v1280_v32 = vpop.f32.mrf.mxu0  ;;  %v1681_v33 = vpop.f32.mrf.mxu1 }
 0x47e   :  { %v2622_v30 = vadd.f32 %v2481_v26, %v314_v23  ;;  %v1682_v36 = vadd.f32 %v1681_v33, %v1280_v32  ;;  %v3087_v13 = vadd.f32 %v3086_v6, %v3085_v7  ;;  %v3094_v26 = vsel %vm64_vm0, %v2864_v19, 0.0  ;;  %v5269_v7 = vld [vmem:[#allocation2 + $0x388] sm:$0xff] }
 0x480   :  { %2751 = vst.msk [vmem:[#allocation2 + $0x3c8] sm:$0xff] %vm64_vm0, %v2622_v30  ;;  %v3089_v18 = vadd.f32 %v3088_v10, %v3087_v13  ;;  %v3096_v30 = vsel %vm64_vm0, %v2865_v52, 0.0  ;;  %v5273_v13 = vld [vmem:[#allocation2 + $0x390] sm:$0xff] }
 0x481   :  { %v2082_v38 = vpop.f32.mrf.mxu2  ;;  %v2483_v44 = vpop.f32.mrf.mxu3 }
 0x482   :  { %v2083_v41 = vadd.f32 %v2082_v38, %v1682_v36  ;;  %v3091_v24 = vadd.f32 %v3090_v16, %v3089_v18  ;;  %v3098_v36 = vsel %vm64_vm0, %v2866_v28, 0.0  ;;  %v5278_v18 = vld [vmem:[#allocation2 + $0x398] sm:$0xff] }
 0x484   :  { %v2484_v47 = vadd.f32 %v2483_v44, %v2083_v41  ;;  %v3093_v27 = vadd.f32 %v3092_v21, %v3091_v24  ;;  %v3100_v41 = vsel %vm64_vm0, %v2867_v34, 0.0  ;;  %v320_v21 = vld [vmem:[#allocation2 + $0x3f8] sm:$0xff]  ;;  %v5282_v24 = vld [vmem:[#allocation2 + $0x3a0] sm:$0xff] }
 0x485   :  { %v1283_v54 = vpop.f32.mrf.mxu0  ;;  %v1684_v55 = vpop.f32.mrf.mxu1  ;;  %v5295_v34 = vld [vmem:[#allocation2 + $0x3b8] sm:$0xff] }
 0x486   :  { %v2623_v51 = vadd.f32 %v2484_v47, %v315_v43  ;;  %v1685_v58 = vadd.f32 %v1684_v55, %v1283_v54  ;;  %v3095_v33 = vadd.f32 %v3094_v26, %v3093_v27  ;;  %v3102_v47 = vsel %vm64_vm0, %v2868_v39, 0.0  ;;  %v5286_v27 = vld [vmem:[#allocation2 + $0x3a8] sm:$0xff] }
 0x488   :  { %2752 = vst.msk [vmem:[#allocation2 + $0x3d0] sm:$0xff] %vm64_vm0, %v2623_v51  ;;  %v3097_v38 = vadd.f32 %v3096_v30, %v3095_v33  ;;  %v3104_v51 = vsel %vm64_vm0, %v2869_v45, 0.0 }
 0x489   :  { %v2085_v60 = vpop.f32.mrf.mxu2  ;;  %v2486_v2 = vpop.f32.mrf.mxu3 }
 0x48a   :  { %v2086_v63 = vadd.f32 %v2085_v60, %v1685_v58  ;;  %v3099_v44 = vadd.f32 %v3098_v36, %v3097_v38  ;;  %v3106_v58 = vsel %vm64_vm0, %v2870_v49, 0.0  ;;  %v3126_v38 = vsel %vm64_vm0, %v5295_v34, 0.0 }
 0x48c   :  { %v2487_v5 = vadd.f32 %v2486_v2, %v2086_v63  ;;  %v3101_v48 = vadd.f32 %v3100_v41, %v3099_v44  ;;  %v3108_v63 = vsel %vm64_vm0, %v2871_v56, 0.0 }
 0x48d   :  { %v1286_v11 = vpop.f32.mrf.mxu0  ;;  %v1687_v12 = vpop.f32.mrf.mxu1 }
 0x48e   :  { %v2624_v9 = vadd.f32 %v2487_v5, %v316_v1  ;;  %v1688_v15 = vadd.f32 %v1687_v12, %v1286_v11  ;;  %v3103_v55 = vadd.f32 %v3102_v47, %v3101_v48  ;;  %v3110_v5 = vsel %vm64_vm0, %v2872_v61, 0.0 }
 0x490   :  { %2753 = vst.msk [vmem:[#allocation2 + $0x3d8] sm:$0xff] %vm64_vm0, %v2624_v9  ;;  %v3105_v60 = vadd.f32 %v3104_v51, %v3103_v55  ;;  %v3112_v9 = vsel %vm64_vm0, %v5266_v3, 0.0 }
 0x491   :  { %v2088_v17 = vpop.f32.mrf.mxu2  ;;  %v2489_v23 = vpop.f32.mrf.mxu3 }
 0x492   :  { %v2089_v20 = vadd.f32 %v2088_v17, %v1688_v15  ;;  %v3107_v2 = vadd.f32 %v3106_v58, %v3105_v60  ;;  %v3114_v15 = vsel %vm64_vm0, %v5269_v7, 0.0 }
 0x494   :  { %v2490_v25 = vadd.f32 %v2489_v23, %v2089_v20  ;;  %v3109_v6 = vadd.f32 %v3108_v63, %v3107_v2  ;;  %v3116_v20 = vsel %vm64_vm0, %v5273_v13, 0.0 }
 0x495   :  { %v1289_v31 = vpop.f32.mrf.mxu0  ;;  %v1690_v32 = vpop.f32.mrf.mxu1 }
 0x496   :  { %v2625_v29 = vadd.f32 %v2490_v25, %v317_v22  ;;  %v1691_v35 = vadd.f32 %v1690_v32, %v1289_v31  ;;  %v3111_v12 = vadd.f32 %v3110_v5, %v3109_v6  ;;  %v3118_v25 = vsel %vm64_vm0, %v5278_v18, 0.0  ;;  %v5290_v31 = vld [vmem:[#allocation2 + $0x3b0] sm:$0xff] }
 0x497   :  { %v3122_v32 = vsel %vm64_vm0, %v5286_v27, 0.0 }
 0x498   :  { %2754 = vst.msk [vmem:[#allocation2 + $0x3e0] sm:$0xff] %vm64_vm0, %v2625_v29  ;;  %v3113_v17 = vadd.f32 %v3112_v9, %v3111_v12  ;;  %v3120_v29 = vsel %vm64_vm0, %v5282_v24, 0.0 }
 0x499   :  { %v2091_v37 = vpop.f32.mrf.mxu2  ;;  %v2492_v43 = vpop.f32.mrf.mxu3 }
 0x49a   :  { %v2092_v40 = vadd.f32 %v2091_v37, %v1691_v35  ;;  %v3115_v23 = vadd.f32 %v3114_v15, %v3113_v17  ;;  %v3124_v35 = vsel %vm64_vm0, %v5290_v31, 0.0  ;;  %v5299_v37 = vld [vmem:[#allocation2 + $0x3c0] sm:$0xff] }
 0x49b   :  { %v3128_v41 = vsel %vm64_vm0, %v5299_v37, 0.0 }
 0x49c   :  { %v2493_v46 = vadd.f32 %v2492_v43, %v2092_v40  ;;  %v3117_v26 = vadd.f32 %v3116_v20, %v3115_v23  ;;  %v5303_v40 = vld [vmem:[#allocation2 + $0x3c8] sm:$0xff]  ;;  %v5307_v43 = vld [vmem:[#allocation2 + $0x3d0] sm:$0xff] }
 0x49d   :  { %v1292_v53 = vpop.f32.mrf.mxu0  ;;  %v1693_v54 = vpop.f32.mrf.mxu1  ;;  %v3130_v44 = vsel %vm64_vm0, %v5303_v40, 0.0  ;;  %v3132_v47 = vsel %vm64_vm0, %v5307_v43, 0.0 }
 0x49e   :  { %v2626_v50 = vadd.f32 %v2493_v46, %v318_v42  ;;  %v1694_v57 = vadd.f32 %v1693_v54, %v1292_v53  ;;  %v3119_v30 = vadd.f32 %v3118_v25, %v3117_v26  ;;  %v5311_v46 = vld [vmem:[#allocation2 + $0x3d8] sm:$0xff]  ;;  %v4348_v25 = vld [vmem:[#allocation2 + $0x20] sm:$0xff] }
 0x49f   :  { %v5315_v49 = vld [vmem:[#allocation2 + $0x3e0] sm:$0xff] }
 0x4a0   :  { %2755 = vst.msk [vmem:[#allocation2 + $0x3e8] sm:$0xff] %vm64_vm0, %v2626_v50  ;;  %v3121_v33 = vadd.f32 %v3120_v29, %v3119_v30  ;;  %v3134_v50 = vsel %vm64_vm0, %v5311_v46, 0.0  ;;  %v3136_v54 = vsel %vm64_vm0, %v5315_v49, 0.0  ;;  %v4349_v29 = vld [vmem:[#allocation2 + $0x28] sm:$0xff] }
 0x4a1   :  { %v2094_v59 = vpop.f32.mrf.mxu2  ;;  %v2495_v1 = vpop.f32.mrf.mxu3 }
 0x4a2   :  { %v2095_v62 = vadd.f32 %v2094_v59, %v1694_v57  ;;  %v3123_v36 = vadd.f32 %v3122_v32, %v3121_v33 }
 0x4a4   :  { %v2496_v4 = vadd.f32 %v2495_v1, %v2095_v62  ;;  %v3125_v39 = vadd.f32 %v3124_v35, %v3123_v36 }
 0x4a5   :  { %v1295_v10 = vpop.f32.mrf.mxu0  ;;  %v1696_v11 = vpop.f32.mrf.mxu1 }
 0x4a6   :  { %v2627_v8 = vadd.f32 %v2496_v4, %v319_v0  ;;  %v1697_v14 = vadd.f32 %v1696_v11, %v1295_v10  ;;  %v3127_v42 = vadd.f32 %v3126_v38, %v3125_v39  ;;  %v4350_v38 = vld [vmem:[#allocation2 + $0x30] sm:$0xff] }
 0x4a7   :  { %v2886_v53 = vld [vmem:[#allocation2 + $0x3e8] sm:$0xff] }
 0x4a8   :  { %2756 = vst.msk [vmem:[#allocation2 + $0x3f0] sm:$0xff] %vm64_vm0, %v2627_v8  ;;  %v3129_v45 = vadd.f32 %v3128_v41, %v3127_v42  ;;  %v3138_v57 = vsel %vm64_vm0, %v2886_v53, 0.0 }
 0x4a9   :  { %v2097_v16 = vpop.f32.mrf.mxu2  ;;  %v2498_v22 = vpop.f32.mrf.mxu3 }
 0x4aa   :  { %v2098_v19 = vadd.f32 %v2097_v16, %v1697_v14  ;;  %v3131_v48 = vadd.f32 %v3130_v44, %v3129_v45  ;;  %v4344_v14 = vld [vmem:[#allocation2] sm:$0xff]  ;;  %v4345_v16 = vld [vmem:[#allocation2 + $0x8] sm:$0xff]  ;;  %v4351_v45 = vld [vmem:[#allocation2 + $0x38] sm:$0xff] }
 0x4ac   :  { %v2499_v52 = vadd.f32 %v2498_v22, %v2098_v19  ;;  %v3133_v51 = vadd.f32 %v3132_v47, %v3131_v48  ;;  %v4346_v19 = vld [vmem:[#allocation2 + $0x10] sm:$0xff] }
 0x4ae   :  { %v2628_v28 = vadd.f32 %v2499_v52, %v320_v21  ;;  %v3135_v55 = vadd.f32 %v3134_v50, %v3133_v51  ;;  %v4347_v21 = vld [vmem:[#allocation2 + $0x18] sm:$0xff] }
 0x4af   :  { %v2887_v56 = vld [vmem:[#allocation2 + $0x3f0] sm:$0xff] }
 0x4b0   :  { %2757 = vst.msk [vmem:[#allocation2 + $0x3f8] sm:$0xff] %vm64_vm0, %v2628_v28  ;;  %v3137_v58 = vadd.f32 %v3136_v54, %v3135_v55  ;;  %v3140_v60 = vsel %vm64_vm0, %v2887_v56, 0.0 }
 0x4b2   :  { %v3139_v61 = vadd.f32 %v3138_v57, %v3137_v58  ;;  %v4353_v58 = vld [vmem:[#allocation2 + $0x48] sm:$0xff] }
 0x4b4   :  { %v3141_v63 = vadd.f32 %v3140_v60, %v3139_v61 }
 0x4b7   :  { %v2888_v59 = vld [vmem:[#allocation2 + $0x3f8] sm:$0xff] }
 0x4b8   :  { %v3142_v62 = vsel %vm64_vm0, %v2888_v59, 0.0 }
 0x4b9   :  { %v3143_v0 = vadd.f32 %v3142_v62, %v3141_v63  ;;  %v4354_v63 = vld [vmem:[#allocation2 + $0x50] sm:$0xff] }
 0x4bb   :  { %v3144_v1 = vrot.slane %v3143_v0, 4 }
 0x4bd   :  { %v3145_v2 = vadd.f32 %v3144_v1, %v3143_v0 }
 0x4bf   :  { %v3146_v4 = vrot.slane %v3145_v2, 2 }
 0x4c1   :  { %v3147_v5 = vadd.f32 %v3146_v4, %v3145_v2 }
 0x4c3   :  { %v3148_v6 = vrot.slane %v3147_v5, 1 }
 0x4c5   :  { %v3149_v8 = vadd.f32 %v3148_v6, %v3147_v5  ;;  %v4355_v5 = vld [vmem:[#allocation2 + $0x58] sm:$0xff] }
 0x4c7   :  { %v5324_v9 = vmul.f32 0.0009765625, %v3149_v8 }
 0x4c9   :  { %v5327_v10 = vsub.f32 %v2886_v53, %v5324_v9  ;;  %v5330_v11 = vsub.f32 %v2887_v56, %v5324_v9  ;;  %v5333_v12 = vsub.f32 %v2888_v59, %v5324_v9  ;;  %v5336_v15 = vsub.f32 %v4344_v14, %v5324_v9  ;;  %v4352_v53 = vld [vmem:[#allocation2 + $0x40] sm:$0xff] }
 0x4ca   :  { %v5339_v17 = vsub.f32 %v4345_v16, %v5324_v9  ;;  %v5342_v20 = vsub.f32 %v4346_v19, %v5324_v9  ;;  %v5345_v22 = vsub.f32 %v4347_v21, %v5324_v9  ;;  %v5352_v26 = vsub.f32 %v4348_v25, %v5324_v9  ;;  %v4356_v19 = vld [vmem:[#allocation2 + $0x60] sm:$0xff] }
 0x4cb   :  { %7851 = vst [vmem:[#allocation10_spill] sm:$0xff] %v5327_v10  ;;  %v3279_v23 = vmul.f32 %v5336_v15, %v5336_v15  ;;  %v5357_v30 = vsub.f32 %v4349_v29, %v5324_v9  ;;  %v5364_v39 = vsub.f32 %v4350_v38, %v5324_v9  ;;  %v5370_v47 = vsub.f32 %v4351_v45, %v5324_v9  ;;  %v4359_v45 = vld [vmem:[#allocation2 + $0x78] sm:$0xff] }
 0x4cc   :  { %7852 = vst [vmem:[#allocation11_spill] sm:$0xff] %v5330_v11  ;;  %v3280_v52 = vmul.f32 %v5339_v17, %v5339_v17  ;;  %v3281_v28 = vmul.f32 %v5342_v20, %v5342_v20  ;;  %v3282_v32 = vmul.f32 %v5345_v22, %v5345_v22  ;;  %v3283_v41 = vmul.f32 %v5352_v26, %v5352_v26 }
 0x4cd   :  { %7853 = vst [vmem:[#allocation12_spill] sm:$0xff] %v5333_v12  ;;  %v3407_v33 = vsel %vm64_vm0, %v3279_v23, 0.0  ;;  %v3284_v48 = vmul.f32 %v5357_v30, %v5357_v30  ;;  %v5376_v54 = vsub.f32 %v4352_v53, %v5324_v9  ;;  %v3285_v55 = vmul.f32 %v5364_v39, %v5364_v39 }
 0x4ce   :  { %7854 = vst [vmem:[#allocation13_spill] sm:$0xff] %v5336_v15  ;;  %v3408_v35 = vsel %vm64_vm0, %v3280_v52, 0.0  ;;  %v3410_v42 = vsel %vm64_vm0, %v3281_v28, 0.0  ;;  %v3412_v50 = vsel %vm64_vm0, %v3282_v32, 0.0  ;;  %v3414_v56 = vsel %vm64_vm0, %v3283_v41, 0.0  ;;  %v4357_v28 = vld [vmem:[#allocation2 + $0x68] sm:$0xff] }
 0x4cf   :  { %7855 = vst [vmem:[#allocation14_spill] sm:$0xff] %v5339_v17  ;;  %v3409_v36 = vadd.f32 %v3408_v35, %v3407_v33  ;;  %v5382_v59 = vsub.f32 %v4353_v58, %v5324_v9  ;;  %v3286_v60 = vmul.f32 %v5370_v47, %v5370_v47  ;;  %v3416_v61 = vsel %vm64_vm0, %v3284_v48, 0.0 }
 0x4d0   :  { %7856 = vst [vmem:[#allocation15_spill] sm:$0xff] %v5342_v20  ;;  %v5388_v0 = vsub.f32 %v4354_v63, %v5324_v9  ;;  %v3287_v1 = vmul.f32 %v5376_v54, %v5376_v54  ;;  %v3418_v2 = vsel %vm64_vm0, %v3285_v55, 0.0  ;;  %v5394_v6 = vsub.f32 %v4355_v5, %v5324_v9  ;;  %v4360_v55 = vld [vmem:[#allocation2 + $0x80] sm:$0xff] }
 0x4d1   :  { %7857 = vst [vmem:[#allocation16_spill] sm:$0xff] %v5345_v22  ;;  %v3411_v44 = vadd.f32 %v3410_v42, %v3409_v36  ;;  %v3288_v8 = vmul.f32 %v5382_v59, %v5382_v59  ;;  %v3420_v14 = vsel %vm64_vm0, %v3286_v60, 0.0  ;;  %v5400_v21 = vsub.f32 %v4356_v19, %v5324_v9  ;;  %v4358_v36 = vld [vmem:[#allocation2 + $0x70] sm:$0xff]  ;;  %v4363_v19 = vld [vmem:[#allocation2 + $0x98] sm:$0xff] }
 0x4d2   :  { %7858 = vst [vmem:[#allocation17_spill] sm:$0xff] %v5352_v26  ;;  %v3289_v23 = vmul.f32 %v5388_v0, %v5388_v0  ;;  %v3422_v52 = vsel %vm64_vm0, %v3287_v1, 0.0  ;;  %v5406_v29 = vsub.f32 %v4357_v28, %v5324_v9  ;;  %v3290_v32 = vmul.f32 %v5394_v6, %v5394_v6 }
 0x4d3   :  { %7859 = vst [vmem:[#allocation18_spill] sm:$0xff] %v5357_v30  ;;  %v3413_v51 = vadd.f32 %v3412_v50, %v3411_v44  ;;  %v3424_v33 = vsel %vm64_vm0, %v3288_v8, 0.0  ;;  %v5412_v38 = vsub.f32 %v4358_v36, %v5324_v9  ;;  %v3291_v41 = vmul.f32 %v5400_v21, %v5400_v21 }
 0x4d4   :  { %7860 = vst [vmem:[#allocation19_spill] sm:$0xff] %v5364_v39  ;;  %v3426_v42 = vsel %vm64_vm0, %v3289_v23, 0.0  ;;  %v5418_v48 = vsub.f32 %v4359_v45, %v5324_v9  ;;  %v3292_v50 = vmul.f32 %v5406_v29, %v5406_v29  ;;  %v5442_v23 = vsub.f32 %v4363_v19, %v5324_v9 }
 0x4d5   :  { %7861 = vst [vmem:[#allocation20_spill] sm:$0xff] %v5370_v47  ;;  %v3415_v57 = vadd.f32 %v3414_v56, %v3413_v51  ;;  %v3428_v51 = vsel %vm64_vm0, %v3290_v32, 0.0  ;;  %v5424_v56 = vsub.f32 %v4360_v55, %v5324_v9  ;;  %v3430_v58 = vsel %vm64_vm0, %v3291_v41, 0.0  ;;  %v4364_v32 = vld [vmem:[#allocation2 + $0xa0] sm:$0xff] }
 0x4d6   :  { %7862 = vst [vmem:[#allocation21_spill] sm:$0xff] %v5376_v54  ;;  %v3294_v63 = vmul.f32 %v5418_v48, %v5418_v48  ;;  %v3432_v1 = vsel %vm64_vm0, %v3292_v50, 0.0  ;;  %v3298_v45 = vmul.f32 %v5442_v23, %v5442_v23 }
 0x4d7   :  { %7863 = vst [vmem:[#allocation22_spill] sm:$0xff] %v5382_v59  ;;  %v3417_v62 = vadd.f32 %v3416_v61, %v3415_v57  ;;  %v3293_v57 = vmul.f32 %v5412_v38, %v5412_v38  ;;  %v4361_v61 = vld [vmem:[#allocation2 + $0x88] sm:$0xff]  ;;  %v3295_v8 = vmul.f32 %v5424_v56, %v5424_v56 }
 0x4d8   :  { %7864 = vst [vmem:[#allocation23_spill] sm:$0xff] %v5388_v0 }
 0x4d9   :  { %v3419_v4 = vadd.f32 %v3418_v2, %v3417_v62  ;;  %7865 = vst [vmem:[#allocation24_spill] sm:$0xff] %v5394_v6  ;;  %v5430_v62 = vsub.f32 %v4361_v61, %v5324_v9  ;;  %v3438_v36 = vsel %vm64_vm0, %v3295_v8, 0.0  ;;  %v4367_v61 = vld [vmem:[#allocation2 + $0xb8] sm:$0xff]  ;;  %v4368_v8 = vld [vmem:[#allocation2 + $0xc0] sm:$0xff] }
 0x4da   :  { %7866 = vst [vmem:[#allocation25_spill] sm:$0xff] %v5400_v21 }
 0x4db   :  { %v3421_v16 = vadd.f32 %v3420_v14, %v3419_v4  ;;  %7867 = vst [vmem:[#allocation26_spill] sm:$0xff] %v5406_v29  ;;  %v4362_v4 = vld [vmem:[#allocation2 + $0x90] sm:$0xff]  ;;  %v3434_v14 = vsel %vm64_vm0, %v3293_v57, 0.0 }
 0x4dc   :  { %7868 = vst [vmem:[#allocation27_spill] sm:$0xff] %v5412_v38  ;;  %v5436_v5 = vsub.f32 %v4362_v4, %v5324_v9 }
 0x4dd   :  { %v3423_v25 = vadd.f32 %v3422_v52, %v3421_v16  ;;  %7869 = vst [vmem:[#allocation28_spill] sm:$0xff] %v5418_v48  ;;  %v3296_v52 = vmul.f32 %v5430_v62, %v5430_v62 }
 0x4de   :  { %7870 = vst [vmem:[#allocation29_spill] sm:$0xff] %v5424_v56 }
 0x4df   :  { %v3425_v35 = vadd.f32 %v3424_v33, %v3423_v25  ;;  %7871 = vst [vmem:[#allocation30_spill] sm:$0xff] %v5430_v62  ;;  %v3436_v25 = vsel %vm64_vm0, %v3294_v63, 0.0  ;;  %v5448_v33 = vsub.f32 %v4364_v32, %v5324_v9  ;;  %v3440_v50 = vsel %vm64_vm0, %v3296_v52, 0.0 }
 0x4e0   :  { %7872 = vst [vmem:[#allocation31_spill] sm:$0xff] %v5436_v5  ;;  %v5466_v63 = vsub.f32 %v4367_v61, %v5324_v9 }
 0x4e1   :  { %v3427_v44 = vadd.f32 %v3426_v42, %v3425_v35  ;;  %7873 = vst [vmem:[#allocation32_spill] sm:$0xff] %v5442_v23  ;;  %v3297_v35 = vmul.f32 %v5436_v5, %v5436_v5  ;;  %v4365_v42 = vld [vmem:[#allocation2 + $0xa8] sm:$0xff]  ;;  %v3299_v57 = vmul.f32 %v5448_v33, %v5448_v33 }
 0x4e2   :  { %7874 = vst [vmem:[#allocation33_spill] sm:$0xff] %v5448_v33  ;;  %v3302_v32 = vmul.f32 %v5466_v63, %v5466_v63 }
 0x4e3   :  { %v3429_v53 = vadd.f32 %v3428_v51, %v3427_v44  ;;  %v5454_v44 = vsub.f32 %v4365_v42, %v5324_v9  ;;  %7877 = vst [vmem:[#allocation36_spill] sm:$0xff] %v5466_v63  ;;  %v3446_v19 = vsel %vm64_vm0, %v3299_v57, 0.0 }
 0x4e5   :  { %v3431_v60 = vadd.f32 %v3430_v58, %v3429_v53  ;;  %7875 = vst [vmem:[#allocation34_spill] sm:$0xff] %v5454_v44  ;;  %v4366_v53 = vld [vmem:[#allocation2 + $0xb0] sm:$0xff]  ;;  %v3442_v58 = vsel %vm64_vm0, %v3297_v35, 0.0 }
 0x4e6   :  { %v5460_v55 = vsub.f32 %v4366_v53, %v5324_v9  ;;  %v4371_v53 = vld [vmem:[#allocation2 + $0xd8] sm:$0xff] }
 0x4e7   :  { %v3433_v2 = vadd.f32 %v3432_v1, %v3431_v60  ;;  %v3300_v1 = vmul.f32 %v5454_v44, %v5454_v44  ;;  %v5490_v57 = vsub.f32 %v4371_v53, %v5324_v9  ;;  %v4375_v53 = vld [vmem:[#allocation2 + $0xf8] sm:$0xff] }
 0x4e8   :  { %7876 = vst [vmem:[#allocation35_spill] sm:$0xff] %v5460_v55 }
 0x4e9   :  { %v3435_v16 = vadd.f32 %v3434_v14, %v3433_v2  ;;  %v3444_v2 = vsel %vm64_vm0, %v3298_v45, 0.0  ;;  %v5472_v14 = vsub.f32 %v4368_v8, %v5324_v9  ;;  %v3448_v35 = vsel %vm64_vm0, %v3300_v1, 0.0  ;;  %7881 = vst [vmem:[#allocation40_spill] sm:$0xff] %v5490_v57  ;;  %v4372_v1 = vld [vmem:[#allocation2 + $0xe0] sm:$0xff] }
 0x4eb   :  { %v3437_v28 = vadd.f32 %v3436_v25, %v3435_v16  ;;  %7878 = vst [vmem:[#allocation37_spill] sm:$0xff] %v5472_v14  ;;  %v3301_v16 = vmul.f32 %v5460_v55, %v5460_v55  ;;  %v4369_v25 = vld [vmem:[#allocation2 + $0xc8] sm:$0xff]  ;;  %v3303_v45 = vmul.f32 %v5472_v14, %v5472_v14 }
 0x4ed   :  { %v3439_v41 = vadd.f32 %v3438_v36, %v3437_v28  ;;  %v5478_v28 = vsub.f32 %v4369_v25, %v5324_v9  ;;  %v3454_v8 = vsel %vm64_vm0, %v3303_v45, 0.0  ;;  %v3306_v25 = vmul.f32 %v5490_v57, %v5490_v57 }
 0x4ef   :  { %v3441_v51 = vadd.f32 %v3440_v50, %v3439_v41  ;;  %7879 = vst [vmem:[#allocation38_spill] sm:$0xff] %v5478_v28  ;;  %v4370_v41 = vld [vmem:[#allocation2 + $0xd0] sm:$0xff]  ;;  %v3450_v50 = vsel %vm64_vm0, %v3301_v16, 0.0 }
 0x4f0   :  { %v5484_v42 = vsub.f32 %v4370_v41, %v5324_v9 }
 0x4f1   :  { %v3443_v60 = vadd.f32 %v3442_v58, %v3441_v51  ;;  %v3304_v58 = vmul.f32 %v5478_v28, %v5478_v28 }
 0x4f2   :  { %7880 = vst [vmem:[#allocation39_spill] sm:$0xff] %v5484_v42 }
 0x4f3   :  { %v3445_v4 = vadd.f32 %v3444_v2, %v3443_v60  ;;  %v3452_v60 = vsel %vm64_vm0, %v3302_v32, 0.0  ;;  %v5496_v2 = vsub.f32 %v4372_v1, %v5324_v9  ;;  %v3456_v32 = vsel %vm64_vm0, %v3304_v58, 0.0 }
 0x4f4   :  { %v3460_v58 = vsel %vm64_vm0, %v3306_v25, 0.0 }
 0x4f5   :  { %v3447_v52 = vadd.f32 %v3446_v19, %v3445_v4  ;;  %7882 = vst [vmem:[#allocation41_spill] sm:$0xff] %v5496_v2  ;;  %v3305_v4 = vmul.f32 %v5484_v42, %v5484_v42  ;;  %v4373_v19 = vld [vmem:[#allocation2 + $0xe8] sm:$0xff] }
 0x4f7   :  { %v3449_v36 = vadd.f32 %v3448_v35, %v3447_v52  ;;  %v5502_v52 = vsub.f32 %v4373_v19, %v5324_v9  ;;  %v3458_v45 = vsel %vm64_vm0, %v3305_v4, 0.0 }
 0x4f9   :  { %v3451_v51 = vadd.f32 %v3450_v50, %v3449_v36  ;;  %7883 = vst [vmem:[#allocation42_spill] sm:$0xff] %v5502_v52  ;;  %v4374_v36 = vld [vmem:[#allocation2 + $0xf0] sm:$0xff]  ;;  %v3307_v50 = vmul.f32 %v5496_v2, %v5496_v2 }
 0x4fa   :  { %v5508_v41 = vsub.f32 %v4374_v36, %v5324_v9 }
 0x4fb   :  { %v3453_v61 = vadd.f32 %v3452_v60, %v3451_v51  ;;  %v5514_v60 = vsub.f32 %v4375_v53, %v5324_v9  ;;  %v3462_v4 = vsel %vm64_vm0, %v3307_v50, 0.0  ;;  %v4378_v53 = vld [vmem:[#allocation2 + $0x110] sm:$0xff] }
 0x4fc   :  { %7884 = vst [vmem:[#allocation43_spill] sm:$0xff] %v5508_v41  ;;  %v3309_v19 = vmul.f32 %v5508_v41, %v5508_v41 }
 0x4fd   :  { %v3455_v16 = vadd.f32 %v3454_v8, %v3453_v61  ;;  %7885 = vst [vmem:[#allocation44_spill] sm:$0xff] %v5514_v60  ;;  %v3308_v61 = vmul.f32 %v5502_v52, %v5502_v52  ;;  %v4376_v8 = vld [vmem:[#allocation2 + $0x100] sm:$0xff] }
 0x4fe   :  { %v3466_v50 = vsel %vm64_vm0, %v3309_v19, 0.0 }
 0x4ff   :  { %v3457_v35 = vadd.f32 %v3456_v32, %v3455_v16  ;;  %v5520_v16 = vsub.f32 %v4376_v8, %v5324_v9  ;;  %v3464_v25 = vsel %vm64_vm0, %v3308_v61, 0.0 }
 0x501   :  { %v3459_v51 = vadd.f32 %v3458_v45, %v3457_v35  ;;  %7886 = vst [vmem:[#allocation45_spill] sm:$0xff] %v5520_v16  ;;  %v4377_v35 = vld [vmem:[#allocation2 + $0x108] sm:$0xff]  ;;  %v3310_v45 = vmul.f32 %v5514_v60, %v5514_v60  ;;  %v3311_v8 = vmul.f32 %v5520_v16, %v5520_v16 }
 0x502   :  { %v5526_v36 = vsub.f32 %v4377_v35, %v5324_v9 }
 0x503   :  { %v3461_v1 = vadd.f32 %v3460_v58, %v3459_v51  ;;  %v5532_v58 = vsub.f32 %v4378_v53, %v5324_v9  ;;  %v3468_v61 = vsel %vm64_vm0, %v3310_v45, 0.0  ;;  %v3470_v19 = vsel %vm64_vm0, %v3311_v8, 0.0 }
 0x504   :  { %7887 = vst [vmem:[#allocation46_spill] sm:$0xff] %v5526_v36  ;;  %v3312_v60 = vmul.f32 %v5526_v36, %v5526_v36 }
 0x505   :  { %v3463_v32 = vadd.f32 %v3462_v4, %v3461_v1  ;;  %7888 = vst [vmem:[#allocation47_spill] sm:$0xff] %v5532_v58  ;;  %v4379_v4 = vld [vmem:[#allocation2 + $0x118] sm:$0xff]  ;;  %v3313_v16 = vmul.f32 %v5532_v58, %v5532_v58 }
 0x506   :  { %v5538_v35 = vsub.f32 %v4379_v4, %v5324_v9  ;;  %v3472_v45 = vsel %vm64_vm0, %v3312_v60, 0.0 }
 0x507   :  { %v3465_v51 = vadd.f32 %v3464_v25, %v3463_v32  ;;  %v4380_v25 = vld [vmem:[#allocation2 + $0x120] sm:$0xff]  ;;  %v3474_v8 = vsel %vm64_vm0, %v3313_v16, 0.0 }
 0x508   :  { %7889 = vst [vmem:[#allocation48_spill] sm:$0xff] %v5538_v35  ;;  %v5544_v53 = vsub.f32 %v4380_v25, %v5324_v9  ;;  %v3314_v36 = vmul.f32 %v5538_v35, %v5538_v35 }
 0x509   :  { %v3467_v1 = vadd.f32 %v3466_v50, %v3465_v51  ;;  %v4381_v50 = vld [vmem:[#allocation2 + $0x128] sm:$0xff] }
 0x50a   :  { %7890 = vst [vmem:[#allocation49_spill] sm:$0xff] %v5544_v53  ;;  %v5550_v4 = vsub.f32 %v4381_v50, %v5324_v9  ;;  %v3315_v58 = vmul.f32 %v5544_v53, %v5544_v53  ;;  %v3476_v60 = vsel %vm64_vm0, %v3314_v36, 0.0 }
 0x50b   :  { %v3469_v32 = vadd.f32 %v3468_v61, %v3467_v1  ;;  %v4382_v61 = vld [vmem:[#allocation2 + $0x130] sm:$0xff] }
 0x50c   :  { %7891 = vst [vmem:[#allocation50_spill] sm:$0xff] %v5550_v4  ;;  %v5556_v25 = vsub.f32 %v4382_v61, %v5324_v9  ;;  %v3316_v35 = vmul.f32 %v5550_v4, %v5550_v4  ;;  %v3478_v16 = vsel %vm64_vm0, %v3315_v58, 0.0 }
 0x50d   :  { %v3471_v51 = vadd.f32 %v3470_v19, %v3469_v32  ;;  %v4383_v19 = vld [vmem:[#allocation2 + $0x138] sm:$0xff] }
 0x50e   :  { %7892 = vst [vmem:[#allocation51_spill] sm:$0xff] %v5556_v25  ;;  %v5562_v50 = vsub.f32 %v4383_v19, %v5324_v9  ;;  %v3317_v53 = vmul.f32 %v5556_v25, %v5556_v25  ;;  %v3480_v36 = vsel %vm64_vm0, %v3316_v35, 0.0 }
 0x50f   :  { %v3473_v1 = vadd.f32 %v3472_v45, %v3471_v51  ;;  %v4384_v45 = vld [vmem:[#allocation2 + $0x140] sm:$0xff] }
 0x510   :  { %7893 = vst [vmem:[#allocation52_spill] sm:$0xff] %v5562_v50  ;;  %v5568_v61 = vsub.f32 %v4384_v45, %v5324_v9  ;;  %v3318_v4 = vmul.f32 %v5562_v50, %v5562_v50  ;;  %v3482_v58 = vsel %vm64_vm0, %v3317_v53, 0.0 }
 0x511   :  { %v3475_v32 = vadd.f32 %v3474_v8, %v3473_v1  ;;  %v4385_v8 = vld [vmem:[#allocation2 + $0x148] sm:$0xff] }
 0x512   :  { %7894 = vst [vmem:[#allocation53_spill] sm:$0xff] %v5568_v61  ;;  %v5574_v19 = vsub.f32 %v4385_v8, %v5324_v9  ;;  %v3319_v25 = vmul.f32 %v5568_v61, %v5568_v61  ;;  %v3484_v35 = vsel %vm64_vm0, %v3318_v4, 0.0 }
 0x513   :  { %v3477_v51 = vadd.f32 %v3476_v60, %v3475_v32  ;;  %v4386_v60 = vld [vmem:[#allocation2 + $0x150] sm:$0xff] }
 0x514   :  { %7895 = vst [vmem:[#allocation54_spill] sm:$0xff] %v5574_v19  ;;  %v5580_v45 = vsub.f32 %v4386_v60, %v5324_v9  ;;  %v3320_v50 = vmul.f32 %v5574_v19, %v5574_v19  ;;  %v3486_v53 = vsel %vm64_vm0, %v3319_v25, 0.0 }
 0x515   :  { %v3479_v1 = vadd.f32 %v3478_v16, %v3477_v51  ;;  %v4387_v16 = vld [vmem:[#allocation2 + $0x158] sm:$0xff] }
 0x516   :  { %7896 = vst [vmem:[#allocation55_spill] sm:$0xff] %v5580_v45  ;;  %v5586_v8 = vsub.f32 %v4387_v16, %v5324_v9  ;;  %v3321_v61 = vmul.f32 %v5580_v45, %v5580_v45  ;;  %v3488_v4 = vsel %vm64_vm0, %v3320_v50, 0.0 }
 0x517   :  { %v3481_v32 = vadd.f32 %v3480_v36, %v3479_v1  ;;  %v4388_v36 = vld [vmem:[#allocation2 + $0x160] sm:$0xff] }
 0x518   :  { %7897 = vst [vmem:[#allocation56_spill] sm:$0xff] %v5586_v8  ;;  %v5592_v60 = vsub.f32 %v4388_v36, %v5324_v9  ;;  %v3322_v19 = vmul.f32 %v5586_v8, %v5586_v8  ;;  %v3490_v25 = vsel %vm64_vm0, %v3321_v61, 0.0 }
 0x519   :  { %v3483_v51 = vadd.f32 %v3482_v58, %v3481_v32  ;;  %v4389_v58 = vld [vmem:[#allocation2 + $0x168] sm:$0xff] }
 0x51a   :  { %7898 = vst [vmem:[#allocation57_spill] sm:$0xff] %v5592_v60  ;;  %v5598_v16 = vsub.f32 %v4389_v58, %v5324_v9  ;;  %v3323_v45 = vmul.f32 %v5592_v60, %v5592_v60  ;;  %v3492_v50 = vsel %vm64_vm0, %v3322_v19, 0.0 }
 0x51b   :  { %v3485_v1 = vadd.f32 %v3484_v35, %v3483_v51  ;;  %v4390_v35 = vld [vmem:[#allocation2 + $0x170] sm:$0xff] }
 0x51c   :  { %7899 = vst [vmem:[#allocation58_spill] sm:$0xff] %v5598_v16  ;;  %v5604_v36 = vsub.f32 %v4390_v35, %v5324_v9  ;;  %v3324_v8 = vmul.f32 %v5598_v16, %v5598_v16  ;;  %v3494_v61 = vsel %vm64_vm0, %v3323_v45, 0.0 }
 0x51d   :  { %v3487_v32 = vadd.f32 %v3486_v53, %v3485_v1  ;;  %v4391_v53 = vld [vmem:[#allocation2 + $0x178] sm:$0xff] }
 0x51e   :  { %7900 = vst [vmem:[#allocation59_spill] sm:$0xff] %v5604_v36  ;;  %v5610_v58 = vsub.f32 %v4391_v53, %v5324_v9  ;;  %v3325_v60 = vmul.f32 %v5604_v36, %v5604_v36  ;;  %v3496_v19 = vsel %vm64_vm0, %v3324_v8, 0.0 }
 0x51f   :  { %v3489_v51 = vadd.f32 %v3488_v4, %v3487_v32  ;;  %v4392_v4 = vld [vmem:[#allocation2 + $0x180] sm:$0xff] }
 0x520   :  { %7901 = vst [vmem:[#allocation60_spill] sm:$0xff] %v5610_v58  ;;  %v5616_v35 = vsub.f32 %v4392_v4, %v5324_v9  ;;  %v3326_v16 = vmul.f32 %v5610_v58, %v5610_v58  ;;  %v3498_v45 = vsel %vm64_vm0, %v3325_v60, 0.0 }
 0x521   :  { %v3491_v1 = vadd.f32 %v3490_v25, %v3489_v51  ;;  %v4393_v25 = vld [vmem:[#allocation2 + $0x188] sm:$0xff] }
 0x522   :  { %7902 = vst [vmem:[#allocation61_spill] sm:$0xff] %v5616_v35  ;;  %v5622_v53 = vsub.f32 %v4393_v25, %v5324_v9  ;;  %v3327_v36 = vmul.f32 %v5616_v35, %v5616_v35  ;;  %v3500_v8 = vsel %vm64_vm0, %v3326_v16, 0.0 }
 0x523   :  { %v3493_v32 = vadd.f32 %v3492_v50, %v3491_v1  ;;  %v4394_v50 = vld [vmem:[#allocation2 + $0x190] sm:$0xff] }
 0x524   :  { %7903 = vst [vmem:[#allocation62_spill] sm:$0xff] %v5622_v53  ;;  %v5628_v4 = vsub.f32 %v4394_v50, %v5324_v9  ;;  %v3328_v58 = vmul.f32 %v5622_v53, %v5622_v53  ;;  %v3502_v60 = vsel %vm64_vm0, %v3327_v36, 0.0 }
 0x525   :  { %v3495_v51 = vadd.f32 %v3494_v61, %v3493_v32  ;;  %v4395_v61 = vld [vmem:[#allocation2 + $0x198] sm:$0xff] }
 0x526   :  { %7904 = vst [vmem:[#allocation63_spill] sm:$0xff] %v5628_v4  ;;  %v5634_v25 = vsub.f32 %v4395_v61, %v5324_v9  ;;  %v3329_v35 = vmul.f32 %v5628_v4, %v5628_v4  ;;  %v3504_v16 = vsel %vm64_vm0, %v3328_v58, 0.0 }
 0x527   :  { %v3497_v1 = vadd.f32 %v3496_v19, %v3495_v51  ;;  %v4396_v19 = vld [vmem:[#allocation2 + $0x1a0] sm:$0xff] }
 0x528   :  { %7905 = vst [vmem:[#allocation64_spill] sm:$0xff] %v5634_v25  ;;  %v5640_v50 = vsub.f32 %v4396_v19, %v5324_v9  ;;  %v3330_v53 = vmul.f32 %v5634_v25, %v5634_v25  ;;  %v3506_v36 = vsel %vm64_vm0, %v3329_v35, 0.0 }
 0x529   :  { %v3499_v32 = vadd.f32 %v3498_v45, %v3497_v1  ;;  %v4397_v45 = vld [vmem:[#allocation2 + $0x1a8] sm:$0xff] }
 0x52a   :  { %7906 = vst [vmem:[#allocation65_spill] sm:$0xff] %v5640_v50  ;;  %v5646_v61 = vsub.f32 %v4397_v45, %v5324_v9  ;;  %v3331_v4 = vmul.f32 %v5640_v50, %v5640_v50  ;;  %v3508_v58 = vsel %vm64_vm0, %v3330_v53, 0.0 }
 0x52b   :  { %v3501_v51 = vadd.f32 %v3500_v8, %v3499_v32  ;;  %v4398_v8 = vld [vmem:[#allocation2 + $0x1b0] sm:$0xff] }
 0x52c   :  { %7907 = vst [vmem:[#allocation66_spill] sm:$0xff] %v5646_v61  ;;  %v5652_v19 = vsub.f32 %v4398_v8, %v5324_v9  ;;  %v3332_v25 = vmul.f32 %v5646_v61, %v5646_v61  ;;  %v3510_v35 = vsel %vm64_vm0, %v3331_v4, 0.0 }
 0x52d   :  { %v3503_v1 = vadd.f32 %v3502_v60, %v3501_v51  ;;  %v4399_v60 = vld [vmem:[#allocation2 + $0x1b8] sm:$0xff] }
 0x52e   :  { %7908 = vst [vmem:[#allocation67_spill] sm:$0xff] %v5652_v19  ;;  %v5658_v45 = vsub.f32 %v4399_v60, %v5324_v9  ;;  %v3333_v50 = vmul.f32 %v5652_v19, %v5652_v19  ;;  %v3512_v53 = vsel %vm64_vm0, %v3332_v25, 0.0 }
 0x52f   :  { %v3505_v32 = vadd.f32 %v3504_v16, %v3503_v1  ;;  %v4400_v16 = vld [vmem:[#allocation2 + $0x1c0] sm:$0xff] }
 0x530   :  { %7909 = vst [vmem:[#allocation68_spill] sm:$0xff] %v5658_v45  ;;  %v5664_v8 = vsub.f32 %v4400_v16, %v5324_v9  ;;  %v3334_v61 = vmul.f32 %v5658_v45, %v5658_v45  ;;  %v3514_v4 = vsel %vm64_vm0, %v3333_v50, 0.0 }
 0x531   :  { %v3507_v51 = vadd.f32 %v3506_v36, %v3505_v32  ;;  %v4401_v36 = vld [vmem:[#allocation2 + $0x1c8] sm:$0xff] }
 0x532   :  { %7910 = vst [vmem:[#allocation69_spill] sm:$0xff] %v5664_v8  ;;  %v5670_v60 = vsub.f32 %v4401_v36, %v5324_v9  ;;  %v3335_v19 = vmul.f32 %v5664_v8, %v5664_v8  ;;  %v3516_v25 = vsel %vm64_vm0, %v3334_v61, 0.0 }
 0x533   :  { %v3509_v1 = vadd.f32 %v3508_v58, %v3507_v51  ;;  %v4402_v58 = vld [vmem:[#allocation2 + $0x1d0] sm:$0xff] }
 0x534   :  { %7911 = vst [vmem:[#allocation70_spill] sm:$0xff] %v5670_v60  ;;  %v5676_v16 = vsub.f32 %v4402_v58, %v5324_v9  ;;  %v3336_v45 = vmul.f32 %v5670_v60, %v5670_v60  ;;  %v3518_v50 = vsel %vm64_vm0, %v3335_v19, 0.0 }
 0x535   :  { %v3511_v32 = vadd.f32 %v3510_v35, %v3509_v1  ;;  %v4403_v35 = vld [vmem:[#allocation2 + $0x1d8] sm:$0xff] }
 0x536   :  { %7912 = vst [vmem:[#allocation71_spill] sm:$0xff] %v5676_v16  ;;  %v5682_v36 = vsub.f32 %v4403_v35, %v5324_v9  ;;  %v3337_v8 = vmul.f32 %v5676_v16, %v5676_v16  ;;  %v3520_v61 = vsel %vm64_vm0, %v3336_v45, 0.0 }
 0x537   :  { %v3513_v51 = vadd.f32 %v3512_v53, %v3511_v32  ;;  %v4404_v53 = vld [vmem:[#allocation2 + $0x1e0] sm:$0xff] }
 0x538   :  { %7913 = vst [vmem:[#allocation72_spill] sm:$0xff] %v5682_v36  ;;  %v5688_v58 = vsub.f32 %v4404_v53, %v5324_v9  ;;  %v3338_v60 = vmul.f32 %v5682_v36, %v5682_v36  ;;  %v3522_v19 = vsel %vm64_vm0, %v3337_v8, 0.0 }
 0x539   :  { %v3515_v1 = vadd.f32 %v3514_v4, %v3513_v51  ;;  %v4405_v4 = vld [vmem:[#allocation2 + $0x1e8] sm:$0xff] }
 0x53a   :  { %7914 = vst [vmem:[#allocation73_spill] sm:$0xff] %v5688_v58  ;;  %v5694_v35 = vsub.f32 %v4405_v4, %v5324_v9  ;;  %v3339_v16 = vmul.f32 %v5688_v58, %v5688_v58  ;;  %v3524_v45 = vsel %vm64_vm0, %v3338_v60, 0.0 }
 0x53b   :  { %v3517_v32 = vadd.f32 %v3516_v25, %v3515_v1  ;;  %v4406_v25 = vld [vmem:[#allocation2 + $0x1f0] sm:$0xff] }
 0x53c   :  { %7915 = vst [vmem:[#allocation74_spill] sm:$0xff] %v5694_v35  ;;  %v5700_v53 = vsub.f32 %v4406_v25, %v5324_v9  ;;  %v3340_v36 = vmul.f32 %v5694_v35, %v5694_v35  ;;  %v3526_v8 = vsel %vm64_vm0, %v3339_v16, 0.0 }
 0x53d   :  { %v3519_v51 = vadd.f32 %v3518_v50, %v3517_v32  ;;  %v4407_v50 = vld [vmem:[#allocation2 + $0x1f8] sm:$0xff] }
 0x53e   :  { %7916 = vst [vmem:[#allocation75_spill] sm:$0xff] %v5700_v53  ;;  %v5706_v4 = vsub.f32 %v4407_v50, %v5324_v9  ;;  %v3341_v58 = vmul.f32 %v5700_v53, %v5700_v53  ;;  %v3528_v60 = vsel %vm64_vm0, %v3340_v36, 0.0 }
 0x53f   :  { %v3521_v1 = vadd.f32 %v3520_v61, %v3519_v51  ;;  %v4408_v61 = vld [vmem:[#allocation2 + $0x200] sm:$0xff] }
 0x540   :  { %7917 = vst [vmem:[#allocation76_spill] sm:$0xff] %v5706_v4  ;;  %v5712_v25 = vsub.f32 %v4408_v61, %v5324_v9  ;;  %v3342_v35 = vmul.f32 %v5706_v4, %v5706_v4  ;;  %v3530_v16 = vsel %vm64_vm0, %v3341_v58, 0.0 }
 0x541   :  { %v3523_v32 = vadd.f32 %v3522_v19, %v3521_v1  ;;  %v4409_v19 = vld [vmem:[#allocation2 + $0x208] sm:$0xff] }
 0x542   :  { %v5718_v50 = vsub.f32 %v4409_v19, %v5324_v9  ;;  %v3343_v53 = vmul.f32 %v5712_v25, %v5712_v25  ;;  %v3532_v36 = vsel %vm64_vm0, %v3342_v35, 0.0 }
 0x543   :  { %v3525_v51 = vadd.f32 %v3524_v45, %v3523_v32  ;;  %v4410_v45 = vld [vmem:[#allocation2 + $0x210] sm:$0xff] }
 0x544   :  { %v5724_v61 = vsub.f32 %v4410_v45, %v5324_v9  ;;  %v3344_v41 = vmul.f32 %v5718_v50, %v5718_v50  ;;  %v3534_v58 = vsel %vm64_vm0, %v3343_v53, 0.0 }
 0x545   :  { %v3527_v1 = vadd.f32 %v3526_v8, %v3525_v51  ;;  %v4411_v8 = vld [vmem:[#allocation2 + $0x218] sm:$0xff] }
 0x546   :  { %v5730_v19 = vsub.f32 %v4411_v8, %v5324_v9  ;;  %v3345_v52 = vmul.f32 %v5724_v61, %v5724_v61  ;;  %v3536_v35 = vsel %vm64_vm0, %v3344_v41, 0.0 }
 0x547   :  { %v3529_v32 = vadd.f32 %v3528_v60, %v3527_v1  ;;  %v4412_v60 = vld [vmem:[#allocation2 + $0x220] sm:$0xff] }
 0x548   :  { %v5736_v45 = vsub.f32 %v4412_v60, %v5324_v9  ;;  %v3346_v2 = vmul.f32 %v5730_v19, %v5730_v19  ;;  %v3538_v53 = vsel %vm64_vm0, %v3345_v52, 0.0 }
 0x549   :  { %v3531_v51 = vadd.f32 %v3530_v16, %v3529_v32  ;;  %v4413_v16 = vld [vmem:[#allocation2 + $0x228] sm:$0xff] }
 0x54a   :  { %v5742_v8 = vsub.f32 %v4413_v16, %v5324_v9  ;;  %v3347_v57 = vmul.f32 %v5736_v45, %v5736_v45  ;;  %v3540_v41 = vsel %vm64_vm0, %v3346_v2, 0.0 }
 0x54b   :  { %v3533_v1 = vadd.f32 %v3532_v36, %v3531_v51  ;;  %v4414_v36 = vld [vmem:[#allocation2 + $0x230] sm:$0xff] }
 0x54c   :  { %v5748_v60 = vsub.f32 %v4414_v36, %v5324_v9  ;;  %v3348_v42 = vmul.f32 %v5742_v8, %v5742_v8  ;;  %v3542_v52 = vsel %vm64_vm0, %v3347_v57, 0.0 }
 0x54d   :  { %v3535_v32 = vadd.f32 %v3534_v58, %v3533_v1  ;;  %v4415_v58 = vld [vmem:[#allocation2 + $0x238] sm:$0xff] }
 0x54e   :  { %v5754_v16 = vsub.f32 %v4415_v58, %v5324_v9  ;;  %v3349_v28 = vmul.f32 %v5748_v60, %v5748_v60  ;;  %v3544_v2 = vsel %vm64_vm0, %v3348_v42, 0.0 }
 0x54f   :  { %v3537_v51 = vadd.f32 %v3536_v35, %v3535_v32  ;;  %v4416_v35 = vld [vmem:[#allocation2 + $0x240] sm:$0xff] }
 0x550   :  { %v5760_v36 = vsub.f32 %v4416_v35, %v5324_v9  ;;  %v3350_v14 = vmul.f32 %v5754_v16, %v5754_v16  ;;  %v3546_v57 = vsel %vm64_vm0, %v3349_v28, 0.0 }
 0x551   :  { %v3539_v1 = vadd.f32 %v3538_v53, %v3537_v51  ;;  %v4417_v53 = vld [vmem:[#allocation2 + $0x248] sm:$0xff] }
 0x552   :  { %v5766_v58 = vsub.f32 %v4417_v53, %v5324_v9  ;;  %v3351_v63 = vmul.f32 %v5760_v36, %v5760_v36  ;;  %v3548_v42 = vsel %vm64_vm0, %v3350_v14, 0.0 }
 0x553   :  { %v3541_v32 = vadd.f32 %v3540_v41, %v3539_v1  ;;  %v4418_v41 = vld [vmem:[#allocation2 + $0x250] sm:$0xff] }
 0x554   :  { %v5772_v35 = vsub.f32 %v4418_v41, %v5324_v9  ;;  %v3352_v55 = vmul.f32 %v5766_v58, %v5766_v58  ;;  %v3550_v28 = vsel %vm64_vm0, %v3351_v63, 0.0 }
 0x555   :  { %v3543_v51 = vadd.f32 %v3542_v52, %v3541_v32  ;;  %v4419_v52 = vld [vmem:[#allocation2 + $0x258] sm:$0xff] }
 0x556   :  { %v5778_v53 = vsub.f32 %v4419_v52, %v5324_v9  ;;  %v3353_v44 = vmul.f32 %v5772_v35, %v5772_v35  ;;  %v3552_v14 = vsel %vm64_vm0, %v3352_v55, 0.0 }
 0x557   :  { %v3545_v1 = vadd.f32 %v3544_v2, %v3543_v51  ;;  %v4420_v2 = vld [vmem:[#allocation2 + $0x260] sm:$0xff] }
 0x558   :  { %v5784_v41 = vsub.f32 %v4420_v2, %v5324_v9  ;;  %v3354_v33 = vmul.f32 %v5778_v53, %v5778_v53  ;;  %v3554_v63 = vsel %vm64_vm0, %v3353_v44, 0.0 }
 0x559   :  { %v3547_v32 = vadd.f32 %v3546_v57, %v3545_v1  ;;  %v4421_v57 = vld [vmem:[#allocation2 + $0x268] sm:$0xff] }
 0x55a   :  { %v5790_v52 = vsub.f32 %v4421_v57, %v5324_v9  ;;  %v3355_v23 = vmul.f32 %v5784_v41, %v5784_v41  ;;  %v3556_v55 = vsel %vm64_vm0, %v3354_v33, 0.0 }
 0x55b   :  { %v3549_v51 = vadd.f32 %v3548_v42, %v3547_v32  ;;  %v4422_v42 = vld [vmem:[#allocation2 + $0x270] sm:$0xff] }
 0x55c   :  { %v5796_v2 = vsub.f32 %v4422_v42, %v5324_v9  ;;  %v3356_v5 = vmul.f32 %v5790_v52, %v5790_v52  ;;  %v3558_v44 = vsel %vm64_vm0, %v3355_v23, 0.0 }
 0x55d   :  { %v3551_v1 = vadd.f32 %v3550_v28, %v3549_v51  ;;  %v4423_v28 = vld [vmem:[#allocation2 + $0x278] sm:$0xff] }
 0x55e   :  { %v5802_v57 = vsub.f32 %v4423_v28, %v5324_v9  ;;  %v3357_v62 = vmul.f32 %v5796_v2, %v5796_v2  ;;  %v3560_v33 = vsel %vm64_vm0, %v3356_v5, 0.0 }
 0x55f   :  { %v3553_v32 = vadd.f32 %v3552_v14, %v3551_v1  ;;  %v4424_v14 = vld [vmem:[#allocation2 + $0x280] sm:$0xff] }
 0x560   :  { %v5808_v42 = vsub.f32 %v4424_v14, %v5324_v9  ;;  %v3358_v56 = vmul.f32 %v5802_v57, %v5802_v57  ;;  %v3562_v23 = vsel %vm64_vm0, %v3357_v62, 0.0 }
 0x561   :  { %v3555_v51 = vadd.f32 %v3554_v63, %v3553_v32  ;;  %v4425_v63 = vld [vmem:[#allocation2 + $0x288] sm:$0xff] }
 0x562   :  { %v5814_v28 = vsub.f32 %v4425_v63, %v5324_v9  ;;  %v3359_v48 = vmul.f32 %v5808_v42, %v5808_v42  ;;  %v3564_v5 = vsel %vm64_vm0, %v3358_v56, 0.0 }
 0x563   :  { %v3557_v1 = vadd.f32 %v3556_v55, %v3555_v51  ;;  %v4426_v55 = vld [vmem:[#allocation2 + $0x290] sm:$0xff] }
 0x564   :  { %v5820_v14 = vsub.f32 %v4426_v55, %v5324_v9  ;;  %v3360_v38 = vmul.f32 %v5814_v28, %v5814_v28  ;;  %v3566_v62 = vsel %vm64_vm0, %v3359_v48, 0.0 }
 0x565   :  { %v3559_v32 = vadd.f32 %v3558_v44, %v3557_v1  ;;  %v4427_v44 = vld [vmem:[#allocation2 + $0x298] sm:$0xff] }
 0x566   :  { %v5826_v63 = vsub.f32 %v4427_v44, %v5324_v9  ;;  %v3361_v29 = vmul.f32 %v5820_v14, %v5820_v14  ;;  %v3568_v56 = vsel %vm64_vm0, %v3360_v38, 0.0 }
 0x567   :  { %v3561_v51 = vadd.f32 %v3560_v33, %v3559_v32  ;;  %v4428_v33 = vld [vmem:[#allocation2 + $0x2a0] sm:$0xff] }
 0x568   :  { %v5832_v55 = vsub.f32 %v4428_v33, %v5324_v9  ;;  %v3362_v21 = vmul.f32 %v5826_v63, %v5826_v63  ;;  %v3570_v48 = vsel %vm64_vm0, %v3361_v29, 0.0 }
 0x569   :  { %v3563_v1 = vadd.f32 %v3562_v23, %v3561_v51  ;;  %v4429_v23 = vld [vmem:[#allocation2 + $0x2a8] sm:$0xff] }
 0x56a   :  { %v5838_v44 = vsub.f32 %v4429_v23, %v5324_v9  ;;  %v3363_v6 = vmul.f32 %v5832_v55, %v5832_v55  ;;  %v3572_v38 = vsel %vm64_vm0, %v3362_v21, 0.0 }
 0x56b   :  { %v3565_v32 = vadd.f32 %v3564_v5, %v3563_v1  ;;  %v4430_v5 = vld [vmem:[#allocation2 + $0x2b0] sm:$0xff] }
 0x56c   :  { %v5844_v33 = vsub.f32 %v4430_v5, %v5324_v9  ;;  %v3364_v0 = vmul.f32 %v5838_v44, %v5838_v44  ;;  %v3574_v29 = vsel %vm64_vm0, %v3363_v6, 0.0 }
 0x56d   :  { %v3567_v51 = vadd.f32 %v3566_v62, %v3565_v32  ;;  %v4431_v62 = vld [vmem:[#allocation2 + $0x2b8] sm:$0xff] }
 0x56e   :  { %v5850_v23 = vsub.f32 %v4431_v62, %v5324_v9  ;;  %v3365_v59 = vmul.f32 %v5844_v33, %v5844_v33  ;;  %v3576_v21 = vsel %vm64_vm0, %v3364_v0, 0.0 }
 0x56f   :  { %v3569_v1 = vadd.f32 %v3568_v56, %v3567_v51  ;;  %v4432_v56 = vld [vmem:[#allocation2 + $0x2c0] sm:$0xff] }
 0x570   :  { %v5856_v5 = vsub.f32 %v4432_v56, %v5324_v9  ;;  %v3366_v54 = vmul.f32 %v5850_v23, %v5850_v23  ;;  %v3578_v6 = vsel %vm64_vm0, %v3365_v59, 0.0 }
 0x571   :  { %v3571_v32 = vadd.f32 %v3570_v48, %v3569_v1  ;;  %v4433_v48 = vld [vmem:[#allocation2 + $0x2c8] sm:$0xff] }
 0x572   :  { %v5862_v62 = vsub.f32 %v4433_v48, %v5324_v9  ;;  %v3367_v47 = vmul.f32 %v5856_v5, %v5856_v5  ;;  %v3580_v0 = vsel %vm64_vm0, %v3366_v54, 0.0 }
 0x573   :  { %v3573_v51 = vadd.f32 %v3572_v38, %v3571_v32  ;;  %v4434_v38 = vld [vmem:[#allocation2 + $0x2d0] sm:$0xff] }
 0x574   :  { %v5868_v56 = vsub.f32 %v4434_v38, %v5324_v9  ;;  %v3368_v39 = vmul.f32 %v5862_v62, %v5862_v62  ;;  %v3582_v59 = vsel %vm64_vm0, %v3367_v47, 0.0 }
 0x575   :  { %v3575_v1 = vadd.f32 %v3574_v29, %v3573_v51  ;;  %v4435_v29 = vld [vmem:[#allocation2 + $0x2d8] sm:$0xff] }
 0x576   :  { %v5874_v48 = vsub.f32 %v4435_v29, %v5324_v9  ;;  %v3369_v4 = vmul.f32 %v5868_v56, %v5868_v56  ;;  %v3584_v54 = vsel %vm64_vm0, %v3368_v39, 0.0 }
 0x577   :  { %v3577_v32 = vadd.f32 %v3576_v21, %v3575_v1  ;;  %v4436_v21 = vld [vmem:[#allocation2 + $0x2e0] sm:$0xff] }
 0x578   :  { %v5880_v38 = vsub.f32 %v4436_v21, %v5324_v9  ;;  %v3370_v30 = vmul.f32 %v5874_v48, %v5874_v48  ;;  %v3586_v47 = vsel %vm64_vm0, %v3369_v4, 0.0 }
 0x579   :  { %v3579_v51 = vadd.f32 %v3578_v6, %v3577_v32  ;;  %v4437_v6 = vld [vmem:[#allocation2 + $0x2e8] sm:$0xff] }
 0x57a   :  { %v5886_v29 = vsub.f32 %v4437_v6, %v5324_v9  ;;  %v3371_v26 = vmul.f32 %v5880_v38, %v5880_v38  ;;  %v3588_v39 = vsel %vm64_vm0, %v3370_v30, 0.0 }
 0x57b   :  { %v3581_v1 = vadd.f32 %v3580_v0, %v3579_v51  ;;  %v4438_v0 = vld [vmem:[#allocation2 + $0x2f0] sm:$0xff] }
 0x57c   :  { %v5892_v21 = vsub.f32 %v4438_v0, %v5324_v9  ;;  %v3372_v22 = vmul.f32 %v5886_v29, %v5886_v29  ;;  %v3590_v4 = vsel %vm64_vm0, %v3371_v26, 0.0 }
 0x57d   :  { %v3583_v32 = vadd.f32 %v3582_v59, %v3581_v1  ;;  %v4439_v59 = vld [vmem:[#allocation2 + $0x2f8] sm:$0xff] }
 0x57e   :  { %v5898_v6 = vsub.f32 %v4439_v59, %v5324_v9  ;;  %v3373_v20 = vmul.f32 %v5892_v21, %v5892_v21  ;;  %v3592_v30 = vsel %vm64_vm0, %v3372_v22, 0.0 }
 0x57f   :  { %v3585_v51 = vadd.f32 %v3584_v54, %v3583_v32  ;;  %v4440_v54 = vld [vmem:[#allocation2 + $0x300] sm:$0xff] }
 0x580   :  { %7918 = vst [vmem:[#allocation77_spill] sm:$0xff] %v5898_v6  ;;  %v5904_v0 = vsub.f32 %v4440_v54, %v5324_v9  ;;  %v3374_v17 = vmul.f32 %v5898_v6, %v5898_v6  ;;  %v3594_v26 = vsel %vm64_vm0, %v3373_v20, 0.0 }
 0x581   :  { %v3587_v1 = vadd.f32 %v3586_v47, %v3585_v51  ;;  %v4441_v47 = vld [vmem:[#allocation2 + $0x308] sm:$0xff] }
 0x582   :  { %7919 = vst [vmem:[#allocation78_spill] sm:$0xff] %v5904_v0  ;;  %v5910_v59 = vsub.f32 %v4441_v47, %v5324_v9  ;;  %v3375_v15 = vmul.f32 %v5904_v0, %v5904_v0  ;;  %v3596_v22 = vsel %vm64_vm0, %v3374_v17, 0.0 }
 0x583   :  { %v3589_v32 = vadd.f32 %v3588_v39, %v3587_v1  ;;  %v4442_v39 = vld [vmem:[#allocation2 + $0x310] sm:$0xff] }
 0x584   :  { %7920 = vst [vmem:[#allocation79_spill] sm:$0xff] %v5910_v59  ;;  %v5916_v54 = vsub.f32 %v4442_v39, %v5324_v9  ;;  %v3376_v6 = vmul.f32 %v5910_v59, %v5910_v59  ;;  %v3598_v20 = vsel %vm64_vm0, %v3375_v15, 0.0 }
 0x585   :  { %v3591_v51 = vadd.f32 %v3590_v4, %v3589_v32  ;;  %v4443_v4 = vld [vmem:[#allocation2 + $0x318] sm:$0xff] }
 0x586   :  { %7921 = vst [vmem:[#allocation80_spill] sm:$0xff] %v5916_v54  ;;  %v5922_v47 = vsub.f32 %v4443_v4, %v5324_v9  ;;  %v3377_v0 = vmul.f32 %v5916_v54, %v5916_v54  ;;  %v3600_v17 = vsel %vm64_vm0, %v3376_v6, 0.0 }
 0x587   :  { %v3593_v1 = vadd.f32 %v3592_v30, %v3591_v51  ;;  %v4444_v30 = vld [vmem:[#allocation2 + $0x320] sm:$0xff] }
 0x588   :  { %7922 = vst [vmem:[#allocation81_spill] sm:$0xff] %v5922_v47  ;;  %v5928_v39 = vsub.f32 %v4444_v30, %v5324_v9  ;;  %v3378_v59 = vmul.f32 %v5922_v47, %v5922_v47  ;;  %v3602_v15 = vsel %vm64_vm0, %v3377_v0, 0.0 }
 0x589   :  { %v3595_v32 = vadd.f32 %v3594_v26, %v3593_v1  ;;  %v4445_v26 = vld [vmem:[#allocation2 + $0x328] sm:$0xff] }
 0x58a   :  { %7923 = vst [vmem:[#allocation82_spill] sm:$0xff] %v5928_v39  ;;  %v5934_v4 = vsub.f32 %v4445_v26, %v5324_v9  ;;  %v3379_v54 = vmul.f32 %v5928_v39, %v5928_v39  ;;  %v3604_v6 = vsel %vm64_vm0, %v3378_v59, 0.0 }
 0x58b   :  { %v3597_v51 = vadd.f32 %v3596_v22, %v3595_v32  ;;  %v4446_v22 = vld [vmem:[#allocation2 + $0x330] sm:$0xff] }
 0x58c   :  { %7924 = vst [vmem:[#allocation83_spill] sm:$0xff] %v5934_v4  ;;  %v5940_v30 = vsub.f32 %v4446_v22, %v5324_v9  ;;  %v3380_v47 = vmul.f32 %v5934_v4, %v5934_v4  ;;  %v3606_v0 = vsel %vm64_vm0, %v3379_v54, 0.0 }
 0x58d   :  { %v3599_v1 = vadd.f32 %v3598_v20, %v3597_v51  ;;  %v4447_v20 = vld [vmem:[#allocation2 + $0x338] sm:$0xff] }
 0x58e   :  { %7925 = vst [vmem:[#allocation84_spill] sm:$0xff] %v5940_v30  ;;  %v5946_v26 = vsub.f32 %v4447_v20, %v5324_v9  ;;  %v3381_v39 = vmul.f32 %v5940_v30, %v5940_v30  ;;  %v3608_v59 = vsel %vm64_vm0, %v3380_v47, 0.0 }
 0x58f   :  { %v3601_v32 = vadd.f32 %v3600_v17, %v3599_v1  ;;  %v4448_v17 = vld [vmem:[#allocation2 + $0x340] sm:$0xff] }
 0x590   :  { %7926 = vst [vmem:[#allocation85_spill] sm:$0xff] %v5946_v26  ;;  %v5952_v22 = vsub.f32 %v4448_v17, %v5324_v9  ;;  %v3382_v4 = vmul.f32 %v5946_v26, %v5946_v26  ;;  %v3610_v54 = vsel %vm64_vm0, %v3381_v39, 0.0 }
 0x591   :  { %v3603_v51 = vadd.f32 %v3602_v15, %v3601_v32  ;;  %v4449_v15 = vld [vmem:[#allocation2 + $0x348] sm:$0xff] }
 0x592   :  { %7927 = vst [vmem:[#allocation86_spill] sm:$0xff] %v5952_v22  ;;  %v5958_v20 = vsub.f32 %v4449_v15, %v5324_v9  ;;  %v3383_v30 = vmul.f32 %v5952_v22, %v5952_v22  ;;  %v3612_v47 = vsel %vm64_vm0, %v3382_v4, 0.0 }
 0x593   :  { %v3605_v1 = vadd.f32 %v3604_v6, %v3603_v51  ;;  %v4450_v6 = vld [vmem:[#allocation2 + $0x350] sm:$0xff] }
 0x594   :  { %7928 = vst [vmem:[#allocation87_spill] sm:$0xff] %v5958_v20  ;;  %v5964_v17 = vsub.f32 %v4450_v6, %v5324_v9  ;;  %v3384_v26 = vmul.f32 %v5958_v20, %v5958_v20  ;;  %v3614_v39 = vsel %vm64_vm0, %v3383_v30, 0.0 }
 0x595   :  { %v3607_v32 = vadd.f32 %v3606_v0, %v3605_v1  ;;  %v4451_v0 = vld [vmem:[#allocation2 + $0x358] sm:$0xff] }
 0x596   :  { %7929 = vst [vmem:[#allocation88_spill] sm:$0xff] %v5964_v17  ;;  %v5970_v15 = vsub.f32 %v4451_v0, %v5324_v9  ;;  %v3385_v22 = vmul.f32 %v5964_v17, %v5964_v17  ;;  %v3616_v4 = vsel %vm64_vm0, %v3384_v26, 0.0 }
 0x597   :  { %v3609_v51 = vadd.f32 %v3608_v59, %v3607_v32  ;;  %v4452_v59 = vld [vmem:[#allocation2 + $0x360] sm:$0xff] }
 0x598   :  { %7930 = vst [vmem:[#allocation89_spill] sm:$0xff] %v5970_v15  ;;  %v5976_v6 = vsub.f32 %v4452_v59, %v5324_v9  ;;  %v3386_v20 = vmul.f32 %v5970_v15, %v5970_v15  ;;  %v3618_v30 = vsel %vm64_vm0, %v3385_v22, 0.0 }
 0x599   :  { %v3611_v1 = vadd.f32 %v3610_v54, %v3609_v51  ;;  %v4453_v54 = vld [vmem:[#allocation2 + $0x368] sm:$0xff] }
 0x59a   :  { %v5982_v0 = vsub.f32 %v4453_v54, %v5324_v9  ;;  %v3387_v17 = vmul.f32 %v5976_v6, %v5976_v6  ;;  %v3620_v26 = vsel %vm64_vm0, %v3386_v20, 0.0 }
 0x59b   :  { %v3613_v32 = vadd.f32 %v3612_v47, %v3611_v1  ;;  %v4454_v47 = vld [vmem:[#allocation2 + $0x370] sm:$0xff] }
 0x59c   :  { %v5988_v59 = vsub.f32 %v4454_v47, %v5324_v9  ;;  %v3388_v15 = vmul.f32 %v5982_v0, %v5982_v0  ;;  %v3622_v22 = vsel %vm64_vm0, %v3387_v17, 0.0 }
 0x59d   :  { %v3615_v51 = vadd.f32 %v3614_v39, %v3613_v32  ;;  %v4455_v39 = vld [vmem:[#allocation2 + $0x378] sm:$0xff] }
 0x59e   :  { %v5994_v54 = vsub.f32 %v4455_v39, %v5324_v9  ;;  %v3389_v47 = vmul.f32 %v5988_v59, %v5988_v59  ;;  %v3624_v20 = vsel %vm64_vm0, %v3388_v15, 0.0 }
 0x59f   :  { %v3617_v1 = vadd.f32 %v3616_v4, %v3615_v51  ;;  %v6001_v4 = vsub.f32 %v5266_v3, %v5324_v9  ;;  %v6015_v3 = vsub.f32 %v5273_v13, %v5324_v9  ;;  %v6029_v13 = vsub.f32 %v5282_v24, %v5324_v9 }
 0x5a0   :  { %v3390_v39 = vmul.f32 %v5994_v54, %v5994_v54  ;;  %v3626_v17 = vsel %vm64_vm0, %v3389_v47, 0.0  ;;  %v6043_v24 = vsub.f32 %v5290_v31, %v5324_v9  ;;  %v6057_v31 = vsub.f32 %v5299_v37, %v5324_v9 }
 0x5a1   :  { %v3619_v32 = vadd.f32 %v3618_v30, %v3617_v1  ;;  %v6008_v30 = vsub.f32 %v5269_v7, %v5324_v9  ;;  %v6022_v7 = vsub.f32 %v5278_v18, %v5324_v9  ;;  %v6036_v18 = vsub.f32 %v5286_v27, %v5324_v9 }
 0x5a2   :  { %v3628_v15 = vsel %vm64_vm0, %v3390_v39, 0.0  ;;  %v6050_v27 = vsub.f32 %v5295_v34, %v5324_v9  ;;  %7931 = vst [vmem:[#allocation90_spill] sm:$0xff] %v6057_v31  ;;  %v6064_v34 = vsub.f32 %v5303_v40, %v5324_v9  ;;  %v6071_v37 = vsub.f32 %v5307_v43, %v5324_v9 }
 0x5a3   :  { %v3621_v51 = vadd.f32 %v3620_v26, %v3619_v32  ;;  %v3391_v26 = vmul.f32 %v6001_v4, %v6001_v4  ;;  %v6078_v40 = vsub.f32 %v5311_v46, %v5324_v9  ;;  %v6085_v43 = vsub.f32 %v5315_v49, %v5324_v9 }
 0x5a4   :  { %7932 = vst [vmem:[#allocation91_spill] sm:$0xff] %v6064_v34  ;;  %v3404_v49 = vmul.f32 %v5327_v10, %v5327_v10 }
 0x5a5   :  { %v3623_v1 = vadd.f32 %v3622_v22, %v3621_v51  ;;  %v3392_v22 = vmul.f32 %v6008_v30, %v6008_v30  ;;  %v3630_v47 = vsel %vm64_vm0, %v3391_v26, 0.0  ;;  %7933 = vst [vmem:[#allocation92_spill] sm:$0xff] %v6071_v37  ;;  %v3402_v46 = vmul.f32 %v6078_v40, %v6078_v40 }
 0x5a6   :  { %7934 = vst [vmem:[#allocation93_spill] sm:$0xff] %v6078_v40 }
 0x5a7   :  { %v3625_v32 = vadd.f32 %v3624_v20, %v3623_v1  ;;  %v3393_v20 = vmul.f32 %v6015_v3, %v6015_v3  ;;  %v3632_v39 = vsel %vm64_vm0, %v3392_v22, 0.0  ;;  %7935 = vst [vmem:[#allocation94_spill] sm:$0xff] %v6085_v43  ;;  %v3652_v9 = vsel %vm64_vm0, %v3402_v46, 0.0 }
 0x5a9   :  { %v3627_v51 = vadd.f32 %v3626_v17, %v3625_v32  ;;  %v3394_v17 = vmul.f32 %v6022_v7, %v6022_v7  ;;  %v3634_v26 = vsel %vm64_vm0, %v3393_v20, 0.0 }
 0x5ab   :  { %v3629_v1 = vadd.f32 %v3628_v15, %v3627_v51  ;;  %v3395_v15 = vmul.f32 %v6029_v13, %v6029_v13  ;;  %v3636_v22 = vsel %vm64_vm0, %v3394_v17, 0.0 }
 0x5ad   :  { %v3631_v32 = vadd.f32 %v3630_v47, %v3629_v1  ;;  %v3396_v47 = vmul.f32 %v6036_v18, %v6036_v18  ;;  %v3638_v20 = vsel %vm64_vm0, %v3395_v15, 0.0 }
 0x5af   :  { %v3633_v51 = vadd.f32 %v3632_v39, %v3631_v32  ;;  %v3397_v39 = vmul.f32 %v6043_v24, %v6043_v24  ;;  %v3640_v17 = vsel %vm64_vm0, %v3396_v47, 0.0 }
 0x5b1   :  { %v3635_v1 = vadd.f32 %v3634_v26, %v3633_v51  ;;  %v3398_v26 = vmul.f32 %v6050_v27, %v6050_v27  ;;  %v3642_v15 = vsel %vm64_vm0, %v3397_v39, 0.0 }
 0x5b3   :  { %v3637_v32 = vadd.f32 %v3636_v22, %v3635_v1  ;;  %v3399_v22 = vmul.f32 %v6057_v31, %v6057_v31  ;;  %v3644_v47 = vsel %vm64_vm0, %v3398_v26, 0.0  ;;  %v3403_v26 = vmul.f32 %v6085_v43, %v6085_v43 }
 0x5b5   :  { %v3639_v51 = vadd.f32 %v3638_v20, %v3637_v32  ;;  %v3400_v20 = vmul.f32 %v6064_v34, %v6064_v34  ;;  %v3646_v39 = vsel %vm64_vm0, %v3399_v22, 0.0  ;;  %v3405_v22 = vmul.f32 %v5330_v11, %v5330_v11 }
 0x5b7   :  { %v3641_v1 = vadd.f32 %v3640_v17, %v3639_v51  ;;  %v3401_v17 = vmul.f32 %v6071_v37, %v6071_v37 }
 0x5b9   :  { %v3643_v32 = vadd.f32 %v3642_v15, %v3641_v1  ;;  %v3648_v15 = vsel %vm64_vm0, %v3400_v20, 0.0  ;;  %v3406_v20 = vmul.f32 %v5333_v12, %v5333_v12 }
 0x5bb   :  { %v3645_v51 = vadd.f32 %v3644_v47, %v3643_v32  ;;  %v3650_v32 = vsel %vm64_vm0, %v3401_v17, 0.0 }
 0x5bd   :  { %v3647_v1 = vadd.f32 %v3646_v39, %v3645_v51  ;;  %v3654_v51 = vsel %vm64_vm0, %v3403_v26, 0.0 }
 0x5bf   :  { %v3649_v31 = vadd.f32 %v3648_v15, %v3647_v1  ;;  %v3656_v1 = vsel %vm64_vm0, %v3404_v49, 0.0 }
 0x5c1   :  { %v3651_v47 = vadd.f32 %v3650_v32, %v3649_v31  ;;  %v3658_v31 = vsel %vm64_vm0, %v3405_v22, 0.0  ;;  %v3660_v32 = vsel %vm64_vm0, %v3406_v20, 0.0  ;;  %v7937_v20 = vld [vmem:[#allocation78_spill] sm:$0xff] }
 0x5c3   :  { %v3653_v37 = vadd.f32 %v3652_v9, %v3651_v47 }
 0x5c5   :  { %v3655_v39 = vadd.f32 %v3654_v51, %v3653_v37 }
 0x5c7   :  { %v3657_v15 = vadd.f32 %v3656_v1, %v3655_v39 }
 0x5c9   :  { %v3659_v17 = vadd.f32 %v3658_v31, %v3657_v15  ;;  %v7938_v15 = vld [vmem:[#allocation79_spill] sm:$0xff]  ;;  %v7939_v31 = vld [vmem:[#allocation80_spill] sm:$0xff] }
 0x5cb   :  { %v3661_v10 = vadd.f32 %v3660_v32, %v3659_v17  ;;  %v7940_v17 = vld [vmem:[#allocation81_spill] sm:$0xff]  ;;  %v7941_v32 = vld [vmem:[#allocation82_spill] sm:$0xff] }
 0x5cd   :  { %v3662_v46 = vrot.slane %v3661_v10, 4 }
 0x5cf   :  { %v3663_v47 = vadd.f32 %v3662_v46, %v3661_v10 }
 0x5d1   :  { %v3664_v9 = vrot.slane %v3663_v47, 2 }
 0x5d3   :  { %v3665_v43 = vadd.f32 %v3664_v9, %v3663_v47  ;;  %v7942_v47 = vld [vmem:[#allocation83_spill] sm:$0xff] }
 0x5d5   :  { %v3666_v11 = vrot.slane %v3665_v43, 1 }
 0x5d7   :  { %v3667_v40 = vadd.f32 %v3666_v11, %v3665_v43  ;;  %v7936_v43 = vld [vmem:[#allocation77_spill] sm:$0xff] }
 0x5d9   :  { %v3668_v26 = vmul.f32 0.0009765625, %v3667_v40 }
 0x5db   :  { %v3669_v37 = vadd.f32 1e-05, %v3668_v26  ;;  %v7943_v26 = vld [vmem:[#allocation84_spill] sm:$0xff] }
 0x5dd   :  { %4342 = vrsqrt.f32 %v3669_v37  ;;  %vm3676_vm2 = vweird.f32 %v3669_v37 }
 0x5e3   :  { %v4343_v51 = vpop.eup %4342 }
 0x5e4   :  { %v3671_v12 = vmul.f32 %v4343_v51, %v3669_v37  ;;  %vm3677_vm1 = vweird.f32 %v4343_v51 }
 0x5e5   :  { %vm3678_vm3 = vmor %vm3676_vm2, %vm3677_vm1 }
 0x5e6   :  { %v3672_v34 = vmul.f32 %v4343_v51, %v3671_v12 }
 0x5e8   :  { %v3673_v49 = vmul.f32 0.5, %v3672_v34 }
 0x5ea   :  { %v3674_v39 = vsub.f32 1.5, %v3673_v49 }
 0x5ec   :  { %v3675_v1 = vmul.f32 %v4343_v51, %v3674_v39  ;;  %v7945_v39 = vld [vmem:[#allocation86_spill] sm:$0xff] }
 0x5ee   :  { %v6107_v22 = vsel %vm3678_vm3, %v4343_v51, %v3675_v1  ;;  %v7944_v51 = vld [vmem:[#allocation85_spill] sm:$0xff] }
 0x5ef   :  { %v6111_v10 = vmul.f32 %v6107_v22, %v5712_v25  ;;  %v6115_v11 = vmul.f32 %v6107_v22, %v5718_v50  ;;  %v6119_v40 = vmul.f32 %v6107_v22, %v5724_v61  ;;  %v6123_v12 = vmul.f32 %v6107_v22, %v5730_v19 }
 0x5f0   :  { %v6127_v34 = vmul.f32 %v6107_v22, %v5736_v45  ;;  %v6131_v25 = vmul.f32 %v6107_v22, %v5742_v8  ;;  %v6135_v50 = vmul.f32 %v6107_v22, %v5748_v60  ;;  %v6139_v61 = vmul.f32 %v6107_v22, %v5754_v16 }
 0x5f1   :  { %v6143_v19 = vmul.f32 %v6107_v22, %v5760_v36  ;;  %v6147_v45 = vmul.f32 %v6107_v22, %v5766_v58  ;;  %v6151_v8 = vmul.f32 %v6107_v22, %v5772_v35  ;;  %v6155_v60 = vmul.f32 %v6107_v22, %v5778_v53 }
 0x5f2   :  { %v6159_v16 = vmul.f32 %v6107_v22, %v5784_v41  ;;  %v6163_v36 = vmul.f32 %v6107_v22, %v5790_v52  ;;  %v6167_v58 = vmul.f32 %v6107_v22, %v5796_v2  ;;  %v6171_v35 = vmul.f32 %v6107_v22, %v5802_v57 }
 0x5f3   :  { %v6175_v53 = vmul.f32 %v6107_v22, %v5808_v42  ;;  %v6179_v41 = vmul.f32 %v6107_v22, %v5814_v28  ;;  %v6183_v52 = vmul.f32 %v6107_v22, %v5820_v14  ;;  %v6187_v2 = vmul.f32 %v6107_v22, %v5826_v63 }
 0x5f4   :  { %v6191_v57 = vmul.f32 %v6107_v22, %v5832_v55  ;;  %v6195_v42 = vmul.f32 %v6107_v22, %v5838_v44  ;;  %v6199_v28 = vmul.f32 %v6107_v22, %v5844_v33  ;;  %v6203_v14 = vmul.f32 %v6107_v22, %v5850_v23 }
 0x5f5   :  { %v6207_v63 = vmul.f32 %v6107_v22, %v5856_v5  ;;  %v6211_v55 = vmul.f32 %v6107_v22, %v5862_v62  ;;  %v6215_v44 = vmul.f32 %v6107_v22, %v5868_v56  ;;  %v6219_v33 = vmul.f32 %v6107_v22, %v5874_v48 }
 0x5f6   :  { %v6223_v23 = vmul.f32 %v6107_v22, %v5880_v38  ;;  %v6227_v5 = vmul.f32 %v6107_v22, %v5886_v29  ;;  %v6231_v62 = vmul.f32 %v6107_v22, %v5892_v21  ;;  %v6235_v56 = vmul.f32 %v6107_v22, %v7936_v43  ;;  %v7946_v43 = vld [vmem:[#allocation87_spill] sm:$0xff] }
 0x5f7   :  { %v6239_v48 = vmul.f32 %v6107_v22, %v7937_v20  ;;  %v6243_v38 = vmul.f32 %v6107_v22, %v7938_v15  ;;  %v6247_v29 = vmul.f32 %v6107_v22, %v7939_v31  ;;  %v6251_v21 = vmul.f32 %v6107_v22, %v7940_v17  ;;  %v7947_v15 = vld [vmem:[#allocation88_spill] sm:$0xff]  ;;  %v7948_v17 = vld [vmem:[#allocation89_spill] sm:$0xff] }
 0x5f8   :  { %v6255_v46 = vmul.f32 %v6107_v22, %v7941_v32  ;;  %v6259_v9 = vmul.f32 %v6107_v22, %v7942_v47  ;;  %v6263_v37 = vmul.f32 %v6107_v22, %v7943_v26  ;;  %v6267_v49 = vmul.f32 %v6107_v22, %v7944_v51 }
 0x5f9   :  { %v6271_v1 = vmul.f32 %v6107_v22, %v7945_v39  ;;  %v6275_v20 = vmul.f32 %v6107_v22, %v7946_v43  ;;  %v6279_v31 = vmul.f32 %v6107_v22, %v7947_v15  ;;  %v6283_v32 = vmul.f32 %v6107_v22, %v7948_v17  ;;  %v6317_v15 = vld [vmem:[#allocation5] ss:$0 sm:$0xff] }
 0x5fa   :  { %v6287_v47 = vmul.f32 %v6107_v22, %v5976_v6  ;;  %v6291_v26 = vmul.f32 %v6107_v22, %v5982_v0  ;;  %v6295_v51 = vmul.f32 %v6107_v22, %v5988_v59  ;;  %v6299_v39 = vmul.f32 %v6107_v22, %v5994_v54 }
 0x5fb   :  { %v6303_v43 = vmul.f32 %v6107_v22, %v6001_v4  ;;  %v6307_v6 = vmul.f32 %v6107_v22, %v6008_v30  ;;  %v6311_v0 = vmul.f32 %v6107_v22, %v6015_v3  ;;  %v6315_v59 = vmul.f32 %v6107_v22, %v6022_v7  ;;  %v7954_v7 = vld [vmem:[#allocation90_spill] sm:$0xff] }
 0x5fc   :  { %v6321_v54 = vmul.f32 %v6107_v22, %v6029_v13  ;;  %v6325_v4 = vmul.f32 %v6107_v22, %v6036_v18  ;;  %v6329_v30 = vmul.f32 %v6107_v22, %v6043_v24  ;;  %v6333_v3 = vmul.f32 %v6107_v22, %v6050_v27 }
 0x5fd   :  { %7949 = vst [vmem:[#allocation77_spill] sm:$0xff] %v6315_v59  ;;  %v6337_v17 = vmul.f32 %v6107_v22, %v7954_v7  ;;  %v7956_v59 = vld [vmem:[#allocation91_spill] sm:$0xff] }
 0x5fe   :  { %7950 = vst [vmem:[#allocation78_spill] sm:$0xff] %v6321_v54  ;;  %v6341_v13 = vmul.f32 %v6107_v22, %v7956_v59  ;;  %v7958_v54 = vld [vmem:[#allocation92_spill] sm:$0xff] }
 0x5ff   :  { %7951 = vst [vmem:[#allocation79_spill] sm:$0xff] %v6325_v4  ;;  %v6345_v18 = vmul.f32 %v6107_v22, %v7958_v54  ;;  %v7959_v4 = vld [vmem:[#allocation93_spill] sm:$0xff] }
 0x600   :  { %7952 = vst [vmem:[#allocation80_spill] sm:$0xff] %v6329_v30  ;;  %v6349_v24 = vmul.f32 %v6107_v22, %v7959_v4  ;;  %v7960_v30 = vld [vmem:[#allocation94_spill] sm:$0xff]  ;;  %v6369_v4 = vmul.f32 %v6317_v15, %v6111_v10  ;;  %v6389_v10 = vmul.f32 %v6317_v15, %v6131_v25  ;;  %v6409_v25 = vmul.f32 %v6317_v15, %v6151_v8 }
 0x601   :  { %7953 = vst [vmem:[#allocation81_spill] sm:$0xff] %v6333_v3  ;;  %v6353_v27 = vmul.f32 %v6107_v22, %v7960_v30  ;;  %v7961_v3 = vld [vmem:[#allocation10_spill] sm:$0xff]  ;;  %v6373_v30 = vmul.f32 %v6317_v15, %v6115_v11  ;;  %v6393_v11 = vmul.f32 %v6317_v15, %v6135_v50  ;;  %v6413_v50 = vmul.f32 %v6317_v15, %v6155_v60 }
 0x602   :  { %7955 = vst [vmem:[#allocation82_spill] sm:$0xff] %v6337_v17  ;;  %v6357_v7 = vmul.f32 %v6107_v22, %v7961_v3  ;;  %v7962_v17 = vld [vmem:[#allocation11_spill] sm:$0xff]  ;;  %v6377_v3 = vmul.f32 %v6317_v15, %v6119_v40  ;;  %v6397_v40 = vmul.f32 %v6317_v15, %v6139_v61  ;;  %v6417_v61 = vmul.f32 %v6317_v15, %v6159_v16 }
 0x603   :  { %7957 = vst [vmem:[#allocation83_spill] sm:$0xff] %v6341_v13  ;;  %v6361_v59 = vmul.f32 %v6107_v22, %v7962_v17  ;;  %v7963_v13 = vld [vmem:[#allocation12_spill] sm:$0xff]  ;;  %v6381_v17 = vmul.f32 %v6317_v15, %v6123_v12  ;;  %v6401_v12 = vmul.f32 %v6317_v15, %v6143_v19  ;;  %v6421_v19 = vmul.f32 %v6317_v15, %v6163_v36 }
 0x604   :  { %v6365_v54 = vmul.f32 %v6107_v22, %v7963_v13  ;;  %v6385_v13 = vmul.f32 %v6317_v15, %v6127_v34  ;;  %v6405_v34 = vmul.f32 %v6317_v15, %v6147_v45  ;;  %v6425_v45 = vmul.f32 %v6317_v15, %v6167_v58 }
 0x605   :  { %v6429_v8 = vmul.f32 %v6317_v15, %v6171_v35  ;;  %v6433_v60 = vmul.f32 %v6317_v15, %v6175_v53  ;;  %v6437_v16 = vmul.f32 %v6317_v15, %v6179_v41  ;;  %v6441_v36 = vmul.f32 %v6317_v15, %v6183_v52 }
 0x606   :  { %v6445_v58 = vmul.f32 %v6317_v15, %v6187_v2  ;;  %v6449_v35 = vmul.f32 %v6317_v15, %v6191_v57  ;;  %v6453_v53 = vmul.f32 %v6317_v15, %v6195_v42  ;;  %v6457_v41 = vmul.f32 %v6317_v15, %v6199_v28 }
 0x607   :  { %v6461_v52 = vmul.f32 %v6317_v15, %v6203_v14  ;;  %v6465_v2 = vmul.f32 %v6317_v15, %v6207_v63  ;;  %v6469_v57 = vmul.f32 %v6317_v15, %v6211_v55  ;;  %v6473_v42 = vmul.f32 %v6317_v15, %v6215_v44 }
 0x608   :  { %v6477_v28 = vmul.f32 %v6317_v15, %v6219_v33  ;;  %v6481_v14 = vmul.f32 %v6317_v15, %v6223_v23  ;;  %v6485_v63 = vmul.f32 %v6317_v15, %v6227_v5  ;;  %v6489_v55 = vmul.f32 %v6317_v15, %v6231_v62 }
 0x609   :  { %v6493_v44 = vmul.f32 %v6317_v15, %v6235_v56  ;;  %v6497_v33 = vmul.f32 %v6317_v15, %v6239_v48  ;;  %v6501_v23 = vmul.f32 %v6317_v15, %v6243_v38  ;;  %v6505_v5 = vmul.f32 %v6317_v15, %v6247_v29 }
 0x60a   :  { %v6509_v62 = vmul.f32 %v6317_v15, %v6251_v21  ;;  %v6513_v56 = vmul.f32 %v6317_v15, %v6255_v46  ;;  %v6517_v48 = vmul.f32 %v6317_v15, %v6259_v9  ;;  %v6521_v38 = vmul.f32 %v6317_v15, %v6263_v37 }
 0x60b   :  { %v6525_v29 = vmul.f32 %v6317_v15, %v6267_v49  ;;  %v6529_v21 = vmul.f32 %v6317_v15, %v6271_v1  ;;  %v6533_v46 = vmul.f32 %v6317_v15, %v6275_v20  ;;  %v6537_v9 = vmul.f32 %v6317_v15, %v6279_v31 }
 0x60c   :  { %7964 = vst [vmem:[#allocation84_spill] sm:$0xff] %v6521_v38  ;;  %v6541_v37 = vmul.f32 %v6317_v15, %v6283_v32  ;;  %v6545_v49 = vmul.f32 %v6317_v15, %v6287_v47  ;;  %v6549_v1 = vmul.f32 %v6317_v15, %v6291_v26  ;;  %v6553_v20 = vmul.f32 %v6317_v15, %v6295_v51  ;;  %v8012_v38 = vld [vmem:[#allocation27_spill] sm:$0xff] }
 0x60d   :  { %7965 = vst [vmem:[#allocation85_spill] sm:$0xff] %v6525_v29  ;;  %v6557_v31 = vmul.f32 %v6317_v15, %v6299_v39  ;;  %v6561_v32 = vmul.f32 %v6317_v15, %v6303_v43  ;;  %v6565_v47 = vmul.f32 %v6317_v15, %v6307_v6  ;;  %v6569_v26 = vmul.f32 %v6317_v15, %v6311_v0 }
 0x60e   :  { %7966 = vst [vmem:[#allocation86_spill] sm:$0xff] %v6529_v21 }
 0x60f   :  { %7967 = vst [vmem:[#allocation87_spill] sm:$0xff] %v6533_v46  ;;  %v6650_v46 = vld [vmem:[#allocation7] ss:$0 sm:$0xff] }
 0x610   :  { %7968 = vst [vmem:[#allocation88_spill] sm:$0xff] %v6537_v9 }
 0x611   :  { %7969 = vst [vmem:[#allocation89_spill] sm:$0xff] %v6541_v37  ;;  %v8008_v37 = vld [vmem:[#allocation23_spill] sm:$0xff] }
 0x612   :  { %7970 = vst [vmem:[#allocation90_spill] sm:$0xff] %v6545_v49  ;;  %v8007_v49 = vld [vmem:[#allocation22_spill] sm:$0xff] }
 0x613   :  { %7971 = vst [vmem:[#allocation91_spill] sm:$0xff] %v6549_v1  ;;  %v7977_v1 = vld [vmem:[#allocation77_spill] sm:$0xff] }
 0x614   :  { %7972 = vst [vmem:[#allocation92_spill] sm:$0xff] %v6553_v20  ;;  %v6573_v51 = vmul.f32 %v6317_v15, %v7977_v1  ;;  %v7979_v20 = vld [vmem:[#allocation78_spill] sm:$0xff] }
 0x615   :  { %7973 = vst [vmem:[#allocation93_spill] sm:$0xff] %v6557_v31  ;;  %v6577_v39 = vmul.f32 %v6317_v15, %v7979_v20  ;;  %v7981_v31 = vld [vmem:[#allocation79_spill] sm:$0xff] }
 0x616   :  { %7974 = vst [vmem:[#allocation94_spill] sm:$0xff] %v6561_v32  ;;  %v6581_v43 = vmul.f32 %v6317_v15, %v7981_v31  ;;  %v7983_v32 = vld [vmem:[#allocation80_spill] sm:$0xff]  ;;  %v6601_v31 = vmul.f32 %v6317_v15, %v6345_v18  ;;  %v6621_v18 = vmul.f32 %v6317_v15, %v6365_v54 }
 0x617   :  { %7975 = vst [vmem:[#allocation10_spill] sm:$0xff] %v6565_v47  ;;  %v6585_v6 = vmul.f32 %v6317_v15, %v7983_v32  ;;  %v7985_v47 = vld [vmem:[#allocation81_spill] sm:$0xff]  ;;  %v6605_v32 = vmul.f32 %v6317_v15, %v6349_v24  ;;  %v8003_v54 = vld [vmem:[#allocation76_spill] sm:$0xff] }
 0x618   :  { %7976 = vst [vmem:[#allocation11_spill] sm:$0xff] %v6569_v26  ;;  %v6589_v0 = vmul.f32 %v6317_v15, %v7985_v47  ;;  %v7987_v26 = vld [vmem:[#allocation82_spill] sm:$0xff]  ;;  %v6609_v47 = vmul.f32 %v6317_v15, %v6353_v27  ;;  %v7999_v27 = vld [vmem:[#allocation15_spill] sm:$0xff] }
 0x619   :  { %7978 = vst [vmem:[#allocation12_spill] sm:$0xff] %v6573_v51  ;;  %v6593_v1 = vmul.f32 %v6317_v15, %v7987_v26  ;;  %v7989_v51 = vld [vmem:[#allocation83_spill] sm:$0xff]  ;;  %v6613_v26 = vmul.f32 %v6317_v15, %v6357_v7 }
 0x61a   :  { %7980 = vst [vmem:[#allocation77_spill] sm:$0xff] %v6577_v39  ;;  %v6597_v20 = vmul.f32 %v6317_v15, %v7989_v51  ;;  %v6617_v51 = vmul.f32 %v6317_v15, %v6361_v59  ;;  %v8006_v39 = vld [vmem:[#allocation21_spill] sm:$0xff] }
 0x61b   :  { %7982 = vst [vmem:[#allocation78_spill] sm:$0xff] %v6581_v43  ;;  %v8005_v43 = vld [vmem:[#allocation20_spill] sm:$0xff] }
 0x61c   :  { %7984 = vst [vmem:[#allocation79_spill] sm:$0xff] %v6585_v6  ;;  %v8004_v6 = vld [vmem:[#allocation19_spill] sm:$0xff] }
 0x61d   :  { %7986 = vst [vmem:[#allocation80_spill] sm:$0xff] %v6589_v0 }
 0x61e   :  { %7988 = vst [vmem:[#allocation81_spill] sm:$0xff] %v6593_v1  ;;  %v8000_v1 = vld [vmem:[#allocation16_spill] sm:$0xff] }
 0x61f   :  { %7990 = vst [vmem:[#allocation82_spill] sm:$0xff] %v6597_v20  ;;  %v3683_v7 = vmul.f32 %v6107_v22, %v8000_v1  ;;  %v3689_v1 = vmul.f32 %v6107_v22, %v8007_v49  ;;  %v8009_v49 = vld [vmem:[#allocation24_spill] sm:$0xff] }
 0x620   :  { %7991 = vst [vmem:[#allocation83_spill] sm:$0xff] %v6601_v31  ;;  %v7997_v31 = vld [vmem:[#allocation13_spill] sm:$0xff]  ;;  %v6658_v29 = vmul.f32 %v6107_v22, %v8009_v49 }
 0x621   :  { %7992 = vst [vmem:[#allocation95_spill] sm:$0xff] %v6605_v32  ;;  %v3680_v24 = vmul.f32 %v6107_v22, %v7997_v31  ;;  %v7998_v32 = vld [vmem:[#allocation14_spill] sm:$0xff]  ;;  %v3686_v31 = vmul.f32 %v6107_v22, %v8004_v6  ;;  %v3815_v6 = vmul.f32 %v6317_v15, %v3683_v7  ;;  %v6670_v7 = vmul.f32 %v6107_v22, %v8012_v38 }
 0x622   :  { %7993 = vst [vmem:[#allocation96_spill] sm:$0xff] %v6609_v47  ;;  %v3681_v20 = vmul.f32 %v6107_v22, %v7998_v32  ;;  %v3682_v47 = vmul.f32 %v6107_v22, %v7999_v27  ;;  %v3687_v32 = vmul.f32 %v6107_v22, %v8005_v43  ;;  %v3688_v27 = vmul.f32 %v6107_v22, %v8006_v39 }
 0x623   :  { %7994 = vst [vmem:[#allocation97_spill] sm:$0xff] %v6613_v26  ;;  %v8001_v26 = vld [vmem:[#allocation17_spill] sm:$0xff]  ;;  %v6682_v49 = vmul.f32 %v6317_v15, %v3689_v1 }
 0x624   :  { %7995 = vst [vmem:[#allocation98_spill] sm:$0xff] %v6617_v51  ;;  %v3684_v59 = vmul.f32 %v6107_v22, %v8001_v26  ;;  %v8002_v51 = vld [vmem:[#allocation18_spill] sm:$0xff]  ;;  %v3690_v26 = vmul.f32 %v6107_v22, %v8008_v37  ;;  %v3813_v9 = vmul.f32 %v6317_v15, %v3681_v20  ;;  %v8010_v37 = vld [vmem:[#allocation25_spill] sm:$0xff] }
 0x625   :  { %7996 = vst [vmem:[#allocation99_spill] sm:$0xff] %v6621_v18  ;;  %v3685_v0 = vmul.f32 %v6107_v22, %v8002_v51  ;;  %v3743_v18 = vmul.f32 %v6107_v22, %v8003_v54  ;;  %v3812_v51 = vmul.f32 %v6317_v15, %v3680_v24  ;;  %v3814_v54 = vmul.f32 %v6317_v15, %v3682_v47  ;;  %v8011_v20 = vld [vmem:[#allocation26_spill] sm:$0xff] }
 0x626   :  { %v3816_v43 = vmul.f32 %v6317_v15, %v3684_v59  ;;  %v6662_v24 = vmul.f32 %v6107_v22, %v8010_v37  ;;  %v6666_v47 = vmul.f32 %v6107_v22, %v8011_v20  ;;  %v6679_v59 = vmul.f32 %v6317_v15, %v3688_v27 }
 0x627   :  { %v3817_v39 = vmul.f32 %v6317_v15, %v3685_v0  ;;  %v3875_v21 = vmul.f32 %v6317_v15, %v3743_v18  ;;  %v6673_v0 = vmul.f32 %v6317_v15, %v3686_v31  ;;  %v6676_v18 = vmul.f32 %v6317_v15, %v3687_v32 }
 0x628   :  { %v6685_v37 = vmul.f32 %v6317_v15, %v3690_v26  ;;  %v6688_v20 = vadd.f32 %v6650_v46, %v3812_v51  ;;  %v6691_v38 = vadd.f32 %v6650_v46, %v3813_v9  ;;  %v6694_v31 = vadd.f32 %v6650_v46, %v3814_v54 }
 0x629   :  { %v6697_v32 = vadd.f32 %v6650_v46, %v3815_v6  ;;  %v6700_v27 = vadd.f32 %v6650_v46, %v3816_v43  ;;  %v6703_v1 = vadd.f32 %v6650_v46, %v3817_v39  ;;  %v6706_v26 = vadd.f32 %v6650_v46, %v3875_v21  ;;  %v8017_v43 = vld [vmem:[#allocation84_spill] sm:$0xff]  ;;  %v8019_v39 = vld [vmem:[#allocation85_spill] sm:$0xff] }
 0x62a   :  { %v6710_v51 = vadd.f32 %v6650_v46, %v6369_v4  ;;  %v6714_v9 = vadd.f32 %v6650_v46, %v6373_v30  ;;  %v6718_v54 = vadd.f32 %v6650_v46, %v6377_v3  ;;  %v6722_v6 = vadd.f32 %v6650_v46, %v6381_v17 }
 0x62b   :  { %v6726_v21 = vadd.f32 %v6650_v46, %v6385_v13  ;;  %v6730_v4 = vadd.f32 %v6650_v46, %v6389_v10  ;;  %v6734_v30 = vadd.f32 %v6650_v46, %v6393_v11  ;;  %v6738_v3 = vadd.f32 %v6650_v46, %v6397_v40 }
 0x62c   :  { %v6742_v17 = vadd.f32 %v6650_v46, %v6401_v12  ;;  %v6746_v13 = vadd.f32 %v6650_v46, %v6405_v34  ;;  %v6750_v10 = vadd.f32 %v6650_v46, %v6409_v25  ;;  %v6754_v11 = vadd.f32 %v6650_v46, %v6413_v50 }
 0x62d   :  { %v6758_v40 = vadd.f32 %v6650_v46, %v6417_v61  ;;  %v6762_v12 = vadd.f32 %v6650_v46, %v6421_v19  ;;  %v6766_v34 = vadd.f32 %v6650_v46, %v6425_v45  ;;  %v6770_v25 = vadd.f32 %v6650_v46, %v6429_v8 }
 0x62e   :  { %v6774_v50 = vadd.f32 %v6650_v46, %v6433_v60  ;;  %v6778_v61 = vadd.f32 %v6650_v46, %v6437_v16  ;;  %v6782_v19 = vadd.f32 %v6650_v46, %v6441_v36  ;;  %v6786_v45 = vadd.f32 %v6650_v46, %v6445_v58 }
 0x62f   :  { %v6790_v8 = vadd.f32 %v6650_v46, %v6449_v35  ;;  %v6794_v60 = vadd.f32 %v6650_v46, %v6453_v53  ;;  %v6798_v16 = vadd.f32 %v6650_v46, %v6457_v41  ;;  %v6802_v36 = vadd.f32 %v6650_v46, %v6461_v52 }
 0x630   :  { %v6806_v58 = vadd.f32 %v6650_v46, %v6465_v2  ;;  %v6810_v35 = vadd.f32 %v6650_v46, %v6469_v57  ;;  %v6814_v53 = vadd.f32 %v6650_v46, %v6473_v42  ;;  %v6818_v41 = vadd.f32 %v6650_v46, %v6477_v28 }
 0x631   :  { %v6822_v52 = vadd.f32 %v6650_v46, %v6481_v14  ;;  %v6826_v2 = vadd.f32 %v6650_v46, %v6485_v63  ;;  %v6830_v57 = vadd.f32 %v6650_v46, %v6489_v55  ;;  %v6834_v42 = vadd.f32 %v6650_v46, %v6493_v44 }
 0x632   :  { %v6838_v28 = vadd.f32 %v6650_v46, %v6497_v33  ;;  %v6842_v14 = vadd.f32 %v6650_v46, %v6501_v23  ;;  %v6846_v63 = vadd.f32 %v6650_v46, %v6505_v5  ;;  %v6850_v55 = vadd.f32 %v6650_v46, %v6509_v62 }
 0x633   :  { %v6854_v44 = vadd.f32 %v6650_v46, %v6513_v56  ;;  %v6858_v33 = vadd.f32 %v6650_v46, %v6517_v48  ;;  %v6862_v23 = vadd.f32 %v6650_v46, %v8017_v43  ;;  %v6866_v5 = vadd.f32 %v6650_v46, %v8019_v39 }
 0x634   :  { %8013 = vst [vmem:[#allocation13_spill] sm:$0xff] %v6846_v63  ;;  %v8021_v63 = vld [vmem:[#allocation86_spill] sm:$0xff] }
 0x635   :  { %8014 = vst [vmem:[#allocation14_spill] sm:$0xff] %v6850_v55  ;;  %v6870_v62 = vadd.f32 %v6650_v46, %v8021_v63  ;;  %v8023_v55 = vld [vmem:[#allocation87_spill] sm:$0xff] }
 0x636   :  { %8015 = vst [vmem:[#allocation15_spill] sm:$0xff] %v6854_v44  ;;  %v6874_v56 = vadd.f32 %v6650_v46, %v8023_v55  ;;  %v8025_v44 = vld [vmem:[#allocation88_spill] sm:$0xff] }
 0x637   :  { %8016 = vst [vmem:[#allocation16_spill] sm:$0xff] %v6858_v33  ;;  %v6878_v48 = vadd.f32 %v6650_v46, %v8025_v44  ;;  %v8027_v33 = vld [vmem:[#allocation89_spill] sm:$0xff] }
 0x638   :  { %8018 = vst [vmem:[#allocation17_spill] sm:$0xff] %v6862_v23  ;;  %v6882_v43 = vadd.f32 %v6650_v46, %v8027_v33  ;;  %v8029_v23 = vld [vmem:[#allocation90_spill] sm:$0xff] }
 0x639   :  { %8020 = vst [vmem:[#allocation18_spill] sm:$0xff] %v6866_v5  ;;  %v6886_v39 = vadd.f32 %v6650_v46, %v8029_v23  ;;  %v8031_v5 = vld [vmem:[#allocation91_spill] sm:$0xff] }
 0x63a   :  { %8022 = vst [vmem:[#allocation76_spill] sm:$0xff] %v6870_v62  ;;  %v6890_v63 = vadd.f32 %v6650_v46, %v8031_v5  ;;  %v8033_v62 = vld [vmem:[#allocation92_spill] sm:$0xff] }
 0x63b   :  { %8024 = vst [vmem:[#allocation19_spill] sm:$0xff] %v6874_v56  ;;  %v6894_v55 = vadd.f32 %v6650_v46, %v8033_v62  ;;  %v8035_v56 = vld [vmem:[#allocation93_spill] sm:$0xff] }
 0x63c   :  { %8026 = vst [vmem:[#allocation20_spill] sm:$0xff] %v6878_v48  ;;  %v6898_v44 = vadd.f32 %v6650_v46, %v8035_v56  ;;  %v8037_v48 = vld [vmem:[#allocation94_spill] sm:$0xff] }
 0x63d   :  { %8028 = vst [vmem:[#allocation21_spill] sm:$0xff] %v6882_v43  ;;  %v6902_v33 = vadd.f32 %v6650_v46, %v8037_v48  ;;  %v8039_v43 = vld [vmem:[#allocation10_spill] sm:$0xff] }
 0x63e   :  { %8030 = vst [vmem:[#allocation22_spill] sm:$0xff] %v6886_v39  ;;  %v6906_v23 = vadd.f32 %v6650_v46, %v8039_v43  ;;  %v8041_v39 = vld [vmem:[#allocation11_spill] sm:$0xff] }
 0x63f   :  { %8032 = vst [vmem:[#allocation23_spill] sm:$0xff] %v6890_v63  ;;  %v6910_v5 = vadd.f32 %v6650_v46, %v8041_v39  ;;  %v8043_v63 = vld [vmem:[#allocation12_spill] sm:$0xff] }
 0x640   :  { %8034 = vst [vmem:[#allocation24_spill] sm:$0xff] %v6894_v55  ;;  %v6914_v62 = vadd.f32 %v6650_v46, %v8043_v63  ;;  %v8045_v55 = vld [vmem:[#allocation77_spill] sm:$0xff] }
 0x641   :  { %8036 = vst [vmem:[#allocation25_spill] sm:$0xff] %v6898_v44  ;;  %v6918_v56 = vadd.f32 %v6650_v46, %v8045_v55  ;;  %v8047_v44 = vld [vmem:[#allocation78_spill] sm:$0xff] }
 0x642   :  { %8038 = vst [vmem:[#allocation26_spill] sm:$0xff] %v6902_v33  ;;  %v6922_v48 = vadd.f32 %v6650_v46, %v8047_v44  ;;  %v8049_v33 = vld [vmem:[#allocation79_spill] sm:$0xff] }
 0x643   :  { %8040 = vst [vmem:[#allocation27_spill] sm:$0xff] %v6906_v23  ;;  %v6926_v43 = vadd.f32 %v6650_v46, %v8049_v33  ;;  %v8051_v23 = vld [vmem:[#allocation80_spill] sm:$0xff] }
 0x644   :  { %8042 = vst [vmem:[#allocation84_spill] sm:$0xff] %v6910_v5  ;;  %v6930_v39 = vadd.f32 %v6650_v46, %v8051_v23  ;;  %v8053_v5 = vld [vmem:[#allocation81_spill] sm:$0xff] }
 0x645   :  { %8044 = vst [vmem:[#allocation85_spill] sm:$0xff] %v6914_v62  ;;  %v6934_v63 = vadd.f32 %v6650_v46, %v8053_v5  ;;  %v8055_v62 = vld [vmem:[#allocation82_spill] sm:$0xff] }
 0x646   :  { %8046 = vst [vmem:[#allocation86_spill] sm:$0xff] %v6918_v56  ;;  %v6938_v55 = vadd.f32 %v6650_v46, %v8055_v62  ;;  %v8057_v56 = vld [vmem:[#allocation83_spill] sm:$0xff] }
 0x647   :  { %8048 = vst [vmem:[#allocation87_spill] sm:$0xff] %v6922_v48  ;;  %v6942_v44 = vadd.f32 %v6650_v46, %v8057_v56  ;;  %v8059_v48 = vld [vmem:[#allocation95_spill] sm:$0xff] }
 0x648   :  { %8050 = vst [vmem:[#allocation88_spill] sm:$0xff] %v6926_v43  ;;  %v6946_v33 = vadd.f32 %v6650_v46, %v8059_v48  ;;  %v8061_v43 = vld [vmem:[#allocation96_spill] sm:$0xff]  ;;  %v3950_v48 = vadd.f32 %v6650_v46, %v6673_v0 }
 0x649   :  { %8052 = vst [vmem:[#allocation89_spill] sm:$0xff] %v6930_v39  ;;  %v6950_v23 = vadd.f32 %v6650_v46, %v8061_v43  ;;  %v8063_v39 = vld [vmem:[#allocation97_spill] sm:$0xff]  ;;  %v4073_v43 = vmax.f32 %v6691_v38, 0.0  ;;  %v3952_v38 = vadd.f32 %v6650_v46, %v6679_v59  ;;  %v8072_v59 = vld [vmem:[#allocation31_spill] sm:$0xff] }
 0x64a   :  { %8054 = vst [vmem:[#allocation90_spill] sm:$0xff] %v6934_v63  ;;  %v6954_v5 = vadd.f32 %v6650_v46, %v8063_v39  ;;  %v8065_v63 = vld [vmem:[#allocation98_spill] sm:$0xff] }
 0x64b   :  { %8056 = vst [vmem:[#allocation91_spill] sm:$0xff] %v6938_v55  ;;  %v6958_v62 = vadd.f32 %v6650_v46, %v8065_v63  ;;  %v8067_v55 = vld [vmem:[#allocation99_spill] sm:$0xff]  ;;  %v3823_v63 = vmul.f32 %v6317_v15, %v6658_v29  ;;  %v8071_v29 = vld [vmem:[#allocation30_spill] sm:$0xff] }
 0x64c   :  { %8058 = vst [vmem:[#allocation92_spill] sm:$0xff] %v6942_v44  ;;  %v6962_v56 = vadd.f32 %v6650_v46, %v8067_v55  ;;  %v8069_v44 = vld [vmem:[#allocation28_spill] sm:$0xff]  ;;  %v4075_v55 = vmax.f32 %v6697_v32, 0.0  ;;  %v3825_v32 = vmul.f32 %v6317_v15, %v6666_v47  ;;  %v4078_v47 = vmax.f32 %v3950_v48, 0.0 }
 0x64d   :  { %8060 = vst [vmem:[#allocation93_spill] sm:$0xff] %v6946_v33  ;;  %v4072_v33 = vmax.f32 %v6688_v20, 0.0  ;;  %v3695_v39 = vmul.f32 %v6107_v22, %v8069_v44  ;;  %v3824_v20 = vmul.f32 %v6317_v15, %v6662_v24  ;;  %v3953_v44 = vadd.f32 %v6650_v46, %v6682_v49  ;;  %v8073_v49 = vld [vmem:[#allocation32_spill] sm:$0xff] }
 0x64e   :  { %8062 = vst [vmem:[#allocation94_spill] sm:$0xff] %v6950_v23  ;;  %v4074_v23 = vmax.f32 %v6694_v31, 0.0  ;;  %v4076_v31 = vmax.f32 %v6700_v27, 0.0  ;;  %v4077_v24 = vmax.f32 %v6703_v1, 0.0  ;;  %v3698_v27 = vmul.f32 %v6107_v22, %v8072_v59 }
 0x64f   :  { %8064 = vst [vmem:[#allocation10_spill] sm:$0xff] %v6954_v5  ;;  %v3699_v1 = vmul.f32 %v6107_v22, %v8073_v49  ;;  %v4080_v5 = vmax.f32 %v3952_v38, 0.0  ;;  %v4081_v49 = vmax.f32 %v3953_v44, 0.0 }
 0x650   :  { %8066 = vst [vmem:[#allocation11_spill] sm:$0xff] %v6958_v62  ;;  %v3951_v62 = vadd.f32 %v6650_v46, %v6676_v18  ;;  %v3697_v18 = vmul.f32 %v6107_v22, %v8071_v29  ;;  %v3955_v29 = vadd.f32 %v6650_v46, %v3823_v63  ;;  %v3830_v38 = vmul.f32 %v6317_v15, %v3698_v27  ;;  %v8078_v27 = vld [vmem:[#allocation37_spill] sm:$0xff] }
 0x651   :  { %8068 = vst [vmem:[#allocation12_spill] sm:$0xff] %v6962_v56  ;;  %v8070_v56 = vld [vmem:[#allocation29_spill] sm:$0xff]  ;;  %v3831_v44 = vmul.f32 %v6317_v15, %v3699_v1  ;;  %v8079_v1 = vld [vmem:[#allocation38_spill] sm:$0xff] }
 0x652   :  { %v3696_v0 = vmul.f32 %v6107_v22, %v8070_v56  ;;  %4200 = vst.msk [vmem:[%s7765_s4] sm:$0xff] %vm64_vm0, %v4072_v33  ;;  %v3826_v33 = vmul.f32 %v6317_v15, %v6670_v7  ;;  %v3954_v56 = vadd.f32 %v6650_v46, %v6685_v37  ;;  %v4079_v59 = vmax.f32 %v3951_v62, 0.0  ;;  %v8074_v7 = vld [vmem:[#allocation33_spill] sm:$0xff] }
 0x653   :  { %4201 = vst.msk [vmem:[%s7765_s4 + $0x8] sm:$0xff] %vm64_vm0, %v4073_v43  ;;  %v3827_v43 = vmul.f32 %v6317_v15, %v3695_v39  ;;  %v3700_v37 = vmul.f32 %v6107_v22, %v8074_v7  ;;  %v8075_v39 = vld [vmem:[#allocation34_spill] sm:$0xff]  ;;  %v3829_v63 = vmul.f32 %v6317_v15, %v3697_v18  ;;  %v8077_v18 = vld [vmem:[#allocation36_spill] sm:$0xff] }
 0x654   :  { %4202 = vst.msk [vmem:[%s7765_s4 + $0x10] sm:$0xff] %vm64_vm0, %v4074_v23  ;;  %v3828_v48 = vmul.f32 %v6317_v15, %v3696_v0  ;;  %v3956_v23 = vadd.f32 %v6650_v46, %v3824_v20  ;;  %v3701_v62 = vmul.f32 %v6107_v22, %v8075_v39  ;;  %v8076_v0 = vld [vmem:[#allocation35_spill] sm:$0xff]  ;;  %v4082_v7 = vmax.f32 %v3954_v56, 0.0 }
 0x655   :  { %4203 = vst.msk [vmem:[%s7765_s4 + $0x18] sm:$0xff] %vm64_vm0, %v4075_v55  ;;  %v3957_v55 = vadd.f32 %v6650_v46, %v3825_v32  ;;  %v3702_v20 = vmul.f32 %v6107_v22, %v8076_v0  ;;  %v3703_v32 = vmul.f32 %v6107_v22, %v8077_v18  ;;  %v4083_v39 = vmax.f32 %v3955_v29, 0.0 }
 0x656   :  { %4204 = vst.msk [vmem:[%s7765_s4 + $0x20] sm:$0xff] %vm64_vm0, %v4076_v31  ;;  %v3958_v31 = vadd.f32 %v6650_v46, %v3826_v33  ;;  %v3704_v33 = vmul.f32 %v6107_v22, %v8078_v27  ;;  %v3832_v56 = vmul.f32 %v6317_v15, %v3700_v37  ;;  %v4084_v0 = vmax.f32 %v3956_v23, 0.0  ;;  %v8080_v37 = vld [vmem:[#allocation39_spill] sm:$0xff] }
 0x657   :  { %4205 = vst.msk [vmem:[%s7765_s4 + $0x28] sm:$0xff] %vm64_vm0, %v4077_v24  ;;  %v3959_v24 = vadd.f32 %v6650_v46, %v3827_v43  ;;  %v3705_v43 = vmul.f32 %v6107_v22, %v8079_v1  ;;  %v3833_v29 = vmul.f32 %v6317_v15, %v3701_v62  ;;  %v4085_v18 = vmax.f32 %v3957_v55, 0.0  ;;  %v8081_v62 = vld [vmem:[#allocation40_spill] sm:$0xff] }
 0x658   :  { %4206 = vst.msk [vmem:[%s7765_s4 + $0x30] sm:$0xff] %vm64_vm0, %v4078_v47  ;;  %v3960_v47 = vadd.f32 %v6650_v46, %v3828_v48  ;;  %v3706_v48 = vmul.f32 %v6107_v22, %v8080_v37  ;;  %v3834_v23 = vmul.f32 %v6317_v15, %v3702_v20  ;;  %v4086_v27 = vmax.f32 %v3958_v31, 0.0  ;;  %v8082_v20 = vld [vmem:[#allocation41_spill] sm:$0xff] }
 0x659   :  { %4207 = vst.msk [vmem:[%s7765_s4 + $0x38] sm:$0xff] %vm64_vm0, %v4079_v59  ;;  %v3961_v59 = vadd.f32 %v6650_v46, %v3829_v63  ;;  %v3707_v63 = vmul.f32 %v6107_v22, %v8081_v62  ;;  %v3835_v55 = vmul.f32 %v6317_v15, %v3703_v32  ;;  %v4087_v1 = vmax.f32 %v3959_v24, 0.0  ;;  %v8083_v32 = vld [vmem:[#allocation42_spill] sm:$0xff] }
 0x65a   :  { %4208 = vst.msk [vmem:[%s7765_s4 + $0x40] sm:$0xff] %vm64_vm0, %v4080_v5  ;;  %v3962_v5 = vadd.f32 %v6650_v46, %v3830_v38  ;;  %v3708_v38 = vmul.f32 %v6107_v22, %v8082_v20  ;;  %v3836_v31 = vmul.f32 %v6317_v15, %v3704_v33  ;;  %v4088_v37 = vmax.f32 %v3960_v47, 0.0  ;;  %v8084_v33 = vld [vmem:[#allocation43_spill] sm:$0xff] }
 0x65b   :  { %4209 = vst.msk [vmem:[%s7765_s4 + $0x48] sm:$0xff] %vm64_vm0, %v4081_v49  ;;  %v3963_v49 = vadd.f32 %v6650_v46, %v3831_v44  ;;  %v3709_v44 = vmul.f32 %v6107_v22, %v8083_v32  ;;  %v3837_v24 = vmul.f32 %v6317_v15, %v3705_v43  ;;  %v4089_v62 = vmax.f32 %v3961_v59, 0.0  ;;  %v8085_v43 = vld [vmem:[#allocation44_spill] sm:$0xff] }
 0x65c   :  { %4210 = vst.msk [vmem:[%s7765_s4 + $0x50] sm:$0xff] %vm64_vm0, %v4082_v7  ;;  %v3964_v7 = vadd.f32 %v6650_v46, %v3832_v56  ;;  %v3710_v56 = vmul.f32 %v6107_v22, %v8084_v33  ;;  %v3838_v47 = vmul.f32 %v6317_v15, %v3706_v48  ;;  %v4090_v20 = vmax.f32 %v3962_v5, 0.0  ;;  %v8086_v48 = vld [vmem:[#allocation45_spill] sm:$0xff] }
 0x65d   :  { %4211 = vst.msk [vmem:[%s7765_s4 + $0x58] sm:$0xff] %vm64_vm0, %v4083_v39  ;;  %v3965_v39 = vadd.f32 %v6650_v46, %v3833_v29  ;;  %v3711_v29 = vmul.f32 %v6107_v22, %v8085_v43  ;;  %v3839_v59 = vmul.f32 %v6317_v15, %v3707_v63  ;;  %v4091_v32 = vmax.f32 %v3963_v49, 0.0  ;;  %v8087_v63 = vld [vmem:[#allocation46_spill] sm:$0xff] }
 0x65e   :  { %4212 = vst.msk [vmem:[%s7765_s4 + $0x60] sm:$0xff] %vm64_vm0, %v4084_v0  ;;  %v3966_v0 = vadd.f32 %v6650_v46, %v3834_v23  ;;  %v3712_v23 = vmul.f32 %v6107_v22, %v8086_v48  ;;  %v3840_v5 = vmul.f32 %v6317_v15, %v3708_v38  ;;  %v4092_v33 = vmax.f32 %v3964_v7, 0.0  ;;  %v8088_v38 = vld [vmem:[#allocation47_spill] sm:$0xff] }
 0x65f   :  { %4213 = vst.msk [vmem:[%s7765_s4 + $0x68] sm:$0xff] %vm64_vm0, %v4085_v18  ;;  %v3967_v18 = vadd.f32 %v6650_v46, %v3835_v55  ;;  %v3713_v55 = vmul.f32 %v6107_v22, %v8087_v63  ;;  %v3841_v49 = vmul.f32 %v6317_v15, %v3709_v44  ;;  %v4093_v43 = vmax.f32 %v3965_v39, 0.0  ;;  %v8089_v44 = vld [vmem:[#allocation48_spill] sm:$0xff] }
 0x660   :  { %4214 = vst.msk [vmem:[%s7765_s4 + $0x70] sm:$0xff] %vm64_vm0, %v4086_v27  ;;  %v3968_v27 = vadd.f32 %v6650_v46, %v3836_v31  ;;  %v3714_v31 = vmul.f32 %v6107_v22, %v8088_v38  ;;  %v3842_v7 = vmul.f32 %v6317_v15, %v3710_v56  ;;  %v4094_v48 = vmax.f32 %v3966_v0, 0.0  ;;  %v8090_v56 = vld [vmem:[#allocation49_spill] sm:$0xff] }
 0x661   :  { %4215 = vst.msk [vmem:[%s7765_s4 + $0x78] sm:$0xff] %vm64_vm0, %v4087_v1  ;;  %v3969_v1 = vadd.f32 %v6650_v46, %v3837_v24  ;;  %v3715_v24 = vmul.f32 %v6107_v22, %v8089_v44  ;;  %v3843_v39 = vmul.f32 %v6317_v15, %v3711_v29  ;;  %v4095_v63 = vmax.f32 %v3967_v18, 0.0  ;;  %v8091_v29 = vld [vmem:[#allocation50_spill] sm:$0xff] }
 0x662   :  { %4216 = vst.msk [vmem:[%s7765_s4 + $0x80] sm:$0xff] %vm64_vm0, %v4088_v37  ;;  %v3970_v37 = vadd.f32 %v6650_v46, %v3838_v47  ;;  %v3716_v47 = vmul.f32 %v6107_v22, %v8090_v56  ;;  %v3844_v0 = vmul.f32 %v6317_v15, %v3712_v23  ;;  %v4096_v38 = vmax.f32 %v3968_v27, 0.0  ;;  %v8092_v23 = vld [vmem:[#allocation51_spill] sm:$0xff] }
 0x663   :  { %4217 = vst.msk [vmem:[%s7765_s4 + $0x88] sm:$0xff] %vm64_vm0, %v4089_v62  ;;  %v3971_v62 = vadd.f32 %v6650_v46, %v3839_v59  ;;  %v3717_v59 = vmul.f32 %v6107_v22, %v8091_v29  ;;  %v3845_v18 = vmul.f32 %v6317_v15, %v3713_v55  ;;  %v4097_v44 = vmax.f32 %v3969_v1, 0.0  ;;  %v8093_v55 = vld [vmem:[#allocation52_spill] sm:$0xff] }
 0x664   :  { %4218 = vst.msk [vmem:[%s7765_s4 + $0x90] sm:$0xff] %vm64_vm0, %v4090_v20  ;;  %v3972_v20 = vadd.f32 %v6650_v46, %v3840_v5  ;;  %v3718_v5 = vmul.f32 %v6107_v22, %v8092_v23  ;;  %v3846_v27 = vmul.f32 %v6317_v15, %v3714_v31  ;;  %v4098_v56 = vmax.f32 %v3970_v37, 0.0  ;;  %v8094_v31 = vld [vmem:[#allocation53_spill] sm:$0xff] }
 0x665   :  { %4219 = vst.msk [vmem:[%s7765_s4 + $0x98] sm:$0xff] %vm64_vm0, %v4091_v32  ;;  %v3973_v32 = vadd.f32 %v6650_v46, %v3841_v49  ;;  %v3719_v49 = vmul.f32 %v6107_v22, %v8093_v55  ;;  %v3847_v1 = vmul.f32 %v6317_v15, %v3715_v24  ;;  %v4099_v29 = vmax.f32 %v3971_v62, 0.0  ;;  %v8095_v24 = vld [vmem:[#allocation54_spill] sm:$0xff] }
 0x666   :  { %4220 = vst.msk [vmem:[%s7765_s4 + $0xa0] sm:$0xff] %vm64_vm0, %v4092_v33  ;;  %v3974_v33 = vadd.f32 %v6650_v46, %v3842_v7  ;;  %v3720_v7 = vmul.f32 %v6107_v22, %v8094_v31  ;;  %v3848_v37 = vmul.f32 %v6317_v15, %v3716_v47  ;;  %v4100_v23 = vmax.f32 %v3972_v20, 0.0  ;;  %v8096_v47 = vld [vmem:[#allocation55_spill] sm:$0xff] }
 0x667   :  { %4221 = vst.msk [vmem:[%s7765_s4 + $0xa8] sm:$0xff] %vm64_vm0, %v4093_v43  ;;  %v3975_v43 = vadd.f32 %v6650_v46, %v3843_v39  ;;  %v3721_v39 = vmul.f32 %v6107_v22, %v8095_v24  ;;  %v3849_v62 = vmul.f32 %v6317_v15, %v3717_v59  ;;  %v4101_v55 = vmax.f32 %v3973_v32, 0.0  ;;  %v8097_v59 = vld [vmem:[#allocation56_spill] sm:$0xff] }
 0x668   :  { %4222 = vst.msk [vmem:[%s7765_s4 + $0xb0] sm:$0xff] %vm64_vm0, %v4094_v48  ;;  %v3976_v48 = vadd.f32 %v6650_v46, %v3844_v0  ;;  %v3722_v0 = vmul.f32 %v6107_v22, %v8096_v47  ;;  %v3850_v20 = vmul.f32 %v6317_v15, %v3718_v5  ;;  %v4102_v31 = vmax.f32 %v3974_v33, 0.0  ;;  %v8098_v5 = vld [vmem:[#allocation57_spill] sm:$0xff] }
 0x669   :  { %4223 = vst.msk [vmem:[%s7765_s4 + $0xb8] sm:$0xff] %vm64_vm0, %v4095_v63  ;;  %v3977_v63 = vadd.f32 %v6650_v46, %v3845_v18  ;;  %v3723_v18 = vmul.f32 %v6107_v22, %v8097_v59  ;;  %v3851_v32 = vmul.f32 %v6317_v15, %v3719_v49  ;;  %v4103_v24 = vmax.f32 %v3975_v43, 0.0  ;;  %v8099_v49 = vld [vmem:[#allocation58_spill] sm:$0xff] }
 0x66a   :  { %4224 = vst.msk [vmem:[%s7765_s4 + $0xc0] sm:$0xff] %vm64_vm0, %v4096_v38  ;;  %v3978_v38 = vadd.f32 %v6650_v46, %v3846_v27  ;;  %v3724_v27 = vmul.f32 %v6107_v22, %v8098_v5  ;;  %v3852_v33 = vmul.f32 %v6317_v15, %v3720_v7  ;;  %v4104_v47 = vmax.f32 %v3976_v48, 0.0  ;;  %v8100_v7 = vld [vmem:[#allocation59_spill] sm:$0xff] }
 0x66b   :  { %4225 = vst.msk [vmem:[%s7765_s4 + $0xc8] sm:$0xff] %vm64_vm0, %v4097_v44  ;;  %v3979_v44 = vadd.f32 %v6650_v46, %v3847_v1  ;;  %v3725_v1 = vmul.f32 %v6107_v22, %v8099_v49  ;;  %v3853_v43 = vmul.f32 %v6317_v15, %v3721_v39  ;;  %v4105_v59 = vmax.f32 %v3977_v63, 0.0  ;;  %v8101_v39 = vld [vmem:[#allocation60_spill] sm:$0xff] }
 0x66c   :  { %4226 = vst.msk [vmem:[%s7765_s4 + $0xd0] sm:$0xff] %vm64_vm0, %v4098_v56  ;;  %v3980_v56 = vadd.f32 %v6650_v46, %v3848_v37  ;;  %v3726_v37 = vmul.f32 %v6107_v22, %v8100_v7  ;;  %v3854_v48 = vmul.f32 %v6317_v15, %v3722_v0  ;;  %v4106_v5 = vmax.f32 %v3978_v38, 0.0  ;;  %v8102_v0 = vld [vmem:[#allocation61_spill] sm:$0xff] }
 0x66d   :  { %4227 = vst.msk [vmem:[%s7765_s4 + $0xd8] sm:$0xff] %vm64_vm0, %v4099_v29  ;;  %v3981_v29 = vadd.f32 %v6650_v46, %v3849_v62  ;;  %v3727_v62 = vmul.f32 %v6107_v22, %v8101_v39  ;;  %v3855_v63 = vmul.f32 %v6317_v15, %v3723_v18  ;;  %v4107_v49 = vmax.f32 %v3979_v44, 0.0  ;;  %v8103_v18 = vld [vmem:[#allocation62_spill] sm:$0xff] }
 0x66e   :  { %4228 = vst.msk [vmem:[%s7765_s4 + $0xe0] sm:$0xff] %vm64_vm0, %v4100_v23  ;;  %v3982_v23 = vadd.f32 %v6650_v46, %v3850_v20  ;;  %v3728_v20 = vmul.f32 %v6107_v22, %v8102_v0  ;;  %v3856_v38 = vmul.f32 %v6317_v15, %v3724_v27  ;;  %v4108_v7 = vmax.f32 %v3980_v56, 0.0  ;;  %v8104_v27 = vld [vmem:[#allocation63_spill] sm:$0xff] }
 0x66f   :  { %4229 = vst.msk [vmem:[%s7765_s4 + $0xe8] sm:$0xff] %vm64_vm0, %v4101_v55  ;;  %v3983_v55 = vadd.f32 %v6650_v46, %v3851_v32  ;;  %v3729_v32 = vmul.f32 %v6107_v22, %v8103_v18  ;;  %v3857_v44 = vmul.f32 %v6317_v15, %v3725_v1  ;;  %v4109_v39 = vmax.f32 %v3981_v29, 0.0  ;;  %v8105_v1 = vld [vmem:[#allocation64_spill] sm:$0xff] }
 0x670   :  { %4230 = vst.msk [vmem:[%s7765_s4 + $0xf0] sm:$0xff] %vm64_vm0, %v4102_v31  ;;  %v3984_v31 = vadd.f32 %v6650_v46, %v3852_v33  ;;  %v3730_v33 = vmul.f32 %v6107_v22, %v8104_v27  ;;  %v3858_v56 = vmul.f32 %v6317_v15, %v3726_v37  ;;  %v4110_v0 = vmax.f32 %v3982_v23, 0.0  ;;  %v8106_v37 = vld [vmem:[#allocation65_spill] sm:$0xff] }
 0x671   :  { %4231 = vst.msk [vmem:[%s7765_s4 + $0xf8] sm:$0xff] %vm64_vm0, %v4103_v24  ;;  %v3985_v24 = vadd.f32 %v6650_v46, %v3853_v43  ;;  %v3731_v43 = vmul.f32 %v6107_v22, %v8105_v1  ;;  %v3859_v29 = vmul.f32 %v6317_v15, %v3727_v62  ;;  %v4111_v18 = vmax.f32 %v3983_v55, 0.0  ;;  %v8107_v62 = vld [vmem:[#allocation66_spill] sm:$0xff] }
 0x672   :  { %4232 = vst.msk [vmem:[%s7765_s4 + $0x100] sm:$0xff] %vm64_vm0, %v4104_v47  ;;  %v3986_v47 = vadd.f32 %v6650_v46, %v3854_v48  ;;  %v3732_v48 = vmul.f32 %v6107_v22, %v8106_v37  ;;  %v3860_v23 = vmul.f32 %v6317_v15, %v3728_v20  ;;  %v4112_v27 = vmax.f32 %v3984_v31, 0.0  ;;  %v8108_v20 = vld [vmem:[#allocation67_spill] sm:$0xff] }
 0x673   :  { %4233 = vst.msk [vmem:[%s7765_s4 + $0x108] sm:$0xff] %vm64_vm0, %v4105_v59  ;;  %v3987_v59 = vadd.f32 %v6650_v46, %v3855_v63  ;;  %v3733_v63 = vmul.f32 %v6107_v22, %v8107_v62  ;;  %v3861_v55 = vmul.f32 %v6317_v15, %v3729_v32  ;;  %v4113_v1 = vmax.f32 %v3985_v24, 0.0  ;;  %v8109_v32 = vld [vmem:[#allocation68_spill] sm:$0xff] }
 0x674   :  { %4234 = vst.msk [vmem:[%s7765_s4 + $0x110] sm:$0xff] %vm64_vm0, %v4106_v5  ;;  %v3988_v5 = vadd.f32 %v6650_v46, %v3856_v38  ;;  %v3734_v38 = vmul.f32 %v6107_v22, %v8108_v20  ;;  %v3862_v31 = vmul.f32 %v6317_v15, %v3730_v33  ;;  %v4114_v37 = vmax.f32 %v3986_v47, 0.0  ;;  %v8110_v33 = vld [vmem:[#allocation69_spill] sm:$0xff] }
 0x675   :  { %4235 = vst.msk [vmem:[%s7765_s4 + $0x118] sm:$0xff] %vm64_vm0, %v4107_v49  ;;  %v3989_v49 = vadd.f32 %v6650_v46, %v3857_v44  ;;  %v3735_v44 = vmul.f32 %v6107_v22, %v8109_v32  ;;  %v3863_v24 = vmul.f32 %v6317_v15, %v3731_v43  ;;  %v4115_v62 = vmax.f32 %v3987_v59, 0.0  ;;  %v8111_v43 = vld [vmem:[#allocation70_spill] sm:$0xff] }
 0x676   :  { %4236 = vst.msk [vmem:[%s7765_s4 + $0x120] sm:$0xff] %vm64_vm0, %v4108_v7  ;;  %v3990_v7 = vadd.f32 %v6650_v46, %v3858_v56  ;;  %v3736_v56 = vmul.f32 %v6107_v22, %v8110_v33  ;;  %v3864_v47 = vmul.f32 %v6317_v15, %v3732_v48  ;;  %v4116_v20 = vmax.f32 %v3988_v5, 0.0  ;;  %v8112_v48 = vld [vmem:[#allocation71_spill] sm:$0xff] }
 0x677   :  { %4237 = vst.msk [vmem:[%s7765_s4 + $0x128] sm:$0xff] %vm64_vm0, %v4109_v39  ;;  %v3991_v39 = vadd.f32 %v6650_v46, %v3859_v29  ;;  %v3737_v29 = vmul.f32 %v6107_v22, %v8111_v43  ;;  %v3865_v59 = vmul.f32 %v6317_v15, %v3733_v63  ;;  %v4117_v32 = vmax.f32 %v3989_v49, 0.0  ;;  %v8113_v63 = vld [vmem:[#allocation72_spill] sm:$0xff] }
 0x678   :  { %4238 = vst.msk [vmem:[%s7765_s4 + $0x130] sm:$0xff] %vm64_vm0, %v4110_v0  ;;  %v3992_v0 = vadd.f32 %v6650_v46, %v3860_v23  ;;  %v3738_v23 = vmul.f32 %v6107_v22, %v8112_v48  ;;  %v3866_v5 = vmul.f32 %v6317_v15, %v3734_v38  ;;  %v4118_v33 = vmax.f32 %v3990_v7, 0.0  ;;  %v8114_v38 = vld [vmem:[#allocation73_spill] sm:$0xff] }
 0x679   :  { %4239 = vst.msk [vmem:[%s7765_s4 + $0x138] sm:$0xff] %vm64_vm0, %v4111_v18  ;;  %v3993_v18 = vadd.f32 %v6650_v46, %v3861_v55  ;;  %v3739_v55 = vmul.f32 %v6107_v22, %v8113_v63  ;;  %v3867_v49 = vmul.f32 %v6317_v15, %v3735_v44  ;;  %v4119_v43 = vmax.f32 %v3991_v39, 0.0  ;;  %v8115_v44 = vld [vmem:[#allocation74_spill] sm:$0xff] }
 0x67a   :  { %4240 = vst.msk [vmem:[%s7765_s4 + $0x140] sm:$0xff] %vm64_vm0, %v4112_v27  ;;  %v3994_v27 = vadd.f32 %v6650_v46, %v3862_v31  ;;  %v3740_v31 = vmul.f32 %v6107_v22, %v8114_v38  ;;  %v3868_v7 = vmul.f32 %v6317_v15, %v3736_v56  ;;  %v4120_v48 = vmax.f32 %v3992_v0, 0.0  ;;  %v8116_v56 = vld [vmem:[#allocation75_spill] sm:$0xff] }
 0x67b   :  { %4241 = vst.msk [vmem:[%s7765_s4 + $0x148] sm:$0xff] %vm64_vm0, %v4113_v1  ;;  %v3995_v1 = vadd.f32 %v6650_v46, %v3863_v24  ;;  %v3741_v24 = vmul.f32 %v6107_v22, %v8115_v44  ;;  %v3869_v39 = vmul.f32 %v6317_v15, %v3737_v29  ;;  %v4121_v63 = vmax.f32 %v3993_v18, 0.0 }
 0x67c   :  { %4242 = vst.msk [vmem:[%s7765_s4 + $0x150] sm:$0xff] %vm64_vm0, %v4114_v37  ;;  %v3996_v37 = vadd.f32 %v6650_v46, %v3864_v47  ;;  %v3742_v47 = vmul.f32 %v6107_v22, %v8116_v56  ;;  %v3870_v0 = vmul.f32 %v6317_v15, %v3738_v23  ;;  %v4122_v38 = vmax.f32 %v3994_v27, 0.0 }
 0x67d   :  { %4243 = vst.msk [vmem:[%s7765_s4 + $0x158] sm:$0xff] %vm64_vm0, %v4115_v62  ;;  %v3997_v62 = vadd.f32 %v6650_v46, %v3865_v59  ;;  %v3871_v29 = vmul.f32 %v6317_v15, %v3739_v55  ;;  %v3999_v59 = vadd.f32 %v6650_v46, %v3867_v49  ;;  %v4123_v18 = vmax.f32 %v3995_v1, 0.0 }
 0x67e   :  { %4244 = vst.msk [vmem:[%s7765_s4 + $0x160] sm:$0xff] %vm64_vm0, %v4116_v20  ;;  %v3998_v20 = vadd.f32 %v6650_v46, %v3866_v5  ;;  %v3872_v22 = vmul.f32 %v6317_v15, %v3740_v31  ;;  %v4124_v23 = vmax.f32 %v3996_v37, 0.0  ;;  %v3873_v5 = vmul.f32 %v6317_v15, %v3741_v24 }
 0x67f   :  { %4245 = vst.msk [vmem:[%s7765_s4 + $0x168] sm:$0xff] %vm64_vm0, %v4117_v32  ;;  %v4000_v32 = vadd.f32 %v6650_v46, %v3868_v7  ;;  %v4001_v27 = vadd.f32 %v6650_v46, %v3869_v39  ;;  %v3874_v55 = vmul.f32 %v6317_v15, %v3742_v47  ;;  %v4002_v49 = vadd.f32 %v6650_v46, %v3870_v0 }
 0x680   :  { %4246 = vst.msk [vmem:[%s7765_s4 + $0x170] sm:$0xff] %vm64_vm0, %v4118_v33  ;;  %v4125_v33 = vmax.f32 %v3997_v62, 0.0  ;;  %v4126_v1 = vmax.f32 %v3998_v20, 0.0  ;;  %v4127_v31 = vmax.f32 %v3999_v59, 0.0  ;;  %v4004_v7 = vadd.f32 %v6650_v46, %v3872_v22  ;;  %v8120_v59 = vld [vmem:[#allocation16_spill] sm:$0xff]  ;;  %v8121_v22 = vld [vmem:[#allocation17_spill] sm:$0xff] }
 0x681   :  { %4247 = vst.msk [vmem:[%s7765_s4 + $0x178] sm:$0xff] %vm64_vm0, %v4119_v43  ;;  %v4003_v43 = vadd.f32 %v6650_v46, %v3871_v29  ;;  %v4128_v37 = vmax.f32 %v4000_v32, 0.0  ;;  %v4005_v15 = vadd.f32 %v6650_v46, %v3873_v5  ;;  %v4006_v44 = vadd.f32 %v6650_v46, %v3874_v55  ;;  %v8124_v55 = vld [vmem:[#allocation19_spill] sm:$0xff] }
 0x682   :  { %4248 = vst.msk [vmem:[%s7765_s4 + $0x180] sm:$0xff] %vm64_vm0, %v4120_v48  ;;  %v4129_v48 = vmax.f32 %v4001_v27, 0.0  ;;  %v4130_v24 = vmax.f32 %v4002_v49, 0.0  ;;  %v4132_v62 = vmax.f32 %v4004_v7, 0.0  ;;  %v4135_v56 = vmax.f32 %v6706_v26, 0.0  ;;  %v8123_v27 = vld [vmem:[#allocation76_spill] sm:$0xff] }
 0x683   :  { %4249 = vst.msk [vmem:[%s7765_s4 + $0x188] sm:$0xff] %vm64_vm0, %v4121_v63  ;;  %v4131_v39 = vmax.f32 %v4003_v43, 0.0  ;;  %v4133_v63 = vmax.f32 %v4005_v15, 0.0  ;;  %v4134_v46 = vmax.f32 %v4006_v44, 0.0  ;;  %v4136_v47 = vmax.f32 %v6710_v51, 0.0 }
 0x684   :  { %4250 = vst.msk [vmem:[%s7765_s4 + $0x190] sm:$0xff] %vm64_vm0, %v4122_v38  ;;  %v4137_v0 = vmax.f32 %v6714_v9, 0.0  ;;  %v4138_v26 = vmax.f32 %v6718_v54, 0.0  ;;  %v4139_v51 = vmax.f32 %v6722_v6, 0.0  ;;  %v4140_v9 = vmax.f32 %v6726_v21, 0.0 }
 0x685   :  { %4251 = vst.msk [vmem:[%s7765_s4 + $0x198] sm:$0xff] %vm64_vm0, %v4123_v18  ;;  %v4141_v54 = vmax.f32 %v6730_v4, 0.0  ;;  %v4142_v6 = vmax.f32 %v6734_v30, 0.0  ;;  %v4143_v21 = vmax.f32 %v6738_v3, 0.0  ;;  %v4144_v4 = vmax.f32 %v6742_v17, 0.0 }
 0x686   :  { %4252 = vst.msk [vmem:[%s7765_s4 + $0x1a0] sm:$0xff] %vm64_vm0, %v4124_v23  ;;  %v4145_v30 = vmax.f32 %v6746_v13, 0.0  ;;  %v4146_v3 = vmax.f32 %v6750_v10, 0.0  ;;  %v4147_v17 = vmax.f32 %v6754_v11, 0.0  ;;  %v4148_v13 = vmax.f32 %v6758_v40, 0.0  ;;  %v8122_v23 = vld [vmem:[#allocation18_spill] sm:$0xff] }
 0x687   :  { %4253 = vst.msk [vmem:[%s7765_s4 + $0x1a8] sm:$0xff] %vm64_vm0, %v4125_v33  ;;  %v4149_v10 = vmax.f32 %v6762_v12, 0.0  ;;  %v4150_v11 = vmax.f32 %v6766_v34, 0.0  ;;  %v4151_v40 = vmax.f32 %v6770_v25, 0.0  ;;  %v4152_v12 = vmax.f32 %v6774_v50, 0.0 }
 0x688   :  { %4254 = vst.msk [vmem:[%s7765_s4 + $0x1b0] sm:$0xff] %vm64_vm0, %v4126_v1  ;;  %v4153_v34 = vmax.f32 %v6778_v61, 0.0  ;;  %v4154_v25 = vmax.f32 %v6782_v19, 0.0  ;;  %v4155_v50 = vmax.f32 %v6786_v45, 0.0  ;;  %v4156_v61 = vmax.f32 %v6790_v8, 0.0  ;;  %v8125_v1 = vld [vmem:[#allocation20_spill] sm:$0xff] }
 0x689   :  { %4255 = vst.msk [vmem:[%s7765_s4 + $0x1b8] sm:$0xff] %vm64_vm0, %v4127_v31  ;;  %v4157_v19 = vmax.f32 %v6794_v60, 0.0  ;;  %v4158_v45 = vmax.f32 %v6798_v16, 0.0  ;;  %v4159_v8 = vmax.f32 %v6802_v36, 0.0  ;;  %v4160_v60 = vmax.f32 %v6806_v58, 0.0  ;;  %v8126_v31 = vld [vmem:[#allocation21_spill] sm:$0xff] }
 0x68a   :  { %4256 = vst.msk [vmem:[%s7765_s4 + $0x1c0] sm:$0xff] %vm64_vm0, %v4128_v37  ;;  %v4161_v16 = vmax.f32 %v6810_v35, 0.0  ;;  %v4162_v36 = vmax.f32 %v6814_v53, 0.0  ;;  %v4163_v58 = vmax.f32 %v6818_v41, 0.0  ;;  %v4164_v35 = vmax.f32 %v6822_v52, 0.0  ;;  %v8127_v37 = vld [vmem:[#allocation22_spill] sm:$0xff] }
 0x68b   :  { %4257 = vst.msk [vmem:[%s7765_s4 + $0x1c8] sm:$0xff] %vm64_vm0, %v4129_v48  ;;  %v4165_v53 = vmax.f32 %v6826_v2, 0.0  ;;  %v4166_v41 = vmax.f32 %v6830_v57, 0.0  ;;  %v4167_v52 = vmax.f32 %v6834_v42, 0.0  ;;  %v4168_v2 = vmax.f32 %v6838_v28, 0.0  ;;  %v8117_v42 = vld [vmem:[#allocation13_spill] sm:$0xff] }
 0x68c   :  { %4258 = vst.msk [vmem:[%s7765_s4 + $0x1d0] sm:$0xff] %vm64_vm0, %v4130_v24  ;;  %v4169_v57 = vmax.f32 %v6842_v14, 0.0  ;;  %v4170_v20 = vmax.f32 %v8117_v42, 0.0  ;;  %v8118_v28 = vld [vmem:[#allocation14_spill] sm:$0xff]  ;;  %v8119_v14 = vld [vmem:[#allocation15_spill] sm:$0xff]  ;;  %v4173_v18 = vmax.f32 %v8120_v59, 0.0 }
 0x68d   :  { %4259 = vst.msk [vmem:[%s7765_s4 + $0x1d8] sm:$0xff] %vm64_vm0, %v4131_v39  ;;  %v4171_v38 = vmax.f32 %v8118_v28, 0.0  ;;  %v4172_v29 = vmax.f32 %v8119_v14, 0.0  ;;  %v4174_v32 = vmax.f32 %v8121_v22, 0.0  ;;  %v4175_v5 = vmax.f32 %v8122_v23, 0.0  ;;  %v8128_v48 = vld [vmem:[#allocation23_spill] sm:$0xff] }
 0x68e   :  { %4260 = vst.msk [vmem:[%s7765_s4 + $0x1e0] sm:$0xff] %vm64_vm0, %v4132_v62  ;;  %v4176_v33 = vmax.f32 %v8123_v27, 0.0  ;;  %v4177_v49 = vmax.f32 %v8124_v55, 0.0  ;;  %v4178_v43 = vmax.f32 %v8125_v1, 0.0  ;;  %v4179_v7 = vmax.f32 %v8126_v31, 0.0  ;;  %v8129_v24 = vld [vmem:[#allocation24_spill] sm:$0xff] }
 0x68f   :  { %4261 = vst.msk [vmem:[%s7765_s4 + $0x1e8] sm:$0xff] %vm64_vm0, %v4133_v63  ;;  %v4180_v15 = vmax.f32 %v8127_v37, 0.0  ;;  %v4181_v44 = vmax.f32 %v8128_v48, 0.0  ;;  %v4182_v39 = vmax.f32 %v8129_v24, 0.0  ;;  %v8130_v62 = vld [vmem:[#allocation25_spill] sm:$0xff] }
 0x690   :  { %4262 = vst.msk [vmem:[%s7765_s4 + $0x1f0] sm:$0xff] %vm64_vm0, %v4134_v46  ;;  %v4183_v63 = vmax.f32 %v8130_v62, 0.0  ;;  %v8131_v46 = vld [vmem:[#allocation26_spill] sm:$0xff] }
 0x691   :  { %4263 = vst.msk [vmem:[%s7765_s4 + $0x1f8] sm:$0xff] %vm64_vm0, %v4135_v56  ;;  %v4184_v56 = vmax.f32 %v8131_v46, 0.0 }
 0x692   :  { %4264 = vst.msk [vmem:[%s7765_s4 + $0x200] sm:$0xff] %vm64_vm0, %v4136_v47  ;;  %v8132_v47 = vld [vmem:[#allocation27_spill] sm:$0xff] }
 0x693   :  { %4265 = vst.msk [vmem:[%s7765_s4 + $0x208] sm:$0xff] %vm64_vm0, %v4137_v0  ;;  %v4185_v0 = vmax.f32 %v8132_v47, 0.0 }
 0x694   :  { %4266 = vst.msk [vmem:[%s7765_s4 + $0x210] sm:$0xff] %vm64_vm0, %v4138_v26  ;;  %v8133_v26 = vld [vmem:[#allocation84_spill] sm:$0xff] }
 0x695   :  { %4267 = vst.msk [vmem:[%s7765_s4 + $0x218] sm:$0xff] %vm64_vm0, %v4139_v51  ;;  %v4186_v51 = vmax.f32 %v8133_v26, 0.0 }
 0x696   :  { %4268 = vst.msk [vmem:[%s7765_s4 + $0x220] sm:$0xff] %vm64_vm0, %v4140_v9  ;;  %v8134_v9 = vld [vmem:[#allocation85_spill] sm:$0xff] }
 0x697   :  { %4269 = vst.msk [vmem:[%s7765_s4 + $0x228] sm:$0xff] %vm64_vm0, %v4141_v54  ;;  %v4187_v54 = vmax.f32 %v8134_v9, 0.0 }
 0x698   :  { %4270 = vst.msk [vmem:[%s7765_s4 + $0x230] sm:$0xff] %vm64_vm0, %v4142_v6  ;;  %v8135_v6 = vld [vmem:[#allocation86_spill] sm:$0xff] }
 0x699   :  { %4271 = vst.msk [vmem:[%s7765_s4 + $0x238] sm:$0xff] %vm64_vm0, %v4143_v21  ;;  %v4188_v21 = vmax.f32 %v8135_v6, 0.0 }
 0x69a   :  { %4272 = vst.msk [vmem:[%s7765_s4 + $0x240] sm:$0xff] %vm64_vm0, %v4144_v4  ;;  %v8136_v4 = vld [vmem:[#allocation87_spill] sm:$0xff] }
 0x69b   :  { %4273 = vst.msk [vmem:[%s7765_s4 + $0x248] sm:$0xff] %vm64_vm0, %v4145_v30  ;;  %v4189_v30 = vmax.f32 %v8136_v4, 0.0 }
 0x69c   :  { %4274 = vst.msk [vmem:[%s7765_s4 + $0x250] sm:$0xff] %vm64_vm0, %v4146_v3  ;;  %v8137_v3 = vld [vmem:[#allocation88_spill] sm:$0xff] }
 0x69d   :  { %4275 = vst.msk [vmem:[%s7765_s4 + $0x258] sm:$0xff] %vm64_vm0, %v4147_v17  ;;  %v4190_v17 = vmax.f32 %v8137_v3, 0.0 }
 0x69e   :  { %4276 = vst.msk [vmem:[%s7765_s4 + $0x260] sm:$0xff] %vm64_vm0, %v4148_v13  ;;  %v8138_v13 = vld [vmem:[#allocation89_spill] sm:$0xff] }
 0x69f   :  { %4277 = vst.msk [vmem:[%s7765_s4 + $0x268] sm:$0xff] %vm64_vm0, %v4149_v10  ;;  %v4191_v10 = vmax.f32 %v8138_v13, 0.0 }
 0x6a0   :  { %4278 = vst.msk [vmem:[%s7765_s4 + $0x270] sm:$0xff] %vm64_vm0, %v4150_v11  ;;  %v8139_v11 = vld [vmem:[#allocation90_spill] sm:$0xff] }
 0x6a1   :  { %4279 = vst.msk [vmem:[%s7765_s4 + $0x278] sm:$0xff] %vm64_vm0, %v4151_v40  ;;  %v4192_v40 = vmax.f32 %v8139_v11, 0.0 }
 0x6a2   :  { %4280 = vst.msk [vmem:[%s7765_s4 + $0x280] sm:$0xff] %vm64_vm0, %v4152_v12  ;;  %v8140_v12 = vld [vmem:[#allocation91_spill] sm:$0xff] }
 0x6a3   :  { %4281 = vst.msk [vmem:[%s7765_s4 + $0x288] sm:$0xff] %vm64_vm0, %v4153_v34  ;;  %v4193_v34 = vmax.f32 %v8140_v12, 0.0 }
 0x6a4   :  { %4282 = vst.msk [vmem:[%s7765_s4 + $0x290] sm:$0xff] %vm64_vm0, %v4154_v25  ;;  %v8141_v25 = vld [vmem:[#allocation92_spill] sm:$0xff] }
 0x6a5   :  { %4283 = vst.msk [vmem:[%s7765_s4 + $0x298] sm:$0xff] %vm64_vm0, %v4155_v50  ;;  %v4194_v50 = vmax.f32 %v8141_v25, 0.0 }
 0x6a6   :  { %4284 = vst.msk [vmem:[%s7765_s4 + $0x2a0] sm:$0xff] %vm64_vm0, %v4156_v61  ;;  %v8142_v61 = vld [vmem:[#allocation93_spill] sm:$0xff] }
 0x6a7   :  { %4285 = vst.msk [vmem:[%s7765_s4 + $0x2a8] sm:$0xff] %vm64_vm0, %v4157_v19  ;;  %v4195_v19 = vmax.f32 %v8142_v61, 0.0 }
 0x6a8   :  { %4286 = vst.msk [vmem:[%s7765_s4 + $0x2b0] sm:$0xff] %vm64_vm0, %v4158_v45  ;;  %v8143_v45 = vld [vmem:[#allocation94_spill] sm:$0xff] }
 0x6a9   :  { %4287 = vst.msk [vmem:[%s7765_s4 + $0x2b8] sm:$0xff] %vm64_vm0, %v4159_v8  ;;  %v4196_v8 = vmax.f32 %v8143_v45, 0.0 }
 0x6aa   :  { %4288 = vst.msk [vmem:[%s7765_s4 + $0x2c0] sm:$0xff] %vm64_vm0, %v4160_v60  ;;  %v8144_v60 = vld [vmem:[#allocation10_spill] sm:$0xff] }
 0x6ab   :  { %4289 = vst.msk [vmem:[%s7765_s4 + $0x2c8] sm:$0xff] %vm64_vm0, %v4161_v16  ;;  %v4197_v16 = vmax.f32 %v8144_v60, 0.0 }
 0x6ac   :  { %4290 = vst.msk [vmem:[%s7765_s4 + $0x2d0] sm:$0xff] %vm64_vm0, %v4162_v36  ;;  %v8145_v36 = vld [vmem:[#allocation11_spill] sm:$0xff] }
 0x6ad   :  { %4291 = vst.msk [vmem:[%s7765_s4 + $0x2d8] sm:$0xff] %vm64_vm0, %v4163_v58  ;;  %v4198_v58 = vmax.f32 %v8145_v36, 0.0 }
 0x6ae   :  { %4292 = vst.msk [vmem:[%s7765_s4 + $0x2e0] sm:$0xff] %vm64_vm0, %v4164_v35  ;;  %v8146_v35 = vld [vmem:[#allocation12_spill] sm:$0xff] }
 0x6af   :  { %4293 = vst.msk [vmem:[%s7765_s4 + $0x2e8] sm:$0xff] %vm64_vm0, %v4165_v53  ;;  %v4199_v53 = vmax.f32 %v8146_v35, 0.0 }
 0x6b0   :  { %4294 = vst.msk [vmem:[%s7765_s4 + $0x2f0] sm:$0xff] %vm64_vm0, %v4166_v41 }
 0x6b1   :  { %4295 = vst.msk [vmem:[%s7765_s4 + $0x2f8] sm:$0xff] %vm64_vm0, %v4167_v52 }
 0x6b2   :  { %4296 = vst.msk [vmem:[%s7765_s4 + $0x300] sm:$0xff] %vm64_vm0, %v4168_v2 }
 0x6b3   :  { %4297 = vst.msk [vmem:[%s7765_s4 + $0x308] sm:$0xff] %vm64_vm0, %v4169_v57 }
 0x6b4   :  { %4298 = vst.msk [vmem:[%s7765_s4 + $0x310] sm:$0xff] %vm64_vm0, %v4170_v20 }
 0x6b5   :  { %4299 = vst.msk [vmem:[%s7765_s4 + $0x318] sm:$0xff] %vm64_vm0, %v4171_v38 }
 0x6b6   :  { %4300 = vst.msk [vmem:[%s7765_s4 + $0x320] sm:$0xff] %vm64_vm0, %v4172_v29 }
 0x6b7   :  { %4301 = vst.msk [vmem:[%s7765_s4 + $0x328] sm:$0xff] %vm64_vm0, %v4173_v18 }
 0x6b8   :  { %4302 = vst.msk [vmem:[%s7765_s4 + $0x330] sm:$0xff] %vm64_vm0, %v4174_v32 }
 0x6b9   :  { %4303 = vst.msk [vmem:[%s7765_s4 + $0x338] sm:$0xff] %vm64_vm0, %v4175_v5 }
 0x6ba   :  { %4304 = vst.msk [vmem:[%s7765_s4 + $0x340] sm:$0xff] %vm64_vm0, %v4176_v33 }
 0x6bb   :  { %4305 = vst.msk [vmem:[%s7765_s4 + $0x348] sm:$0xff] %vm64_vm0, %v4177_v49 }
 0x6bc   :  { %4306 = vst.msk [vmem:[%s7765_s4 + $0x350] sm:$0xff] %vm64_vm0, %v4178_v43 }
 0x6bd   :  { %4307 = vst.msk [vmem:[%s7765_s4 + $0x358] sm:$0xff] %vm64_vm0, %v4179_v7 }
 0x6be   :  { %4308 = vst.msk [vmem:[%s7765_s4 + $0x360] sm:$0xff] %vm64_vm0, %v4180_v15 }
 0x6bf   :  { %4309 = vst.msk [vmem:[%s7765_s4 + $0x368] sm:$0xff] %vm64_vm0, %v4181_v44 }
 0x6c0   :  { %4310 = vst.msk [vmem:[%s7765_s4 + $0x370] sm:$0xff] %vm64_vm0, %v4182_v39 }
 0x6c1   :  { %4311 = vst.msk [vmem:[%s7765_s4 + $0x378] sm:$0xff] %vm64_vm0, %v4183_v63 }
 0x6c2   :  { %4312 = vst.msk [vmem:[%s7765_s4 + $0x380] sm:$0xff] %vm64_vm0, %v4184_v56 }
 0x6c3   :  { %4313 = vst.msk [vmem:[%s7765_s4 + $0x388] sm:$0xff] %vm64_vm0, %v4185_v0 }
 0x6c4   :  { %4314 = vst.msk [vmem:[%s7765_s4 + $0x390] sm:$0xff] %vm64_vm0, %v4186_v51 }
 0x6c5   :  { %4315 = vst.msk [vmem:[%s7765_s4 + $0x398] sm:$0xff] %vm64_vm0, %v4187_v54 }
 0x6c6   :  { %4316 = vst.msk [vmem:[%s7765_s4 + $0x3a0] sm:$0xff] %vm64_vm0, %v4188_v21 }
 0x6c7   :  { %4317 = vst.msk [vmem:[%s7765_s4 + $0x3a8] sm:$0xff] %vm64_vm0, %v4189_v30 }
 0x6c8   :  { %4318 = vst.msk [vmem:[%s7765_s4 + $0x3b0] sm:$0xff] %vm64_vm0, %v4190_v17 }
 0x6c9   :  { %4319 = vst.msk [vmem:[%s7765_s4 + $0x3b8] sm:$0xff] %vm64_vm0, %v4191_v10 }
 0x6ca   :  { %4320 = vst.msk [vmem:[%s7765_s4 + $0x3c0] sm:$0xff] %vm64_vm0, %v4192_v40 }
 0x6cb   :  { %4321 = vst.msk [vmem:[%s7765_s4 + $0x3c8] sm:$0xff] %vm64_vm0, %v4193_v34 }
 0x6cc   :  { %4322 = vst.msk [vmem:[%s7765_s4 + $0x3d0] sm:$0xff] %vm64_vm0, %v4194_v50 }
 0x6cd   :  { %4323 = vst.msk [vmem:[%s7765_s4 + $0x3d8] sm:$0xff] %vm64_vm0, %v4195_v19 }
 0x6ce   :  { %4324 = vst.msk [vmem:[%s7765_s4 + $0x3e0] sm:$0xff] %vm64_vm0, %v4196_v8 }
 0x6cf   :  { %4325 = vst.msk [vmem:[%s7765_s4 + $0x3e8] sm:$0xff] %vm64_vm0, %v4197_v16 }
 0x6d0   :  { %4326 = vst.msk [vmem:[%s7765_s4 + $0x3f0] sm:$0xff] %vm64_vm0, %v4198_v58 }
 0x6d1   :  { %4327 = vst.msk [vmem:[%s7765_s4 + $0x3f8] sm:$0xff] %vm64_vm0, %v4199_v53 }
 0x6d2   :  { %4332 = vsyncpa [#allocation4], 1 }
 0x6d3   :  { %4333 = vsyncpa [#allocation6], 1 }

</bundles_post_ra>
